<compile_context>
chip_gen: v7x
topology: tpu7x:2x2x1
jax: 0.10.0
libtpu: 0.0.40
codegen_flags: <defaults>
</compile_context>

<pallas_src>
import jax
import jax.numpy as jnp
from jax.experimental import pallas as pl
from jax.experimental.pallas import tpu as pltpu


# ---------------------------------------------------------------------------
# kernels
# ---------------------------------------------------------------------------
def _featuremap_dense_kernel(x_ref, o_ref):
    """x_ref: (bb, CH, wt) -> o_ref: (bb, wt//2, 2*CH) lane-dense output."""
    bb, ch, wt = x_ref.shape
    t = wt // 2
    xb = x_ref[...]                              # (bb, CH, wt); wt dense in lanes
    xr = xb.reshape(bb, ch, t, 2)                # split W -> (t, 2)
    xt = jnp.swapaxes(xr, 1, 2)                  # (bb, t, CH, 2)   (XLU shuffle)
    o_ref[...] = xt.reshape(bb, t, 2 * ch)       # merge (CH, 2) -> 512 dense lanes


def _featuremap_fallback_kernel(x_ref, o_ref):
    """Known-good layout: o_ref is (bb, T, CH, 2); per-chunk copies."""
    bb, ch, w = x_ref.shape
    t_chunks = w // 2
    xb = x_ref[...]                              # (bb, CH, W)
    for b in range(bb):                          # bb is tiny (1 for the test)
        for t in range(t_chunks):
            o_ref[b, t] = xb[b, :, 2 * t:2 * t + 2]


# ---------------------------------------------------------------------------
# blocking heuristics
# ---------------------------------------------------------------------------
def _pick_wt(width):
    """W-block per grid step: full W for small widths; otherwise a divisor of W
    that is a multiple of 128 (keeps the input block lane-aligned)."""
    if width <= 4096:
        return width
    wt = 4096
    while wt >= 128:
        if width % wt == 0:
            return wt
        wt -= 128
    return width


def _pick_bb(batch, ch, wt, itemsize):
    """Largest divisor of `batch` whose input tile stays <= ~2 MiB, keeping >= 2
    grid steps along the batch axis when batch >= 2 (v7x has 2 TensorCores)."""
    target = 2 << 20
    bb = 1
    for cand in range(1, batch + 1):
        if batch % cand:
            continue
        if batch >= 2 and batch // cand < 2:
            continue
        if cand * ch * wt * itemsize <= target:
            bb = cand
    return bb


# ---------------------------------------------------------------------------
# pallas_call builders
# ---------------------------------------------------------------------------
def _build_dense(B, CH, W, dtype):
    T = W // 2
    wt = _pick_wt(W)
    tt = wt // 2
    bb = _pick_bb(B, CH, wt, jnp.dtype(dtype).itemsize)
    return pl.pallas_call(
        _featuremap_dense_kernel,
        out_shape=jax.ShapeDtypeStruct((B, T, 2 * CH), dtype),
        grid_spec=pltpu.PrefetchScalarGridSpec(
            num_scalar_prefetch=0,
            grid=(B // bb, W // wt),
            in_specs=[pl.BlockSpec((bb, CH, wt), lambda i, j: (i, 0, j))],
            out_specs=pl.BlockSpec((bb, tt, 2 * CH), lambda i, j: (i, j, 0)),
        ),
        compiler_params=pltpu.CompilerParams(
            dimension_semantics=("parallel", "parallel")),
    )


def _build_fallback(B, CH, W, dtype):
    T = W // 2
    bb = _pick_bb(B, CH, W, jnp.dtype(dtype).itemsize)
    call = pl.pallas_call(
        _featuremap_fallback_kernel,
        out_shape=jax.ShapeDtypeStruct((B, T, CH, 2), dtype),
        grid_spec=pltpu.PrefetchScalarGridSpec(
            num_scalar_prefetch=0,
            grid=(B // bb,),
            in_specs=[pl.BlockSpec((bb, CH, W), lambda i: (i, 0, 0))],
            out_specs=pl.BlockSpec((bb, T, CH, 2), lambda i: (i, 0, 0, 0)),
        ),
        compiler_params=pltpu.CompilerParams(
            dimension_semantics=("parallel",)),
    )

    def run(xf):
        return call(xf).reshape(B, T, 2 * CH)    # free row-major reshape (glue)

    return run


# ---------------------------------------------------------------------------
# implementation selection (one-time capability probe per shape/dtype)
# ---------------------------------------------------------------------------
_IMPL_CACHE = {}


def _get_impl(B, CH, W, dtype):
    key = (B, CH, W, jnp.dtype(dtype).name)
    impl = _IMPL_CACHE.get(key)
    if impl is not None:
        return impl
    T = W // 2
    try:
        dense = _build_dense(B, CH, W, dtype)
        # Probe: compile + run the lane-dense kernel once and check it bit-exactly
        # against the pure-JAX reference of the same data movement.
        probe = jax.random.normal(
            jax.random.PRNGKey(42), (B, CH, W), dtype=jnp.float32).astype(dtype)
        want = jnp.swapaxes(probe.reshape(B, CH, T, 2), 1, 2).reshape(B, T, 2 * CH)
        got = jax.block_until_ready(dense(probe))
        if not bool(jnp.array_equal(got, want)):
            raise ValueError("lane-dense FeatureMap kernel produced wrong layout")
        impl = dense
    except Exception:
        # TODO(synk): drop this fallback once the in-kernel (CH,2)->lane interleave
        # (reshape + swapaxes) is guaranteed to lower on all Mosaic versions; the
        # fallback keeps the original (lane-padded, per-chunk-store) layout.
        impl = _build_fallback(B, CH, W, dtype)
    _IMPL_CACHE[key] = impl
    return impl


# ---------------------------------------------------------------------------
# public wrapper
# ---------------------------------------------------------------------------
def feature_map(x):
    """Pallas TPU implementation of FeatureMap.forward.

    x: (B, C=32, H=8, W) with W even (hard-coded by the PyTorch module's
    reshape to 32*8*2).  Returns (B, W//2, 512).
    """
    B, C, H, W = x.shape
    assert C == 32 and H == 8, "FeatureMap hard-codes a 32*8*2 reshape"
    assert W % 2 == 0, "width must be even (chunks of width 2)"
    CH = C * H
    xf = x.reshape(B, CH, W)                     # free row-major reshape (glue)
    impl = _get_impl(B, CH, W, x.dtype)
    return impl(xf)


if __name__ == "__main__":
    key = jax.random.PRNGKey(0)
    B, C, H, W = 2, 32, 8, 16                    # batch=2, width=16 -> 8 chunks of 2
    x = jax.random.normal(key, (B, C, H, W), dtype=jnp.float32)

    out = jax.block_until_ready(feature_map(x))

    # Reference mirroring the PyTorch forward:
    #   split(dim=3, size=2) -> reshape(B, 32*8*2) -> stack(dim=1)
    T = W // 2
    ref = jnp.stack(
        [x[:, :, :, 2 * i:2 * i + 2].reshape(B, C * H * 2) for i in range(T)],
        axis=1)
    assert out.shape == (B, T, C * H * 2)
    assert jnp.array_equal(out, ref)
    print("KERNEL_OK")
</pallas_src>

<mosaic_0001>
module attributes {stable_mosaic.version = 11 : i64} {
  func.func @_featuremap_dense_kernel(%arg0: i32, %arg1: i32, %arg2: memref<1x256x16xf32, #tpu.memory_space<vmem>>, %arg3: memref<1x8x512xf32, #tpu.memory_space<vmem>>) attributes {dimension_semantics = [#tpu.dimension_semantics<parallel>, #tpu.dimension_semantics<parallel>], iteration_bounds = array<i64: 2, 1>, scalar_prefetch = 0 : i64, scratch_operands = 0 : i64, tpu.core_type = #tpu.core_type<tc>, window_params = [{transform_indices = @transform_0, window_bounds = array<i64: 1, 256, 16>}, {transform_indices = @transform_1, window_bounds = array<i64: 1, 8, 512>}]} {
    %c0 = arith.constant 0 : index
    %c0_0 = arith.constant 0 : index
    %c0_1 = arith.constant 0 : index
    %0 = vector.load %arg2[%c0, %c0_0, %c0_1] : memref<1x256x16xf32, #tpu.memory_space<vmem>>, vector<1x256x16xf32>
    %1 = vector.shape_cast %0 : vector<1x256x16xf32> to vector<1x256x8x2xf32>
    %2 = tpu.transpose %1, [0, 2, 1, 3] : vector<1x256x8x2xf32> -> vector<1x8x256x2xf32>
    %3 = vector.shape_cast %2 : vector<1x8x256x2xf32> to vector<1x8x512xf32>
    %c0_2 = arith.constant 0 : index
    %c0_3 = arith.constant 0 : index
    %c0_4 = arith.constant 0 : index
    %4 = vector.load %arg3[%c0_2, %c0_3, %c0_4] : memref<1x8x512xf32, #tpu.memory_space<vmem>>, vector<1x8x512xf32>
    tpu.vector_store %arg3[%c0_2, %c0_3, %c0_4], %3 {strides = array<i32>} : memref<1x8x512xf32, #tpu.memory_space<vmem>>, vector<1x8x512xf32>,
    return
  }
  func.func @transform_0(%arg0: i32, %arg1: i32) -> (i32, i32, i32) {
    %c0_i32 = arith.constant 0 : i32
    %c0_i32_0 = arith.constant 0 : i32
    return %arg0, %c0_i32, %arg1 : i32, i32, i32
  }
  func.func @transform_1(%arg0: i32, %arg1: i32) -> (i32, i32, i32) {
    %c0_i32 = arith.constant 0 : i32
    %c0_i32_0 = arith.constant 0 : i32
    return %arg0, %arg1, %c0_i32 : i32, i32, i32
  }
}

module attributes {stable_mosaic.version = 11 : i64} {
  func.func @_featuremap_fallback_kernel(%arg0: i32, %arg1: memref<1x256x16xf32, #tpu.memory_space<vmem>>, %arg2: memref<1x8x256x2xf32, #tpu.memory_space<vmem>>) attributes {dimension_semantics = [#tpu.dimension_semantics<parallel>], iteration_bounds = array<i64: 2>, scalar_prefetch = 0 : i64, scratch_operands = 0 : i64, tpu.core_type = #tpu.core_type<tc>, window_params = [{transform_indices = @transform_0, window_bounds = array<i64: 1, 256, 16>}, {transform_indices = @transform_1, window_bounds = array<i64: 1, 8, 256, 2>}]} {
    %c0 = arith.constant 0 : index
    %c0_0 = arith.constant 0 : index
    %c0_1 = arith.constant 0 : index
    %0 = vector.load %arg1[%c0, %c0_0, %c0_1] : memref<1x256x16xf32, #tpu.memory_space<vmem>>, vector<1x256x16xf32>
    %1 = vector.extract_strided_slice %0 {offsets = [0, 0, 0], sizes = [1, 256, 2], strides = [1, 1, 1]} : vector<1x256x16xf32> to vector<1x256x2xf32>
    %2 = vector.shape_cast %1 : vector<1x256x2xf32> to vector<256x2xf32>
    %c0_2 = arith.constant 0 : index
    %c0_3 = arith.constant 0 : index
    %c0_4 = arith.constant 0 : index
    %c0_5 = arith.constant 0 : index
    %3 = vector.load %arg2[%c0_2, %c0_3, %c0_4, %c0_5] : memref<1x8x256x2xf32, #tpu.memory_space<vmem>>, vector<1x1x256x2xf32>
    %4 = vector.shape_cast %3 : vector<1x1x256x2xf32> to vector<256x2xf32>
    %5 = vector.shape_cast %2 : vector<256x2xf32> to vector<1x1x256x2xf32>
    tpu.vector_store %arg2[%c0_2, %c0_3, %c0_4, %c0_5], %5 {strides = array<i32>} : memref<1x8x256x2xf32, #tpu.memory_space<vmem>>, vector<1x1x256x2xf32>,
    %6 = vector.extract_strided_slice %0 {offsets = [0, 0, 2], sizes = [1, 256, 2], strides = [1, 1, 1]} : vector<1x256x16xf32> to vector<1x256x2xf32>
    %7 = vector.shape_cast %6 : vector<1x256x2xf32> to vector<256x2xf32>
    %c0_6 = arith.constant 0 : index
    %c1 = arith.constant 1 : index
    %c0_7 = arith.constant 0 : index
    %c0_8 = arith.constant 0 : index
    %8 = vector.load %arg2[%c0_6, %c1, %c0_7, %c0_8] : memref<1x8x256x2xf32, #tpu.memory_space<vmem>>, vector<1x1x256x2xf32>
    %9 = vector.shape_cast %8 : vector<1x1x256x2xf32> to vector<256x2xf32>
    %10 = vector.shape_cast %7 : vector<256x2xf32> to vector<1x1x256x2xf32>
    tpu.vector_store %arg2[%c0_6, %c1, %c0_7, %c0_8], %10 {strides = array<i32>} : memref<1x8x256x2xf32, #tpu.memory_space<vmem>>, vector<1x1x256x2xf32>,
    %11 = vector.extract_strided_slice %0 {offsets = [0, 0, 4], sizes = [1, 256, 2], strides = [1, 1, 1]} : vector<1x256x16xf32> to vector<1x256x2xf32>
    %12 = vector.shape_cast %11 : vector<1x256x2xf32> to vector<256x2xf32>
    %c0_9 = arith.constant 0 : index
    %c2 = arith.constant 2 : index
    %c0_10 = arith.constant 0 : index
    %c0_11 = arith.constant 0 : index
    %13 = vector.load %arg2[%c0_9, %c2, %c0_10, %c0_11] : memref<1x8x256x2xf32, #tpu.memory_space<vmem>>, vector<1x1x256x2xf32>
    %14 = vector.shape_cast %13 : vector<1x1x256x2xf32> to vector<256x2xf32>
    %15 = vector.shape_cast %12 : vector<256x2xf32> to vector<1x1x256x2xf32>
    tpu.vector_store %arg2[%c0_9, %c2, %c0_10, %c0_11], %15 {strides = array<i32>} : memref<1x8x256x2xf32, #tpu.memory_space<vmem>>, vector<1x1x256x2xf32>,
    %16 = vector.extract_strided_slice %0 {offsets = [0, 0, 6], sizes = [1, 256, 2], strides = [1, 1, 1]} : vector<1x256x16xf32> to vector<1x256x2xf32>
    %17 = vector.shape_cast %16 : vector<1x256x2xf32> to vector<256x2xf32>
    %c0_12 = arith.constant 0 : index
    %c3 = arith.constant 3 : index
    %c0_13 = arith.constant 0 : index
    %c0_14 = arith.constant 0 : index
    %18 = vector.load %arg2[%c0_12, %c3, %c0_13, %c0_14] : memref<1x8x256x2xf32, #tpu.memory_space<vmem>>, vector<1x1x256x2xf32>
    %19 = vector.shape_cast %18 : vector<1x1x256x2xf32> to vector<256x2xf32>
    %20 = vector.shape_cast %17 : vector<256x2xf32> to vector<1x1x256x2xf32>
    tpu.vector_store %arg2[%c0_12, %c3, %c0_13, %c0_14], %20 {strides = array<i32>} : memref<1x8x256x2xf32, #tpu.memory_space<vmem>>, vector<1x1x256x2xf32>,
    %21 = vector.extract_strided_slice %0 {offsets = [0, 0, 8], sizes = [1, 256, 2], strides = [1, 1, 1]} : vector<1x256x16xf32> to vector<1x256x2xf32>
    %22 = vector.shape_cast %21 : vector<1x256x2xf32> to vector<256x2xf32>
    %c0_15 = arith.constant 0 : index
    %c4 = arith.constant 4 : index
    %c0_16 = arith.constant 0 : index
    %c0_17 = arith.constant 0 : index
    %23 = vector.load %arg2[%c0_15, %c4, %c0_16, %c0_17] : memref<1x8x256x2xf32, #tpu.memory_space<vmem>>, vector<1x1x256x2xf32>
    %24 = vector.shape_cast %23 : vector<1x1x256x2xf32> to vector<256x2xf32>
    %25 = vector.shape_cast %22 : vector<256x2xf32> to vector<1x1x256x2xf32>
    tpu.vector_store %arg2[%c0_15, %c4, %c0_16, %c0_17], %25 {strides = array<i32>} : memref<1x8x256x2xf32, #tpu.memory_space<vmem>>, vector<1x1x256x2xf32>,
    %26 = vector.extract_strided_slice %0 {offsets = [0, 0, 10], sizes = [1, 256, 2], strides = [1, 1, 1]} : vector<1x256x16xf32> to vector<1x256x2xf32>
    %27 = vector.shape_cast %26 : vector<1x256x2xf32> to vector<256x2xf32>
    %c0_18 = arith.constant 0 : index
    %c5 = arith.constant 5 : index
    %c0_19 = arith.constant 0 : index
    %c0_20 = arith.constant 0 : index
    %28 = vector.load %arg2[%c0_18, %c5, %c0_19, %c0_20] : memref<1x8x256x2xf32, #tpu.memory_space<vmem>>, vector<1x1x256x2xf32>
    %29 = vector.shape_cast %28 : vector<1x1x256x2xf32> to vector<256x2xf32>
    %30 = vector.shape_cast %27 : vector<256x2xf32> to vector<1x1x256x2xf32>
    tpu.vector_store %arg2[%c0_18, %c5, %c0_19, %c0_20], %30 {strides = array<i32>} : memref<1x8x256x2xf32, #tpu.memory_space<vmem>>, vector<1x1x256x2xf32>,
    %31 = vector.extract_strided_slice %0 {offsets = [0, 0, 12], sizes = [1, 256, 2], strides = [1, 1, 1]} : vector<1x256x16xf32> to vector<1x256x2xf32>
    %32 = vector.shape_cast %31 : vector<1x256x2xf32> to vector<256x2xf32>
    %c0_21 = arith.constant 0 : index
    %c6 = arith.constant 6 : index
    %c0_22 = arith.constant 0 : index
    %c0_23 = arith.constant 0 : index
    %33 = vector.load %arg2[%c0_21, %c6, %c0_22, %c0_23] : memref<1x8x256x2xf32, #tpu.memory_space<vmem>>, vector<1x1x256x2xf32>
    %34 = vector.shape_cast %33 : vector<1x1x256x2xf32> to vector<256x2xf32>
    %35 = vector.shape_cast %32 : vector<256x2xf32> to vector<1x1x256x2xf32>
    tpu.vector_store %arg2[%c0_21, %c6, %c0_22, %c0_23], %35 {strides = array<i32>} : memref<1x8x256x2xf32, #tpu.memory_space<vmem>>, vector<1x1x256x2xf32>,
    %36 = vector.extract_strided_slice %0 {offsets = [0, 0, 14], sizes = [1, 256, 2], strides = [1, 1, 1]} : vector<1x256x16xf32> to vector<1x256x2xf32>
    %37 = vector.shape_cast %36 : vector<1x256x2xf32> to vector<256x2xf32>
    %c0_24 = arith.constant 0 : index
    %c7 = arith.constant 7 : index
    %c0_25 = arith.constant 0 : index
    %c0_26 = arith.constant 0 : index
    %38 = vector.load %arg2[%c0_24, %c7, %c0_25, %c0_26] : memref<1x8x256x2xf32, #tpu.memory_space<vmem>>, vector<1x1x256x2xf32>
    %39 = vector.shape_cast %38 : vector<1x1x256x2xf32> to vector<256x2xf32>
    %40 = vector.shape_cast %37 : vector<256x2xf32> to vector<1x1x256x2xf32>
    tpu.vector_store %arg2[%c0_24, %c7, %c0_25, %c0_26], %40 {strides = array<i32>} : memref<1x8x256x2xf32, #tpu.memory_space<vmem>>, vector<1x1x256x2xf32>,
    return
  }
  func.func @transform_0(%arg0: i32) -> (i32, i32, i32) {
    %c0_i32 = arith.constant 0 : i32
    %c0_i32_0 = arith.constant 0 : i32
    %c0_i32_1 = arith.constant 0 : i32
    return %arg0, %c0_i32, %c0_i32_0 : i32, i32, i32
  }
  func.func @transform_1(%arg0: i32) -> (i32, i32, i32, i32) {
    %c0_i32 = arith.constant 0 : i32
    %c0_i32_0 = arith.constant 0 : i32
    %c0_i32_1 = arith.constant 0 : i32
    %c0_i32_2 = arith.constant 0 : i32
    return %arg0, %c0_i32, %c0_i32_0, %c0_i32_1 : i32, i32, i32, i32
  }
}

</mosaic_0001>

<bundles_post_ra>
// kernel: tpu_custom_call.1
= control target key start
LH: loop header
LB: loop body
LE: loop exit
PB: predicated region body
PF: predicated region fallthrough
CT: control target
= control target key end

     0   :  { %s22446_s0 = inlined_call_operand.vmem [shape: f32[2,256,16], index: 0, kind: input, shape index: {}]   ;;  %s22447_s1 = inlined_call_operand.hbm [shape: f32[2,8,512], index: 1, kind: output, shape index: {}]  }
   0x1   :  { %23278 = sst [smem:[#allocation210_spill]] %s22446_s0 }
   0x2   :  { %23279 = sst [smem:[#allocation211_spill]] %s22447_s1 }
   0x3   :  { %6 = vsyncpa [#allocation3], 0 }
   0x4   :  { %8 = vsyncpa [#allocation3 + $0x1], 0  ;;  %s16187_s6 = smov 0   ;;  %s16189_s7 = smov 0  }
   0x5   :  { %s16191_s8 = smov 0   ;;  %s16193_s9 = smov 0  }
   0x6   :  { %s16195_s10 = smov 0   ;;  %s16197_s11 = smov 0  }
   0x7 LB: > { %23280 = sst [smem:[#allocation5_spill]] %s16089_s6  ;;  %s15352_s12 = sadd.s32 4294967295, %s16109_s11   ;;  %s16109_s11 = sphi %s16197_s11, %s14_s11   ;;  %s16105_s10 = sphi %s16195_s10, %s24694_s10   ;;  %s16101_s9 = sphi %s16193_s9, %s24693_s9   ;;  %s16097_s8 = sphi %s16191_s8, %s24692_s8   ;;  %s16093_s7 = sphi %s16189_s7, %s24691_s7   ;;  %s16089_s6 = sphi %s16187_s6, %s24690_s6  }
   0x8   : > { %23281 = sst [smem:[#allocation6_spill]] %s16093_s7  ;;  %s15353_s13 = sadd.s32 4294967294, %s16109_s11  }
   0x9   : > { %23282 = sst [smem:[#allocation7_spill]] %s16097_s8  ;;  %s26_s14 = sadd.s32 1, %s16105_s10 }
   0xa   : > { %23283 = sst [smem:[#allocation8_spill]] %s16101_s9  ;;  %s63_s15 = sadd.s32 1, %s16097_s8 }
   0xb   : > { %23284 = sst [smem:[#allocation9_spill]] %s16105_s10  ;;  %p28_p0 = scmp.ge.s32.totalorder %s26_s14, 2 }
   0xc   : > { %23285 = sst [smem:[#allocation10_spill]] %s16109_s11  ;;  %p73_p1 = scmp.ne.s32.totalorder %s16097_s8, %s16093_s7 }
   0xd   : > { %p74_p2 = scmp.eq.s32.totalorder %s15352_s12, 1  ;;  %p79_p3 = scmp.ne.s32.totalorder %s16093_s7, %s16089_s6 }
   0xe   : > { %s24696_s14 = smov (%p28_p0, %s26_s14), 0  ;;  %p80_p5 = scmp.eq.s32.totalorder %s15353_s13, 1 }
   0xf   : > { %23286 = sst [smem:[#allocation11_spill]] %s24696_s14  ;;  %p16227_p4 = por %p74_p2, %p73_p1 }
  0x10   : > { %s58_s17 = ssub.s32 %s16105_s10, %s24696_s14  ;;  %p15356_p6 = scmp.ge.s32.totalorder %s16109_s11, 1 }
  0x11   : > { %s23287_s16 = scalar_select %p16227_p4, 1, 0 }
  0x12   : > { %p61_p7 = scmp.eq.s32.totalorder %s58_s17, 0  ;;  %p16234_p8 = por %p80_p5, %p79_p3 }
  0x13   : > { %23288 = sst [smem:[#allocation12_spill]] %s23287_s16  ;;  %p109_p9 = scmp.lt.s32.totalorder %s16109_s11, 3 }
  0x14   : > { %s23289_s18 = scalar_select %p16234_p8, 1, 0 }
  0x15   : > { %s16240_s19 = scalar_select %p61_p7, %s16097_s8, %s63_s15  }
  0x16   : > { %23290 = sst [smem:[#allocation13_spill]] %s23289_s18  ;;  %p110_p10 = pnand %p15356_p6, %p109_p9 }
  0x17   : > { %23291 = sst [smem:[#allocation14_spill]] %s16240_s19 }
  0x18   : > { %113 = sbr.rel (%p110_p10) target bundleno = 1401 (0x579), region = 24 }
  0x1f   : > { %p132_p11 = scmp.lt.s32.totalorder %s16101_s9, 1  ;;  %s23292_s0 = sld [smem:[#allocation210_spill]]  ;;  %vm14940_vm0 = vcmask 15360   ;;  %vm14942_vm1 = vcmask 31744   ;;  %vm14944_vm2 = vcmask 48128   ;;  %vm14946_vm3 = vcmask 64512  }
  0x20   : > { %s23206_s25 = smov 126   ;;  %s23208_s26 = smov 124   ;;  %vm14948_vm4 = vcmask 80896   ;;  %vm14950_vm5 = vcmask 97280   ;;  %vm14952_vm6 = vcmask 113664   ;;  %vm14954_vm7 = vcmask 130048  }
  0x21   : > { %s133_s20 = scalar_select %p132_p11, %s16101_s9, 1  ;;  %vm14956_vm8 = vcmask 146432   ;;  %vm23273_vm9 = vcmask 162816   ;;  %vm23272_vm10 = vcmask 179200   ;;  %vm23181_vm11 = vcmask 195584  }
  0x22   : > { %s23213_s27 = smov 122   ;;  %s23215_s28 = smov 120   ;;  %vm23176_vm12 = vcmask 211968   ;;  %vm23174_vm13 = vcmask 228352   ;;  %vm23175_vm14 = vcmask 244736   ;;  %vm23188_vm15 = vcmask 261120  }
  0x23   : > { %s15877_s21 = sshll.u32 %s133_s20, 8  ;;  %s23219_s29 = smov 118  }
  0x24   : > { %s23221_s30 = smov 116   ;;  %s23225_s2 = smov 114  }
  0x25   : > { %s16247_s24 = scalar_lea.vmem %s23292_s0, %s15877_s21  ;;  %s23200_s3 = smov 4  }
  0x26   : > { %v16250_v0 = vld [vmem:[%s16247_s24 + $0x10] sm:$0xff]  ;;  %v16253_v1 = vld [vmem:[%s16247_s24] sm:$0xff]  ;;  %v16260_v2 = vld [vmem:[%s16247_s24 + $0x18] sm:$0xff]  ;;  %s23202_s4 = smov 2   ;;  %s23196_s5 = smov 6  }
  0x27   : > { %208 = vrot.lane.b32.xlu1 %v16250_v0, %s23206_s25  ;;  %204 = vrot.lane.b32.xlu0 %v16253_v1, %s23206_s25  ;;  %v16263_v3 = vld [vmem:[%s16247_s24 + $0x8] sm:$0xff]  ;;  %v16273_v5 = vld [vmem:[%s16247_s24 + $0x20] sm:$0xff]  ;;  %s23194_s12 = smov 8   ;;  %s23191_s13 = smov 10  }
  0x28   : > { %v16270_v4 = vld [vmem:[%s16247_s24 + $0x28] sm:$0xff]  ;;  %v16280_v6 = vld [vmem:[%s16247_s24 + $0x38] sm:$0xff]  ;;  %v16283_v7 = vld [vmem:[%s16247_s24 + $0x30] sm:$0xff]  ;;  %s23189_s15 = smov 12   ;;  %s23185_s17 = smov 14  }
  0x29   : > { %v16290_v8 = vld [vmem:[%s16247_s24 + $0x48] sm:$0xff]  ;;  %v16293_v9 = vld [vmem:[%s16247_s24 + $0x40] sm:$0xff]  ;;  %v16300_v10 = vld [vmem:[%s16247_s24 + $0x58] sm:$0xff]  ;;  %s23183_s20 = smov 16   ;;  %s23179_s21 = smov 18  }
  0x2a   : > { %v16303_v11 = vld [vmem:[%s16247_s24 + $0x50] sm:$0xff]  ;;  %v16310_v12 = vld [vmem:[%s16247_s24 + $0x68] sm:$0xff]  ;;  %v16313_v13 = vld [vmem:[%s16247_s24 + $0x60] sm:$0xff]  ;;  %s23177_s22 = smov 20   ;;  %s23014_s23 = smov 22  }
  0x2b   : > { %210 = vrot.lane.b32.xlu1 %v16260_v2, %s23206_s25  ;;  %206 = vrot.lane.b32.xlu0 %v16263_v3, %s23206_s25  ;;  %v16320_v14 = vld [vmem:[%s16247_s24 + $0x78] sm:$0xff]  ;;  %v16323_v15 = vld [vmem:[%s16247_s24 + $0x70] sm:$0xff]  ;;  %s24165_s0 = smov 60   ;;  %s24170_s14 = smov 62  }
  0x2c   : > { %v16330_v16 = vld [vmem:[%s16247_s24 + $0x88] sm:$0xff]  ;;  %v16333_v17 = vld [vmem:[%s16247_s24 + $0x80] sm:$0xff]  ;;  %v16340_v18 = vld [vmem:[%s16247_s24 + $0x98] sm:$0xff]  ;;  %s24171_s10 = smov 64   ;;  %s24180_s19 = smov 66  }
  0x2d   : > { %v16343_v19 = vld [vmem:[%s16247_s24 + $0x90] sm:$0xff]  ;;  %v16350_v20 = vld [vmem:[%s16247_s24 + $0xa8] sm:$0xff]  ;;  %v16353_v21 = vld [vmem:[%s16247_s24 + $0xa0] sm:$0xff]  ;;  %s24181_s8 = smov 68   ;;  %s24182_s18 = smov 70  }
  0x2e   : > { %v16360_v22 = vld [vmem:[%s16247_s24 + $0xb8] sm:$0xff]  ;;  %v16363_v23 = vld [vmem:[%s16247_s24 + $0xb0] sm:$0xff]  ;;  %v16370_v24 = vld [vmem:[%s16247_s24 + $0xc8] sm:$0xff]  ;;  %s24183_s6 = smov 72   ;;  %s24192_s11 = smov 74  }
  0x2f   : > { %214 = vrot.lane.b32.xlu1 %v16270_v4, %s23206_s25  ;;  %212 = vrot.lane.b32.xlu0 %v16273_v5, %s23206_s25  ;;  %23293 = vst [vmem:[#allocation15_spill] sm:$0xff] %v16370_v24  ;;  %v16373_v25 = vld [vmem:[%s16247_s24 + $0xc0] sm:$0xff]  ;;  %v16380_v26 = vld [vmem:[%s16247_s24 + $0xd8] sm:$0xff]  ;;  %s24193_s1 = smov 76   ;;  %s24194_s16 = smov 78  }
  0x30   : > { %23294 = vst [vmem:[#allocation16_spill] sm:$0xff] %v16380_v26  ;;  %v16383_v27 = vld [vmem:[%s16247_s24 + $0xd0] sm:$0xff]  ;;  %v16390_v28 = vld [vmem:[%s16247_s24 + $0xe8] sm:$0xff]  ;;  %v16393_v29 = vld [vmem:[%s16247_s24 + $0xe0] sm:$0xff]  ;;  %s24195_s9 = smov 80  }
  0x31   : > { %23295 = vst [vmem:[#allocation17_spill] sm:$0xff] %v16383_v27  ;;  %23296 = vst [vmem:[#allocation18_spill] sm:$0xff] %v16393_v29  ;;  %v16400_v30 = vld [vmem:[%s16247_s24 + $0xf8] sm:$0xff]  ;;  %v16403_v31 = vld [vmem:[%s16247_s24 + $0xf0] sm:$0xff] }
  0x32   : > { %23297 = vst [vmem:[#allocation19_spill] sm:$0xff] %v16403_v31 }
  0x33   : > { %218 = vrot.lane.b32.xlu1 %v16280_v6, %s23206_s25  ;;  %216 = vrot.lane.b32.xlu0 %v16283_v7, %s23206_s25 }
  0x37   : > { %222 = vrot.lane.b32.xlu1 %v16290_v8, %s23206_s25  ;;  %220 = vrot.lane.b32.xlu0 %v16293_v9, %s23206_s25 }
  0x3b   : > { %226 = vrot.lane.b32.xlu1 %v16300_v10, %s23206_s25  ;;  %224 = vrot.lane.b32.xlu0 %v16303_v11, %s23206_s25 }
  0x3f   : > { %230 = vrot.lane.b32.xlu1 %v16310_v12, %s23206_s25  ;;  %228 = vrot.lane.b32.xlu0 %v16313_v13, %s23206_s25 }
  0x43   : > { %234 = vrot.lane.b32.xlu1 %v16320_v14, %s23206_s25  ;;  %232 = vrot.lane.b32.xlu0 %v16323_v15, %s23206_s25 }
  0x47   : > { %238 = vrot.lane.b32.xlu1 %v16330_v16, %s23206_s25  ;;  %236 = vrot.lane.b32.xlu0 %v16333_v17, %s23206_s25 }
  0x4b   : > { %242 = vrot.lane.b32.xlu1 %v16340_v18, %s23206_s25  ;;  %240 = vrot.lane.b32.xlu0 %v16343_v19, %s23206_s25 }
  0x4f   : > { %246 = vrot.lane.b32.xlu1 %v16350_v20, %s23206_s25  ;;  %244 = vrot.lane.b32.xlu0 %v16353_v21, %s23206_s25 }
  0x53   : > { %250 = vrot.lane.b32.xlu1 %v16360_v22, %s23206_s25  ;;  %248 = vrot.lane.b32.xlu0 %v16363_v23, %s23206_s25 }
  0x57   : > { %254 = vrot.lane.b32.xlu1 %v16370_v24, %s23206_s25  ;;  %252 = vrot.lane.b32.xlu0 %v16373_v25, %s23206_s25 }
  0x5b   : > { %258 = vrot.lane.b32.xlu1 %v16380_v26, %s23206_s25  ;;  %256 = vrot.lane.b32.xlu0 %v16383_v27, %s23206_s25 }
  0x5f   : > { %262 = vrot.lane.b32.xlu1 %v16390_v28, %s23206_s25  ;;  %260 = vrot.lane.b32.xlu0 %v16393_v29, %s23206_s25 }
  0x63   : > { %266 = vrot.lane.b32.xlu1 %v16400_v30, %s23206_s25  ;;  %264 = vrot.lane.b32.xlu0 %v16403_v31, %s23206_s25 }
  0x67   : > { %302 = vrot.lane.b32.xlu1 %v16263_v3, %s23208_s26  ;;  %300 = vrot.lane.b32.xlu0 %v16253_v1, %s23208_s26 }
  0x6b   : > { %306 = vrot.lane.b32.xlu1 %v16260_v2, %s23208_s26  ;;  %304 = vrot.lane.b32.xlu0 %v16250_v0, %s23208_s26 }
  0x6f   : > { %310 = vrot.lane.b32.xlu1 %v16270_v4, %s23208_s26  ;;  %308 = vrot.lane.b32.xlu0 %v16273_v5, %s23208_s26 }
  0x73   : > { %314 = vrot.lane.b32.xlu1 %v16280_v6, %s23208_s26  ;;  %312 = vrot.lane.b32.xlu0 %v16283_v7, %s23208_s26 }
  0x77   : > { %318 = vrot.lane.b32.xlu1 %v16290_v8, %s23208_s26  ;;  %316 = vrot.lane.b32.xlu0 %v16293_v9, %s23208_s26 }
  0x7b   : > { %322 = vrot.lane.b32.xlu1 %v16300_v10, %s23208_s26  ;;  %320 = vrot.lane.b32.xlu0 %v16303_v11, %s23208_s26 }
  0x7f   : > { %326 = vrot.lane.b32.xlu1 %v16310_v12, %s23208_s26  ;;  %324 = vrot.lane.b32.xlu0 %v16313_v13, %s23208_s26 }
  0x83   : > { %330 = vrot.lane.b32.xlu1 %v16320_v14, %s23208_s26  ;;  %328 = vrot.lane.b32.xlu0 %v16323_v15, %s23208_s26 }
  0x87   : > { %334 = vrot.lane.b32.xlu1 %v16330_v16, %s23208_s26  ;;  %332 = vrot.lane.b32.xlu0 %v16333_v17, %s23208_s26 }
  0x8b   : > { %338 = vrot.lane.b32.xlu1 %v16340_v18, %s23208_s26  ;;  %336 = vrot.lane.b32.xlu0 %v16343_v19, %s23208_s26 }
  0x8f   : > { %342 = vrot.lane.b32.xlu1 %v16350_v20, %s23208_s26  ;;  %340 = vrot.lane.b32.xlu0 %v16353_v21, %s23208_s26 }
  0x93   : > { %346 = vrot.lane.b32.xlu1 %v16360_v22, %s23208_s26  ;;  %344 = vrot.lane.b32.xlu0 %v16363_v23, %s23208_s26 }
  0x97   : > { %350 = vrot.lane.b32.xlu1 %v16370_v24, %s23208_s26  ;;  %348 = vrot.lane.b32.xlu0 %v16373_v25, %s23208_s26 }
  0x99   : > { %v16461_v32 = vpop.permute.xlu1 %208  ;;  %v16463_v33 = vpop.permute.xlu0 %204 }
  0x9a   : > { %23298 = vst [vmem:[#allocation20_spill] sm:$0xff] %v16461_v32  ;;  %23299 = vst [vmem:[#allocation21_spill] sm:$0xff] %v16463_v33 }
  0x9b   : > { %354 = vrot.lane.b32.xlu1 %v16380_v26, %s23208_s26  ;;  %352 = vrot.lane.b32.xlu0 %v16383_v27, %s23208_s26 }
  0x9d   : > { %v16469_v34 = vpop.permute.xlu1 %210  ;;  %v16471_v35 = vpop.permute.xlu0 %206 }
  0x9e   : > { %23300 = vst [vmem:[#allocation22_spill] sm:$0xff] %v16469_v34  ;;  %23301 = vst [vmem:[#allocation23_spill] sm:$0xff] %v16471_v35 }
  0x9f   : > { %358 = vrot.lane.b32.xlu1 %v16390_v28, %s23208_s26  ;;  %356 = vrot.lane.b32.xlu0 %v16393_v29, %s23208_s26 }
  0xa1   : > { %v16477_v36 = vpop.permute.xlu1 %214  ;;  %v16479_v37 = vpop.permute.xlu0 %212 }
  0xa2   : > { %23302 = vst [vmem:[#allocation24_spill] sm:$0xff] %v16477_v36  ;;  %23303 = vst [vmem:[#allocation25_spill] sm:$0xff] %v16479_v37 }
  0xa3   : > { %362 = vrot.lane.b32.xlu1 %v16400_v30, %s23208_s26  ;;  %360 = vrot.lane.b32.xlu0 %v16403_v31, %s23208_s26 }
  0xa5   : > { %v16485_v38 = vpop.permute.xlu1 %218  ;;  %v16487_v39 = vpop.permute.xlu0 %216 }
  0xa6   : > { %23304 = vst [vmem:[#allocation26_spill] sm:$0xff] %v16485_v38  ;;  %23305 = vst [vmem:[#allocation27_spill] sm:$0xff] %v16487_v39 }
  0xa7   : > { %398 = vrot.lane.b32.xlu1 %v16263_v3, %s23213_s27  ;;  %396 = vrot.lane.b32.xlu0 %v16253_v1, %s23213_s27 }
  0xa9   : > { %v16493_v40 = vpop.permute.xlu1 %222  ;;  %v16495_v41 = vpop.permute.xlu0 %220 }
  0xaa   : > { %23306 = vst [vmem:[#allocation28_spill] sm:$0xff] %v16493_v40  ;;  %23307 = vst [vmem:[#allocation29_spill] sm:$0xff] %v16495_v41 }
  0xab   : > { %402 = vrot.lane.b32.xlu1 %v16260_v2, %s23213_s27  ;;  %400 = vrot.lane.b32.xlu0 %v16250_v0, %s23213_s27 }
  0xad   : > { %v16501_v42 = vpop.permute.xlu1 %226  ;;  %v16503_v43 = vpop.permute.xlu0 %224 }
  0xae   : > { %23308 = vst [vmem:[#allocation30_spill] sm:$0xff] %v16501_v42  ;;  %23309 = vst [vmem:[#allocation31_spill] sm:$0xff] %v16503_v43 }
  0xaf   : > { %406 = vrot.lane.b32.xlu1 %v16270_v4, %s23213_s27  ;;  %404 = vrot.lane.b32.xlu0 %v16273_v5, %s23213_s27 }
  0xb1   : > { %v16509_v44 = vpop.permute.xlu1 %230  ;;  %v16511_v45 = vpop.permute.xlu0 %228 }
  0xb2   : > { %23310 = vst [vmem:[#allocation32_spill] sm:$0xff] %v16509_v44  ;;  %23311 = vst [vmem:[#allocation33_spill] sm:$0xff] %v16511_v45 }
  0xb3   : > { %410 = vrot.lane.b32.xlu1 %v16280_v6, %s23213_s27  ;;  %408 = vrot.lane.b32.xlu0 %v16283_v7, %s23213_s27 }
  0xb5   : > { %v16517_v46 = vpop.permute.xlu1 %234  ;;  %v16519_v47 = vpop.permute.xlu0 %232 }
  0xb6   : > { %23312 = vst [vmem:[#allocation34_spill] sm:$0xff] %v16517_v46  ;;  %23313 = vst [vmem:[#allocation35_spill] sm:$0xff] %v16519_v47 }
  0xb7   : > { %414 = vrot.lane.b32.xlu1 %v16290_v8, %s23213_s27  ;;  %412 = vrot.lane.b32.xlu0 %v16293_v9, %s23213_s27 }
  0xb9   : > { %v16525_v48 = vpop.permute.xlu1 %238  ;;  %v16527_v49 = vpop.permute.xlu0 %236 }
  0xba   : > { %23314 = vst [vmem:[#allocation36_spill] sm:$0xff] %v16525_v48  ;;  %23315 = vst [vmem:[#allocation37_spill] sm:$0xff] %v16527_v49 }
  0xbb   : > { %418 = vrot.lane.b32.xlu1 %v16300_v10, %s23213_s27  ;;  %416 = vrot.lane.b32.xlu0 %v16303_v11, %s23213_s27 }
  0xbd   : > { %v16533_v50 = vpop.permute.xlu1 %242  ;;  %v16535_v51 = vpop.permute.xlu0 %240 }
  0xbe   : > { %23316 = vst [vmem:[#allocation38_spill] sm:$0xff] %v16533_v50  ;;  %23317 = vst [vmem:[#allocation39_spill] sm:$0xff] %v16535_v51 }
  0xbf   : > { %422 = vrot.lane.b32.xlu1 %v16310_v12, %s23213_s27  ;;  %420 = vrot.lane.b32.xlu0 %v16313_v13, %s23213_s27 }
  0xc1   : > { %v16541_v52 = vpop.permute.xlu1 %246  ;;  %v16543_v53 = vpop.permute.xlu0 %244 }
  0xc2   : > { %23318 = vst [vmem:[#allocation40_spill] sm:$0xff] %v16541_v52  ;;  %23319 = vst [vmem:[#allocation41_spill] sm:$0xff] %v16543_v53 }
  0xc3   : > { %426 = vrot.lane.b32.xlu1 %v16320_v14, %s23213_s27  ;;  %424 = vrot.lane.b32.xlu0 %v16323_v15, %s23213_s27 }
  0xc5   : > { %v16549_v54 = vpop.permute.xlu1 %250  ;;  %v16551_v55 = vpop.permute.xlu0 %248 }
  0xc6   : > { %23320 = vst [vmem:[#allocation42_spill] sm:$0xff] %v16549_v54  ;;  %23321 = vst [vmem:[#allocation43_spill] sm:$0xff] %v16551_v55 }
  0xc7   : > { %430 = vrot.lane.b32.xlu1 %v16330_v16, %s23213_s27  ;;  %428 = vrot.lane.b32.xlu0 %v16333_v17, %s23213_s27 }
  0xc9   : > { %v16557_v56 = vpop.permute.xlu1 %254  ;;  %v16559_v57 = vpop.permute.xlu0 %252 }
  0xca   : > { %23322 = vst [vmem:[#allocation44_spill] sm:$0xff] %v16557_v56  ;;  %23323 = vst [vmem:[#allocation45_spill] sm:$0xff] %v16559_v57 }
  0xcb   : > { %434 = vrot.lane.b32.xlu1 %v16340_v18, %s23213_s27  ;;  %432 = vrot.lane.b32.xlu0 %v16343_v19, %s23213_s27 }
  0xcd   : > { %v16565_v58 = vpop.permute.xlu1 %258  ;;  %v16567_v59 = vpop.permute.xlu0 %256 }
  0xce   : > { %23324 = vst [vmem:[#allocation46_spill] sm:$0xff] %v16565_v58  ;;  %23325 = vst [vmem:[#allocation47_spill] sm:$0xff] %v16567_v59 }
  0xcf   : > { %438 = vrot.lane.b32.xlu1 %v16350_v20, %s23213_s27  ;;  %436 = vrot.lane.b32.xlu0 %v16353_v21, %s23213_s27 }
  0xd1   : > { %v16573_v60 = vpop.permute.xlu1 %262  ;;  %v16575_v61 = vpop.permute.xlu0 %260 }
  0xd2   : > { %23326 = vst [vmem:[#allocation48_spill] sm:$0xff] %v16573_v60  ;;  %23327 = vst [vmem:[#allocation49_spill] sm:$0xff] %v16575_v61 }
  0xd3   : > { %442 = vrot.lane.b32.xlu1 %v16360_v22, %s23213_s27  ;;  %440 = vrot.lane.b32.xlu0 %v16363_v23, %s23213_s27 }
  0xd5   : > { %v16581_v62 = vpop.permute.xlu1 %266  ;;  %v16583_v63 = vpop.permute.xlu0 %264 }
  0xd6   : > { %23328 = vst [vmem:[#allocation50_spill] sm:$0xff] %v16581_v62  ;;  %23329 = vst [vmem:[#allocation51_spill] sm:$0xff] %v16583_v63 }
  0xd7   : > { %446 = vrot.lane.b32.xlu1 %v16370_v24, %s23213_s27  ;;  %444 = vrot.lane.b32.xlu0 %v16373_v25, %s23213_s27 }
  0xd9   : > { %v16589_v59 = vpop.permute.xlu1 %302  ;;  %v16591_v60 = vpop.permute.xlu0 %300 }
  0xdb   : > { %450 = vrot.lane.b32.xlu1 %v16380_v26, %s23213_s27  ;;  %448 = vrot.lane.b32.xlu0 %v16383_v27, %s23213_s27 }
  0xdd   : > { %v16597_v61 = vpop.permute.xlu1 %306  ;;  %v16599_v62 = vpop.permute.xlu0 %304 }
  0xdf   : > { %454 = vrot.lane.b32.xlu1 %v16390_v28, %s23213_s27  ;;  %452 = vrot.lane.b32.xlu0 %v16393_v29, %s23213_s27 }
  0xe1   : > { %v16605_v63 = vpop.permute.xlu1 %310  ;;  %v16607_v58 = vpop.permute.xlu0 %308 }
  0xe3   : > { %458 = vrot.lane.b32.xlu1 %v16400_v30, %s23213_s27  ;;  %456 = vrot.lane.b32.xlu0 %v16403_v31, %s23213_s27 }
  0xe5   : > { %v16613_v57 = vpop.permute.xlu1 %314  ;;  %v16615_v56 = vpop.permute.xlu0 %312 }
  0xe7   : > { %494 = vrot.lane.b32.xlu1 %v16263_v3, %s23215_s28  ;;  %492 = vrot.lane.b32.xlu0 %v16253_v1, %s23215_s28 }
  0xe9   : > { %v16621_v55 = vpop.permute.xlu1 %318  ;;  %v16623_v54 = vpop.permute.xlu0 %316 }
  0xeb   : > { %498 = vrot.lane.b32.xlu1 %v16260_v2, %s23215_s28  ;;  %496 = vrot.lane.b32.xlu0 %v16250_v0, %s23215_s28 }
  0xed   : > { %v16629_v53 = vpop.permute.xlu1 %322  ;;  %v16631_v52 = vpop.permute.xlu0 %320 }
  0xef   : > { %502 = vrot.lane.b32.xlu1 %v16270_v4, %s23215_s28  ;;  %500 = vrot.lane.b32.xlu0 %v16273_v5, %s23215_s28 }
  0xf1   : > { %v16637_v51 = vpop.permute.xlu1 %326  ;;  %v16639_v50 = vpop.permute.xlu0 %324 }
  0xf3   : > { %506 = vrot.lane.b32.xlu1 %v16280_v6, %s23215_s28  ;;  %504 = vrot.lane.b32.xlu0 %v16283_v7, %s23215_s28 }
  0xf5   : > { %v16645_v49 = vpop.permute.xlu1 %330  ;;  %v16647_v48 = vpop.permute.xlu0 %328 }
  0xf7   : > { %510 = vrot.lane.b32.xlu1 %v16290_v8, %s23215_s28  ;;  %508 = vrot.lane.b32.xlu0 %v16293_v9, %s23215_s28 }
  0xf9   : > { %v16653_v47 = vpop.permute.xlu1 %334  ;;  %v16655_v46 = vpop.permute.xlu0 %332 }
  0xfb   : > { %514 = vrot.lane.b32.xlu1 %v16300_v10, %s23215_s28  ;;  %512 = vrot.lane.b32.xlu0 %v16303_v11, %s23215_s28 }
  0xfd   : > { %v16661_v45 = vpop.permute.xlu1 %338  ;;  %v16663_v44 = vpop.permute.xlu0 %336 }
  0xff   : > { %518 = vrot.lane.b32.xlu1 %v16310_v12, %s23215_s28  ;;  %516 = vrot.lane.b32.xlu0 %v16313_v13, %s23215_s28 }
 0x101   : > { %v16669_v43 = vpop.permute.xlu1 %342  ;;  %v16671_v42 = vpop.permute.xlu0 %340 }
 0x103   : > { %522 = vrot.lane.b32.xlu1 %v16320_v14, %s23215_s28  ;;  %520 = vrot.lane.b32.xlu0 %v16323_v15, %s23215_s28 }
 0x105   : > { %v16677_v41 = vpop.permute.xlu1 %346  ;;  %v16679_v40 = vpop.permute.xlu0 %344 }
 0x107   : > { %526 = vrot.lane.b32.xlu1 %v16330_v16, %s23215_s28  ;;  %524 = vrot.lane.b32.xlu0 %v16333_v17, %s23215_s28 }
 0x109   : > { %v16685_v39 = vpop.permute.xlu1 %350  ;;  %v16687_v38 = vpop.permute.xlu0 %348 }
 0x10a   : > { %23330 = vst [vmem:[#allocation52_spill] sm:$0xff] %v16685_v39  ;;  %23331 = vst [vmem:[#allocation53_spill] sm:$0xff] %v16687_v38  ;;  %v881_v38 = vlaneseq }
 0x10b   : > { %530 = vrot.lane.b32.xlu1 %v16340_v18, %s23215_s28  ;;  %528 = vrot.lane.b32.xlu0 %v16343_v19, %s23215_s28 }
 0x10d   : > { %v16693_v37 = vpop.permute.xlu1 %354  ;;  %v16695_v36 = vpop.permute.xlu0 %352 }
 0x10e   : > { %23332 = vst [vmem:[#allocation54_spill] sm:$0xff] %v16693_v37  ;;  %23333 = vst [vmem:[#allocation55_spill] sm:$0xff] %v16695_v36 }
 0x10f   : > { %534 = vrot.lane.b32.xlu1 %v16350_v20, %s23215_s28  ;;  %532 = vrot.lane.b32.xlu0 %v16353_v21, %s23215_s28 }
 0x111   : > { %v16701_v32 = vpop.permute.xlu1 %358  ;;  %v16703_v34 = vpop.permute.xlu0 %356 }
 0x112   : > { %23334 = vst [vmem:[#allocation56_spill] sm:$0xff] %v16701_v32  ;;  %23335 = vst [vmem:[#allocation57_spill] sm:$0xff] %v16703_v34 }
 0x113   : > { %538 = vrot.lane.b32.xlu1 %v16360_v22, %s23215_s28  ;;  %536 = vrot.lane.b32.xlu0 %v16363_v23, %s23215_s28 }
 0x115   : > { %v16709_v33 = vpop.permute.xlu1 %362  ;;  %v16711_v37 = vpop.permute.xlu0 %360 }
 0x116   : > { %23336 = vst [vmem:[#allocation58_spill] sm:$0xff] %v16709_v33  ;;  %23337 = vst [vmem:[#allocation59_spill] sm:$0xff] %v16711_v37  ;;  %v16115_v37 = vmov 1983009808  }
 0x117   : > { %542 = vrot.lane.b32.xlu1 %v16370_v24, %s23215_s28  ;;  %540 = vrot.lane.b32.xlu0 %v16373_v25, %s23215_s28  ;;  %v879_v35 = vunpack.c.l.s4 %v16115_v37  ;;  %v16116_v24 = vmov 1934713408  }
 0x118   : > { %v943_v39 = vunpack.c.l.s4 %v16116_v24 }
 0x119   : > { %v16717_v36 = vpop.permute.xlu1 %398  ;;  %v16719_v32 = vpop.permute.xlu0 %396 }
 0x11a   : > { %23338 = vst [vmem:[#allocation60_spill] sm:$0xff] %v16717_v36  ;;  %23339 = vst [vmem:[#allocation61_spill] sm:$0xff] %v16719_v32  ;;  %v882_v36 = vshrl.u32 %v881_v38, 7  ;;  %v876_v38 = vcombine.low %v16253_v1, %v16591_v60 }
 0x11b   : > { %546 = vrot.lane.b32.xlu1 %v16380_v26, %s23215_s28  ;;  %544 = vrot.lane.b32.xlu0 %v16383_v27, %s23215_s28  ;;  %v880_v27 = vunpack.c.0.s8 %v879_v35  ;;  %v1013_v35 = vcombine.high %v16263_v3, %v16589_v59 }
 0x11d   : > { %v16725_v34 = vpop.permute.xlu1 %402  ;;  %v16727_v33 = vpop.permute.xlu0 %400 }
 0x11e   : > { %23340 = vst [vmem:[#allocation62_spill] sm:$0xff] %v16725_v34  ;;  %23341 = vst [vmem:[#allocation63_spill] sm:$0xff] %v16727_v33  ;;  %v944_v34 = vunpack.c.0.s8 %v943_v39  ;;  %v16745_v33 = vsub.s32 %v880_v27, %v882_v36  ;;  %v877_v39 = vcombine.high %v16253_v1, %v16591_v60  ;;  %v1284_v27 = vcombine.low %v16260_v2, %v16597_v61 }
 0x11f   : > { %550 = vrot.lane.b32.xlu1 %v16390_v28, %s23215_s28  ;;  %548 = vrot.lane.b32.xlu0 %v16393_v29, %s23215_s28  ;;  %v1556_v60 = vcombine.low %v16270_v4, %v16605_v63 }
 0x120   : > { %v16747_v29 = vsub.s32 %v944_v34, %v882_v36  ;;  %v1285_v34 = vcombine.high %v16260_v2, %v16597_v61  ;;  %v1148_v36 = vcombine.low %v16250_v0, %v16599_v62  ;;  %v1421_v61 = vcombine.high %v16273_v5, %v16607_v58 }
 0x121   : > { %v16733_v32 = vpop.permute.xlu1 %406  ;;  %v16735_v26 = vpop.permute.xlu0 %404 }
 0x122   : > { %23342 = vst [vmem:[#allocation64_spill] sm:$0xff] %v16733_v32  ;;  %23343 = vst [vmem:[#allocation65_spill] sm:$0xff] %v16735_v26  ;;  %v1012_v26 = vcombine.low %v16263_v3, %v16589_v59  ;;  %v1149_v59 = vcombine.high %v16250_v0, %v16599_v62  ;;  %v1828_v62 = vcombine.low %v16280_v6, %v16613_v57 }
 0x123   : > { %554 = vrot.lane.b32.xlu1 %v16400_v30, %s23215_s28  ;;  %552 = vrot.lane.b32.xlu0 %v16403_v31, %s23215_s28  ;;  %23346 = vst [vmem:[#allocation68_spill] sm:$0xff] %v16747_v29  ;;  %v1692_v29 = vcombine.low %v16283_v7, %v16615_v56 }
 0x124   : > { %v16790_v31 = vrot.slane %v1012_v26, %v16745_v33  ;;  %v16810_v26 = vrot.slane %v1148_v36, %v16745_v33 }
 0x125   : > { %v16741_v24 = vpop.permute.xlu1 %410  ;;  %v16743_v37 = vpop.permute.xlu0 %408 }
 0x126   : > { %23344 = vst [vmem:[#allocation66_spill] sm:$0xff] %v16741_v24  ;;  %23345 = vst [vmem:[#allocation67_spill] sm:$0xff] %v16743_v37  ;;  %v1420_v37 = vcombine.low %v16273_v5, %v16607_v58  ;;  %v16793_v58 = vrot.slane %v1013_v35, %v16745_v33  ;;  %v16813_v35 = vrot.slane %v1149_v59, %v16745_v33 }
 0x127   : > { %590 = vrot.lane.b32.xlu1 %v16263_v3, %s23219_s29  ;;  %588 = vrot.lane.b32.xlu0 %v16253_v1, %s23219_s29  ;;  %v1557_v3 = vcombine.high %v16270_v4, %v16605_v63  ;;  %v1829_v1 = vcombine.high %v16280_v6, %v16613_v57  ;;  %v1693_v63 = vcombine.high %v16283_v7, %v16615_v56 }
 0x128   : > { %v16804_v57 = vrot.slane %v1284_v27, %v16745_v33  ;;  %v16807_v56 = vrot.slane %v1285_v34, %v16745_v33  ;;  %v16827_v27 = vrot.slane %v1421_v61, %v16745_v33  ;;  %v16834_v59 = vrot.slane %v1828_v62, %v16745_v33 }
 0x129   : > { %v16777_v24 = vpop.permute.xlu1 %414  ;;  %v16779_v32 = vpop.permute.xlu0 %412  ;;  %v2101_v61 = vcombine.high %v16290_v8, %v16621_v55  ;;  %v1965_v62 = vcombine.high %v16293_v9, %v16623_v54 }
 0x12a   : > { %23347 = vst [vmem:[#allocation69_spill] sm:$0xff] %v16777_v24  ;;  %23348 = vst [vmem:[#allocation70_spill] sm:$0xff] %v16779_v32  ;;  %v16796_v32 = vrot.slane %v876_v38, %v16745_v33  ;;  %v16799_v24 = vrot.slane %v877_v39, %v16745_v33  ;;  %v16818_v38 = vrot.slane %v1556_v60, %v16745_v33 }
 0x12b   : > { %594 = vrot.lane.b32.xlu1 %v16260_v2, %s23219_s29  ;;  %592 = vrot.lane.b32.xlu0 %v16250_v0, %s23219_s29  ;;  %v16821_v2 = vrot.slane %v1557_v3, %v16745_v33  ;;  %v16824_v39 = vrot.slane %v1420_v37, %v16745_v33  ;;  %23351 = vst [vmem:[#allocation73_spill] sm:$0xff] %v16834_v59 }
 0x12c   : > { %v16837_v0 = vrot.slane %v1829_v1, %v16745_v33  ;;  %v16840_v60 = vrot.slane %v1692_v29, %v16745_v33  ;;  %v16843_v3 = vrot.slane %v1693_v63, %v16745_v33  ;;  %v2100_v37 = vcombine.low %v16290_v8, %v16621_v55 }
 0x12d   : > { %v16829_v34 = vpop.permute.xlu1 %418  ;;  %v16831_v36 = vpop.permute.xlu0 %416  ;;  %v2372_v29 = vcombine.low %v16300_v10, %v16629_v53  ;;  %v2373_v1 = vcombine.high %v16300_v10, %v16629_v53  ;;  %v2236_v63 = vcombine.low %v16303_v11, %v16631_v52  ;;  %v2237_v55 = vcombine.high %v16303_v11, %v16631_v52 }
 0x12e   : > { %23349 = vst [vmem:[#allocation71_spill] sm:$0xff] %v16829_v34  ;;  %23350 = vst [vmem:[#allocation72_spill] sm:$0xff] %v16831_v36  ;;  %v1964_v36 = vcombine.low %v16293_v9, %v16623_v54  ;;  %v2644_v54 = vcombine.low %v16310_v12, %v16637_v51  ;;  %v2508_v34 = vcombine.low %v16313_v13, %v16639_v50 }
 0x12f   : > { %23352 = vst [vmem:[#allocation74_spill] sm:$0xff] %v16837_v0  ;;  %23353 = vst [vmem:[#allocation75_spill] sm:$0xff] %v16840_v60  ;;  %598 = vrot.lane.b32.xlu1 %v16270_v4, %s23219_s29  ;;  %596 = vrot.lane.b32.xlu0 %v16273_v5, %s23219_s29  ;;  %v2645_v4 = vcombine.high %v16310_v12, %v16637_v51  ;;  %v2509_v53 = vcombine.high %v16313_v13, %v16639_v50 }
 0x130   : > { %23354 = vst [vmem:[#allocation76_spill] sm:$0xff] %v16843_v3  ;;  %v2916_v52 = vcombine.low %v16320_v14, %v16645_v49  ;;  %v2917_v5 = vcombine.high %v16320_v14, %v16645_v49  ;;  %v2780_v0 = vcombine.low %v16323_v15, %v16647_v48  ;;  %v2781_v51 = vcombine.high %v16323_v15, %v16647_v48 }
 0x131   : > { %v16873_v3 = vpop.permute.xlu1 %422  ;;  %v16875_v60 = vpop.permute.xlu0 %420  ;;  %v16886_v59 = vrot.slane %v2100_v37, %v16745_v33  ;;  %v16889_v50 = vrot.slane %v2101_v61, %v16745_v33  ;;  %v16900_v49 = vrot.slane %v2372_v29, %v16745_v33  ;;  %v16903_v48 = vrot.slane %v2373_v1, %v16745_v33 }
 0x132   : > { %23355 = vst [vmem:[#allocation77_spill] sm:$0xff] %v16873_v3  ;;  %23356 = vst [vmem:[#allocation78_spill] sm:$0xff] %v16875_v60  ;;  %v16892_v60 = vrot.slane %v1964_v36, %v16745_v33  ;;  %v16895_v3 = vrot.slane %v1965_v62, %v16745_v33  ;;  %v16906_v37 = vrot.slane %v2236_v63, %v16745_v33 }
 0x133   : > { %602 = vrot.lane.b32.xlu1 %v16280_v6, %s23219_s29  ;;  %v16909_v61 = vrot.slane %v2237_v55, %v16745_v33  ;;  %600 = vrot.lane.b32.xlu0 %v16283_v7, %s23219_s29  ;;  %v16914_v36 = vrot.slane %v2644_v54, %v16745_v33  ;;  %v16917_v6 = vrot.slane %v2645_v4, %v16745_v33 }
 0x134   : > { %v16920_v62 = vrot.slane %v2508_v34, %v16745_v33  ;;  %v16923_v29 = vrot.slane %v2509_v53, %v16745_v33  ;;  %v16930_v55 = vrot.slane %v2916_v52, %v16745_v33  ;;  %v16933_v7 = vrot.slane %v2917_v5, %v16745_v33 }
 0x135   : > { %v16925_v1 = vpop.permute.xlu1 %426  ;;  %v16927_v63 = vpop.permute.xlu0 %424  ;;  %v16936_v54 = vrot.slane %v2780_v0, %v16745_v33  ;;  %v16939_v4 = vrot.slane %v2781_v51, %v16745_v33  ;;  %v3188_v34 = vcombine.low %v16330_v16, %v16653_v47  ;;  %v3189_v53 = vcombine.high %v16330_v16, %v16653_v47 }
 0x136   : > { %23357 = vst [vmem:[#allocation79_spill] sm:$0xff] %v16920_v62  ;;  %23358 = vst [vmem:[#allocation80_spill] sm:$0xff] %v16923_v29  ;;  %v3053_v52 = vcombine.high %v16333_v17, %v16655_v46  ;;  %v3460_v0 = vcombine.low %v16340_v18, %v16661_v45  ;;  %v3461_v5 = vcombine.high %v16340_v18, %v16661_v45 }
 0x137   : > { %23359 = vst [vmem:[#allocation81_spill] sm:$0xff] %v16927_v63  ;;  %23360 = vst [vmem:[#allocation82_spill] sm:$0xff] %v16930_v55  ;;  %v3052_v63 = vcombine.low %v16333_v17, %v16655_v46  ;;  %606 = vrot.lane.b32.xlu1 %v16290_v8, %s23219_s29  ;;  %v3324_v51 = vcombine.low %v16343_v19, %v16663_v44  ;;  %v3325_v47 = vcombine.high %v16343_v19, %v16663_v44 }
 0x138   : > { %23361 = vst [vmem:[#allocation83_spill] sm:$0xff] %v16933_v7  ;;  %23362 = vst [vmem:[#allocation84_spill] sm:$0xff] %v16936_v54  ;;  %604 = vrot.lane.b32.xlu0 %v16293_v9, %s23219_s29  ;;  %v3732_v46 = vcombine.low %v16350_v20, %v16669_v43  ;;  %v3733_v8 = vcombine.high %v16350_v20, %v16669_v43  ;;  %v3597_v45 = vcombine.high %v16353_v21, %v16671_v42 }
 0x139   : > { %23363 = vst [vmem:[#allocation85_spill] sm:$0xff] %v16939_v4  ;;  %v3596_v4 = vcombine.low %v16353_v21, %v16671_v42  ;;  %v16969_v54 = vpop.permute.xlu1 %430  ;;  %v16971_v7 = vpop.permute.xlu0 %428  ;;  %v4004_v44 = vcombine.low %v16360_v22, %v16677_v41  ;;  %v4005_v9 = vcombine.high %v16360_v22, %v16677_v41  ;;  %v3868_v55 = vcombine.low %v16363_v23, %v16679_v40 }
 0x13a   : > { %23364 = vst [vmem:[#allocation86_spill] sm:$0xff] %v16969_v54  ;;  %23365 = vst [vmem:[#allocation87_spill] sm:$0xff] %v16971_v7  ;;  %v3869_v43 = vcombine.high %v16363_v23, %v16679_v40  ;;  %v16982_v29 = vrot.slane %v3188_v34, %v16745_v33  ;;  %v16985_v42 = vrot.slane %v3189_v53, %v16745_v33 }
 0x13b   : > { %v16988_v7 = vrot.slane %v3052_v63, %v16745_v33  ;;  %v16991_v54 = vrot.slane %v3053_v52, %v16745_v33  ;;  %610 = vrot.lane.b32.xlu1 %v16300_v10, %s23219_s29  ;;  %v16996_v41 = vrot.slane %v3460_v0, %v16745_v33  ;;  %v16999_v40 = vrot.slane %v3461_v5, %v16745_v33 }
 0x13c   : > { %23366 = vst [vmem:[#allocation88_spill] sm:$0xff] %v16982_v29  ;;  %23367 = vst [vmem:[#allocation89_spill] sm:$0xff] %v16985_v42  ;;  %v17002_v34 = vrot.slane %v3324_v51, %v16745_v33  ;;  %v17005_v53 = vrot.slane %v3325_v47, %v16745_v33  ;;  %608 = vrot.lane.b32.xlu0 %v16303_v11, %s23219_s29  ;;  %v17010_v63 = vrot.slane %v3732_v46, %v16745_v33 }
 0x13d   : > { %23368 = vst [vmem:[#allocation90_spill] sm:$0xff] %v16988_v7  ;;  %23369 = vst [vmem:[#allocation91_spill] sm:$0xff] %v16991_v54  ;;  %v17013_v10 = vrot.slane %v3733_v8, %v16745_v33  ;;  %v17016_v52 = vrot.slane %v3596_v4, %v16745_v33  ;;  %v17019_v0 = vrot.slane %v3597_v45, %v16745_v33  ;;  %v17021_v5 = vpop.permute.xlu1 %434  ;;  %v17023_v51 = vpop.permute.xlu0 %432  ;;  %v23384_v4 = vld [vmem:[#allocation52_spill] sm:$0xff] }
 0x13e   : > { %23370 = vst [vmem:[#allocation92_spill] sm:$0xff] %v16996_v41  ;;  %23371 = vst [vmem:[#allocation93_spill] sm:$0xff] %v16999_v40  ;;  %v17026_v47 = vrot.slane %v4004_v44, %v16745_v33  ;;  %v17029_v11 = vrot.slane %v4005_v9, %v16745_v33  ;;  %v17032_v46 = vrot.slane %v3868_v55, %v16745_v33  ;;  %v23387_v44 = vld [vmem:[#allocation60_spill] sm:$0xff]  ;;  %v23389_v9 = vld [vmem:[#allocation54_spill] sm:$0xff] }
 0x13f   : > { %23372 = vst [vmem:[#allocation94_spill] sm:$0xff] %v17002_v34  ;;  %23373 = vst [vmem:[#allocation95_spill] sm:$0xff] %v17005_v53  ;;  %v17035_v8 = vrot.slane %v3869_v43, %v16745_v33  ;;  %614 = vrot.lane.b32.xlu1 %v16310_v12, %s23219_s29  ;;  %v23390_v43 = vld [vmem:[#allocation16_spill] sm:$0xff]  ;;  %v23393_v41 = vld [vmem:[#allocation55_spill] sm:$0xff] }
 0x140   : > { %23374 = vst [vmem:[#allocation96_spill] sm:$0xff] %v17010_v63  ;;  %23375 = vst [vmem:[#allocation97_spill] sm:$0xff] %v17013_v10  ;;  %v23386_v10 = vld [vmem:[#allocation53_spill] sm:$0xff]  ;;  %612 = vrot.lane.b32.xlu0 %v16313_v13, %s23219_s29  ;;  %v4549_v40 = vcombine.high %v23390_v43, %v23389_v9 }
 0x141   : > { %23376 = vst [vmem:[#allocation98_spill] sm:$0xff] %v17016_v52  ;;  %23377 = vst [vmem:[#allocation99_spill] sm:$0xff] %v17019_v0  ;;  %v23385_v52 = vld [vmem:[#allocation15_spill] sm:$0xff]  ;;  %v4140_v63 = vcombine.low %v16373_v25, %v23386_v10  ;;  %v4141_v55 = vcombine.high %v16373_v25, %v23386_v10  ;;  %v23394_v12 = vld [vmem:[#allocation17_spill] sm:$0xff]  ;;  %v17065_v7 = vpop.permute.xlu1 %438 }
 0x142   : > { %23378 = vst [vmem:[#allocation100_spill] sm:$0xff] %v17021_v5  ;;  %23379 = vst [vmem:[#allocation101_spill] sm:$0xff] %v17023_v51  ;;  %v4276_v45 = vcombine.low %v23385_v52, %v23384_v4  ;;  %v4277_v0 = vcombine.high %v23385_v52, %v23384_v4  ;;  %v23392_v4 = vld [vmem:[#allocation21_spill] sm:$0xff]  ;;  %v4412_v51 = vcombine.low %v23394_v12, %v23393_v41  ;;  %v23399_v5 = vld [vmem:[#allocation18_spill] sm:$0xff] }
 0x143   : > { %23380 = vst [vmem:[#allocation102_spill] sm:$0xff] %v17026_v47  ;;  %23381 = vst [vmem:[#allocation103_spill] sm:$0xff] %v17029_v11  ;;  %v23388_v47 = vld [vmem:[#allocation23_spill] sm:$0xff]  ;;  %v23391_v11 = vld [vmem:[#allocation61_spill] sm:$0xff]  ;;  %v4413_v10 = vcombine.high %v23394_v12, %v23393_v41  ;;  %618 = vrot.lane.b32.xlu1 %v16320_v14, %s23219_s29 }
 0x144   : > { %23382 = vst [vmem:[#allocation104_spill] sm:$0xff] %v17032_v46  ;;  %23383 = vst [vmem:[#allocation105_spill] sm:$0xff] %v17035_v8  ;;  %v1028_v53 = vcombine.low %v23388_v47, %v23387_v44  ;;  %v4548_v8 = vcombine.low %v23390_v43, %v23389_v9  ;;  %v1029_v46 = vcombine.high %v23388_v47, %v23387_v44  ;;  %v17067_v47 = vpop.permute.xlu0 %436  ;;  %v23397_v44 = vld [vmem:[#allocation56_spill] sm:$0xff]  ;;  %v23398_v9 = vld [vmem:[#allocation57_spill] sm:$0xff]  ;;  %616 = vrot.lane.b32.xlu0 %v16323_v15, %s23219_s29 }
 0x145   : > { %v892_v34 = vcombine.low %v23392_v4, %v23391_v11  ;;  %v893_v54 = vcombine.high %v23392_v4, %v23391_v11  ;;  %23395 = vst [vmem:[#allocation52_spill] sm:$0xff] %v17065_v7  ;;  %23396 = vst [vmem:[#allocation15_spill] sm:$0xff] %v17067_v47  ;;  %v4820_v42 = vcombine.low %v16390_v28, %v23397_v44 }
 0x146   : > { %v4821_v13 = vcombine.high %v16390_v28, %v23397_v44  ;;  %v4684_v29 = vcombine.low %v23399_v5, %v23398_v9  ;;  %v4685_v62 = vcombine.high %v23399_v5, %v23398_v9  ;;  %v17078_v41 = vrot.slane %v4276_v45, %v16745_v33 }
 0x147   : > { %v17081_v11 = vrot.slane %v4277_v0, %v16745_v33  ;;  %v17084_v4 = vrot.slane %v4140_v63, %v16745_v33  ;;  %v1036_v47 = vrot.slane %v1028_v53, %v16745_v33  ;;  %v17090_v44 = vrot.slane %v4141_v55, %v16745_v33  ;;  %622 = vrot.lane.b32.xlu1 %v16330_v16, %s23219_s29 }
 0x148   : > { %23400 = vst [vmem:[#allocation53_spill] sm:$0xff] %v17078_v41  ;;  %v17093_v7 = vrot.slane %v4548_v8, %v16745_v33  ;;  %v1043_v45 = vrot.slane %v1029_v46, %v16745_v33  ;;  %v900_v9 = vrot.slane %v892_v34, %v16745_v33  ;;  %v17100_v63 = vrot.slane %v4549_v40, %v16745_v33  ;;  %v17109_v8 = vpop.permute.xlu1 %442  ;;  %v17111_v55 = vpop.permute.xlu0 %440  ;;  %v23412_v46 = vld [vmem:[#allocation58_spill] sm:$0xff] }
 0x149   : > { %23401 = vst [vmem:[#allocation60_spill] sm:$0xff] %v17081_v11  ;;  %23402 = vst [vmem:[#allocation23_spill] sm:$0xff] %v17084_v4  ;;  %v17103_v53 = vrot.slane %v4412_v51, %v16745_v33  ;;  %v17106_v14 = vrot.slane %v4413_v10, %v16745_v33  ;;  %v907_v0 = vrot.slane %v893_v54, %v16745_v33  ;;  %620 = vrot.lane.b32.xlu0 %v16333_v17, %s23219_s29 }
 0x14a   : > { %23403 = vst [vmem:[#allocation54_spill] sm:$0xff] %v17090_v44  ;;  %23404 = vst [vmem:[#allocation16_spill] sm:$0xff] %v17093_v7  ;;  %v17114_v34 = vrot.slane %v4820_v42, %v16745_v33  ;;  %v17117_v15 = vrot.slane %v4821_v13, %v16745_v33  ;;  %v17120_v40 = vrot.slane %v4684_v29, %v16745_v33  ;;  %v23418_v7 = vld [vmem:[#allocation20_spill] sm:$0xff] }
 0x14b   : > { %23405 = vst [vmem:[#allocation61_spill] sm:$0xff] %v17100_v63  ;;  %23406 = vst [vmem:[#allocation21_spill] sm:$0xff] %v17103_v53  ;;  %v17123_v51 = vrot.slane %v4685_v62, %v16745_v33  ;;  %v5092_v10 = vcombine.low %v16400_v30, %v23412_v46  ;;  %v1076_v54 = vcombine.low %v16790_v31, %v1036_v47  ;;  %v23413_v53 = vld [vmem:[#allocation62_spill] sm:$0xff]  ;;  %626 = vrot.lane.b32.xlu1 %v16340_v18, %s23219_s29 }
 0x14c   : > { %23407 = vst [vmem:[#allocation55_spill] sm:$0xff] %v17106_v14  ;;  %23408 = vst [vmem:[#allocation17_spill] sm:$0xff] %v17114_v34  ;;  %v1077_v14 = vcombine.high %v16790_v31, %v1036_v47  ;;  %v23414_v63 = vld [vmem:[#allocation22_spill] sm:$0xff]  ;;  %v1092_v13 = vcombine.low %v16793_v58, %v1043_v45  ;;  %v1093_v29 = vcombine.high %v16793_v58, %v1043_v45  ;;  %v17147_v58 = vpop.permute.xlu0 %444  ;;  %v23415_v45 = vld [vmem:[#allocation59_spill] sm:$0xff] }
 0x14d   : > { %23409 = vst [vmem:[#allocation56_spill] sm:$0xff] %v17117_v15  ;;  %23410 = vst [vmem:[#allocation57_spill] sm:$0xff] %v17120_v40  ;;  %v1300_v42 = vcombine.low %v23414_v63, %v23413_v53  ;;  %v940_v62 = vcombine.low %v16796_v32, %v900_v9  ;;  %v5093_v31 = vcombine.high %v16400_v30, %v23412_v46  ;;  %v17145_v15 = vpop.permute.xlu1 %446  ;;  %v23416_v34 = vld [vmem:[#allocation19_spill] sm:$0xff]  ;;  %624 = vrot.lane.b32.xlu0 %v16343_v19, %s23219_s29 }
 0x14e   : > { %23411 = vst [vmem:[#allocation18_spill] sm:$0xff] %v17123_v51  ;;  %v941_v51 = vcombine.high %v16796_v32, %v900_v9  ;;  %v956_v47 = vcombine.low %v16799_v24, %v907_v0  ;;  %v957_v40 = vcombine.high %v16799_v24, %v907_v0  ;;  %v1301_v16 = vcombine.high %v23414_v63, %v23413_v53  ;;  %v23417_v9 = vld [vmem:[#allocation63_spill] sm:$0xff]  ;;  %v23420_v63 = vld [vmem:[#allocation68_spill] sm:$0xff] }
 0x14f   : > { %v4956_v32 = vcombine.low %v23416_v34, %v23415_v45  ;;  %v4957_v17 = vcombine.high %v23416_v34, %v23415_v45  ;;  %v1164_v46 = vcombine.low %v23418_v7, %v23417_v9  ;;  %v1165_v44 = vcombine.high %v23418_v7, %v23417_v9  ;;  %630 = vrot.lane.b32.xlu1 %v16350_v20, %s23219_s29 }
 0x150   : > { %v17158_v24 = vrot.slane %v5092_v10, %v16745_v33  ;;  %v1084_v53 = vrot.slane %v1076_v54, %v23420_v63  ;;  %v1091_v0 = vrot.slane %v1077_v14, %v23420_v63  ;;  %v1308_v4 = vrot.slane %v1300_v42, %v16745_v33 }
 0x151   : > { %v1100_v45 = vrot.slane %v1092_v13, %v23420_v63  ;;  %v1107_v11 = vrot.slane %v1093_v29, %v23420_v63  ;;  %v948_v41 = vrot.slane %v940_v62, %v23420_v63  ;;  %v955_v7 = vrot.slane %v941_v51, %v23420_v63  ;;  %v17177_v42 = vpop.permute.xlu1 %450  ;;  %v17179_v13 = vpop.permute.xlu0 %448  ;;  %628 = vrot.lane.b32.xlu0 %v16353_v21, %s23219_s29 }
 0x152   : > { %23419 = vst [vmem:[#allocation58_spill] sm:$0xff] %v17158_v24  ;;  %v17172_v10 = vrot.slane %v5093_v31, %v16745_v33  ;;  %v964_v14 = vrot.slane %v956_v47, %v23420_v63  ;;  %v971_v54 = vrot.slane %v957_v40, %v23420_v63  ;;  %v1315_v18 = vrot.slane %v1301_v16, %v16745_v33 }
 0x153   : > { %23422 = vst [vmem:[#allocation22_spill] sm:$0xff] %v17179_v13  ;;  %v17182_v29 = vrot.slane %v4956_v32, %v16745_v33  ;;  %v17185_v51 = vrot.slane %v4957_v17, %v16745_v33  ;;  %v1172_v19 = vrot.slane %v1164_v46, %v16745_v33  ;;  %v1179_v62 = vrot.slane %v1165_v44, %v16745_v33 }
 0x154   : > { %23421 = vst [vmem:[#allocation62_spill] sm:$0xff] %v17172_v10  ;;  %v15368_v31 = vcombine.low %v1084_v53, %v1091_v0  ;;  %v15370_v47 = vcombine.high %v1084_v53, %v1091_v0  ;;  %v1348_v40 = vcombine.low %v16804_v57, %v1308_v4  ;;  %v1349_v16 = vcombine.high %v16804_v57, %v1308_v4 }
 0x155   : > { %23423 = vst [vmem:[#allocation59_spill] sm:$0xff] %v17182_v29  ;;  %23424 = vst [vmem:[#allocation19_spill] sm:$0xff] %v17185_v51  ;;  %v15372_v9 = vcombine.low %v1100_v45, %v1107_v11  ;;  %v15374_v10 = vcombine.high %v1100_v45, %v1107_v11  ;;  %v15360_v32 = vcombine.low %v948_v41, %v955_v7  ;;  %v17197_v0 = vpop.permute.xlu1 %454  ;;  %v17199_v51 = vpop.permute.xlu0 %452  ;;  %634 = vrot.lane.b32.xlu1 %v16360_v22, %s23219_s29 }
 0x156   : > { %v15362_v29 = vcombine.high %v948_v41, %v955_v7  ;;  %v15364_v17 = vcombine.low %v964_v14, %v971_v54  ;;  %v15366_v46 = vcombine.high %v964_v14, %v971_v54  ;;  %v1364_v44 = vcombine.low %v16807_v56, %v1315_v18  ;;  %23425 = vst [vmem:[#allocation63_spill] sm:$0xff] %v17197_v0 }
 0x157   : > { %v1365_v53 = vcombine.high %v16807_v56, %v1315_v18  ;;  %23426 = vst [vmem:[#allocation20_spill] sm:$0xff] %v17199_v51  ;;  %v1212_v57 = vcombine.low %v16810_v26, %v1172_v19  ;;  %v1213_v20 = vcombine.high %v16810_v26, %v1172_v19  ;;  %v1228_v11 = vcombine.low %v16813_v35, %v1179_v62  ;;  %v23556_v51 = vld [vmem:[#allocation86_spill] sm:$0xff] }
 0x158   : > { %v1229_v41 = vcombine.high %v16813_v35, %v1179_v62  ;;  %v17206_v21 = vrot.slane %v15368_v31, %v16745_v33  ;;  %v17209_v4 = vrot.slane %v15370_v47, %v16745_v33  ;;  %v1356_v56 = vrot.slane %v1348_v40, %v23420_v63  ;;  %632 = vrot.lane.b32.xlu0 %v16363_v23, %s23219_s29 }
 0x159   : > { %v1363_v45 = vrot.slane %v1349_v16, %v23420_v63  ;;  %v17216_v7 = vrot.slane %v15372_v9, %v16745_v33  ;;  %v17219_v26 = vrot.slane %v15374_v10, %v16745_v33  ;;  %v17222_v35 = vrot.slane %v15360_v32, %v16745_v33  ;;  %v17237_v19 = vpop.permute.xlu1 %458  ;;  %v17239_v62 = vpop.permute.xlu0 %456  ;;  %v23437_v32 = vld [vmem:[#allocation64_spill] sm:$0xff]  ;;  %638 = vrot.lane.b32.xlu1 %v23385_v52, %s23219_s29 }
 0x15a   : > { %23427 = vst [vmem:[#allocation68_spill] sm:$0xff] %v17206_v21  ;;  %23428 = vst [vmem:[#allocation106_spill] sm:$0xff] %v17209_v4  ;;  %v17225_v14 = vrot.slane %v15362_v29, %v16745_v33  ;;  %v17230_v54 = vrot.slane %v15364_v17, %v16745_v33  ;;  %v17233_v22 = vrot.slane %v15366_v46, %v16745_v33  ;;  %v23438_v17 = vld [vmem:[#allocation24_spill] sm:$0xff] }
 0x15b   : > { %23429 = vst [vmem:[#allocation107_spill] sm:$0xff] %v17216_v7  ;;  %23430 = vst [vmem:[#allocation108_spill] sm:$0xff] %v17219_v26  ;;  %v1372_v18 = vrot.slane %v1364_v44, %v23420_v63  ;;  %v1379_v10 = vrot.slane %v1365_v53, %v23420_v63  ;;  %v1220_v29 = vrot.slane %v1212_v57, %v23420_v63  ;;  %v23477_v7 = vld [vmem:[#allocation69_spill] sm:$0xff] }
 0x15c   : > { %23431 = vst [vmem:[#allocation109_spill] sm:$0xff] %v17222_v35  ;;  %23432 = vst [vmem:[#allocation110_spill] sm:$0xff] %v17225_v14  ;;  %v1227_v31 = vrot.slane %v1213_v20, %v23420_v63  ;;  %v1236_v23 = vrot.slane %v1228_v11, %v23420_v63  ;;  %v1243_v47 = vrot.slane %v1229_v41, %v23420_v63  ;;  %v23439_v20 = vld [vmem:[#allocation65_spill] sm:$0xff]  ;;  %636 = vrot.lane.b32.xlu0 %v16373_v25, %s23219_s29 }
 0x15d   : > { %23433 = vst [vmem:[#allocation111_spill] sm:$0xff] %v17230_v54  ;;  %23434 = vst [vmem:[#allocation112_spill] sm:$0xff] %v17233_v22  ;;  %v15384_v16 = vcombine.low %v1356_v56, %v1363_v45  ;;  %v15386_v9 = vcombine.high %v1356_v56, %v1363_v45  ;;  %v1572_v46 = vcombine.low %v23438_v17, %v23437_v32  ;;  %v23440_v11 = vld [vmem:[#allocation25_spill] sm:$0xff]  ;;  %v17265_v40 = vpop.permute.xlu1 %494  ;;  %v17267_v53 = vpop.permute.xlu0 %492  ;;  %642 = vrot.lane.b32.xlu1 %v23390_v43, %s23219_s29 }
 0x15e   : > { %23435 = vst [vmem:[#allocation113_spill] sm:$0xff] %v17237_v19  ;;  %23436 = vst [vmem:[#allocation114_spill] sm:$0xff] %v17239_v62  ;;  %v1573_v57 = vcombine.high %v23438_v17, %v23437_v32  ;;  %v1436_v41 = vcombine.low %v23440_v11, %v23439_v20  ;;  %v15388_v45 = vcombine.low %v1372_v18, %v1379_v10 }
 0x15f   : > { %v15390_v52 = vcombine.high %v1372_v18, %v1379_v10  ;;  %v1437_v44 = vcombine.high %v23440_v11, %v23439_v20  ;;  %23441 = vst [vmem:[#allocation64_spill] sm:$0xff] %v17265_v40  ;;  %23442 = vst [vmem:[#allocation24_spill] sm:$0xff] %v17267_v53  ;;  %v15376_v4 = vcombine.low %v1220_v29, %v1227_v31 }
 0x160   : > { %v15378_v32 = vcombine.high %v1220_v29, %v1227_v31  ;;  %v15380_v17 = vcombine.low %v1236_v23, %v1243_v47  ;;  %v15382_v21 = vcombine.high %v1236_v23, %v1243_v47  ;;  %v17272_v25 = vrot.slane %v15384_v16, %v16745_v33  ;;  %640 = vrot.lane.b32.xlu0 %v23394_v12, %s23219_s29  ;;  %v23453_v47 = vld [vmem:[#allocation66_spill] sm:$0xff] }
 0x161   : > { %v17275_v56 = vrot.slane %v15386_v9, %v16745_v33  ;;  %v1580_v18 = vrot.slane %v1572_v46, %v16745_v33  ;;  %v1587_v31 = vrot.slane %v1573_v57, %v16745_v33  ;;  %v1444_v23 = vrot.slane %v1436_v41, %v16745_v33  ;;  %v17297_v46 = vpop.permute.xlu1 %498  ;;  %v17299_v20 = vpop.permute.xlu0 %496  ;;  %v23454_v29 = vld [vmem:[#allocation26_spill] sm:$0xff]  ;;  %646 = vrot.lane.b32.xlu1 %v16390_v28, %s23219_s29 }
 0x162   : > { %23443 = vst [vmem:[#allocation65_spill] sm:$0xff] %v17272_v25  ;;  %v17291_v16 = vrot.slane %v15388_v45, %v16745_v33  ;;  %v17294_v43 = vrot.slane %v15390_v52, %v16745_v33  ;;  %v1451_v9 = vrot.slane %v1437_v44, %v16745_v33  ;;  %23447 = vst [vmem:[#allocation117_spill] sm:$0xff] %v17297_v46 }
 0x163   : > { %23444 = vst [vmem:[#allocation25_spill] sm:$0xff] %v17275_v56  ;;  %23448 = vst [vmem:[#allocation118_spill] sm:$0xff] %v17299_v20  ;;  %v17302_v57 = vrot.slane %v15376_v4, %v16745_v33  ;;  %v17305_v12 = vrot.slane %v15378_v32, %v16745_v33  ;;  %v17308_v11 = vrot.slane %v15380_v17, %v16745_v33 }
 0x164   : > { %23445 = vst [vmem:[#allocation115_spill] sm:$0xff] %v17291_v16  ;;  %23446 = vst [vmem:[#allocation116_spill] sm:$0xff] %v17294_v43  ;;  %v17311_v41 = vrot.slane %v15382_v21, %v16745_v33  ;;  %v1620_v44 = vcombine.low %v16818_v38, %v1580_v18  ;;  %v1621_v52 = vcombine.high %v16818_v38, %v1580_v18  ;;  %644 = vrot.lane.b32.xlu0 %v23399_v5, %s23219_s29  ;;  %v17376_v16 = vld [vmem:[%s16247_s24 + $0x8] sm:$0xff] }
 0x165   : > { %23449 = vst [vmem:[#allocation119_spill] sm:$0xff] %v17302_v57  ;;  %23450 = vst [vmem:[#allocation120_spill] sm:$0xff] %v17305_v12  ;;  %v1844_v4 = vcombine.low %v23454_v29, %v23453_v47  ;;  %v1636_v32 = vcombine.low %v16821_v2, %v1587_v31  ;;  %v1637_v17 = vcombine.high %v16821_v2, %v1587_v31  ;;  %v17333_v24 = vpop.permute.xlu1 %502  ;;  %v17335_v2 = vpop.permute.xlu0 %500  ;;  %v23457_v31 = vld [vmem:[#allocation67_spill] sm:$0xff]  ;;  %650 = vrot.lane.b32.xlu1 %v16400_v30, %s23219_s29 }
 0x166   : > { %23451 = vst [vmem:[#allocation121_spill] sm:$0xff] %v17308_v11  ;;  %23452 = vst [vmem:[#allocation122_spill] sm:$0xff] %v17311_v41  ;;  %v1484_v21 = vcombine.low %v16824_v39, %v1444_v23  ;;  %v1485_v10 = vcombine.high %v16824_v39, %v1444_v23  ;;  %v1500_v18 = vcombine.low %v16827_v27, %v1451_v9  ;;  %v23458_v23 = vld [vmem:[#allocation27_spill] sm:$0xff] }
 0x167   : > { %v1501_v45 = vcombine.high %v16827_v27, %v1451_v9  ;;  %v1845_v28 = vcombine.high %v23454_v29, %v23453_v47  ;;  %23455 = vst [vmem:[#allocation66_spill] sm:$0xff] %v17333_v24  ;;  %23456 = vst [vmem:[#allocation26_spill] sm:$0xff] %v17335_v2  ;;  %v1708_v38 = vcombine.low %v23458_v23, %v23457_v31  ;;  %v17381_v41 = vld [vmem:[%s16247_s24] sm:$0xff] }
 0x168   : > { %v1709_v56 = vcombine.high %v23458_v23, %v23457_v31  ;;  %v1628_v29 = vrot.slane %v1620_v44, %v23420_v63  ;;  %v1635_v47 = vrot.slane %v1621_v52, %v23420_v63  ;;  %v1852_v9 = vrot.slane %v1844_v4, %v16745_v33  ;;  %648 = vrot.lane.b32.xlu0 %v23416_v34, %s23219_s29 }
 0x169   : > { %v1644_v5 = vrot.slane %v1636_v32, %v23420_v63  ;;  %v1651_v39 = vrot.slane %v1637_v17, %v23420_v63  ;;  %v1492_v43 = vrot.slane %v1484_v21, %v23420_v63  ;;  %v1499_v31 = vrot.slane %v1485_v10, %v23420_v63  ;;  %v17363_v32 = vpop.permute.xlu1 %506  ;;  %v17365_v17 = vpop.permute.xlu0 %504  ;;  %686 = vrot.lane.b32.xlu1 %v17376_v16, %s23221_s30 }
 0x16a   : > { %v1508_v52 = vrot.slane %v1500_v18, %v23420_v63  ;;  %v1515_v4 = vrot.slane %v1501_v45, %v23420_v63  ;;  %v1859_v30 = vrot.slane %v1845_v28, %v16745_v33  ;;  %23459 = vst [vmem:[#allocation67_spill] sm:$0xff] %v17363_v32  ;;  %23460 = vst [vmem:[#allocation27_spill] sm:$0xff] %v17365_v17  ;;  %v23461_v45 = vld [vmem:[#allocation73_spill] sm:$0xff] }
 0x16b   : > { %v1716_v21 = vrot.slane %v1708_v38, %v16745_v33  ;;  %v1723_v23 = vrot.slane %v1709_v56, %v16745_v33  ;;  %v15400_v18 = vcombine.low %v1628_v29, %v1635_v47  ;;  %v15402_v44 = vcombine.high %v1628_v29, %v1635_v47  ;;  %v23462_v29 = vld [vmem:[#allocation74_spill] sm:$0xff] }
 0x16c   : > { %v1892_v27 = vcombine.low %v23461_v45, %v1852_v9  ;;  %v1893_v28 = vcombine.high %v23461_v45, %v1852_v9  ;;  %v15404_v10 = vcombine.low %v1644_v5, %v1651_v39  ;;  %v15406_v25 = vcombine.high %v1644_v5, %v1651_v39  ;;  %684 = vrot.lane.b32.xlu0 %v17381_v41, %s23221_s30  ;;  %v23465_v39 = vld [vmem:[#allocation75_spill] sm:$0xff] }
 0x16d   : > { %v15392_v12 = vcombine.low %v1492_v43, %v1499_v31  ;;  %v15394_v34 = vcombine.high %v1492_v43, %v1499_v31  ;;  %v15396_v56 = vcombine.low %v1508_v52, %v1515_v4  ;;  %v15398_v38 = vcombine.high %v1508_v52, %v1515_v4  ;;  %v17387_v45 = vpop.permute.xlu1 %510  ;;  %v17389_v11 = vpop.permute.xlu0 %508  ;;  %v23466_v31 = vld [vmem:[#allocation76_spill] sm:$0xff] }
 0x16e   : > { %v1908_v47 = vcombine.low %v23462_v29, %v1859_v30  ;;  %v1909_v9 = vcombine.high %v23462_v29, %v1859_v30  ;;  %23463 = vst [vmem:[#allocation73_spill] sm:$0xff] %v17387_v45  ;;  %23464 = vst [vmem:[#allocation74_spill] sm:$0xff] %v17389_v11  ;;  %v1756_v5 = vcombine.low %v23465_v39, %v1716_v21  ;;  %v17404_v29 = vld [vmem:[%s16247_s24 + $0x18] sm:$0xff] }
 0x16f   : > { %v1757_v43 = vcombine.high %v23465_v39, %v1716_v21  ;;  %v1772_v57 = vcombine.low %v23466_v31, %v1723_v23  ;;  %v1773_v17 = vcombine.high %v23466_v31, %v1723_v23  ;;  %v17396_v32 = vrot.slane %v15400_v18, %v16745_v33  ;;  %690 = vrot.lane.b32.xlu1 %v17404_v29, %s23221_s30 }
 0x170   : > { %v17399_v52 = vrot.slane %v15402_v44, %v16745_v33  ;;  %v1900_v4 = vrot.slane %v1892_v27, %v23420_v63  ;;  %v1907_v30 = vrot.slane %v1893_v28, %v23420_v63  ;;  %v17409_v21 = vrot.slane %v15404_v10, %v16745_v33  ;;  %v17421_v27 = vld [vmem:[%s16247_s24 + $0x10] sm:$0xff] }
 0x171   : > { %23467 = vst [vmem:[#allocation75_spill] sm:$0xff] %v17396_v32  ;;  %v17412_v23 = vrot.slane %v15406_v25, %v16745_v33  ;;  %v17415_v18 = vrot.slane %v15392_v12, %v16745_v33  ;;  %v17418_v44 = vrot.slane %v15394_v34, %v16745_v33  ;;  %688 = vrot.lane.b32.xlu0 %v17421_v27, %s23221_s30  ;;  %v17433_v39 = vpop.permute.xlu1 %514  ;;  %v17435_v34 = vpop.permute.xlu0 %512 }
 0x172   : > { %23468 = vst [vmem:[#allocation76_spill] sm:$0xff] %v17399_v52  ;;  %23469 = vst [vmem:[#allocation123_spill] sm:$0xff] %v17409_v21  ;;  %v17426_v28 = vrot.slane %v15396_v56, %v16745_v33  ;;  %v17429_v10 = vrot.slane %v15398_v38, %v16745_v33  ;;  %v1916_v25 = vrot.slane %v1908_v47, %v23420_v63  ;;  %v23480_v38 = vld [vmem:[#allocation29_spill] sm:$0xff]  ;;  %v23494_v21 = vld [vmem:[#allocation30_spill] sm:$0xff] }
 0x173   : > { %23470 = vst [vmem:[#allocation124_spill] sm:$0xff] %v17412_v23  ;;  %23471 = vst [vmem:[#allocation125_spill] sm:$0xff] %v17415_v18  ;;  %v1923_v12 = vrot.slane %v1909_v9, %v23420_v63  ;;  %v1764_v31 = vrot.slane %v1756_v5, %v23420_v63  ;;  %v1771_v11 = vrot.slane %v1757_v43, %v23420_v63  ;;  %v23478_v9 = vld [vmem:[#allocation28_spill] sm:$0xff]  ;;  %v23479_v43 = vld [vmem:[#allocation70_spill] sm:$0xff] }
 0x174   : > { %23472 = vst [vmem:[#allocation126_spill] sm:$0xff] %v17418_v44  ;;  %23473 = vst [vmem:[#allocation127_spill] sm:$0xff] %v17426_v28  ;;  %v1780_v45 = vrot.slane %v1772_v57, %v23420_v63  ;;  %v1787_v56 = vrot.slane %v1773_v17, %v23420_v63  ;;  %v15416_v26 = vcombine.low %v1900_v4, %v1907_v30  ;;  %v23493_v23 = vld [vmem:[#allocation71_spill] sm:$0xff] }
 0x175   : > { %23474 = vst [vmem:[#allocation128_spill] sm:$0xff] %v17429_v10  ;;  %23475 = vst [vmem:[#allocation129_spill] sm:$0xff] %v17433_v39  ;;  %v15418_v47 = vcombine.high %v1900_v4, %v1907_v30  ;;  %v2116_v2 = vcombine.low %v23478_v9, %v23477_v7  ;;  %v17446_v39 = vld [vmem:[%s16247_s24 + $0x28] sm:$0xff]  ;;  %v2117_v17 = vcombine.high %v23478_v9, %v23477_v7  ;;  %v17459_v30 = vld [vmem:[%s16247_s24 + $0x20] sm:$0xff]  ;;  %v17467_v52 = vpop.permute.xlu1 %518  ;;  %v17469_v7 = vpop.permute.xlu0 %516 }
 0x176   : > { %23476 = vst [vmem:[#allocation130_spill] sm:$0xff] %v17435_v34  ;;  %694 = vrot.lane.b32.xlu1 %v17446_v39, %s23221_s30  ;;  %v1980_v4 = vcombine.low %v23480_v38, %v23479_v43  ;;  %692 = vrot.lane.b32.xlu0 %v17459_v30, %s23221_s30  ;;  %v15420_v24 = vcombine.low %v1916_v25, %v1923_v12  ;;  %23481 = vst [vmem:[#allocation69_spill] sm:$0xff] %v17467_v52  ;;  %v17528_v10 = vld [vmem:[%s16247_s24 + $0x48] sm:$0xff]  ;;  %v17537_v28 = vld [vmem:[%s16247_s24 + $0x40] sm:$0xff] }
 0x177   : > { %v15422_v5 = vcombine.high %v1916_v25, %v1923_v12  ;;  %v1981_v57 = vcombine.high %v23480_v38, %v23479_v43  ;;  %23482 = vst [vmem:[#allocation28_spill] sm:$0xff] %v17469_v7  ;;  %v15408_v9 = vcombine.low %v1764_v31, %v1771_v11  ;;  %v15410_v32 = vcombine.high %v1764_v31, %v1771_v11  ;;  %v17481_v38 = vld [vmem:[%s16247_s24 + $0x38] sm:$0xff] }
 0x178   : > { %v15412_v20 = vcombine.low %v1780_v45, %v1787_v56  ;;  %v15414_v46 = vcombine.high %v1780_v45, %v1787_v56  ;;  %v17474_v40 = vrot.slane %v15416_v26, %v16745_v33  ;;  %v17477_v25 = vrot.slane %v15418_v47, %v16745_v33  ;;  %v17492_v56 = vld [vmem:[%s16247_s24 + $0x30] sm:$0xff] }
 0x179   : > { %v2124_v12 = vrot.slane %v2116_v2, %v16745_v33  ;;  %v2131_v31 = vrot.slane %v2117_v17, %v16745_v33  ;;  %v1988_v26 = vrot.slane %v1980_v4, %v16745_v33  ;;  %v17499_v47 = vrot.slane %v15420_v24, %v16745_v33  ;;  %v17505_v17 = vpop.permute.xlu1 %522  ;;  %v17507_v4 = vpop.permute.xlu0 %520 }
 0x17a   : > { %23483 = vst [vmem:[#allocation70_spill] sm:$0xff] %v17474_v40  ;;  %23484 = vst [vmem:[#allocation29_spill] sm:$0xff] %v17477_v25  ;;  %698 = vrot.lane.b32.xlu1 %v17481_v38, %s23221_s30  ;;  %696 = vrot.lane.b32.xlu0 %v17492_v56, %s23221_s30  ;;  %v17502_v43 = vrot.slane %v15422_v5, %v16745_v33  ;;  %v1995_v34 = vrot.slane %v1981_v57, %v16745_v33 }
 0x17b   : > { %23485 = vst [vmem:[#allocation131_spill] sm:$0xff] %v17499_v47  ;;  %23487 = vst [vmem:[#allocation133_spill] sm:$0xff] %v17505_v17  ;;  %v17510_v45 = vrot.slane %v15408_v9, %v16745_v33  ;;  %v17513_v11 = vrot.slane %v15410_v32, %v16745_v33  ;;  %v17516_v2 = vrot.slane %v15412_v20, %v16745_v33  ;;  %v23513_v17 = vld [vmem:[#allocation77_spill] sm:$0xff] }
 0x17c   : > { %23486 = vst [vmem:[#allocation132_spill] sm:$0xff] %v17502_v43  ;;  %23488 = vst [vmem:[#allocation134_spill] sm:$0xff] %v17507_v4  ;;  %v17519_v24 = vrot.slane %v15414_v46, %v16745_v33  ;;  %v2164_v57 = vcombine.low %v16886_v59, %v2124_v12  ;;  %v2165_v53 = vcombine.high %v16886_v59, %v2124_v12  ;;  %v23497_v4 = vld [vmem:[#allocation72_spill] sm:$0xff]  ;;  %v23498_v59 = vld [vmem:[#allocation31_spill] sm:$0xff] }
 0x17d   : > { %23489 = vst [vmem:[#allocation135_spill] sm:$0xff] %v17510_v45  ;;  %23490 = vst [vmem:[#allocation136_spill] sm:$0xff] %v17513_v11  ;;  %v2388_v9 = vcombine.low %v23494_v21, %v23493_v23  ;;  %v2180_v20 = vcombine.low %v16889_v50, %v2131_v31  ;;  %v2181_v46 = vcombine.high %v16889_v50, %v2131_v31  ;;  %v17547_v31 = vpop.permute.xlu1 %526  ;;  %v17596_v45 = vld [vmem:[%s16247_s24 + $0x68] sm:$0xff]  ;;  %v17601_v43 = vld [vmem:[%s16247_s24 + $0x60] sm:$0xff] }
 0x17e   : > { %23491 = vst [vmem:[#allocation137_spill] sm:$0xff] %v17516_v2  ;;  %23492 = vst [vmem:[#allocation138_spill] sm:$0xff] %v17519_v24  ;;  %702 = vrot.lane.b32.xlu1 %v17528_v10, %s23221_s30  ;;  %v2028_v32 = vcombine.low %v16892_v60, %v1988_v26  ;;  %v2029_v5 = vcombine.high %v16892_v60, %v1988_v26  ;;  %700 = vrot.lane.b32.xlu0 %v17537_v28, %s23221_s30  ;;  %v17549_v60 = vpop.permute.xlu0 %524 }
 0x17f   : > { %v2044_v12 = vcombine.low %v16895_v3, %v1995_v34  ;;  %v2045_v44 = vcombine.high %v16895_v3, %v1995_v34  ;;  %v2389_v50 = vcombine.high %v23494_v21, %v23493_v23  ;;  %23495 = vst [vmem:[#allocation71_spill] sm:$0xff] %v17547_v31  ;;  %23496 = vst [vmem:[#allocation30_spill] sm:$0xff] %v17549_v60  ;;  %v17565_v60 = vld [vmem:[%s16247_s24 + $0x58] sm:$0xff]  ;;  %v17574_v21 = vld [vmem:[%s16247_s24 + $0x50] sm:$0xff] }
 0x180   : > { %v2252_v25 = vcombine.low %v23498_v59, %v23497_v4  ;;  %v2253_v3 = vcombine.high %v23498_v59, %v23497_v4  ;;  %v2172_v23 = vrot.slane %v2164_v57, %v23420_v63  ;;  %v2179_v34 = vrot.slane %v2165_v53, %v23420_v63 }
 0x181   : > { %v2396_v40 = vrot.slane %v2388_v9, %v16745_v33  ;;  %v2188_v18 = vrot.slane %v2180_v20, %v23420_v63  ;;  %v2195_v26 = vrot.slane %v2181_v46, %v23420_v63  ;;  %v2036_v4 = vrot.slane %v2028_v32, %v23420_v63  ;;  %v17583_v46 = vpop.permute.xlu1 %530 }
 0x182   : > { %706 = vrot.lane.b32.xlu1 %v17565_v60, %s23221_s30  ;;  %v2043_v59 = vrot.slane %v2029_v5, %v23420_v63  ;;  %704 = vrot.lane.b32.xlu0 %v17574_v21, %s23221_s30  ;;  %v2052_v57 = vrot.slane %v2044_v12, %v23420_v63  ;;  %v2059_v9 = vrot.slane %v2045_v44, %v23420_v63  ;;  %v17585_v32 = vpop.permute.xlu0 %528 }
 0x183   : > { %v2403_v20 = vrot.slane %v2389_v50, %v16745_v33  ;;  %23499 = vst [vmem:[#allocation72_spill] sm:$0xff] %v17583_v46  ;;  %23500 = vst [vmem:[#allocation31_spill] sm:$0xff] %v17585_v32  ;;  %v2260_v47 = vrot.slane %v2252_v25, %v16745_v33  ;;  %v2267_v53 = vrot.slane %v2253_v3, %v16745_v33 }
 0x184   : > { %v15432_v12 = vcombine.low %v2172_v23, %v2179_v34  ;;  %v15434_v11 = vcombine.high %v2172_v23, %v2179_v34  ;;  %v2436_v44 = vcombine.low %v16900_v49, %v2396_v40  ;;  %v2437_v50 = vcombine.high %v16900_v49, %v2396_v40 }
 0x185   : > { %v15436_v32 = vcombine.low %v2188_v18, %v2195_v26  ;;  %v15438_v5 = vcombine.high %v2188_v18, %v2195_v26  ;;  %v15424_v46 = vcombine.low %v2036_v4, %v2043_v59  ;;  %v15426_v31 = vcombine.high %v2036_v4, %v2043_v59  ;;  %v17607_v40 = vpop.permute.xlu1 %534 }
 0x186   : > { %710 = vrot.lane.b32.xlu1 %v17596_v45, %s23221_s30  ;;  %708 = vrot.lane.b32.xlu0 %v17601_v43, %s23221_s30  ;;  %v15428_v25 = vcombine.low %v2052_v57, %v2059_v9  ;;  %v15430_v3 = vcombine.high %v2052_v57, %v2059_v9  ;;  %v2452_v23 = vcombine.low %v16903_v48, %v2403_v20  ;;  %v17609_v34 = vpop.permute.xlu0 %532 }
 0x187   : > { %v2453_v49 = vcombine.high %v16903_v48, %v2403_v20  ;;  %23501 = vst [vmem:[#allocation139_spill] sm:$0xff] %v17607_v40  ;;  %23502 = vst [vmem:[#allocation140_spill] sm:$0xff] %v17609_v34  ;;  %v2300_v18 = vcombine.low %v16906_v37, %v2260_v47  ;;  %v2301_v26 = vcombine.high %v16906_v37, %v2260_v47  ;;  %v17624_v20 = vld [vmem:[%s16247_s24 + $0x78] sm:$0xff] }
 0x188   : > { %v2316_v4 = vcombine.low %v16909_v61, %v2267_v53  ;;  %v2317_v59 = vcombine.high %v16909_v61, %v2267_v53  ;;  %v17616_v24 = vrot.slane %v15432_v12, %v16745_v33  ;;  %v17619_v57 = vrot.slane %v15434_v11, %v16745_v33  ;;  %v17641_v53 = vld [vmem:[%s16247_s24 + $0x70] sm:$0xff] }
 0x189   : > { %v2444_v48 = vrot.slane %v2436_v44, %v23420_v63  ;;  %v2451_v9 = vrot.slane %v2437_v50, %v23420_v63  ;;  %v17629_v37 = vrot.slane %v15436_v32, %v16745_v33  ;;  %v17632_v61 = vrot.slane %v15438_v5, %v16745_v33  ;;  %v17653_v44 = vpop.permute.xlu1 %538 }
 0x18a   : > { %23503 = vst [vmem:[#allocation141_spill] sm:$0xff] %v17616_v24  ;;  %23504 = vst [vmem:[#allocation142_spill] sm:$0xff] %v17619_v57  ;;  %714 = vrot.lane.b32.xlu1 %v17624_v20, %s23221_s30  ;;  %v17635_v47 = vrot.slane %v15424_v46, %v16745_v33  ;;  %v17638_v11 = vrot.slane %v15426_v31, %v16745_v33  ;;  %712 = vrot.lane.b32.xlu0 %v17641_v53, %s23221_s30  ;;  %v17655_v31 = vpop.permute.xlu0 %536 }
 0x18b   : > { %23505 = vst [vmem:[#allocation143_spill] sm:$0xff] %v17629_v37  ;;  %23506 = vst [vmem:[#allocation144_spill] sm:$0xff] %v17632_v61  ;;  %v17646_v12 = vrot.slane %v15428_v25, %v16745_v33  ;;  %v17649_v32 = vrot.slane %v15430_v3, %v16745_v33  ;;  %v2460_v5 = vrot.slane %v2452_v23, %v23420_v63  ;;  %v23516_v3 = vld [vmem:[#allocation33_spill] sm:$0xff]  ;;  %v23529_v61 = vld [vmem:[#allocation34_spill] sm:$0xff] }
 0x18c   : > { %23507 = vst [vmem:[#allocation145_spill] sm:$0xff] %v17635_v47  ;;  %23508 = vst [vmem:[#allocation146_spill] sm:$0xff] %v17638_v11  ;;  %v2467_v46 = vrot.slane %v2453_v49, %v23420_v63  ;;  %v2308_v50 = vrot.slane %v2300_v18, %v23420_v63  ;;  %v2315_v2 = vrot.slane %v2301_v26, %v23420_v63  ;;  %v23514_v49 = vld [vmem:[#allocation32_spill] sm:$0xff] }
 0x18d   : > { %23509 = vst [vmem:[#allocation147_spill] sm:$0xff] %v17646_v12  ;;  %23510 = vst [vmem:[#allocation148_spill] sm:$0xff] %v17649_v32  ;;  %v2324_v34 = vrot.slane %v2316_v4, %v23420_v63  ;;  %v2331_v25 = vrot.slane %v2317_v59, %v23420_v63  ;;  %v15448_v40 = vcombine.low %v2444_v48, %v2451_v9  ;;  %v23515_v59 = vld [vmem:[#allocation78_spill] sm:$0xff]  ;;  %v17687_v57 = vpop.permute.xlu1 %542  ;;  %v17748_v37 = vld [vmem:[%s16247_s24 + $0xa8] sm:$0xff] }
 0x18e   : > { %23511 = vst [vmem:[#allocation149_spill] sm:$0xff] %v17653_v44  ;;  %23512 = vst [vmem:[#allocation150_spill] sm:$0xff] %v17655_v31  ;;  %v15450_v23 = vcombine.high %v2444_v48, %v2451_v9  ;;  %v2660_v7 = vcombine.low %v23514_v49, %v23513_v17  ;;  %v17666_v44 = vld [vmem:[%s16247_s24 + $0x88] sm:$0xff]  ;;  %v2661_v4 = vcombine.high %v23514_v49, %v23513_v17  ;;  %v17679_v9 = vld [vmem:[%s16247_s24 + $0x80] sm:$0xff]  ;;  %v17689_v17 = vpop.permute.xlu0 %540 }
 0x18f   : > { %718 = vrot.lane.b32.xlu1 %v17666_v44, %s23221_s30  ;;  %v2524_v48 = vcombine.low %v23516_v3, %v23515_v59  ;;  %716 = vrot.lane.b32.xlu0 %v17679_v9, %s23221_s30  ;;  %v15452_v52 = vcombine.low %v2460_v5, %v2467_v46  ;;  %v15454_v18 = vcombine.high %v2460_v5, %v2467_v46  ;;  %v17757_v12 = vld [vmem:[%s16247_s24 + $0xa0] sm:$0xff] }
 0x190   : > { %v2525_v26 = vcombine.high %v23516_v3, %v23515_v59  ;;  %23517 = vst [vmem:[#allocation77_spill] sm:$0xff] %v17687_v57  ;;  %23518 = vst [vmem:[#allocation32_spill] sm:$0xff] %v17689_v17  ;;  %v15440_v49 = vcombine.low %v2308_v50, %v2315_v2  ;;  %v15442_v24 = vcombine.high %v2308_v50, %v2315_v2  ;;  %v17701_v3 = vld [vmem:[%s16247_s24 + $0x98] sm:$0xff] }
 0x191   : > { %v15444_v22 = vcombine.low %v2324_v34, %v2331_v25  ;;  %v15446_v54 = vcombine.high %v2324_v34, %v2331_v25  ;;  %v17694_v35 = vrot.slane %v15448_v40, %v16745_v33  ;;  %v17697_v5 = vrot.slane %v15450_v23, %v16745_v33  ;;  %v17712_v25 = vld [vmem:[%s16247_s24 + $0x90] sm:$0xff] }
 0x192   : > { %v2668_v46 = vrot.slane %v2660_v7, %v16745_v33  ;;  %v2675_v50 = vrot.slane %v2661_v4, %v16745_v33  ;;  %v2532_v40 = vrot.slane %v2524_v48, %v16745_v33  ;;  %v17719_v23 = vrot.slane %v15452_v52, %v16745_v33  ;;  %v17725_v4 = vpop.permute.xlu1 %546  ;;  %v17727_v48 = vpop.permute.xlu0 %544 }
 0x193   : > { %23519 = vst [vmem:[#allocation78_spill] sm:$0xff] %v17694_v35  ;;  %23520 = vst [vmem:[#allocation33_spill] sm:$0xff] %v17697_v5  ;;  %722 = vrot.lane.b32.xlu1 %v17701_v3, %s23221_s30  ;;  %720 = vrot.lane.b32.xlu0 %v17712_v25, %s23221_s30  ;;  %v17722_v59 = vrot.slane %v15454_v18, %v16745_v33  ;;  %v2539_v31 = vrot.slane %v2525_v26, %v16745_v33 }
 0x194   : > { %23521 = vst [vmem:[#allocation151_spill] sm:$0xff] %v17719_v23  ;;  %23523 = vst [vmem:[#allocation153_spill] sm:$0xff] %v17725_v4  ;;  %v17730_v34 = vrot.slane %v15440_v49, %v16745_v33  ;;  %v17733_v2 = vrot.slane %v15442_v24, %v16745_v33  ;;  %v17736_v7 = vrot.slane %v15444_v22, %v16745_v33  ;;  %v23530_v24 = vld [vmem:[#allocation79_spill] sm:$0xff] }
 0x195   : > { %23522 = vst [vmem:[#allocation152_spill] sm:$0xff] %v17722_v59  ;;  %23524 = vst [vmem:[#allocation154_spill] sm:$0xff] %v17727_v48  ;;  %v17739_v52 = vrot.slane %v15446_v54, %v16745_v33  ;;  %v2708_v26 = vcombine.low %v16914_v36, %v2668_v46  ;;  %v2709_v14 = vcombine.high %v16914_v36, %v2668_v46  ;;  %v23531_v46 = vld [vmem:[#allocation80_spill] sm:$0xff]  ;;  %v23533_v48 = vld [vmem:[#allocation81_spill] sm:$0xff] }
 0x196   : > { %23525 = vst [vmem:[#allocation155_spill] sm:$0xff] %v17730_v34  ;;  %23526 = vst [vmem:[#allocation156_spill] sm:$0xff] %v17733_v2  ;;  %v2932_v49 = vcombine.low %v23529_v61, %v16925_v1  ;;  %v2724_v22 = vcombine.low %v16917_v6, %v2675_v50  ;;  %v2725_v54 = vcombine.high %v16917_v6, %v2675_v50  ;;  %v17767_v50 = vpop.permute.xlu1 %550  ;;  %v23534_v4 = vld [vmem:[#allocation35_spill] sm:$0xff]  ;;  %v17777_v5 = vpop.permute.xlu0 %548 }
 0x197   : > { %23527 = vst [vmem:[#allocation157_spill] sm:$0xff] %v17736_v7  ;;  %23528 = vst [vmem:[#allocation158_spill] sm:$0xff] %v17739_v52  ;;  %726 = vrot.lane.b32.xlu1 %v17748_v37, %s23221_s30  ;;  %v2572_v32 = vcombine.low %v23530_v24, %v2532_v40  ;;  %v2573_v18 = vcombine.high %v23530_v24, %v2532_v40  ;;  %724 = vrot.lane.b32.xlu0 %v17757_v12, %s23221_s30  ;;  %v17785_v40 = vld [vmem:[%s16247_s24 + $0xb8] sm:$0xff] }
 0x198   : > { %v2588_v11 = vcombine.low %v23531_v46, %v2539_v31  ;;  %v2589_v47 = vcombine.high %v23531_v46, %v2539_v31  ;;  %v2933_v6 = vcombine.high %v23529_v61, %v16925_v1  ;;  %23532 = vst [vmem:[#allocation34_spill] sm:$0xff] %v17767_v50  ;;  %v2796_v17 = vcombine.low %v23534_v4, %v23533_v48  ;;  %v17794_v1 = vld [vmem:[%s16247_s24 + $0xb0] sm:$0xff] }
 0x199   : > { %v2797_v36 = vcombine.high %v23534_v4, %v23533_v48  ;;  %23535 = vst [vmem:[#allocation79_spill] sm:$0xff] %v17777_v5  ;;  %v2716_v61 = vrot.slane %v2708_v26, %v23420_v63  ;;  %v2723_v31 = vrot.slane %v2709_v14, %v23420_v63  ;;  %v2940_v46 = vrot.slane %v2932_v49, %v16745_v33 }
 0x19a   : > { %v2732_v24 = vrot.slane %v2724_v22, %v23420_v63  ;;  %v2739_v4 = vrot.slane %v2725_v54, %v23420_v63  ;;  %v2580_v48 = vrot.slane %v2572_v32, %v23420_v63  ;;  %v2587_v59 = vrot.slane %v2573_v18, %v23420_v63  ;;  %v17803_v54 = vpop.permute.xlu1 %554  ;;  %v17811_v14 = vpop.permute.xlu0 %552 }
 0x19b   : > { %730 = vrot.lane.b32.xlu1 %v17785_v40, %s23221_s30  ;;  %728 = vrot.lane.b32.xlu0 %v17794_v1, %s23221_s30  ;;  %v2596_v26 = vrot.slane %v2588_v11, %v23420_v63  ;;  %v2603_v49 = vrot.slane %v2589_v47, %v23420_v63  ;;  %v2947_v22 = vrot.slane %v2933_v6, %v16745_v33  ;;  %v23538_v47 = vld [vmem:[#allocation82_spill] sm:$0xff] }
 0x19c   : > { %23536 = vst [vmem:[#allocation80_spill] sm:$0xff] %v17803_v54  ;;  %v2804_v23 = vrot.slane %v2796_v17, %v16745_v33  ;;  %v2811_v35 = vrot.slane %v2797_v36, %v16745_v33  ;;  %23537 = vst [vmem:[#allocation81_spill] sm:$0xff] %v17811_v14  ;;  %v15464_v11 = vcombine.low %v2716_v61, %v2723_v31  ;;  %v17816_v54 = vld [vmem:[%s16247_s24 + $0xc8] sm:$0xff]  ;;  %v17821_v17 = vld [vmem:[%s16247_s24 + $0xc0] sm:$0xff] }
 0x19d   : > { %v15466_v2 = vcombine.high %v2716_v61, %v2723_v31  ;;  %v2980_v34 = vcombine.low %v23538_v47, %v2940_v46  ;;  %v2981_v6 = vcombine.high %v23538_v47, %v2940_v46  ;;  %v15468_v32 = vcombine.low %v2732_v24, %v2739_v4  ;;  %v23539_v31 = vld [vmem:[#allocation83_spill] sm:$0xff]  ;;  %v23541_v14 = vld [vmem:[#allocation84_spill] sm:$0xff] }
 0x19e   : > { %v15470_v5 = vcombine.high %v2732_v24, %v2739_v4  ;;  %v15456_v18 = vcombine.low %v2580_v48, %v2587_v59  ;;  %v15458_v52 = vcombine.high %v2580_v48, %v2587_v59  ;;  %v15460_v36 = vcombine.low %v2596_v26, %v2603_v49  ;;  %v17827_v47 = vpop.permute.xlu1 %590  ;;  %v23542_v59 = vld [vmem:[#allocation85_spill] sm:$0xff]  ;;  %v17833_v57 = vpop.permute.xlu0 %588 }
 0x19f   : > { %734 = vrot.lane.b32.xlu1 %v17816_v54, %s23221_s30  ;;  %732 = vrot.lane.b32.xlu0 %v17821_v17, %s23221_s30  ;;  %v15462_v61 = vcombine.high %v2596_v26, %v2603_v49  ;;  %v2996_v7 = vcombine.low %v23539_v31, %v2947_v22  ;;  %v2997_v46 = vcombine.high %v23539_v31, %v2947_v22  ;;  %v17844_v31 = vld [vmem:[%s16247_s24 + $0xd8] sm:$0xff] }
 0x1a0   : > { %23540 = vst [vmem:[#allocation35_spill] sm:$0xff] %v17827_v47  ;;  %v2844_v50 = vcombine.low %v23541_v14, %v2804_v23  ;;  %v2845_v24 = vcombine.high %v23541_v14, %v2804_v23  ;;  %v2860_v4 = vcombine.low %v23542_v59, %v2811_v35  ;;  %v2861_v48 = vcombine.high %v23542_v59, %v2811_v35 }
 0x1a1   : > { %23543 = vst [vmem:[#allocation82_spill] sm:$0xff] %v17833_v57  ;;  %v17836_v62 = vrot.slane %v15464_v11, %v16745_v33  ;;  %v17839_v26 = vrot.slane %v15466_v2, %v16745_v33  ;;  %v2988_v49 = vrot.slane %v2980_v34, %v23420_v63  ;;  %v2995_v22 = vrot.slane %v2981_v6, %v23420_v63  ;;  %v17861_v34 = vld [vmem:[%s16247_s24 + $0xd0] sm:$0xff] }
 0x1a2   : > { %23546 = vst [vmem:[#allocation85_spill] sm:$0xff] %v17844_v31  ;;  %v17849_v23 = vrot.slane %v15468_v32, %v16745_v33  ;;  %v17852_v35 = vrot.slane %v15470_v5, %v16745_v33  ;;  %v17855_v14 = vrot.slane %v15456_v18, %v16745_v33  ;;  %v17858_v2 = vrot.slane %v15458_v52, %v16745_v33  ;;  %v17873_v6 = vpop.permute.xlu1 %594 }
 0x1a3   : > { %23544 = vst [vmem:[#allocation83_spill] sm:$0xff] %v17836_v62  ;;  %23545 = vst [vmem:[#allocation84_spill] sm:$0xff] %v17839_v26  ;;  %738 = vrot.lane.b32.xlu1 %v17844_v31, %s23221_s30  ;;  %736 = vrot.lane.b32.xlu0 %v17861_v34, %s23221_s30  ;;  %v17866_v11 = vrot.slane %v15460_v36, %v16745_v33  ;;  %v17869_v32 = vrot.slane %v15462_v61, %v16745_v33  ;;  %v17879_v36 = vpop.permute.xlu0 %592  ;;  %v23560_v61 = vld [vmem:[#allocation37_spill] sm:$0xff] }
 0x1a4   : > { %23547 = vst [vmem:[#allocation159_spill] sm:$0xff] %v17849_v23  ;;  %23548 = vst [vmem:[#allocation160_spill] sm:$0xff] %v17852_v35  ;;  %v3004_v5 = vrot.slane %v2996_v7, %v23420_v63  ;;  %v3011_v18 = vrot.slane %v2997_v46, %v23420_v63  ;;  %v2852_v52 = vrot.slane %v2844_v50, %v23420_v63  ;;  %v23557_v46 = vld [vmem:[#allocation36_spill] sm:$0xff]  ;;  %v23574_v23 = vld [vmem:[#allocation38_spill] sm:$0xff] }
 0x1a5   : > { %23549 = vst [vmem:[#allocation161_spill] sm:$0xff] %v17855_v14  ;;  %23550 = vst [vmem:[#allocation162_spill] sm:$0xff] %v17858_v2  ;;  %v2859_v59 = vrot.slane %v2845_v24, %v23420_v63  ;;  %v2868_v57 = vrot.slane %v2860_v4, %v23420_v63  ;;  %v2875_v47 = vrot.slane %v2861_v48, %v23420_v63  ;;  %v23559_v48 = vld [vmem:[#allocation87_spill] sm:$0xff] }
 0x1a6   : > { %23551 = vst [vmem:[#allocation163_spill] sm:$0xff] %v17861_v34  ;;  %23552 = vst [vmem:[#allocation164_spill] sm:$0xff] %v17866_v11  ;;  %v15480_v19 = vcombine.low %v2988_v49, %v2995_v22  ;;  %v15482_v7 = vcombine.high %v2988_v49, %v2995_v22  ;;  %v3204_v0 = vcombine.low %v23557_v46, %v23556_v51  ;;  %v17899_v22 = vld [vmem:[%s16247_s24 + $0xe0] sm:$0xff]  ;;  %v17907_v26 = vpop.permute.xlu1 %598  ;;  %v23576_v11 = vld [vmem:[#allocation90_spill] sm:$0xff] }
 0x1a7   : > { %23553 = vst [vmem:[#allocation165_spill] sm:$0xff] %v17869_v32  ;;  %23554 = vst [vmem:[#allocation166_spill] sm:$0xff] %v17873_v6  ;;  %v17886_v6 = vld [vmem:[%s16247_s24 + $0xe8] sm:$0xff]  ;;  %v3205_v4 = vcombine.high %v23557_v46, %v23556_v51  ;;  %v3068_v49 = vcombine.low %v23560_v61, %v23559_v48  ;;  %740 = vrot.lane.b32.xlu0 %v17899_v22, %s23221_s30  ;;  %v15486_v50 = vcombine.high %v3004_v5, %v3011_v18  ;;  %v17909_v31 = vpop.permute.xlu0 %596 }
 0x1a8   : > { %23555 = vst [vmem:[#allocation167_spill] sm:$0xff] %v17879_v36  ;;  %23558 = vst [vmem:[#allocation86_spill] sm:$0xff] %v17886_v6  ;;  %742 = vrot.lane.b32.xlu1 %v17886_v6, %s23221_s30  ;;  %v15484_v6 = vcombine.low %v3004_v5, %v3011_v18  ;;  %v3069_v24 = vcombine.high %v23560_v61, %v23559_v48  ;;  %v15472_v51 = vcombine.low %v2852_v52, %v2859_v59  ;;  %v17921_v61 = vld [vmem:[%s16247_s24 + $0xf8] sm:$0xff] }
 0x1a9   : > { %23561 = vst [vmem:[#allocation36_spill] sm:$0xff] %v17899_v22  ;;  %v15474_v46 = vcombine.high %v2852_v52, %v2859_v59  ;;  %v15476_v62 = vcombine.low %v2868_v57, %v2875_v47  ;;  %v15478_v34 = vcombine.high %v2868_v57, %v2875_v47  ;;  %v17914_v13 = vrot.slane %v15480_v19, %v16745_v33  ;;  %v17932_v59 = vld [vmem:[%s16247_s24 + $0xf0] sm:$0xff]  ;;  %s23012_s24 = smov 24  }
 0x1aa   : > { %v17917_v5 = vrot.slane %v15482_v7, %v16745_v33  ;;  %v3212_v18 = vrot.slane %v3204_v0, %v16745_v33  ;;  %v3219_v52 = vrot.slane %v3205_v4, %v16745_v33  ;;  %v3076_v19 = vrot.slane %v3068_v49, %v16745_v33  ;;  %v17945_v47 = vpop.permute.xlu1 %602 }
 0x1ab   : > { %23562 = vst [vmem:[#allocation87_spill] sm:$0xff] %v17914_v13  ;;  %744 = vrot.lane.b32.xlu0 %v17932_v59, %s23221_s30  ;;  %v17939_v7 = vrot.slane %v15484_v6, %v16745_v33  ;;  %v17942_v48 = vrot.slane %v15486_v50, %v16745_v33  ;;  %v3083_v36 = vrot.slane %v3069_v24, %v16745_v33  ;;  %23566 = vst [vmem:[#allocation170_spill] sm:$0xff] %v17945_v47  ;;  %v17959_v6 = vpop.permute.xlu0 %600  ;;  %v23572_v24 = vld [vmem:[#allocation88_spill] sm:$0xff] }
 0x1ac   : > { %23563 = vst [vmem:[#allocation37_spill] sm:$0xff] %v17917_v5  ;;  %746 = vrot.lane.b32.xlu1 %v17921_v61, %s23221_s30  ;;  %v17948_v4 = vrot.slane %v15472_v51, %v16745_v33  ;;  %v17951_v49 = vrot.slane %v15474_v46, %v16745_v33  ;;  %v17954_v57 = vrot.slane %v15476_v62, %v16745_v33  ;;  %23571 = vst [vmem:[#allocation175_spill] sm:$0xff] %v17959_v6  ;;  %v23573_v51 = vld [vmem:[#allocation100_spill] sm:$0xff]  ;;  %v23575_v62 = vld [vmem:[#allocation89_spill] sm:$0xff] }
 0x1ad   : > { %23564 = vst [vmem:[#allocation168_spill] sm:$0xff] %v17939_v7  ;;  %23565 = vst [vmem:[#allocation169_spill] sm:$0xff] %v17942_v48  ;;  %v17957_v0 = vrot.slane %v15478_v34, %v16745_v33  ;;  %v3252_v22 = vcombine.low %v23572_v24, %v3212_v18  ;;  %v3253_v35 = vcombine.high %v23572_v24, %v3212_v18  ;;  %v23577_v24 = vld [vmem:[#allocation91_spill] sm:$0xff]  ;;  %v23582_v48 = vld [vmem:[#allocation92_spill] sm:$0xff] }
 0x1ae   : > { %23567 = vst [vmem:[#allocation171_spill] sm:$0xff] %v17948_v4  ;;  %23568 = vst [vmem:[#allocation172_spill] sm:$0xff] %v17951_v49  ;;  %v3476_v32 = vcombine.low %v23574_v23, %v23573_v51  ;;  %v3268_v46 = vcombine.low %v23575_v62, %v3219_v52  ;;  %v3269_v34 = vcombine.high %v23575_v62, %v3219_v52  ;;  %v17981_v47 = vpop.permute.xlu1 %606 }
 0x1af   : > { %23569 = vst [vmem:[#allocation173_spill] sm:$0xff] %v17954_v57  ;;  %23570 = vst [vmem:[#allocation174_spill] sm:$0xff] %v17957_v0  ;;  %v3116_v2 = vcombine.low %v23576_v11, %v3076_v19  ;;  %v3117_v14 = vcombine.high %v23576_v11, %v3076_v19  ;;  %780 = vrot.lane.b32.xlu0 %v17381_v41, %s23225_s2  ;;  %v3132_v50 = vcombine.low %v23577_v24, %v3083_v36  ;;  %v23578_v19 = vld [vmem:[#allocation101_spill] sm:$0xff]  ;;  %v23579_v41 = vld [vmem:[#allocation39_spill] sm:$0xff]  ;;  %v17991_v5 = vpop.permute.xlu0 %604 }
 0x1b0   : > { %782 = vrot.lane.b32.xlu1 %v17376_v16, %s23225_s2  ;;  %v3133_v6 = vcombine.high %v23577_v24, %v3083_v36  ;;  %v3477_v16 = vcombine.high %v23574_v23, %v23573_v51  ;;  %v3340_v62 = vcombine.low %v23579_v41, %v23578_v19  ;;  %v3341_v18 = vcombine.high %v23579_v41, %v23578_v19  ;;  %v23585_v57 = vld [vmem:[#allocation94_spill] sm:$0xff] }
 0x1b1   : > { %v3260_v23 = vrot.slane %v3252_v22, %v23420_v63  ;;  %v3267_v51 = vrot.slane %v3253_v35, %v23420_v63  ;;  %v3484_v24 = vrot.slane %v3476_v32, %v16745_v33  ;;  %v3276_v11 = vrot.slane %v3268_v46, %v23420_v63 }
 0x1b2   : > { %v3283_v52 = vrot.slane %v3269_v34, %v23420_v63  ;;  %v3124_v19 = vrot.slane %v3116_v2, %v23420_v63  ;;  %v3131_v41 = vrot.slane %v3117_v14, %v23420_v63  ;;  %v3140_v35 = vrot.slane %v3132_v50, %v23420_v63  ;;  %v18011_v36 = vpop.permute.xlu1 %610  ;;  %v23583_v14 = vld [vmem:[#allocation93_spill] sm:$0xff] }
 0x1b3   : > { %784 = vrot.lane.b32.xlu0 %v17421_v27, %s23225_s2  ;;  %v3147_v32 = vrot.slane %v3133_v6, %v23420_v63  ;;  %23580 = vst [vmem:[#allocation88_spill] sm:$0xff] %v18011_v36  ;;  %v3348_v2 = vrot.slane %v3340_v62, %v16745_v33  ;;  %v3355_v27 = vrot.slane %v3341_v18, %v16745_v33  ;;  %v18019_v34 = vpop.permute.xlu0 %608 }
 0x1b4   : > { %786 = vrot.lane.b32.xlu1 %v17404_v29, %s23225_s2  ;;  %v3491_v29 = vrot.slane %v3477_v16, %v16745_v33  ;;  %23581 = vst [vmem:[#allocation100_spill] sm:$0xff] %v18019_v34  ;;  %v15496_v22 = vcombine.low %v3260_v23, %v3267_v51  ;;  %v15498_v50 = vcombine.high %v3260_v23, %v3267_v51 }
 0x1b5   : > { %v3524_v6 = vcombine.low %v23582_v48, %v3484_v24  ;;  %v3525_v16 = vcombine.high %v23582_v48, %v3484_v24  ;;  %v15500_v7 = vcombine.low %v3276_v11, %v3283_v52  ;;  %v15502_v46 = vcombine.high %v3276_v11, %v3283_v52 }
 0x1b6   : > { %v15488_v13 = vcombine.low %v3124_v19, %v3131_v41  ;;  %v15490_v49 = vcombine.high %v3124_v19, %v3131_v41  ;;  %v15492_v62 = vcombine.low %v3140_v35, %v3147_v32  ;;  %v15494_v18 = vcombine.high %v3140_v35, %v3147_v32  ;;  %v18029_v51 = vpop.permute.xlu1 %614 }
 0x1b7   : > { %788 = vrot.lane.b32.xlu0 %v17459_v30, %s23225_s2  ;;  %v3540_v0 = vcombine.low %v23583_v14, %v3491_v29  ;;  %v3541_v23 = vcombine.high %v23583_v14, %v3491_v29  ;;  %23584 = vst [vmem:[#allocation38_spill] sm:$0xff] %v18029_v51  ;;  %v3388_v48 = vcombine.low %v23585_v57, %v3348_v2  ;;  %v18035_v11 = vpop.permute.xlu0 %612 }
 0x1b8   : > { %790 = vrot.lane.b32.xlu1 %v17446_v39, %s23225_s2  ;;  %v3389_v24 = vcombine.high %v23585_v57, %v3348_v2  ;;  %v23586_v39 = vld [vmem:[#allocation95_spill] sm:$0xff]  ;;  %23587 = vst [vmem:[#allocation89_spill] sm:$0xff] %v18035_v11  ;;  %v18038_v30 = vrot.slane %v15496_v22, %v16745_v33  ;;  %v18041_v19 = vrot.slane %v15498_v50, %v16745_v33 }
 0x1b9   : > { %v3404_v4 = vcombine.low %v23586_v39, %v3355_v27  ;;  %v3405_v52 = vcombine.high %v23586_v39, %v3355_v27  ;;  %v3532_v41 = vrot.slane %v3524_v6, %v23420_v63  ;;  %v3539_v35 = vrot.slane %v3525_v16, %v23420_v63  ;;  %v23600_v39 = vld [vmem:[#allocation15_spill] sm:$0xff] }
 0x1ba   : > { %23588 = vst [vmem:[#allocation90_spill] sm:$0xff] %v18038_v30  ;;  %23589 = vst [vmem:[#allocation91_spill] sm:$0xff] %v18041_v19  ;;  %v18048_v57 = vrot.slane %v15500_v7, %v16745_v33  ;;  %v18051_v32 = vrot.slane %v15502_v46, %v16745_v33  ;;  %v18054_v29 = vrot.slane %v15488_v13, %v16745_v33  ;;  %v18069_v2 = vpop.permute.xlu1 %618 }
 0x1bb   : > { %v18057_v22 = vrot.slane %v15490_v49, %v16745_v33  ;;  %792 = vrot.lane.b32.xlu0 %v17492_v56, %s23225_s2  ;;  %v18062_v14 = vrot.slane %v15492_v62, %v16745_v33  ;;  %v3548_v7 = vrot.slane %v3540_v0, %v23420_v63  ;;  %v3555_v46 = vrot.slane %v3541_v23, %v23420_v63  ;;  %v18075_v50 = vpop.permute.xlu0 %616  ;;  %v23598_v0 = vld [vmem:[#allocation52_spill] sm:$0xff] }
 0x1bc   : > { %794 = vrot.lane.b32.xlu1 %v17481_v38, %s23225_s2  ;;  %23590 = vst [vmem:[#allocation101_spill] sm:$0xff] %v18048_v57  ;;  %23591 = vst [vmem:[#allocation39_spill] sm:$0xff] %v18051_v32  ;;  %v18065_v38 = vrot.slane %v15494_v18, %v16745_v33  ;;  %v3396_v13 = vrot.slane %v3388_v48, %v23420_v63  ;;  %v3403_v49 = vrot.slane %v3389_v24, %v23420_v63  ;;  %v23599_v18 = vld [vmem:[#allocation40_spill] sm:$0xff] }
 0x1bd   : > { %23592 = vst [vmem:[#allocation92_spill] sm:$0xff] %v18054_v29  ;;  %23593 = vst [vmem:[#allocation93_spill] sm:$0xff] %v18057_v22  ;;  %v3412_v27 = vrot.slane %v3404_v4, %v23420_v63  ;;  %v3419_v56 = vrot.slane %v3405_v52, %v23420_v63  ;;  %v15512_v16 = vcombine.low %v3532_v41, %v3539_v35  ;;  %v23601_v52 = vld [vmem:[#allocation41_spill] sm:$0xff]  ;;  %v23700_v29 = vld [vmem:[#allocation19_spill] sm:$0xff] }
 0x1be   : > { %23594 = vst [vmem:[#allocation94_spill] sm:$0xff] %v18062_v14  ;;  %23595 = vst [vmem:[#allocation95_spill] sm:$0xff] %v18065_v38  ;;  %v15514_v62 = vcombine.high %v3532_v41, %v3539_v35  ;;  %v3748_v23 = vcombine.low %v23599_v18, %v23598_v0  ;;  %v3749_v24 = vcombine.high %v23599_v18, %v23598_v0  ;;  %v18097_v19 = vpop.permute.xlu1 %622 }
 0x1bf   : > { %23596 = vst [vmem:[#allocation176_spill] sm:$0xff] %v18069_v2  ;;  %23597 = vst [vmem:[#allocation177_spill] sm:$0xff] %v18075_v50  ;;  %v3612_v6 = vcombine.low %v23601_v52, %v23600_v39  ;;  %796 = vrot.lane.b32.xlu0 %v17537_v28, %s23225_s2  ;;  %v15516_v35 = vcombine.low %v3548_v7, %v3555_v46  ;;  %v3613_v48 = vcombine.high %v23601_v52, %v23600_v39  ;;  %v18099_v18 = vpop.permute.xlu0 %620 }
 0x1c0   : > { %798 = vrot.lane.b32.xlu1 %v17528_v10, %s23225_s2  ;;  %v15518_v10 = vcombine.high %v3548_v7, %v3555_v46  ;;  %23602 = vst [vmem:[#allocation52_spill] sm:$0xff] %v18097_v19  ;;  %v15504_v4 = vcombine.low %v3396_v13, %v3403_v49  ;;  %v15506_v30 = vcombine.high %v3396_v13, %v3403_v49  ;;  %23603 = vst [vmem:[#allocation40_spill] sm:$0xff] %v18099_v18  ;;  %v23617_v46 = vld [vmem:[#allocation98_spill] sm:$0xff] }
 0x1c1   : > { %v15508_v50 = vcombine.low %v3412_v27, %v3419_v56  ;;  %v15510_v0 = vcombine.high %v3412_v27, %v3419_v56  ;;  %v18104_v28 = vrot.slane %v15512_v16, %v16745_v33  ;;  %v18107_v41 = vrot.slane %v15514_v62, %v16745_v33 }
 0x1c2   : > { %v3756_v7 = vrot.slane %v3748_v23, %v16745_v33  ;;  %v3763_v49 = vrot.slane %v3749_v24, %v16745_v33  ;;  %v3620_v27 = vrot.slane %v3612_v6, %v16745_v33  ;;  %v18123_v16 = vrot.slane %v15516_v35, %v16745_v33  ;;  %v18129_v23 = vpop.permute.xlu1 %626 }
 0x1c3   : > { %23604 = vst [vmem:[#allocation15_spill] sm:$0xff] %v18104_v28  ;;  %23605 = vst [vmem:[#allocation41_spill] sm:$0xff] %v18107_v41  ;;  %800 = vrot.lane.b32.xlu0 %v17574_v21, %s23225_s2  ;;  %v3627_v62 = vrot.slane %v3613_v48, %v16745_v33  ;;  %v18132_v24 = vrot.slane %v15504_v4, %v16745_v33  ;;  %v18135_v6 = vrot.slane %v15506_v30, %v16745_v33  ;;  %v18143_v52 = vpop.permute.xlu0 %624  ;;  %v23614_v48 = vld [vmem:[#allocation96_spill] sm:$0xff]  ;;  %v23615_v4 = vld [vmem:[#allocation42_spill] sm:$0xff] }
 0x1c4   : > { %802 = vrot.lane.b32.xlu1 %v17565_v60, %s23225_s2  ;;  %23606 = vst [vmem:[#allocation178_spill] sm:$0xff] %v18123_v16  ;;  %v18126_v60 = vrot.slane %v15518_v10, %v16745_v33  ;;  %23608 = vst [vmem:[#allocation180_spill] sm:$0xff] %v18129_v23  ;;  %v18138_v21 = vrot.slane %v15508_v50, %v16745_v33  ;;  %v18141_v39 = vrot.slane %v15510_v0, %v16745_v33  ;;  %v23616_v30 = vld [vmem:[#allocation97_spill] sm:$0xff] }
 0x1c5   : > { %23609 = vst [vmem:[#allocation181_spill] sm:$0xff] %v18132_v24  ;;  %23610 = vst [vmem:[#allocation182_spill] sm:$0xff] %v18135_v6  ;;  %v3796_v10 = vcombine.low %v23614_v48, %v3756_v7  ;;  %v3797_v56 = vcombine.high %v23614_v48, %v3756_v7  ;;  %v4020_v13 = vcombine.low %v23615_v4, %v17109_v8  ;;  %v23618_v48 = vld [vmem:[#allocation99_spill] sm:$0xff]  ;;  %v23680_v24 = vld [vmem:[#allocation49_spill] sm:$0xff] }
 0x1c6   : > { %23607 = vst [vmem:[#allocation179_spill] sm:$0xff] %v18126_v60  ;;  %23611 = vst [vmem:[#allocation183_spill] sm:$0xff] %v18138_v21  ;;  %v3812_v50 = vcombine.low %v23616_v30, %v3763_v49  ;;  %v3813_v0 = vcombine.high %v23616_v30, %v3763_v49  ;;  %v3660_v2 = vcombine.low %v23617_v46, %v3620_v27  ;;  %v18165_v38 = vpop.permute.xlu1 %630  ;;  %v23624_v60 = vld [vmem:[#allocation102_spill] sm:$0xff]  ;;  %v23627_v21 = vld [vmem:[#allocation104_spill] sm:$0xff] }
 0x1c7   : > { %23612 = vst [vmem:[#allocation184_spill] sm:$0xff] %v18141_v39  ;;  %23613 = vst [vmem:[#allocation185_spill] sm:$0xff] %v18143_v52  ;;  %v3661_v32 = vcombine.high %v23617_v46, %v3620_v27  ;;  %804 = vrot.lane.b32.xlu0 %v17601_v43, %s23225_s2  ;;  %v3676_v35 = vcombine.low %v23618_v48, %v3627_v62  ;;  %v3677_v57 = vcombine.high %v23618_v48, %v3627_v62  ;;  %v23620_v43 = vld [vmem:[#allocation43_spill] sm:$0xff]  ;;  %v18175_v7 = vpop.permute.xlu0 %628  ;;  %v23750_v23 = vld [vmem:[#allocation121_spill] sm:$0xff] }
 0x1c8   : > { %806 = vrot.lane.b32.xlu1 %v17596_v45, %s23225_s2  ;;  %v4021_v45 = vcombine.high %v23615_v4, %v17109_v8  ;;  %23619 = vst [vmem:[#allocation96_spill] sm:$0xff] %v18165_v38  ;;  %v3884_v27 = vcombine.low %v23620_v43, %v17111_v55  ;;  %v3885_v30 = vcombine.high %v23620_v43, %v17111_v55  ;;  %23621 = vst [vmem:[#allocation42_spill] sm:$0xff] %v18175_v7 }
 0x1c9   : > { %v3804_v8 = vrot.slane %v3796_v10, %v23420_v63  ;;  %v3811_v4 = vrot.slane %v3797_v56, %v23420_v63  ;;  %v4028_v48 = vrot.slane %v4020_v13, %v16745_v33  ;;  %v3820_v46 = vrot.slane %v3812_v50, %v23420_v63 }
 0x1ca   : > { %v3827_v49 = vrot.slane %v3813_v0, %v23420_v63  ;;  %v3668_v55 = vrot.slane %v3660_v2, %v23420_v63  ;;  %v3675_v43 = vrot.slane %v3661_v32, %v23420_v63  ;;  %v3684_v56 = vrot.slane %v3676_v35, %v23420_v63  ;;  %v18195_v62 = vpop.permute.xlu1 %634  ;;  %v23625_v32 = vld [vmem:[#allocation103_spill] sm:$0xff] }
 0x1cb   : > { %808 = vrot.lane.b32.xlu0 %v17641_v53, %s23225_s2  ;;  %v3691_v13 = vrot.slane %v3677_v57, %v23420_v63  ;;  %23622 = vst [vmem:[#allocation97_spill] sm:$0xff] %v18195_v62  ;;  %v3892_v2 = vrot.slane %v3884_v27, %v16745_v33  ;;  %v3899_v53 = vrot.slane %v3885_v30, %v16745_v33  ;;  %v18203_v0 = vpop.permute.xlu0 %632 }
 0x1cc   : > { %810 = vrot.lane.b32.xlu1 %v17624_v20, %s23225_s2  ;;  %v4035_v20 = vrot.slane %v4021_v45, %v16745_v33  ;;  %23623 = vst [vmem:[#allocation98_spill] sm:$0xff] %v18203_v0  ;;  %v15528_v10 = vcombine.low %v3804_v8, %v3811_v4  ;;  %v15530_v35 = vcombine.high %v3804_v8, %v3811_v4 }
 0x1cd   : > { %v4068_v57 = vcombine.low %v23624_v60, %v4028_v48  ;;  %v4069_v45 = vcombine.high %v23624_v60, %v4028_v48  ;;  %v15532_v16 = vcombine.low %v3820_v46, %v3827_v49  ;;  %v15534_v50 = vcombine.high %v3820_v46, %v3827_v49 }
 0x1ce   : > { %v15520_v41 = vcombine.low %v3668_v55, %v3675_v43  ;;  %v15522_v28 = vcombine.high %v3668_v55, %v3675_v43  ;;  %v15524_v27 = vcombine.low %v3684_v56, %v3691_v13  ;;  %v15526_v30 = vcombine.high %v3684_v56, %v3691_v13  ;;  %v18213_v4 = vpop.permute.xlu1 %638 }
 0x1cf   : > { %812 = vrot.lane.b32.xlu0 %v17679_v9, %s23225_s2  ;;  %v4084_v39 = vcombine.low %v23625_v32, %v4035_v20  ;;  %v4085_v8 = vcombine.high %v23625_v32, %v4035_v20  ;;  %23626 = vst [vmem:[#allocation99_spill] sm:$0xff] %v18213_v4  ;;  %v3932_v60 = vcombine.low %v23627_v21, %v3892_v2  ;;  %v18219_v46 = vpop.permute.xlu0 %636 }
 0x1d0   : > { %814 = vrot.lane.b32.xlu1 %v17666_v44, %s23225_s2  ;;  %v3933_v48 = vcombine.high %v23627_v21, %v3892_v2  ;;  %v23628_v44 = vld [vmem:[#allocation105_spill] sm:$0xff]  ;;  %23629 = vst [vmem:[#allocation43_spill] sm:$0xff] %v18219_v46  ;;  %v18222_v9 = vrot.slane %v15528_v10, %v16745_v33  ;;  %v18225_v55 = vrot.slane %v15530_v35, %v16745_v33  ;;  %v23739_v46 = vld [vmem:[#allocation67_spill] sm:$0xff] }
 0x1d1   : > { %v3948_v6 = vcombine.low %v23628_v44, %v3899_v53  ;;  %v3949_v49 = vcombine.high %v23628_v44, %v3899_v53  ;;  %v4076_v43 = vrot.slane %v4068_v57, %v23420_v63  ;;  %v4083_v56 = vrot.slane %v4069_v45, %v23420_v63 }
 0x1d2   : > { %23630 = vst [vmem:[#allocation102_spill] sm:$0xff] %v18222_v9  ;;  %23631 = vst [vmem:[#allocation103_spill] sm:$0xff] %v18225_v55  ;;  %v18232_v21 = vrot.slane %v15532_v16, %v16745_v33  ;;  %v18235_v13 = vrot.slane %v15534_v50, %v16745_v33  ;;  %v18238_v20 = vrot.slane %v15520_v41, %v16745_v33  ;;  %v18253_v2 = vpop.permute.xlu1 %642 }
 0x1d3   : > { %v18241_v10 = vrot.slane %v15522_v28, %v16745_v33  ;;  %816 = vrot.lane.b32.xlu0 %v17712_v25, %s23225_s2  ;;  %v18246_v32 = vrot.slane %v15524_v27, %v16745_v33  ;;  %v4092_v16 = vrot.slane %v4084_v39, %v23420_v63  ;;  %v4099_v50 = vrot.slane %v4085_v8, %v23420_v63  ;;  %v18259_v35 = vpop.permute.xlu0 %640  ;;  %v23640_v39 = vld [vmem:[#allocation44_spill] sm:$0xff] }
 0x1d4   : > { %818 = vrot.lane.b32.xlu1 %v17701_v3, %s23225_s2  ;;  %23632 = vst [vmem:[#allocation104_spill] sm:$0xff] %v18232_v21  ;;  %23633 = vst [vmem:[#allocation105_spill] sm:$0xff] %v18235_v13  ;;  %v18249_v3 = vrot.slane %v15526_v30, %v16745_v33  ;;  %v3940_v41 = vrot.slane %v3932_v60, %v23420_v63  ;;  %v3947_v28 = vrot.slane %v3933_v48, %v23420_v63  ;;  %v23658_v21 = vld [vmem:[#allocation54_spill] sm:$0xff] }
 0x1d5   : > { %23634 = vst [vmem:[#allocation186_spill] sm:$0xff] %v18238_v20  ;;  %23635 = vst [vmem:[#allocation187_spill] sm:$0xff] %v18241_v10  ;;  %v3956_v53 = vrot.slane %v3948_v6, %v23420_v63  ;;  %v3963_v25 = vrot.slane %v3949_v49, %v23420_v63  ;;  %v15544_v45 = vcombine.low %v4076_v43, %v4083_v56 }
 0x1d6   : > { %23636 = vst [vmem:[#allocation188_spill] sm:$0xff] %v18246_v32  ;;  %23637 = vst [vmem:[#allocation189_spill] sm:$0xff] %v18249_v3  ;;  %v15546_v27 = vcombine.high %v4076_v43, %v4083_v56  ;;  %v4292_v30 = vcombine.low %v23640_v39, %v17145_v15  ;;  %v4293_v48 = vcombine.high %v23640_v39, %v17145_v15  ;;  %v23641_v43 = vld [vmem:[#allocation45_spill] sm:$0xff]  ;;  %v18281_v8 = vpop.permute.xlu1 %646 }
 0x1d7   : > { %23638 = vst [vmem:[#allocation190_spill] sm:$0xff] %v18253_v2  ;;  %23639 = vst [vmem:[#allocation191_spill] sm:$0xff] %v18259_v35  ;;  %820 = vrot.lane.b32.xlu0 %v17757_v12, %s23225_s2  ;;  %v15548_v44 = vcombine.low %v4092_v16, %v4099_v50  ;;  %v15550_v49 = vcombine.high %v4092_v16, %v4099_v50  ;;  %v4157_v56 = vcombine.high %v23641_v43, %v17147_v58  ;;  %v18283_v13 = vpop.permute.xlu0 %644  ;;  %v23665_v32 = vld [vmem:[#allocation61_spill] sm:$0xff]  ;;  %v23710_v2 = vld [vmem:[#allocation110_spill] sm:$0xff] }
 0x1d8   : > { %822 = vrot.lane.b32.xlu1 %v17748_v37, %s23225_s2  ;;  %v4156_v37 = vcombine.low %v23641_v43, %v17147_v58  ;;  %23642 = vst [vmem:[#allocation44_spill] sm:$0xff] %v18281_v8  ;;  %v15536_v6 = vcombine.low %v3940_v41, %v3947_v28  ;;  %v15538_v57 = vcombine.high %v3940_v41, %v3947_v28  ;;  %23643 = vst [vmem:[#allocation45_spill] sm:$0xff] %v18283_v13 }
 0x1d9   : > { %v15540_v55 = vcombine.low %v3956_v53, %v3963_v25  ;;  %v15542_v60 = vcombine.high %v3956_v53, %v3963_v25  ;;  %v18288_v12 = vrot.slane %v15544_v45, %v16745_v33  ;;  %v18291_v16 = vrot.slane %v15546_v27, %v16745_v33 }
 0x1da   : > { %v4300_v50 = vrot.slane %v4292_v30, %v16745_v33  ;;  %v4307_v53 = vrot.slane %v4293_v48, %v16745_v33  ;;  %v18306_v25 = vrot.slane %v15548_v44, %v16745_v33  ;;  %v18309_v45 = vrot.slane %v15550_v49, %v16745_v33  ;;  %v18313_v39 = vpop.permute.xlu1 %650 }
 0x1db   : > { %23644 = vst [vmem:[#allocation192_spill] sm:$0xff] %v18288_v12  ;;  %23645 = vst [vmem:[#allocation193_spill] sm:$0xff] %v18291_v16  ;;  %824 = vrot.lane.b32.xlu0 %v17794_v1, %s23225_s2  ;;  %v4171_v27 = vrot.slane %v4157_v56, %v16745_v33  ;;  %v18316_v30 = vrot.slane %v15536_v6, %v16745_v33  ;;  %v18319_v48 = vrot.slane %v15538_v57, %v16745_v33  ;;  %v18327_v49 = vpop.permute.xlu0 %648  ;;  %v23655_v6 = vld [vmem:[#allocation46_spill] sm:$0xff]  ;;  %v23656_v57 = vld [vmem:[#allocation60_spill] sm:$0xff] }
 0x1dc   : > { %826 = vrot.lane.b32.xlu1 %v17785_v40, %s23225_s2  ;;  %23646 = vst [vmem:[#allocation194_spill] sm:$0xff] %v18306_v25  ;;  %23647 = vst [vmem:[#allocation195_spill] sm:$0xff] %v18309_v45  ;;  %v4164_v40 = vrot.slane %v4156_v37, %v16745_v33  ;;  %v18322_v1 = vrot.slane %v15540_v55, %v16745_v33  ;;  %v18325_v44 = vrot.slane %v15542_v60, %v16745_v33  ;;  %v23654_v37 = vld [vmem:[#allocation53_spill] sm:$0xff]  ;;  %v23663_v12 = vld [vmem:[#allocation16_spill] sm:$0xff] }
 0x1dd   : > { %23648 = vst [vmem:[#allocation196_spill] sm:$0xff] %v18313_v39  ;;  %23649 = vst [vmem:[#allocation197_spill] sm:$0xff] %v18316_v30  ;;  %v4340_v56 = vcombine.low %v23654_v37, %v4300_v50  ;;  %v4341_v28 = vcombine.high %v23654_v37, %v4300_v50  ;;  %v4564_v41 = vcombine.low %v23655_v6, %v17177_v42  ;;  %v23657_v50 = vld [vmem:[#allocation23_spill] sm:$0xff]  ;;  %v23661_v55 = vld [vmem:[#allocation85_spill] sm:$0xff] }
 0x1de   : > { %23650 = vst [vmem:[#allocation198_spill] sm:$0xff] %v18319_v48  ;;  %23651 = vst [vmem:[#allocation199_spill] sm:$0xff] %v18322_v1  ;;  %v4356_v60 = vcombine.low %v23656_v57, %v4307_v53  ;;  %v4357_v58 = vcombine.high %v23656_v57, %v4307_v53  ;;  %v4565_v43 = vcombine.high %v23655_v6, %v17177_v42  ;;  %v18349_v3 = vpop.permute.xlu1 %686  ;;  %v23659_v42 = vld [vmem:[#allocation22_spill] sm:$0xff]  ;;  %v23660_v6 = vld [vmem:[#allocation47_spill] sm:$0xff] }
 0x1df   : > { %23652 = vst [vmem:[#allocation200_spill] sm:$0xff] %v18325_v44  ;;  %23653 = vst [vmem:[#allocation201_spill] sm:$0xff] %v18327_v49  ;;  %828 = vrot.lane.b32.xlu0 %v17821_v17, %s23225_s2  ;;  %v4204_v37 = vcombine.low %v23657_v50, %v4164_v40  ;;  %v4205_v15 = vcombine.high %v23657_v50, %v4164_v40  ;;  %v4220_v9 = vcombine.low %v23658_v21, %v4171_v27  ;;  %v18359_v16 = vpop.permute.xlu0 %684  ;;  %v23662_v40 = vld [vmem:[#allocation163_spill] sm:$0xff]  ;;  %v23667_v1 = vld [vmem:[#allocation21_spill] sm:$0xff] }
 0x1e0   : > { %830 = vrot.lane.b32.xlu1 %v17816_v54, %s23225_s2  ;;  %v4221_v54 = vcombine.high %v23658_v21, %v4171_v27  ;;  %v4428_v57 = vcombine.low %v23660_v6, %v23659_v42  ;;  %v4429_v17 = vcombine.high %v23660_v6, %v23659_v42  ;;  %v4348_v21 = vrot.slane %v4340_v56, %v23420_v63 }
 0x1e1   : > { %v4355_v27 = vrot.slane %v4341_v28, %v23420_v63  ;;  %v4572_v50 = vrot.slane %v4564_v41, %v16745_v33  ;;  %v4364_v45 = vrot.slane %v4356_v60, %v23420_v63  ;;  %v4371_v42 = vrot.slane %v4357_v58, %v23420_v63 }
 0x1e2   : > { %v4579_v6 = vrot.slane %v4565_v43, %v16745_v33  ;;  %v4212_v56 = vrot.slane %v4204_v37, %v23420_v63  ;;  %v4219_v28 = vrot.slane %v4205_v15, %v23420_v63  ;;  %v4228_v41 = vrot.slane %v4220_v9, %v23420_v63  ;;  %v18379_v25 = vpop.permute.xlu1 %690 }
 0x1e3   : > { %832 = vrot.lane.b32.xlu0 %v23662_v40, %s23225_s2  ;;  %v4436_v43 = vrot.slane %v4428_v57, %v16745_v33  ;;  %v4443_v40 = vrot.slane %v4429_v17, %v16745_v33  ;;  %v15560_v53 = vcombine.low %v4348_v21, %v4355_v27  ;;  %v15562_v37 = vcombine.high %v4348_v21, %v4355_v27  ;;  %v18393_v58 = vpop.permute.xlu0 %688  ;;  %v23666_v57 = vld [vmem:[#allocation36_spill] sm:$0xff] }
 0x1e4   : > { %834 = vrot.lane.b32.xlu1 %v23661_v55, %s23225_s2  ;;  %v4235_v55 = vrot.slane %v4221_v54, %v23420_v63  ;;  %v4612_v15 = vcombine.low %v23663_v12, %v4572_v50  ;;  %v4613_v9 = vcombine.high %v23663_v12, %v4572_v50  ;;  %v23664_v54 = vld [vmem:[#allocation86_spill] sm:$0xff]  ;;  %v15564_v48 = vcombine.low %v4364_v45, %v4371_v42 }
 0x1e5   : > { %v15566_v30 = vcombine.high %v4364_v45, %v4371_v42  ;;  %v4628_v60 = vcombine.low %v23665_v32, %v4579_v6  ;;  %v4629_v10 = vcombine.high %v23665_v32, %v4579_v6  ;;  %v15552_v17 = vcombine.low %v4212_v56, %v4219_v28 }
 0x1e6   : > { %v15554_v21 = vcombine.high %v4212_v56, %v4219_v28  ;;  %v15556_v27 = vcombine.low %v4228_v41, %v4235_v55  ;;  %v15558_v44 = vcombine.high %v4228_v41, %v4235_v55  ;;  %v4476_v12 = vcombine.low %v23667_v1, %v4436_v43 }
 0x1e7   : > { %836 = vrot.lane.b32.xlu0 %v23666_v57, %s23225_s2  ;;  %v4477_v50 = vcombine.high %v23667_v1, %v4436_v43  ;;  %v18402_v42 = vrot.slane %v15560_v53, %v16745_v33  ;;  %v18405_v32 = vrot.slane %v15562_v37, %v16745_v33  ;;  %v4620_v6 = vrot.slane %v4612_v15, %v23420_v63  ;;  %v23679_v15 = vld [vmem:[#allocation20_spill] sm:$0xff] }
 0x1e8   : > { %838 = vrot.lane.b32.xlu1 %v23664_v54, %s23225_s2  ;;  %v23668_v54 = vld [vmem:[#allocation55_spill] sm:$0xff]  ;;  %v4627_v56 = vrot.slane %v4613_v9, %v23420_v63  ;;  %v18409_v28 = vpop.permute.xlu1 %694  ;;  %v18414_v1 = vrot.slane %v15564_v48, %v16745_v33  ;;  %v18417_v41 = vrot.slane %v15566_v30, %v16745_v33  ;;  %v4636_v53 = vrot.slane %v4628_v60, %v23420_v63  ;;  %v18439_v37 = vpop.permute.xlu0 %692 }
 0x1e9   : > { %v4492_v20 = vcombine.low %v23668_v54, %v4443_v40  ;;  %v4493_v45 = vcombine.high %v23668_v54, %v4443_v40  ;;  %23669 = vst [vmem:[#allocation53_spill] sm:$0xff] %v18402_v42  ;;  %23670 = vst [vmem:[#allocation46_spill] sm:$0xff] %v18405_v32  ;;  %v4643_v55 = vrot.slane %v4629_v10, %v23420_v63 }
 0x1ea   : > { %23671 = vst [vmem:[#allocation60_spill] sm:$0xff] %v18414_v1  ;;  %23672 = vst [vmem:[#allocation23_spill] sm:$0xff] %v18417_v41  ;;  %v18424_v43 = vrot.slane %v15552_v17, %v16745_v33  ;;  %v18427_v40 = vrot.slane %v15554_v21, %v16745_v33  ;;  %v18433_v48 = vrot.slane %v15558_v44, %v16745_v33  ;;  %v23677_v17 = vld [vmem:[#allocation63_spill] sm:$0xff]  ;;  %v23678_v21 = vld [vmem:[#allocation48_spill] sm:$0xff] }
 0x1eb   : > { %840 = vrot.lane.b32.xlu0 %v17932_v59, %s23225_s2  ;;  %v4484_v30 = vrot.slane %v4476_v12, %v23420_v63  ;;  %v4491_v60 = vrot.slane %v4477_v50, %v23420_v63  ;;  %v4500_v10 = vrot.slane %v4492_v20, %v23420_v63  ;;  %v4507_v59 = vrot.slane %v4493_v45, %v23420_v63  ;;  %v23692_v1 = vld [vmem:[#allocation114_spill] sm:$0xff] }
 0x1ec   : > { %842 = vrot.lane.b32.xlu1 %v17921_v61, %s23225_s2  ;;  %23673 = vst [vmem:[#allocation54_spill] sm:$0xff] %v18424_v43  ;;  %23674 = vst [vmem:[#allocation22_spill] sm:$0xff] %v18427_v40  ;;  %v18430_v61 = vrot.slane %v15556_v27, %v16745_v33  ;;  %v15576_v9 = vcombine.low %v4620_v6, %v4627_v56  ;;  %v15578_v57 = vcombine.high %v4620_v6, %v4627_v56  ;;  %v18457_v49 = vpop.permute.xlu1 %698 }
 0x1ed   : > { %23676 = vst [vmem:[#allocation85_spill] sm:$0xff] %v18433_v48  ;;  %v4836_v27 = vcombine.low %v23678_v21, %v23677_v17  ;;  %v15580_v50 = vcombine.low %v4636_v53, %v4643_v55  ;;  %v15582_v20 = vcombine.high %v4636_v53, %v4643_v55  ;;  %v4837_v45 = vcombine.high %v23678_v21, %v23677_v17  ;;  %v23691_v53 = vld [vmem:[#allocation50_spill] sm:$0xff] }
 0x1ee   : > { %23675 = vst [vmem:[#allocation47_spill] sm:$0xff] %v18430_v61  ;;  %v4700_v6 = vcombine.low %v23680_v24, %v23679_v15  ;;  %v4701_v56 = vcombine.high %v23680_v24, %v23679_v15  ;;  %v15568_v44 = vcombine.low %v4484_v30, %v4491_v60  ;;  %v15570_v32 = vcombine.high %v4484_v30, %v4491_v60 }
 0x1ef   : > { %v15572_v42 = vcombine.low %v4500_v10, %v4507_v59  ;;  %v15574_v12 = vcombine.high %v4500_v10, %v4507_v59  ;;  %v18462_v55 = vrot.slane %v15576_v9, %v16745_v33  ;;  %v18465_v17 = vrot.slane %v15578_v57, %v16745_v33  ;;  %v18478_v10 = vpop.permute.xlu0 %696  ;;  %v23693_v59 = vld [vmem:[#allocation51_spill] sm:$0xff] }
 0x1f0   : > { %v4844_v21 = vrot.slane %v4836_v27, %v16745_v33  ;;  %v18473_v30 = vrot.slane %v15580_v50, %v16745_v33  ;;  %v18476_v60 = vrot.slane %v15582_v20, %v16745_v33  ;;  %v4851_v9 = vrot.slane %v4837_v45, %v16745_v33  ;;  %v23689_v45 = vld [vmem:[#allocation17_spill] sm:$0xff]  ;;  %v18503_v41 = vpop.permute.xlu1 %702 }
 0x1f1   : > { %23681 = vst [vmem:[#allocation163_spill] sm:$0xff] %v18462_v55  ;;  %23682 = vst [vmem:[#allocation16_spill] sm:$0xff] %v18465_v17  ;;  %v4708_v57 = vrot.slane %v4700_v6, %v16745_v33  ;;  %v4715_v27 = vrot.slane %v4701_v56, %v16745_v33  ;;  %v18486_v54 = vrot.slane %v15568_v44, %v16745_v33  ;;  %v23690_v56 = vld [vmem:[#allocation113_spill] sm:$0xff]  ;;  %v23696_v55 = vld [vmem:[#allocation18_spill] sm:$0xff] }
 0x1f2   : > { %23683 = vst [vmem:[#allocation86_spill] sm:$0xff] %v18473_v30  ;;  %23684 = vst [vmem:[#allocation61_spill] sm:$0xff] %v18476_v60  ;;  %v18489_v50 = vrot.slane %v15570_v32, %v16745_v33  ;;  %v18492_v20 = vrot.slane %v15572_v42, %v16745_v33  ;;  %v18495_v15 = vrot.slane %v15574_v12, %v16745_v33  ;;  %v23695_v32 = vld [vmem:[#allocation57_spill] sm:$0xff] }
 0x1f3   : > { %23685 = vst [vmem:[#allocation36_spill] sm:$0xff] %v18486_v54  ;;  %v4884_v24 = vcombine.low %v23689_v45, %v4844_v21  ;;  %v4885_v6 = vcombine.high %v23689_v45, %v4844_v21  ;;  %v5108_v44 = vcombine.low %v23691_v53, %v23690_v56  ;;  %v5109_v12 = vcombine.high %v23691_v53, %v23690_v56  ;;  %v23694_v45 = vld [vmem:[#allocation56_spill] sm:$0xff]  ;;  %v18523_v56 = vpop.permute.xlu0 %700 }
 0x1f4   : > { %23686 = vst [vmem:[#allocation21_spill] sm:$0xff] %v18489_v50  ;;  %23687 = vst [vmem:[#allocation55_spill] sm:$0xff] %v18492_v20  ;;  %v4972_v48 = vcombine.low %v23693_v59, %v23692_v1  ;;  %v4900_v61 = vcombine.low %v23694_v45, %v4851_v9  ;;  %v4901_v40 = vcombine.high %v23694_v45, %v4851_v9  ;;  %v23697_v50 = vld [vmem:[#allocation58_spill] sm:$0xff]  ;;  %v23699_v20 = vld [vmem:[#allocation59_spill] sm:$0xff] }
 0x1f5   : > { %23688 = vst [vmem:[#allocation63_spill] sm:$0xff] %v18495_v15  ;;  %v4973_v43 = vcombine.high %v23693_v59, %v23692_v1  ;;  %v4748_v17 = vcombine.low %v23695_v32, %v4708_v57  ;;  %v4749_v42 = vcombine.high %v23695_v32, %v4708_v57  ;;  %v4764_v14 = vcombine.low %v23696_v55, %v4715_v27  ;;  %v23698_v15 = vld [vmem:[#allocation62_spill] sm:$0xff] }
 0x1f6   : > { %v4765_v53 = vcombine.high %v23696_v55, %v4715_v27  ;;  %v4892_v60 = vrot.slane %v4884_v24, %v23420_v63  ;;  %v4899_v9 = vrot.slane %v4885_v6, %v23420_v63  ;;  %v5116_v45 = vrot.slane %v5108_v44, %v16745_v33  ;;  %v18541_v44 = vpop.permute.xlu1 %706 }
 0x1f7   : > { %v5123_v57 = vrot.slane %v5109_v12, %v16745_v33  ;;  %v4980_v55 = vrot.slane %v4972_v48, %v16745_v33  ;;  %v4908_v32 = vrot.slane %v4900_v61, %v23420_v63  ;;  %v4915_v24 = vrot.slane %v4901_v40, %v23420_v63  ;;  %v18553_v22 = vpop.permute.xlu0 %704 }
 0x1f8   : > { %v4987_v6 = vrot.slane %v4973_v43, %v16745_v33  ;;  %v4756_v1 = vrot.slane %v4748_v17, %v23420_v63  ;;  %v4763_v21 = vrot.slane %v4749_v42, %v23420_v63  ;;  %v4772_v59 = vrot.slane %v4764_v14, %v23420_v63 }
 0x1f9   : > { %v4779_v12 = vrot.slane %v4765_v53, %v23420_v63  ;;  %v15592_v48 = vcombine.low %v4892_v60, %v4899_v9  ;;  %v15594_v30 = vcombine.high %v4892_v60, %v4899_v9  ;;  %v5156_v27 = vcombine.low %v23697_v50, %v5116_v45 }
 0x1fa   : > { %v5157_v61 = vcombine.high %v23697_v50, %v5116_v45  ;;  %v5172_v40 = vcombine.low %v23698_v15, %v5123_v57  ;;  %v5173_v43 = vcombine.high %v23698_v15, %v5123_v57  ;;  %v5020_v54 = vcombine.low %v23699_v20, %v4980_v55 }
 0x1fb   : > { %v5021_v17 = vcombine.high %v23699_v20, %v4980_v55  ;;  %v15596_v42 = vcombine.low %v4908_v32, %v4915_v24  ;;  %v15598_v14 = vcombine.high %v4908_v32, %v4915_v24  ;;  %v5036_v53 = vcombine.low %v23700_v29, %v4987_v6  ;;  %v18565_v55 = vpop.permute.xlu1 %710 }
 0x1fc   : > { %v5037_v60 = vcombine.high %v23700_v29, %v4987_v6  ;;  %v15584_v9 = vcombine.low %v4756_v1, %v4763_v21  ;;  %v15586_v39 = vcombine.high %v4756_v1, %v4763_v21  ;;  %v15588_v13 = vcombine.low %v4772_v59, %v4779_v12 }
 0x1fd   : > { %v15590_v50 = vcombine.high %v4772_v59, %v4779_v12  ;;  %v18558_v45 = vrot.slane %v15592_v48, %v16745_v33  ;;  %v18561_v15 = vrot.slane %v15594_v30, %v16745_v33  ;;  %v5164_v20 = vrot.slane %v5156_v27, %v23420_v63 }
 0x1fe   : > { %v5171_v57 = vrot.slane %v5157_v61, %v23420_v63  ;;  %v5180_v32 = vrot.slane %v5172_v40, %v23420_v63  ;;  %v5187_v29 = vrot.slane %v5173_v43, %v23420_v63  ;;  %v5028_v21 = vrot.slane %v5020_v54, %v23420_v63  ;;  %v18591_v61 = vpop.permute.xlu0 %708  ;;  %v23709_v40 = vld [vmem:[#allocation109_spill] sm:$0xff] }
 0x1ff   : > { %23701 = vst [vmem:[#allocation48_spill] sm:$0xff] %v18558_v45  ;;  %23702 = vst [vmem:[#allocation20_spill] sm:$0xff] %v18561_v15  ;;  %v5035_v1 = vrot.slane %v5021_v17, %v23420_v63  ;;  %v18572_v59 = vrot.slane %v15596_v42, %v16745_v33  ;;  %v18575_v30 = vrot.slane %v15598_v14, %v16745_v33  ;;  %v18601_v35 = vpop.permute.xlu1 %714 }
 0x200   : > { %v5044_v27 = vrot.slane %v5036_v53, %v23420_v63  ;;  %v5051_v24 = vrot.slane %v5037_v60, %v23420_v63  ;;  %v18580_v6 = vrot.slane %v15584_v9, %v16745_v33  ;;  %v18583_v12 = vrot.slane %v15586_v39, %v16745_v33 }
 0x201   : > { %23703 = vst [vmem:[#allocation49_spill] sm:$0xff] %v18572_v59  ;;  %23704 = vst [vmem:[#allocation17_spill] sm:$0xff] %v18575_v30  ;;  %v18586_v54 = vrot.slane %v15588_v13, %v16745_v33  ;;  %v18589_v48 = vrot.slane %v15590_v50, %v16745_v33  ;;  %v15608_v17 = vcombine.low %v5164_v20, %v5171_v57 }
 0x202   : > { %23705 = vst [vmem:[#allocation113_spill] sm:$0xff] %v18580_v6  ;;  %23706 = vst [vmem:[#allocation50_spill] sm:$0xff] %v18583_v12  ;;  %v15610_v42 = vcombine.high %v5164_v20, %v5171_v57  ;;  %v15612_v14 = vcombine.low %v5180_v32, %v5187_v29  ;;  %v15614_v53 = vcombine.high %v5180_v32, %v5187_v29  ;;  %v23713_v32 = vld [vmem:[#allocation111_spill] sm:$0xff]  ;;  %v23714_v29 = vld [vmem:[#allocation112_spill] sm:$0xff] }
 0x203   : > { %23707 = vst [vmem:[#allocation114_spill] sm:$0xff] %v18586_v54  ;;  %23708 = vst [vmem:[#allocation51_spill] sm:$0xff] %v18589_v48  ;;  %v15600_v39 = vcombine.low %v5028_v21, %v5035_v1  ;;  %v15602_v60 = vcombine.high %v5028_v21, %v5035_v1  ;;  %v15604_v50 = vcombine.low %v5044_v27, %v5051_v24 }
 0x204   : > { %v15606_v8 = vcombine.high %v5044_v27, %v5051_v24  ;;  %v23711_v43 = vcombine.low %v23709_v40, %v23710_v2  ;;  %v23712_v20 = vcombine.high %v23709_v40, %v23710_v2  ;;  %v23715_v21 = vcombine.low %v23713_v32, %v23714_v29 }
 0x205   : > { %v23716_v27 = vcombine.high %v23713_v32, %v23714_v29  ;;  %v18624_v13 = vrot.slane %v15608_v17, %v16745_v33  ;;  %v18627_v2 = vrot.slane %v15610_v42, %v16745_v33  ;;  %v18630_v40 = vrot.slane %v15612_v14, %v16745_v33  ;;  %v23726_v42 = vld [vmem:[#allocation24_spill] sm:$0xff] }
 0x206   : > { %v5300_v15 = vrot.slane %v23711_v43, %v23420_v63  ;;  %v5307_v57 = vrot.slane %v23712_v20, %v23420_v63  ;;  %v5332_v1 = vrot.slane %v23715_v21, %v23420_v63  ;;  %v18633_v20 = vrot.slane %v15614_v53, %v16745_v33  ;;  %v18641_v21 = vpop.permute.xlu0 %712 }
 0x207   : > { %v5339_v24 = vrot.slane %v23716_v27, %v23420_v63  ;;  %23717 = vst [vmem:[#allocation56_spill] sm:$0xff] %v18624_v13  ;;  %23718 = vst [vmem:[#allocation57_spill] sm:$0xff] %v18627_v2  ;;  %v18636_v32 = vrot.slane %v15600_v39, %v16745_v33  ;;  %v18639_v29 = vrot.slane %v15602_v60, %v16745_v33  ;;  %v23725_v39 = vld [vmem:[#allocation64_spill] sm:$0xff] }
 0x208   : > { %23719 = vst [vmem:[#allocation18_spill] sm:$0xff] %v18630_v40  ;;  %23720 = vst [vmem:[#allocation58_spill] sm:$0xff] %v18633_v20  ;;  %v18648_v14 = vrot.slane %v15604_v50, %v16745_v33  ;;  %v18651_v53 = vrot.slane %v15606_v8, %v16745_v33  ;;  %v1044_v27 = vcombine.low %v23725_v39, %v18349_v3  ;;  %v18661_v50 = vpop.permute.xlu1 %718 }
 0x209   : > { %23721 = vst [vmem:[#allocation62_spill] sm:$0xff] %v18636_v32  ;;  %23722 = vst [vmem:[#allocation59_spill] sm:$0xff] %v18639_v29  ;;  %v15616_v43 = vcombine.low %v5300_v15, %v5307_v57  ;;  %v15618_v60 = vcombine.high %v5300_v15, %v5307_v57  ;;  %v15617_v9 = vcombine.low %v5332_v1, %v5339_v24  ;;  %v23735_v32 = vld [vmem:[#allocation107_spill] sm:$0xff] }
 0x20a   : > { %23723 = vst [vmem:[#allocation19_spill] sm:$0xff] %v18648_v14  ;;  %23724 = vst [vmem:[#allocation109_spill] sm:$0xff] %v18651_v53  ;;  %v1045_v17 = vcombine.high %v23725_v39, %v18349_v3  ;;  %v908_v59 = vcombine.low %v23726_v42, %v18359_v16  ;;  %v15619_v45 = vcombine.high %v5332_v1, %v5339_v24  ;;  %v23727_v24 = vld [vmem:[#allocation117_spill] sm:$0xff]  ;;  %v18688_v15 = vpop.permute.xlu0 %716 }
 0x20b   : > { %v909_v57 = vcombine.high %v23726_v42, %v18359_v16  ;;  %v1316_v8 = vcombine.low %v23727_v24, %v18379_v25  ;;  %v18680_v48 = vrot.slane %v1044_v27, %v16745_v33  ;;  %v1317_v30 = vcombine.high %v23727_v24, %v18379_v25  ;;  %v23728_v16 = vld [vmem:[#allocation118_spill] sm:$0xff] }
 0x20c   : > { %v1180_v42 = vcombine.low %v23728_v16, %v18393_v58  ;;  %v1181_v3 = vcombine.high %v23728_v16, %v18393_v58  ;;  %v18691_v39 = vrot.slane %v1045_v17, %v16745_v33  ;;  %v18694_v1 = vrot.slane %v908_v59, %v16745_v33  ;;  %v23729_v24 = vld [vmem:[#allocation66_spill] sm:$0xff]  ;;  %v18710_v2 = vpop.permute.xlu1 %722 }
 0x20d   : > { %v9588_v27 = vrot.slane %v15616_v43, %v16745_v33  ;;  %v9604_v40 = vrot.slane %v15618_v60, %v16745_v33  ;;  %v18699_v25 = vrot.slane %v909_v57, %v16745_v33  ;;  %v1588_v20 = vcombine.low %v23729_v24, %v18409_v28  ;;  %v23730_v43 = vld [vmem:[#allocation68_spill] sm:$0xff]  ;;  %v23731_v60 = vld [vmem:[#allocation106_spill] sm:$0xff] }
 0x20e   : > { %v9595_v58 = vrot.slane %v15617_v9, %v16745_v33  ;;  %v9611_v16 = vrot.slane %v15619_v45, %v16745_v33  ;;  %v18706_v17 = vrot.slane %v1316_v8, %v16745_v33  ;;  %v1589_v59 = vcombine.high %v23729_v24, %v18409_v28  ;;  %v23734_v28 = vld [vmem:[#allocation26_spill] sm:$0xff]  ;;  %v18744_v12 = vpop.permute.xlu0 %720 }
 0x20f   : > { %v23732_v57 = vcombine.low %v23730_v43, %v23731_v60  ;;  %v23733_v53 = vcombine.high %v23730_v43, %v23731_v60  ;;  %v18721_v45 = vrot.slane %v1317_v30, %v16745_v33  ;;  %v18724_v8 = vrot.slane %v1180_v42, %v16745_v33  ;;  %v23736_v43 = vld [vmem:[#allocation108_spill] sm:$0xff] }
 0x210   : > { %v1452_v24 = vcombine.low %v23734_v28, %v18439_v37  ;;  %v1453_v14 = vcombine.high %v23734_v28, %v18439_v37  ;;  %v18731_v29 = vrot.slane %v1181_v3, %v16745_v33  ;;  %v23738_v30 = vcombine.high %v23735_v32, %v23736_v43 }
 0x211   : > { %v5436_v13 = vrot.slane %v23732_v57, %v23420_v63  ;;  %v5443_v9 = vrot.slane %v23733_v53, %v23420_v63  ;;  %v9645_v57 = vcombine.high %v9588_v27, %v9604_v40  ;;  %v23737_v53 = vcombine.low %v23735_v32, %v23736_v43 }
 0x212   : > { %v5475_v42 = vrot.slane %v23738_v30, %v23420_v63  ;;  %v18742_v54 = vrot.slane %v1588_v20, %v16745_v33  ;;  %v9644_v37 = vcombine.low %v9588_v27, %v9604_v40  ;;  %v9660_v28 = vcombine.low %v9595_v58, %v9611_v16  ;;  %v23740_v40 = vld [vmem:[#allocation27_spill] sm:$0xff] }
 0x213   : > { %v5468_v60 = vrot.slane %v23737_v53, %v23420_v63  ;;  %v9661_v3 = vcombine.high %v9595_v58, %v9611_v16  ;;  %v18747_v6 = vrot.slane %v1589_v59, %v16745_v33  ;;  %v1860_v4 = vcombine.low %v23739_v46, %v18457_v49  ;;  %v18763_v16 = vpop.permute.xlu1 %726 }
 0x214   : > { %v15624_v53 = vcombine.low %v5436_v13, %v5443_v9  ;;  %v15626_v0 = vcombine.high %v5436_v13, %v5443_v9  ;;  %v18752_v62 = vrot.slane %v1452_v24, %v16745_v33  ;;  %v18755_v32 = vrot.slane %v1453_v14, %v16745_v33  ;;  %v23741_v24 = vld [vmem:[#allocation73_spill] sm:$0xff] }
 0x215   : > { %v1861_v20 = vcombine.high %v23739_v46, %v18457_v49  ;;  %v1724_v27 = vcombine.low %v23740_v40, %v18478_v10  ;;  %v1725_v58 = vcombine.high %v23740_v40, %v18478_v10  ;;  %v18766_v59 = vrot.slane %v9645_v57, %v23420_v63  ;;  %v23746_v40 = vld [vmem:[#allocation120_spill] sm:$0xff] }
 0x216   : > { %v15625_v13 = vcombine.low %v5468_v60, %v5475_v42  ;;  %v15627_v9 = vcombine.high %v5468_v60, %v5475_v42  ;;  %v2132_v14 = vcombine.low %v23741_v24, %v18503_v41  ;;  %v18771_v43 = vrot.slane %v9644_v37, %v23420_v63 }
 0x217   : > { %v18774_v46 = vrot.slane %v9660_v28, %v23420_v63  ;;  %v18777_v49 = vrot.slane %v9661_v3, %v23420_v63  ;;  %v18780_v10 = vrot.slane %v1860_v4, %v16745_v33  ;;  %v2133_v57 = vcombine.high %v23741_v24, %v18503_v41  ;;  %v18792_v28 = vpop.permute.xlu0 %724  ;;  %v23745_v3 = vld [vmem:[#allocation119_spill] sm:$0xff] }
 0x218   : > { %23742 = vst [vmem:[#allocation110_spill] sm:$0xff] %v18771_v43  ;;  %v9724_v60 = vrot.slane %v15624_v53, %v16745_v33  ;;  %v9740_v30 = vrot.slane %v15626_v0, %v16745_v33  ;;  %v18787_v42 = vrot.slane %v1861_v20, %v16745_v33  ;;  %v18790_v37 = vrot.slane %v1724_v27, %v16745_v33  ;;  %v23749_v20 = vld [vmem:[#allocation74_spill] sm:$0xff] }
 0x219   : > { %23743 = vst [vmem:[#allocation111_spill] sm:$0xff] %v18774_v46  ;;  %23744 = vst [vmem:[#allocation112_spill] sm:$0xff] %v18777_v49  ;;  %v23747_v4 = vcombine.low %v23745_v3, %v23746_v40  ;;  %v23748_v41 = vcombine.high %v23745_v3, %v23746_v40  ;;  %v18803_v0 = vrot.slane %v1725_v58, %v16745_v33  ;;  %v23751_v3 = vld [vmem:[#allocation122_spill] sm:$0xff] }
 0x21a   : > { %v1996_v24 = vcombine.low %v23749_v20, %v18523_v56  ;;  %v9731_v27 = vrot.slane %v15625_v13, %v16745_v33  ;;  %v9747_v38 = vrot.slane %v15627_v9, %v16745_v33  ;;  %v18810_v52 = vrot.slane %v2132_v14, %v16745_v33  ;;  %v23754_v9 = vld [vmem:[#allocation129_spill] sm:$0xff]  ;;  %v23755_v49 = vld [vmem:[#allocation130_spill] sm:$0xff] }
 0x21b   : > { %v5572_v7 = vrot.slane %v23747_v4, %v23420_v63  ;;  %v5579_v53 = vrot.slane %v23748_v41, %v23420_v63  ;;  %v1997_v4 = vcombine.high %v23749_v20, %v18523_v56  ;;  %v23752_v40 = vcombine.low %v23750_v23, %v23751_v3  ;;  %v18829_v56 = vpop.permute.xlu1 %730  ;;  %v18843_v36 = vpop.permute.xlu0 %728 }
 0x21c   : > { %v23753_v58 = vcombine.high %v23750_v23, %v23751_v3  ;;  %v18823_v13 = vrot.slane %v2133_v57, %v16745_v33  ;;  %v2404_v14 = vcombine.low %v23754_v9, %v18541_v44  ;;  %v2405_v19 = vcombine.high %v23754_v9, %v18541_v44  ;;  %v23756_v44 = vld [vmem:[#allocation69_spill] sm:$0xff] }
 0x21d   : > { %v5604_v41 = vrot.slane %v23752_v40, %v23420_v63  ;;  %v9780_v20 = vcombine.low %v9724_v60, %v9740_v30  ;;  %v2268_v40 = vcombine.low %v23755_v49, %v18553_v22  ;;  %v9781_v11 = vcombine.high %v9724_v60, %v9740_v30 }
 0x21e   : > { %v5611_v18 = vrot.slane %v23753_v58, %v23420_v63  ;;  %v15632_v51 = vcombine.low %v5572_v7, %v5579_v53  ;;  %v15634_v46 = vcombine.high %v5572_v7, %v5579_v53  ;;  %v18834_v23 = vrot.slane %v1996_v24, %v16745_v33 }
 0x21f   : > { %v2269_v57 = vcombine.high %v23755_v49, %v18553_v22  ;;  %v9796_v3 = vcombine.low %v9731_v27, %v9747_v38  ;;  %v9797_v58 = vcombine.high %v9731_v27, %v9747_v38  ;;  %v18839_v34 = vrot.slane %v1997_v4, %v16745_v33 }
 0x220   : > { %v2676_v9 = vcombine.low %v23756_v44, %v18565_v55  ;;  %v15633_v43 = vcombine.low %v5604_v41, %v5611_v18  ;;  %v15635_v60 = vcombine.high %v5604_v41, %v5611_v18  ;;  %v18846_v7 = vrot.slane %v2404_v14, %v16745_v33 }
 0x221   : > { %v18849_v30 = vrot.slane %v2405_v19, %v16745_v33  ;;  %v2677_v22 = vcombine.high %v23756_v44, %v18565_v55  ;;  %v18854_v38 = vrot.slane %v9780_v20, %v23420_v63  ;;  %v18857_v49 = vrot.slane %v2268_v40, %v16745_v33  ;;  %v23762_v19 = vld [vmem:[#allocation28_spill] sm:$0xff]  ;;  %v18869_v55 = vpop.permute.xlu1 %734  ;;  %v23768_v44 = vld [vmem:[#allocation65_spill] sm:$0xff] }
 0x222   : > { %v18860_v53 = vrot.slane %v9781_v11, %v23420_v63  ;;  %v9860_v18 = vrot.slane %v15632_v51, %v16745_v33  ;;  %v9876_v24 = vrot.slane %v15634_v46, %v16745_v33  ;;  %v18865_v27 = vrot.slane %v2269_v57, %v16745_v33  ;;  %v23767_v57 = vld [vmem:[#allocation133_spill] sm:$0xff] }
 0x223   : > { %23757 = vst [vmem:[#allocation64_spill] sm:$0xff] %v18849_v30  ;;  %23758 = vst [vmem:[#allocation24_spill] sm:$0xff] %v18854_v38  ;;  %v2540_v4 = vcombine.low %v23762_v19, %v18591_v61  ;;  %v18872_v41 = vrot.slane %v9796_v3, %v23420_v63  ;;  %v18875_v14 = vrot.slane %v9797_v58, %v23420_v63  ;;  %v23769_v58 = vld [vmem:[#allocation25_spill] sm:$0xff] }
 0x224   : > { %23759 = vst [vmem:[#allocation117_spill] sm:$0xff] %v18857_v49  ;;  %23760 = vst [vmem:[#allocation118_spill] sm:$0xff] %v18860_v53  ;;  %v18878_v11 = vrot.slane %v2676_v9, %v16745_v33  ;;  %v2541_v51 = vcombine.high %v23762_v19, %v18591_v61  ;;  %v9867_v46 = vrot.slane %v15633_v43, %v16745_v33  ;;  %v18903_v53 = vpop.permute.xlu0 %732 }
 0x225   : > { %23761 = vst [vmem:[#allocation66_spill] sm:$0xff] %v18865_v27  ;;  %23763 = vst [vmem:[#allocation68_spill] sm:$0xff] %v18872_v41  ;;  %v9883_v20 = vrot.slane %v15635_v60, %v16745_v33  ;;  %v18885_v40 = vrot.slane %v2677_v22, %v16745_v33  ;;  %v2948_v3 = vcombine.low %v23767_v57, %v18601_v35  ;;  %v23772_v60 = vld [vmem:[#allocation134_spill] sm:$0xff] }
 0x226   : > { %23764 = vst [vmem:[#allocation106_spill] sm:$0xff] %v18875_v14  ;;  %23765 = vst [vmem:[#allocation26_spill] sm:$0xff] %v18878_v11  ;;  %v23770_v14 = vcombine.low %v23768_v44, %v23769_v58  ;;  %v23771_v9 = vcombine.high %v23768_v44, %v23769_v58  ;;  %v2949_v43 = vcombine.high %v23767_v57, %v18601_v35  ;;  %v23774_v11 = vld [vmem:[#allocation115_spill] sm:$0xff]  ;;  %v23775_v44 = vld [vmem:[#allocation116_spill] sm:$0xff] }
 0x227   : > { %23766 = vst [vmem:[#allocation107_spill] sm:$0xff] %v18885_v40  ;;  %v2812_v22 = vcombine.low %v23772_v60, %v18641_v21  ;;  %v2813_v19 = vcombine.high %v23772_v60, %v18641_v21  ;;  %v9916_v38 = vcombine.low %v9860_v18, %v9876_v24  ;;  %v18906_v40 = vrot.slane %v2540_v4, %v16745_v33  ;;  %v23778_v21 = vld [vmem:[#allocation71_spill] sm:$0xff] }
 0x228   : > { %v5708_v41 = vrot.slane %v23770_v14, %v23420_v63  ;;  %v5715_v61 = vrot.slane %v23771_v9, %v23420_v63  ;;  %v9917_v14 = vcombine.high %v9860_v18, %v9876_v24  ;;  %v23776_v58 = vcombine.low %v23774_v11, %v23775_v44 }
 0x229   : > { %23773 = vst [vmem:[#allocation108_spill] sm:$0xff] %v18906_v40  ;;  %v23777_v35 = vcombine.high %v23774_v11, %v23775_v44  ;;  %v18917_v27 = vrot.slane %v2541_v51, %v16745_v33  ;;  %v3220_v60 = vcombine.low %v23778_v21, %v18661_v50  ;;  %v9932_v49 = vcombine.low %v9867_v46, %v9883_v20 }
 0x22a   : > { %v5740_v9 = vrot.slane %v23776_v58, %v23420_v63  ;;  %v9933_v4 = vcombine.high %v9867_v46, %v9883_v20  ;;  %v18922_v18 = vrot.slane %v2948_v3, %v16745_v33  ;;  %v3221_v24 = vcombine.high %v23778_v21, %v18661_v50  ;;  %v18926_v58 = vpop.permute.xlu1 %738  ;;  %v23784_v20 = vld [vmem:[#allocation30_spill] sm:$0xff] }
 0x22b   : > { %v5747_v57 = vrot.slane %v23777_v35, %v23420_v63  ;;  %v15640_v40 = vcombine.low %v5708_v41, %v5715_v61  ;;  %v15642_v30 = vcombine.high %v5708_v41, %v5715_v61  ;;  %v18929_v11 = vrot.slane %v2949_v43, %v16745_v33 }
 0x22c   : > { %23779 = vst [vmem:[#allocation67_spill] sm:$0xff] %v18922_v18  ;;  %v18932_v51 = vrot.slane %v2812_v22, %v16745_v33  ;;  %v18935_v44 = vrot.slane %v2813_v19, %v16745_v33  ;;  %v18938_v46 = vrot.slane %v9916_v38, %v23420_v63  ;;  %v3084_v3 = vcombine.low %v23784_v20, %v18688_v15  ;;  %v18950_v22 = vpop.permute.xlu0 %736 }
 0x22d   : > { %23780 = vst [vmem:[#allocation27_spill] sm:$0xff] %v18929_v11  ;;  %v18943_v50 = vrot.slane %v9917_v14, %v23420_v63  ;;  %v15641_v35 = vcombine.low %v5740_v9, %v5747_v57  ;;  %v15643_v41 = vcombine.high %v5740_v9, %v5747_v57  ;;  %v18946_v61 = vrot.slane %v3220_v60, %v16745_v33  ;;  %v23790_v14 = vld [vmem:[#allocation72_spill] sm:$0xff] }
 0x22e   : > { %23781 = vst [vmem:[#allocation73_spill] sm:$0xff] %v18932_v51  ;;  %23782 = vst [vmem:[#allocation119_spill] sm:$0xff] %v18935_v44  ;;  %v3085_v43 = vcombine.high %v23784_v20, %v18688_v15  ;;  %v18953_v19 = vrot.slane %v9932_v49, %v23420_v63  ;;  %v18956_v38 = vrot.slane %v9933_v4, %v23420_v63  ;;  %v23791_v20 = vld [vmem:[#allocation31_spill] sm:$0xff]  ;;  %v23793_v4 = vld [vmem:[#allocation126_spill] sm:$0xff] }
 0x22f   : > { %23783 = vst [vmem:[#allocation120_spill] sm:$0xff] %v18938_v46  ;;  %23785 = vst [vmem:[#allocation74_spill] sm:$0xff] %v18943_v50  ;;  %v18959_v21 = vrot.slane %v3221_v24, %v16745_v33  ;;  %v3492_v9 = vcombine.low %v23790_v14, %v18710_v2  ;;  %v9996_v57 = vrot.slane %v15640_v40, %v16745_v33 }
 0x230   : > { %23786 = vst [vmem:[#allocation121_spill] sm:$0xff] %v18946_v61  ;;  %23787 = vst [vmem:[#allocation122_spill] sm:$0xff] %v18953_v19  ;;  %v10012_v60 = vrot.slane %v15642_v30, %v16745_v33  ;;  %v3493_v15 = vcombine.high %v23790_v14, %v18710_v2  ;;  %v3356_v49 = vcombine.low %v23791_v20, %v18744_v12  ;;  %v23792_v19 = vld [vmem:[#allocation125_spill] sm:$0xff]  ;;  %v18982_v2 = vpop.permute.xlu1 %742 }
 0x231   : > { %23788 = vst [vmem:[#allocation129_spill] sm:$0xff] %v18956_v38  ;;  %23789 = vst [vmem:[#allocation130_spill] sm:$0xff] %v18959_v21  ;;  %v23794_v38 = vcombine.low %v23792_v19, %v23793_v4  ;;  %v23795_v24 = vcombine.high %v23792_v19, %v23793_v4  ;;  %v18978_v40 = vrot.slane %v3084_v3, %v16745_v33  ;;  %v23799_v19 = vld [vmem:[#allocation127_spill] sm:$0xff]  ;;  %v23800_v4 = vld [vmem:[#allocation128_spill] sm:$0xff] }
 0x232   : > { %v3357_v30 = vcombine.high %v23791_v20, %v18744_v12  ;;  %v10003_v14 = vrot.slane %v15641_v35, %v16745_v33  ;;  %v10019_v21 = vrot.slane %v15643_v41, %v16745_v33  ;;  %v18987_v61 = vrot.slane %v3085_v43, %v16745_v33 }
 0x233   : > { %v5844_v50 = vrot.slane %v23794_v38, %v23420_v63  ;;  %v5851_v46 = vrot.slane %v23795_v24, %v23420_v63  ;;  %23796 = vst [vmem:[#allocation69_spill] sm:$0xff] %v18978_v40  ;;  %v23798_v38 = vld [vmem:[#allocation139_spill] sm:$0xff]  ;;  %v23801_v3 = vcombine.low %v23799_v19, %v23800_v4  ;;  %v23802_v12 = vcombine.high %v23799_v19, %v23800_v4 }
 0x234   : > { %23797 = vst [vmem:[#allocation28_spill] sm:$0xff] %v18987_v61  ;;  %v3764_v44 = vcombine.low %v23798_v38, %v18763_v16  ;;  %v19000_v35 = vrot.slane %v3492_v9, %v16745_v33  ;;  %v3765_v41 = vcombine.high %v23798_v38, %v18763_v16  ;;  %v10052_v43 = vcombine.low %v9996_v57, %v10012_v60  ;;  %v23804_v9 = vld [vmem:[#allocation140_spill] sm:$0xff] }
 0x235   : > { %v5876_v24 = vrot.slane %v23801_v3, %v23420_v63  ;;  %v5883_v20 = vrot.slane %v23802_v12, %v23420_v63  ;;  %v10053_v61 = vcombine.high %v9996_v57, %v10012_v60  ;;  %v19005_v40 = vrot.slane %v3493_v15, %v16745_v33  ;;  %v19010_v3 = vpop.permute.xlu0 %740 }
 0x236   : > { %v19008_v51 = vrot.slane %v3356_v49, %v16745_v33  ;;  %v15648_v11 = vcombine.low %v5844_v50, %v5851_v46  ;;  %v15650_v18 = vcombine.high %v5844_v50, %v5851_v46  ;;  %v19013_v19 = vrot.slane %v3357_v30, %v16745_v33  ;;  %v23806_v46 = vld [vmem:[#allocation149_spill] sm:$0xff]  ;;  %v19027_v30 = vpop.permute.xlu1 %746 }
 0x237   : > { %v3628_v4 = vcombine.low %v23804_v9, %v18792_v28  ;;  %v3629_v16 = vcombine.high %v23804_v9, %v18792_v28  ;;  %v10068_v57 = vcombine.low %v10003_v14, %v10019_v21  ;;  %v19020_v60 = vrot.slane %v3764_v44, %v16745_v33 }
 0x238   : > { %23803 = vst [vmem:[#allocation133_spill] sm:$0xff] %v19013_v19  ;;  %v10069_v15 = vcombine.high %v10003_v14, %v10019_v21  ;;  %v15649_v49 = vcombine.low %v5876_v24, %v5883_v20  ;;  %v15651_v38 = vcombine.high %v5876_v24, %v5883_v20  ;;  %v19023_v12 = vrot.slane %v3765_v41, %v16745_v33  ;;  %v23809_v21 = vld [vmem:[#allocation150_spill] sm:$0xff] }
 0x239   : > { %v4036_v50 = vcombine.low %v23806_v46, %v18829_v56  ;;  %v19030_v19 = vrot.slane %v10052_v43, %v23420_v63  ;;  %v19033_v28 = vrot.slane %v10053_v61, %v23420_v63  ;;  %v4037_v44 = vcombine.high %v23806_v46, %v18829_v56  ;;  %v23812_v43 = vld [vmem:[#allocation77_spill] sm:$0xff]  ;;  %v23813_v46 = vld [vmem:[#allocation32_spill] sm:$0xff] }
 0x23a   : > { %23805 = vst [vmem:[#allocation65_spill] sm:$0xff] %v19023_v12  ;;  %v3900_v14 = vcombine.low %v23809_v21, %v18843_v36  ;;  %v10132_v24 = vrot.slane %v15648_v11, %v16745_v33  ;;  %v10148_v20 = vrot.slane %v15650_v18, %v16745_v33  ;;  %v19042_v41 = vrot.slane %v3628_v4, %v16745_v33 }
 0x23b   : > { %23807 = vst [vmem:[#allocation25_spill] sm:$0xff] %v19030_v19  ;;  %23808 = vst [vmem:[#allocation134_spill] sm:$0xff] %v19033_v28  ;;  %v19045_v9 = vrot.slane %v3629_v16, %v16745_v33  ;;  %v3901_v61 = vcombine.high %v23809_v21, %v18843_v36  ;;  %v4308_v28 = vcombine.low %v23812_v43, %v18869_v55  ;;  %v19055_v19 = vpop.permute.xlu0 %744 }
 0x23c   : > { %23810 = vst [vmem:[#allocation115_spill] sm:$0xff] %v19042_v41  ;;  %v4309_v56 = vcombine.high %v23812_v43, %v18869_v55  ;;  %v4172_v11 = vcombine.low %v23813_v46, %v18903_v53  ;;  %v10139_v18 = vrot.slane %v15649_v49, %v16745_v33  ;;  %v10155_v4 = vrot.slane %v15651_v38, %v16745_v33 }
 0x23d   : > { %23811 = vst [vmem:[#allocation116_spill] sm:$0xff] %v19045_v9  ;;  %v19060_v16 = vrot.slane %v4036_v50, %v16745_v33  ;;  %v4173_v36 = vcombine.high %v23813_v46, %v18903_v53  ;;  %v19065_v21 = vrot.slane %v10068_v57, %v23420_v63  ;;  %v19068_v55 = vrot.slane %v10069_v15, %v23420_v63  ;;  %v783_v53 = vpop.permute.xlu1 %782  ;;  %v23821_v57 = vld [vmem:[#allocation75_spill] sm:$0xff]  ;;  %v23822_v46 = vld [vmem:[#allocation76_spill] sm:$0xff] }
 0x23e   : > { %v19071_v43 = vrot.slane %v4037_v44, %v16745_v33  ;;  %v19074_v9 = vrot.slane %v3900_v14, %v16745_v33  ;;  %v10188_v49 = vcombine.low %v10132_v24, %v10148_v20  ;;  %v10189_v38 = vcombine.high %v10132_v24, %v10148_v20 }
 0x23f   : > { %23814 = vst [vmem:[#allocation71_spill] sm:$0xff] %v19060_v16  ;;  %23815 = vst [vmem:[#allocation30_spill] sm:$0xff] %v19065_v21  ;;  %v19077_v50 = vrot.slane %v3901_v61, %v16745_v33  ;;  %v19080_v16 = vrot.slane %v4308_v28, %v16745_v33  ;;  %v23823_v15 = vcombine.low %v23821_v57, %v23822_v46 }
 0x240   : > { %23816 = vst [vmem:[#allocation72_spill] sm:$0xff] %v19068_v55  ;;  %23817 = vst [vmem:[#allocation31_spill] sm:$0xff] %v19071_v43  ;;  %v23824_v44 = vcombine.high %v23821_v57, %v23822_v46  ;;  %v19091_v21 = vrot.slane %v4309_v56, %v16745_v33  ;;  %v19094_v24 = vrot.slane %v4172_v11, %v16745_v33 }
 0x241   : > { %23818 = vst [vmem:[#allocation125_spill] sm:$0xff] %v19074_v9  ;;  %23819 = vst [vmem:[#allocation126_spill] sm:$0xff] %v19077_v50  ;;  %v5980_v55 = vrot.slane %v23823_v15, %v23420_v63  ;;  %v10204_v20 = vcombine.low %v10139_v18, %v10155_v4  ;;  %v10205_v28 = vcombine.high %v10139_v18, %v10155_v4  ;;  %v23829_v15 = vld [vmem:[#allocation123_spill] sm:$0xff]  ;;  %v23830_v9 = vld [vmem:[#allocation124_spill] sm:$0xff] }
 0x242   : > { %23820 = vst [vmem:[#allocation139_spill] sm:$0xff] %v19080_v16  ;;  %v5987_v14 = vrot.slane %v23824_v44, %v23420_v63  ;;  %23825 = vst [vmem:[#allocation127_spill] sm:$0xff] %v19091_v21  ;;  %v19097_v61 = vrot.slane %v4173_v36, %v16745_v33  ;;  %v23828_v16 = vld [vmem:[#allocation153_spill] sm:$0xff]  ;;  %v23831_v43 = vcombine.low %v23829_v15, %v23830_v9  ;;  %v23833_v18 = vld [vmem:[#allocation35_spill] sm:$0xff]  ;;  %v781_v36 = vpop.permute.xlu0 %780 }
 0x243   : > { %23826 = vst [vmem:[#allocation128_spill] sm:$0xff] %v19094_v24  ;;  %v4580_v50 = vcombine.low %v23828_v16, %v18926_v58  ;;  %v23832_v56 = vcombine.high %v23829_v15, %v23830_v9  ;;  %v4581_v11 = vcombine.high %v23828_v16, %v18926_v58  ;;  %v1060_v4 = vcombine.low %v23833_v18, %v783_v53  ;;  %v23836_v24 = vld [vmem:[#allocation154_spill] sm:$0xff] }
 0x244   : > { %23827 = vst [vmem:[#allocation140_spill] sm:$0xff] %v19097_v61  ;;  %v6012_v57 = vrot.slane %v23831_v43, %v23420_v63  ;;  %v19113_v44 = vrot.slane %v10188_v49, %v23420_v63  ;;  %v19116_v61 = vrot.slane %v10189_v38, %v23420_v63  ;;  %v4444_v43 = vcombine.low %v23836_v24, %v18950_v22 }
 0x245   : > { %v6019_v46 = vrot.slane %v23832_v56, %v23420_v63  ;;  %v4445_v21 = vcombine.high %v23836_v24, %v18950_v22  ;;  %v15656_v9 = vcombine.low %v5980_v55, %v5987_v14  ;;  %v15658_v15 = vcombine.high %v5980_v55, %v5987_v14  ;;  %v23837_v56 = vld [vmem:[#allocation34_spill] sm:$0xff]  ;;  %v23841_v14 = vld [vmem:[#allocation79_spill] sm:$0xff] }
 0x246   : > { %23834 = vst [vmem:[#allocation149_spill] sm:$0xff] %v19113_v44  ;;  %23835 = vst [vmem:[#allocation150_spill] sm:$0xff] %v19116_v61  ;;  %v4852_v58 = vcombine.low %v23837_v56, %v18982_v2  ;;  %v1061_v16 = vcombine.high %v23833_v18, %v783_v53  ;;  %v19126_v41 = vrot.slane %v10204_v20, %v23420_v63  ;;  %v23840_v61 = vld [vmem:[#allocation82_spill] sm:$0xff] }
 0x247   : > { %v19129_v49 = vrot.slane %v10205_v28, %v23420_v63  ;;  %v4853_v38 = vcombine.high %v23837_v56, %v18982_v2  ;;  %v924_v44 = vcombine.low %v23840_v61, %v781_v36  ;;  %v15657_v12 = vcombine.low %v6012_v57, %v6019_v46 }
 0x248   : > { %23838 = vst [vmem:[#allocation77_spill] sm:$0xff] %v19126_v41  ;;  %v15659_v22 = vcombine.high %v6012_v57, %v6019_v46  ;;  %v19135_v55 = vrot.slane %v4580_v50, %v16745_v33  ;;  %v4716_v24 = vcombine.low %v23841_v14, %v19010_v3  ;;  %v1068_v53 = vrot.slane %v1060_v4, %v16745_v33 }
 0x249   : > { %23839 = vst [vmem:[#allocation32_spill] sm:$0xff] %v19129_v49  ;;  %v925_v20 = vcombine.high %v23840_v61, %v781_v36  ;;  %v19142_v28 = vrot.slane %v4581_v11, %v16745_v33  ;;  %v4717_v2 = vcombine.high %v23841_v14, %v19010_v3  ;;  %v10268_v18 = vrot.slane %v15656_v9, %v16745_v33 }
 0x24a   : > { %v10284_v57 = vrot.slane %v15658_v15, %v16745_v33  ;;  %v19149_v50 = vrot.slane %v4444_v43, %v16745_v33  ;;  %v19152_v46 = vrot.slane %v4445_v21, %v16745_v33  ;;  %v19155_v4 = vrot.slane %v4852_v58, %v16745_v33 }
 0x24b   : > { %v1075_v61 = vrot.slane %v1061_v16, %v16745_v33  ;;  %v19159_v11 = vrot.slane %v4853_v38, %v16745_v33  ;;  %v932_v3 = vrot.slane %v924_v44, %v16745_v33  ;;  %v10275_v36 = vrot.slane %v15657_v12, %v16745_v33  ;;  %v23847_v16 = vld [vmem:[#allocation80_spill] sm:$0xff] }
 0x24c   : > { %23842 = vst [vmem:[#allocation75_spill] sm:$0xff] %v19152_v46  ;;  %23843 = vst [vmem:[#allocation76_spill] sm:$0xff] %v19155_v4  ;;  %v10291_v9 = vrot.slane %v15659_v22, %v16745_v33  ;;  %v19165_v43 = vrot.slane %v4716_v24, %v16745_v33  ;;  %v1108_v21 = vcombine.low %v18680_v48, %v1068_v53  ;;  %v23848_v22 = vld [vmem:[#allocation81_spill] sm:$0xff] }
 0x24d   : > { %23844 = vst [vmem:[#allocation153_spill] sm:$0xff] %v19159_v11  ;;  %v1109_v15 = vcombine.high %v18680_v48, %v1068_v53  ;;  %v939_v56 = vrot.slane %v925_v20, %v16745_v33  ;;  %v19171_v58 = vrot.slane %v4717_v2, %v16745_v33  ;;  %v5124_v38 = vcombine.low %v23847_v16, %v19027_v30 }
 0x24e   : > { %23845 = vst [vmem:[#allocation123_spill] sm:$0xff] %v19165_v43  ;;  %v5125_v12 = vcombine.high %v23847_v16, %v19027_v30  ;;  %v10324_v44 = vcombine.low %v10268_v18, %v10284_v57  ;;  %v4988_v14 = vcombine.low %v23848_v22, %v19055_v19  ;;  %v1124_v24 = vcombine.low %v18691_v39, %v1075_v61 }
 0x24f   : > { %23846 = vst [vmem:[#allocation124_spill] sm:$0xff] %v19171_v58  ;;  %v1125_v49 = vcombine.high %v18691_v39, %v1075_v61  ;;  %v10325_v48 = vcombine.high %v10268_v18, %v10284_v57  ;;  %v4989_v53 = vcombine.high %v23848_v22, %v19055_v19  ;;  %v972_v20 = vcombine.low %v18694_v1, %v932_v3  ;;  %v787_v58 = vpop.permute.xlu1 %786 }
 0x250   : > { %v973_v2 = vcombine.high %v18694_v1, %v932_v3  ;;  %v10340_v43 = vcombine.low %v10275_v36, %v10291_v9  ;;  %v1116_v30 = vrot.slane %v1108_v21, %v23420_v63  ;;  %v1123_v16 = vrot.slane %v1109_v15, %v23420_v63  ;;  %v23852_v3 = vld [vmem:[#allocation166_spill] sm:$0xff]  ;;  %v785_v15 = vpop.permute.xlu0 %784 }
 0x251   : > { %v988_v11 = vcombine.low %v18699_v25, %v939_v56  ;;  %v989_v41 = vcombine.high %v18699_v25, %v939_v56  ;;  %v19190_v39 = vrot.slane %v5124_v38, %v16745_v33  ;;  %v19193_v18 = vrot.slane %v5125_v12, %v16745_v33 }
 0x252   : > { %v19196_v19 = vrot.slane %v10324_v44, %v23420_v63  ;;  %v10341_v1 = vcombine.high %v10275_v36, %v10291_v9  ;;  %v1132_v57 = vrot.slane %v1124_v24, %v23420_v63  ;;  %v1139_v61 = vrot.slane %v1125_v49, %v23420_v63  ;;  %v23855_v24 = vld [vmem:[#allocation167_spill] sm:$0xff] }
 0x253   : > { %23849 = vst [vmem:[#allocation35_spill] sm:$0xff] %v19190_v39  ;;  %23850 = vst [vmem:[#allocation154_spill] sm:$0xff] %v19193_v18  ;;  %v1332_v21 = vcombine.low %v23852_v3, %v787_v58  ;;  %v19202_v22 = vrot.slane %v10325_v48, %v23420_v63  ;;  %v19205_v25 = vrot.slane %v4988_v14, %v16745_v33  ;;  %v23856_v39 = vld [vmem:[#allocation135_spill] sm:$0xff]  ;;  %v23857_v14 = vld [vmem:[#allocation136_spill] sm:$0xff] }
 0x254   : > { %23851 = vst [vmem:[#allocation34_spill] sm:$0xff] %v19196_v19  ;;  %v980_v56 = vrot.slane %v972_v20, %v23420_v63  ;;  %v987_v38 = vrot.slane %v973_v2, %v23420_v63  ;;  %v1333_v12 = vcombine.high %v23852_v3, %v787_v58  ;;  %v15369_v36 = vcombine.low %v1116_v30, %v1123_v16 }
 0x255   : > { %23853 = vst [vmem:[#allocation82_spill] sm:$0xff] %v19202_v22  ;;  %23854 = vst [vmem:[#allocation79_spill] sm:$0xff] %v19205_v25  ;;  %v15371_v9 = vcombine.high %v1116_v30, %v1123_v16  ;;  %v996_v44 = vrot.slane %v988_v11, %v23420_v63  ;;  %v1003_v49 = vrot.slane %v989_v41, %v23420_v63 }
 0x256   : > { %v1196_v18 = vcombine.low %v23855_v24, %v785_v15  ;;  %v1197_v48 = vcombine.high %v23855_v24, %v785_v15  ;;  %v23858_v25 = vcombine.low %v23856_v39, %v23857_v14  ;;  %v23860_v58 = vcombine.high %v23856_v39, %v23857_v14 }
 0x257   : > { %v19227_v11 = vrot.slane %v4989_v53, %v16745_v33  ;;  %v15373_v41 = vcombine.low %v1132_v57, %v1139_v61  ;;  %v15375_v2 = vcombine.high %v1132_v57, %v1139_v61  ;;  %v1340_v30 = vrot.slane %v1332_v21, %v16745_v33  ;;  %v791_v61 = vpop.permute.xlu1 %790 }
 0x258   : > { %v19218_v22 = vrot.slane %v23858_v25, %v23420_v63  ;;  %v19224_v20 = vrot.slane %v23860_v58, %v23420_v63  ;;  %v15361_v16 = vcombine.low %v980_v56, %v987_v38  ;;  %v15363_v3 = vcombine.high %v980_v56, %v987_v38 }
 0x259   : > { %23862 = vst [vmem:[#allocation166_spill] sm:$0xff] %v19227_v11  ;;  %v1347_v15 = vrot.slane %v1333_v12, %v16745_v33  ;;  %v19232_v25 = vrot.slane %v10340_v43, %v23420_v63  ;;  %v19235_v24 = vrot.slane %v15369_v36, %v16745_v33  ;;  %v19238_v39 = vrot.slane %v15371_v9, %v16745_v33 }
 0x25a   : > { %23859 = vst [vmem:[#allocation80_spill] sm:$0xff] %v19218_v22  ;;  %23861 = vst [vmem:[#allocation81_spill] sm:$0xff] %v19224_v20  ;;  %v15365_v14 = vcombine.low %v996_v44, %v1003_v49  ;;  %v15367_v53 = vcombine.high %v996_v44, %v1003_v49  ;;  %v1204_v58 = vrot.slane %v1196_v18, %v16745_v33  ;;  %v23866_v20 = vld [vmem:[#allocation175_spill] sm:$0xff] }
 0x25b   : > { %23863 = vst [vmem:[#allocation167_spill] sm:$0xff] %v19232_v25  ;;  %v1211_v57 = vrot.slane %v1197_v48, %v16745_v33  ;;  %v19243_v21 = vrot.slane %v10341_v1, %v23420_v63  ;;  %v19248_v56 = vrot.slane %v15373_v41, %v16745_v33  ;;  %v19251_v38 = vrot.slane %v15375_v2, %v16745_v33  ;;  %v789_v2 = vpop.permute.xlu0 %788 }
 0x25c   : > { %v1380_v12 = vcombine.low %v18706_v17, %v1340_v30  ;;  %v1381_v36 = vcombine.high %v18706_v17, %v1340_v30  ;;  %v19256_v18 = vrot.slane %v15361_v16, %v16745_v33  ;;  %v19259_v9 = vrot.slane %v15363_v3, %v16745_v33 }
 0x25d   : > { %23864 = vst [vmem:[#allocation135_spill] sm:$0xff] %v19243_v21  ;;  %v1396_v1 = vcombine.low %v18721_v45, %v1347_v15  ;;  %v1397_v44 = vcombine.high %v18721_v45, %v1347_v15  ;;  %v19266_v48 = vrot.slane %v15365_v14, %v16745_v33  ;;  %v19269_v41 = vrot.slane %v15367_v53, %v16745_v33 }
 0x25e   : > { %v1604_v17 = vcombine.low %v17907_v26, %v791_v61  ;;  %v1244_v30 = vcombine.low %v18724_v8, %v1204_v58  ;;  %v1245_v16 = vcombine.high %v18724_v8, %v1204_v58  ;;  %v1260_v3 = vcombine.low %v18731_v29, %v1211_v57 }
 0x25f   : > { %v1261_v45 = vcombine.high %v18731_v29, %v1211_v57  ;;  %v1388_v14 = vrot.slane %v1380_v12, %v23420_v63  ;;  %v1395_v43 = vrot.slane %v1381_v36, %v23420_v63  ;;  %v1605_v53 = vcombine.high %v17907_v26, %v791_v61 }
 0x260   : > { %v1404_v11 = vrot.slane %v1396_v1, %v23420_v63  ;;  %v1411_v8 = vrot.slane %v1397_v44, %v23420_v63  ;;  %v1468_v58 = vcombine.low %v17909_v31, %v789_v2  ;;  %v1612_v12 = vrot.slane %v1604_v17, %v16745_v33 }
 0x261   : > { %v1469_v36 = vcombine.high %v17909_v31, %v789_v2  ;;  %v1252_v26 = vrot.slane %v1244_v30, %v23420_v63  ;;  %v1259_v61 = vrot.slane %v1245_v16, %v23420_v63  ;;  %v1268_v1 = vrot.slane %v1260_v3, %v23420_v63 }
 0x262   : > { %v1275_v44 = vrot.slane %v1261_v45, %v23420_v63  ;;  %v15385_v15 = vcombine.low %v1388_v14, %v1395_v43  ;;  %v15387_v29 = vcombine.high %v1388_v14, %v1395_v43  ;;  %v1619_v21 = vrot.slane %v1605_v53, %v16745_v33 }
 0x263   : > { %v15389_v57 = vcombine.low %v1404_v11, %v1411_v8  ;;  %v15391_v31 = vcombine.high %v1404_v11, %v1411_v8  ;;  %v1476_v2 = vrot.slane %v1468_v58, %v16745_v33  ;;  %v1652_v16 = vcombine.low %v18742_v54, %v1612_v12 }
 0x264   : > { %v1653_v3 = vcombine.high %v18742_v54, %v1612_v12  ;;  %v1483_v45 = vrot.slane %v1469_v36, %v16745_v33  ;;  %v15377_v49 = vcombine.low %v1252_v26, %v1259_v61  ;;  %v15379_v43 = vcombine.high %v1252_v26, %v1259_v61  ;;  %v795_v26 = vpop.permute.xlu1 %794 }
 0x265   : > { %v15381_v14 = vcombine.low %v1268_v1, %v1275_v44  ;;  %v15383_v53 = vcombine.high %v1268_v1, %v1275_v44  ;;  %v19308_v25 = vrot.slane %v15385_v15, %v16745_v33  ;;  %v19311_v11 = vrot.slane %v15387_v29, %v16745_v33 }
 0x266   : > { %v1668_v8 = vcombine.low %v18747_v6, %v1619_v21  ;;  %v1669_v58 = vcombine.high %v18747_v6, %v1619_v21  ;;  %v19316_v30 = vrot.slane %v15389_v57, %v16745_v33  ;;  %v19319_v54 = vrot.slane %v15391_v31, %v16745_v33 }
 0x267   : > { %v1516_v12 = vcombine.low %v18752_v62, %v1476_v2  ;;  %v1517_v36 = vcombine.high %v18752_v62, %v1476_v2  ;;  %v1660_v15 = vrot.slane %v1652_v16, %v23420_v63  ;;  %v1667_v29 = vrot.slane %v1653_v3, %v23420_v63 }
 0x268   : > { %v1532_v61 = vcombine.low %v18755_v32, %v1483_v45  ;;  %v1533_v1 = vcombine.high %v18755_v32, %v1483_v45  ;;  %v19328_v6 = vrot.slane %v15377_v49, %v16745_v33  ;;  %v19331_v21 = vrot.slane %v15379_v43, %v16745_v33  ;;  %v23865_v32 = vld [vmem:[#allocation170_spill] sm:$0xff]  ;;  %v793_v49 = vpop.permute.xlu0 %792 }
 0x269   : > { %v19334_v57 = vrot.slane %v15381_v14, %v16745_v33  ;;  %v19337_v62 = vrot.slane %v15383_v53, %v16745_v33  ;;  %v1676_v31 = vrot.slane %v1668_v8, %v23420_v63  ;;  %v1683_v2 = vrot.slane %v1669_v58, %v23420_v63 }
 0x26a   : > { %v1876_v16 = vcombine.low %v23865_v32, %v795_v26  ;;  %v1524_v45 = vrot.slane %v1516_v12, %v23420_v63  ;;  %v1531_v43 = vrot.slane %v1517_v36, %v23420_v63  ;;  %v1877_v14 = vcombine.high %v23865_v32, %v795_v26 }
 0x26b   : > { %v15401_v53 = vcombine.low %v1660_v15, %v1667_v29  ;;  %v15403_v17 = vcombine.high %v1660_v15, %v1667_v29  ;;  %v1540_v44 = vrot.slane %v1532_v61, %v23420_v63  ;;  %v1547_v8 = vrot.slane %v1533_v1, %v23420_v63 }
 0x26c   : > { %v1740_v3 = vcombine.low %v23866_v20, %v793_v49  ;;  %v1741_v12 = vcombine.high %v23866_v20, %v793_v49  ;;  %v15405_v26 = vcombine.low %v1676_v31, %v1683_v2  ;;  %v15407_v32 = vcombine.high %v1676_v31, %v1683_v2 }
 0x26d   : > { %v1884_v15 = vrot.slane %v1876_v16, %v16745_v33  ;;  %v15393_v61 = vcombine.low %v1524_v45, %v1531_v43  ;;  %v15395_v1 = vcombine.high %v1524_v45, %v1531_v43  ;;  %v1891_v58 = vrot.slane %v1877_v14, %v16745_v33 }
 0x26e   : > { %v19364_v22 = vrot.slane %v15401_v53, %v16745_v33  ;;  %v19367_v19 = vrot.slane %v15403_v17, %v16745_v33  ;;  %v15397_v20 = vcombine.low %v1540_v44, %v1547_v8  ;;  %v15399_v49 = vcombine.high %v1540_v44, %v1547_v8 }
 0x26f   : > { %v1748_v16 = vrot.slane %v1740_v3, %v16745_v33  ;;  %v1755_v45 = vrot.slane %v1741_v12, %v16745_v33  ;;  %v19376_v43 = vrot.slane %v15405_v26, %v16745_v33  ;;  %v19379_v14 = vrot.slane %v15407_v32, %v16745_v33  ;;  %v797_v26 = vpop.permute.xlu0 %796 }
 0x270   : > { %23867 = vst [vmem:[#allocation136_spill] sm:$0xff] %v19364_v22  ;;  %23868 = vst [vmem:[#allocation170_spill] sm:$0xff] %v19367_v19  ;;  %v1924_v17 = vcombine.low %v18780_v10, %v1884_v15  ;;  %v1925_v44 = vcombine.high %v18780_v10, %v1884_v15  ;;  %v19384_v53 = vrot.slane %v15393_v61, %v16745_v33 }
 0x271   : > { %23869 = vst [vmem:[#allocation175_spill] sm:$0xff] %v19376_v43  ;;  %23870 = vst [vmem:[#allocation202_spill] sm:$0xff] %v19379_v14  ;;  %v19387_v8 = vrot.slane %v15395_v1, %v16745_v33  ;;  %v1940_v3 = vcombine.low %v18787_v42, %v1891_v58  ;;  %v1941_v12 = vcombine.high %v18787_v42, %v1891_v58  ;;  %v799_v58 = vpop.permute.xlu1 %798 }
 0x272   : > { %v19396_v2 = vrot.slane %v15397_v20, %v16745_v33  ;;  %v19399_v10 = vrot.slane %v15399_v49, %v16745_v33  ;;  %v1788_v15 = vcombine.low %v18790_v37, %v1748_v16  ;;  %v1789_v61 = vcombine.high %v18790_v37, %v1748_v16 }
 0x273   : > { %v1804_v1 = vcombine.low %v18803_v0, %v1755_v45  ;;  %v1805_v42 = vcombine.high %v18803_v0, %v1755_v45  ;;  %v1932_v20 = vrot.slane %v1924_v17, %v23420_v63  ;;  %v1939_v49 = vrot.slane %v1925_v44, %v23420_v63 }
 0x274   : > { %v1948_v16 = vrot.slane %v1940_v3, %v23420_v63  ;;  %v1955_v0 = vrot.slane %v1941_v12, %v23420_v63  ;;  %v2148_v17 = vcombine.low %v17981_v47, %v799_v58  ;;  %v2149_v44 = vcombine.high %v17981_v47, %v799_v58 }
 0x275   : > { %v1796_v31 = vrot.slane %v1788_v15, %v23420_v63  ;;  %v1803_v29 = vrot.slane %v1789_v61, %v23420_v63  ;;  %v1812_v37 = vrot.slane %v1804_v1, %v23420_v63  ;;  %v1819_v3 = vrot.slane %v1805_v42, %v23420_v63 }
 0x276   : > { %v15417_v12 = vcombine.low %v1932_v20, %v1939_v49  ;;  %v15419_v36 = vcombine.high %v1932_v20, %v1939_v49  ;;  %v23871_v45 = vcombine.low %v19256_v18, %v19259_v9  ;;  %v23872_v47 = vcombine.high %v19256_v18, %v19259_v9 }
 0x277   : > { %v15421_v4 = vcombine.low %v1948_v16, %v1955_v0  ;;  %v15423_v15 = vcombine.high %v1948_v16, %v1955_v0  ;;  %v2012_v61 = vcombine.low %v17991_v5, %v797_v26  ;;  %v2013_v1 = vcombine.high %v17991_v5, %v797_v26 }
 0x278   : > { %v5316_v32 = vrot.slane %v23871_v45, %v23420_v63  ;;  %v5323_v58 = vrot.slane %v23872_v47, %v23420_v63  ;;  %v2156_v42 = vrot.slane %v2148_v17, %v16745_v33  ;;  %v2163_v20 = vrot.slane %v2149_v44, %v16745_v33 }
 0x279   : > { %v15409_v43 = vcombine.low %v1796_v31, %v1803_v29  ;;  %v15411_v19 = vcombine.high %v1796_v31, %v1803_v29  ;;  %v15413_v45 = vcombine.low %v1812_v37, %v1819_v3  ;;  %v15415_v22 = vcombine.high %v1812_v37, %v1819_v3 }
 0x27a   : > { %v15620_v49 = vcombine.low %v5316_v32, %v5323_v58  ;;  %v15622_v14 = vcombine.high %v5316_v32, %v5323_v58  ;;  %v19440_v46 = vrot.slane %v15417_v12, %v16745_v33  ;;  %v19443_v18 = vrot.slane %v15419_v36, %v16745_v33 }
 0x27b   : > { %v19448_v26 = vrot.slane %v15421_v4, %v16745_v33  ;;  %v19451_v16 = vrot.slane %v15423_v15, %v16745_v33  ;;  %v2020_v29 = vrot.slane %v2012_v61, %v16745_v33  ;;  %v2027_v31 = vrot.slane %v2013_v1, %v16745_v33  ;;  %v803_v61 = vpop.permute.xlu1 %802 }
 0x27c   : > { %23873 = vst [vmem:[#allocation203_spill] sm:$0xff] %v19440_v46  ;;  %23874 = vst [vmem:[#allocation204_spill] sm:$0xff] %v19443_v18  ;;  %v9620_v9 = vrot.slane %v15620_v49, %v16745_v33  ;;  %v9636_v5 = vrot.slane %v15622_v14, %v16745_v33  ;;  %v23877_v36 = vcombine.low %v19266_v48, %v19269_v41  ;;  %v23880_v49 = vld [vmem:[#allocation110_spill] sm:$0xff]  ;;  %v23892_v18 = vld [vmem:[#allocation89_spill] sm:$0xff] }
 0x27d   : > { %23875 = vst [vmem:[#allocation205_spill] sm:$0xff] %v19448_v26  ;;  %23876 = vst [vmem:[#allocation206_spill] sm:$0xff] %v19451_v16  ;;  %v23878_v14 = vcombine.high %v19266_v48, %v19269_v41  ;;  %v19464_v17 = vrot.slane %v15409_v43, %v16745_v33  ;;  %v19467_v44 = vrot.slane %v15411_v19, %v16745_v33 }
 0x27e   : > { %v9677_v32 = vcombine.high %v9620_v9, %v9636_v5  ;;  %v9676_v37 = vcombine.low %v9620_v9, %v9636_v5  ;;  %v5348_v0 = vrot.slane %v23877_v36, %v23420_v63  ;;  %v19470_v3 = vrot.slane %v15413_v45, %v16745_v33 }
 0x27f   : > { %v5355_v4 = vrot.slane %v23878_v14, %v23420_v63  ;;  %v19473_v12 = vrot.slane %v15415_v22, %v16745_v33  ;;  %v2196_v19 = vcombine.low %v18810_v52, %v2156_v42  ;;  %v2197_v43 = vcombine.high %v18810_v52, %v2156_v42  ;;  %v801_v14 = vpop.permute.xlu0 %800 }
 0x280   : > { %v9691_v48 = vrot.slane %v9677_v32, %v23420_v63  ;;  %v19481_v41 = vrot.slane %v9676_v37, %v23420_v63  ;;  %v2212_v15 = vcombine.low %v18823_v13, %v2163_v20  ;;  %v2213_v22 = vcombine.high %v18823_v13, %v2163_v20 }
 0x281   : > { %v15621_v9 = vcombine.low %v5348_v0, %v5355_v4  ;;  %v15623_v5 = vcombine.high %v5348_v0, %v5355_v4  ;;  %v2060_v52 = vcombine.low %v18834_v23, %v2020_v29  ;;  %v2061_v42 = vcombine.high %v18834_v23, %v2020_v29  ;;  %v23881_v29 = vld [vmem:[#allocation88_spill] sm:$0xff] }
 0x282   : > { %23879 = vst [vmem:[#allocation207_spill] sm:$0xff] %v19481_v41  ;;  %v9710_v1 = vcombine.low %v18766_v59, %v9691_v48  ;;  %v9709_v45 = vcombine.high %v23880_v49, %v19481_v41  ;;  %v2076_v20 = vcombine.low %v18839_v34, %v2027_v31  ;;  %v2077_v36 = vcombine.high %v18839_v34, %v2027_v31  ;;  %v23883_v41 = vld [vmem:[#allocation111_spill] sm:$0xff] }
 0x283   : > { %v2204_v0 = vrot.slane %v2196_v19, %v23420_v63  ;;  %v2211_v4 = vrot.slane %v2197_v43, %v23420_v63  ;;  %v2220_v23 = vrot.slane %v2212_v15, %v23420_v63  ;;  %v2420_v37 = vcombine.low %v23881_v29, %v803_v61 }
 0x284   : > { %13937 = vrot.lane.b32.xlu1 %v9710_v1, %s23200_s3  ;;  %13933 = vrot.lane.b32.xlu0 %v9709_v45, %s23202_s4  ;;  %v2227_v32 = vrot.slane %v2213_v22, %v23420_v63  ;;  %v2421_v58 = vcombine.high %v23881_v29, %v803_v61  ;;  %v19509_v34 = vrot.slane %v15621_v9, %v16745_v33  ;;  %v23882_v45 = vld [vmem:[#allocation100_spill] sm:$0xff] }
 0x285   : > { %v19512_v31 = vrot.slane %v15623_v5, %v16745_v33  ;;  %v2068_v1 = vrot.slane %v2060_v52, %v23420_v63  ;;  %v2075_v19 = vrot.slane %v2061_v42, %v23420_v63  ;;  %v2284_v43 = vcombine.low %v23882_v45, %v801_v14 }
 0x286   : > { %v9711_v15 = vcombine.high %v18766_v59, %v9691_v48  ;;  %v2084_v47 = vrot.slane %v2076_v20, %v23420_v63  ;;  %v2091_v22 = vrot.slane %v2077_v36, %v23420_v63  ;;  %v2285_v61 = vcombine.high %v23882_v45, %v801_v14 }
 0x287   : > { %v9692_v9 = vcombine.low %v19509_v34, %v19512_v31  ;;  %v15433_v42 = vcombine.low %v2204_v0, %v2211_v4  ;;  %v2428_v29 = vrot.slane %v2420_v37, %v16745_v33  ;;  %v15435_v59 = vcombine.high %v2204_v0, %v2211_v4 }
 0x288   : > { %13941 = vrot.lane.b32.xlu0 %v9711_v15, %s23196_s5  ;;  %v15437_v48 = vcombine.low %v2220_v23, %v2227_v32  ;;  %v2435_v20 = vrot.slane %v2421_v58, %v16745_v33  ;;  %v15439_v45 = vcombine.high %v2220_v23, %v2227_v32  ;;  %v15425_v5 = vcombine.low %v2068_v1, %v2075_v19  ;;  %v23887_v23 = vld [vmem:[#allocation64_spill] sm:$0xff] }
 0x289   : > { %v9700_v36 = vrot.slane %v9692_v9, %v23420_v63  ;;  %v2292_v13 = vrot.slane %v2284_v43, %v16745_v33  ;;  %v15427_v52 = vcombine.high %v2068_v1, %v2075_v19  ;;  %v15429_v49 = vcombine.low %v2084_v47, %v2091_v22 }
 0x28a   : > { %v2299_v37 = vrot.slane %v2285_v61, %v16745_v33  ;;  %v19537_v0 = vrot.slane %v15433_v42, %v16745_v33  ;;  %v15431_v4 = vcombine.high %v2084_v47, %v2091_v22  ;;  %v2468_v58 = vcombine.low %v18846_v7, %v2428_v29 }
 0x28b   : > { %v9712_v16 = vcombine.low %v23883_v41, %v9700_v36  ;;  %v2469_v15 = vcombine.high %v18846_v7, %v2428_v29  ;;  %v19542_v9 = vrot.slane %v15435_v59, %v16745_v33  ;;  %v19545_v32 = vrot.slane %v15437_v48, %v16745_v33  ;;  %v23889_v7 = vld [vmem:[#allocation117_spill] sm:$0xff]  ;;  %v23890_v59 = vld [vmem:[#allocation66_spill] sm:$0xff] }
 0x28c   : > { %23884 = vst [vmem:[#allocation88_spill] sm:$0xff] %v19537_v0  ;;  %v2484_v1 = vcombine.low %v23887_v23, %v2435_v20  ;;  %v2485_v19 = vcombine.high %v23887_v23, %v2435_v20  ;;  %v19551_v43 = vrot.slane %v15439_v45, %v16745_v33  ;;  %v19554_v47 = vrot.slane %v15425_v5, %v16745_v33  ;;  %v807_v20 = vpop.permute.xlu1 %806 }
 0x28d   : > { %23885 = vst [vmem:[#allocation100_spill] sm:$0xff] %v19542_v9  ;;  %23886 = vst [vmem:[#allocation111_spill] sm:$0xff] %v19545_v32  ;;  %13945 = vrot.lane.b32.xlu1 %v9712_v16, %s23194_s12  ;;  %v2332_v22 = vcombine.low %v23889_v7, %v2292_v13  ;;  %v2333_v61 = vcombine.high %v23889_v7, %v2292_v13  ;;  %v19559_v42 = vrot.slane %v15427_v52, %v16745_v33 }
 0x28e   : > { %23888 = vst [vmem:[#allocation64_spill] sm:$0xff] %v19551_v43  ;;  %v19562_v29 = vrot.slane %v15429_v49, %v16745_v33  ;;  %v2348_v48 = vcombine.low %v23890_v59, %v2299_v37  ;;  %v2349_v16 = vcombine.high %v23890_v59, %v2299_v37  ;;  %v19567_v45 = vrot.slane %v15431_v4, %v16745_v33  ;;  %v23891_v59 = vld [vmem:[#allocation38_spill] sm:$0xff]  ;;  %v23893_v43 = vld [vmem:[#allocation112_spill] sm:$0xff] }
 0x28f   : > { %v2476_v5 = vrot.slane %v2468_v58, %v23420_v63  ;;  %v2483_v23 = vrot.slane %v2469_v15, %v23420_v63  ;;  %v9693_v13 = vcombine.high %v19509_v34, %v19512_v31  ;;  %v2492_v7 = vrot.slane %v2484_v1, %v23420_v63  ;;  %v805_v34 = vpop.permute.xlu0 %804 }
 0x290   : > { %v2499_v37 = vrot.slane %v2485_v19, %v23420_v63  ;;  %v2340_v58 = vrot.slane %v2332_v22, %v23420_v63  ;;  %v2347_v15 = vrot.slane %v2333_v61, %v23420_v63  ;;  %v2692_v14 = vcombine.low %v23891_v59, %v807_v20  ;;  %v23908_v61 = vld [vmem:[#allocation177_spill] sm:$0xff] }
 0x291   : > { %v2356_v52 = vrot.slane %v2348_v48, %v23420_v63  ;;  %v2363_v49 = vrot.slane %v2349_v16, %v23420_v63  ;;  %v2693_v1 = vcombine.high %v23891_v59, %v807_v20  ;;  %v15449_v19 = vcombine.low %v2476_v5, %v2483_v23  ;;  %v23899_v59 = vld [vmem:[#allocation26_spill] sm:$0xff] }
 0x292   : > { %v15451_v9 = vcombine.high %v2476_v5, %v2483_v23  ;;  %v9707_v4 = vrot.slane %v9693_v13, %v23420_v63  ;;  %v9713_v22 = vcombine.high %v23883_v41, %v9700_v36  ;;  %v15453_v0 = vcombine.low %v2492_v7, %v2499_v37 }
 0x293   : > { %v15455_v26 = vcombine.high %v2492_v7, %v2499_v37  ;;  %v2556_v46 = vcombine.low %v23892_v18, %v805_v34  ;;  %v15441_v31 = vcombine.low %v2340_v58, %v2347_v15  ;;  %v2700_v48 = vrot.slane %v2692_v14, %v16745_v33  ;;  %v809_v41 = vpop.permute.xlu0 %808 }
 0x294   : > { %v2557_v16 = vcombine.high %v23892_v18, %v805_v34  ;;  %v9714_v20 = vcombine.low %v23893_v43, %v9707_v4  ;;  %13949 = vrot.lane.b32.xlu0 %v9713_v22, %s23191_s13  ;;  %v15443_v36 = vcombine.high %v2340_v58, %v2347_v15  ;;  %v15445_v5 = vcombine.low %v2356_v52, %v2363_v49  ;;  %v23903_v22 = vld [vmem:[#allocation107_spill] sm:$0xff] }
 0x295   : > { %v15447_v23 = vcombine.high %v2356_v52, %v2363_v49  ;;  %v19601_v13 = vrot.slane %v15449_v19, %v16745_v33  ;;  %v19604_v7 = vrot.slane %v15451_v9, %v16745_v33  ;;  %v2707_v14 = vrot.slane %v2693_v1, %v16745_v33  ;;  %v23905_v9 = vld [vmem:[#allocation176_spill] sm:$0xff] }
 0x296   : > { %13953 = vrot.lane.b32.xlu1 %v9714_v20, %s23189_s15  ;;  %v9715_v18 = vcombine.high %v23893_v43, %v9707_v4  ;;  %v19612_v58 = vrot.slane %v15453_v0, %v16745_v33  ;;  %v19615_v52 = vrot.slane %v15455_v26, %v16745_v33  ;;  %v2564_v49 = vrot.slane %v2556_v46, %v16745_v33 }
 0x297   : > { %23894 = vst [vmem:[#allocation117_spill] sm:$0xff] %v19601_v13  ;;  %23895 = vst [vmem:[#allocation66_spill] sm:$0xff] %v19604_v7  ;;  %v19621_v15 = vrot.slane %v15441_v31, %v16745_v33  ;;  %v2740_v34 = vcombine.low %v23899_v59, %v2700_v48  ;;  %v2571_v43 = vrot.slane %v2557_v16, %v16745_v33  ;;  %v811_v31 = vpop.permute.xlu1 %810 }
 0x298   : > { %23896 = vst [vmem:[#allocation38_spill] sm:$0xff] %v19612_v58  ;;  %23897 = vst [vmem:[#allocation89_spill] sm:$0xff] %v19615_v52  ;;  %13957 = vrot.lane.b32.xlu0 %v9715_v18, %s23185_s17  ;;  %v19627_v0 = vrot.slane %v15443_v36, %v16745_v33  ;;  %v19630_v26 = vrot.slane %v15445_v5, %v16745_v33  ;;  %v19633_v46 = vrot.slane %v15447_v23, %v16745_v33  ;;  %v23904_v23 = vld [vmem:[#allocation108_spill] sm:$0xff] }
 0x299   : > { %23898 = vst [vmem:[#allocation112_spill] sm:$0xff] %v19621_v15  ;;  %v2741_v4 = vcombine.high %v23899_v59, %v2700_v48  ;;  %v2756_v16 = vcombine.low %v23903_v22, %v2707_v14  ;;  %v2757_v20 = vcombine.high %v23903_v22, %v2707_v14  ;;  %v2604_v18 = vcombine.low %v23904_v23, %v2564_v49 }
 0x29a   : > { %23900 = vst [vmem:[#allocation26_spill] sm:$0xff] %v19627_v0  ;;  %23901 = vst [vmem:[#allocation208_spill] sm:$0xff] %v19630_v26  ;;  %v2605_v48 = vcombine.high %v23904_v23, %v2564_v49  ;;  %v2748_v59 = vrot.slane %v2740_v34, %v23420_v63  ;;  %v2620_v1 = vcombine.low %v18917_v27, %v2571_v43 }
 0x29b   : > { %23902 = vst [vmem:[#allocation209_spill] sm:$0xff] %v19633_v46  ;;  %v2621_v19 = vcombine.high %v18917_v27, %v2571_v43  ;;  %v2964_v37 = vcombine.low %v23905_v9, %v811_v31  ;;  %v2755_v14 = vrot.slane %v2741_v4, %v23420_v63  ;;  %v2965_v22 = vcombine.high %v23905_v9, %v811_v31 }
 0x29c   : > { %v23906_v5 = vcombine.low %v19235_v24, %v19238_v39  ;;  %v23907_v49 = vcombine.high %v19235_v24, %v19238_v39  ;;  %v2764_v4 = vrot.slane %v2756_v16, %v23420_v63  ;;  %v2771_v9 = vrot.slane %v2757_v20, %v23420_v63 }
 0x29d   : > { %v2619_v23 = vrot.slane %v2605_v48, %v23420_v63  ;;  %v2828_v24 = vcombine.low %v23908_v61, %v809_v41  ;;  %v2635_v43 = vrot.slane %v2621_v19, %v23420_v63  ;;  %v2972_v16 = vrot.slane %v2964_v37, %v16745_v33  ;;  %v23909_v37 = vld [vmem:[#allocation67_spill] sm:$0xff] }
 0x29e   : > { %v5452_v36 = vrot.slane %v23906_v5, %v23420_v63  ;;  %v5459_v34 = vrot.slane %v23907_v49, %v23420_v63  ;;  %v2612_v5 = vrot.slane %v2604_v18, %v23420_v63  ;;  %v2628_v49 = vrot.slane %v2620_v1, %v23420_v63 }
 0x29f   : > { %v15465_v27 = vcombine.low %v2748_v59, %v2755_v14  ;;  %v2979_v20 = vrot.slane %v2965_v22, %v16745_v33  ;;  %v15467_v58 = vcombine.high %v2748_v59, %v2755_v14  ;;  %v15469_v18 = vcombine.low %v2764_v4, %v2771_v9 }
 0x2a0   : > { %v15628_v52 = vcombine.low %v5452_v36, %v5459_v34  ;;  %v15630_v31 = vcombine.high %v5452_v36, %v5459_v34  ;;  %v15471_v7 = vcombine.high %v2764_v4, %v2771_v9  ;;  %v2829_v48 = vcombine.high %v23908_v61, %v809_v41  ;;  %v23910_v36 = vld [vmem:[#allocation27_spill] sm:$0xff]  ;;  %v815_v9 = vpop.permute.xlu1 %814 }
 0x2a1   : > { %v15457_v13 = vcombine.low %v2612_v5, %v2619_v23  ;;  %v2836_v0 = vrot.slane %v2828_v24, %v16745_v33  ;;  %v15459_v19 = vcombine.high %v2612_v5, %v2619_v23  ;;  %v15461_v46 = vcombine.low %v2628_v49, %v2635_v43  ;;  %v23915_v5 = vld [vmem:[#allocation73_spill] sm:$0xff] }
 0x2a2   : > { %v9756_v39 = vrot.slane %v15628_v52, %v16745_v33  ;;  %v9772_v1 = vrot.slane %v15630_v31, %v16745_v33  ;;  %v3012_v26 = vcombine.low %v23909_v37, %v2972_v16  ;;  %v3013_v22 = vcombine.high %v23909_v37, %v2972_v16  ;;  %v23917_v37 = vld [vmem:[#allocation24_spill] sm:$0xff] }
 0x2a3   : > { %v15463_v15 = vcombine.high %v2628_v49, %v2635_v43  ;;  %v3028_v59 = vcombine.low %v23910_v36, %v2979_v20  ;;  %v3029_v14 = vcombine.high %v23910_v36, %v2979_v20  ;;  %v19688_v61 = vrot.slane %v15465_v27, %v16745_v33 }
 0x2a4   : > { %v9812_v34 = vcombine.low %v9756_v39, %v9772_v1  ;;  %v19691_v41 = vrot.slane %v15467_v58, %v16745_v33  ;;  %v19694_v52 = vrot.slane %v15469_v18, %v16745_v33  ;;  %v2843_v4 = vrot.slane %v2829_v48, %v16745_v33 }
 0x2a5   : > { %23911 = vst [vmem:[#allocation107_spill] sm:$0xff] %v19688_v61  ;;  %v19698_v31 = vrot.slane %v15471_v7, %v16745_v33  ;;  %v19701_v43 = vrot.slane %v15457_v13, %v16745_v33  ;;  %v2876_v23 = vcombine.low %v23915_v5, %v2836_v0  ;;  %v3020_v24 = vrot.slane %v3012_v26, %v23420_v63  ;;  %v23916_v7 = vld [vmem:[#allocation52_spill] sm:$0xff]  ;;  %v23918_v26 = vld [vmem:[#allocation119_spill] sm:$0xff]  ;;  %v23935_v61 = vld [vmem:[#allocation185_spill] sm:$0xff] }
 0x2a6   : > { %23912 = vst [vmem:[#allocation108_spill] sm:$0xff] %v19691_v41  ;;  %23913 = vst [vmem:[#allocation176_spill] sm:$0xff] %v19694_v52  ;;  %v9820_v27 = vrot.slane %v9812_v34, %v23420_v63  ;;  %v3027_v58 = vrot.slane %v3013_v22, %v23420_v63  ;;  %v2877_v49 = vcombine.high %v23915_v5, %v2836_v0 }
 0x2a7   : > { %23914 = vst [vmem:[#allocation177_spill] sm:$0xff] %v19698_v31  ;;  %v9813_v16 = vcombine.high %v9756_v39, %v9772_v1  ;;  %v3036_v20 = vrot.slane %v3028_v59, %v23420_v63  ;;  %v3043_v18 = vrot.slane %v3029_v14, %v23420_v63  ;;  %v3236_v48 = vcombine.low %v23916_v7, %v815_v9 }
 0x2a8   : > { %v9844_v13 = vcombine.low %v23917_v37, %v9820_v27  ;;  %v19713_v36 = vrot.slane %v15459_v19, %v16745_v33  ;;  %v19716_v34 = vrot.slane %v15461_v46, %v16745_v33  ;;  %v2892_v32 = vcombine.low %v23918_v26, %v2843_v4 }
 0x2a9   : > { %v2893_v22 = vcombine.high %v23918_v26, %v2843_v4  ;;  %v19725_v1 = vrot.slane %v15463_v15, %v16745_v33  ;;  %v3237_v59 = vcombine.high %v23916_v7, %v815_v9  ;;  %v15481_v46 = vcombine.low %v3020_v24, %v3027_v58  ;;  %v813_v4 = vpop.permute.xlu0 %812 }
 0x2aa   : > { %13961 = vrot.lane.b32.xlu1 %v9844_v13, %s23183_s20  ;;  %v2884_v19 = vrot.slane %v2876_v23, %v23420_v63  ;;  %v2891_v14 = vrot.slane %v2877_v49, %v23420_v63  ;;  %v19732_v5 = vrot.slane %v9813_v16, %v23420_v63  ;;  %v15483_v26 = vcombine.high %v3020_v24, %v3027_v58  ;;  %v23919_v13 = vld [vmem:[#allocation118_spill] sm:$0xff]  ;;  %v23920_v58 = vld [vmem:[#allocation40_spill] sm:$0xff] }
 0x2ab   : > { %v15485_v0 = vcombine.low %v3036_v20, %v3043_v18  ;;  %v3244_v39 = vrot.slane %v3236_v48, %v16745_v33  ;;  %v9845_v15 = vcombine.high %v23917_v37, %v9820_v27  ;;  %v15487_v41 = vcombine.high %v3036_v20, %v3043_v18 }
 0x2ac   : > { %v2900_v9 = vrot.slane %v2892_v32, %v23420_v63  ;;  %v2907_v7 = vrot.slane %v2893_v22, %v23420_v63  ;;  %v9846_v23 = vcombine.low %v23919_v13, %v19732_v5  ;;  %v3251_v24 = vrot.slane %v3237_v59, %v16745_v33  ;;  %v23923_v22 = vld [vmem:[#allocation121_spill] sm:$0xff] }
 0x2ad   : > { %v3100_v48 = vcombine.low %v23920_v58, %v813_v4  ;;  %13965 = vrot.lane.b32.xlu0 %v9845_v15, %s23179_s21  ;;  %v19750_v27 = vrot.slane %v15481_v46, %v16745_v33  ;;  %v15473_v20 = vcombine.low %v2884_v19, %v2891_v14  ;;  %v15475_v18 = vcombine.high %v2884_v19, %v2891_v14 }
 0x2ae   : > { %13969 = vrot.lane.b32.xlu1 %v9846_v23, %s23177_s22  ;;  %v19754_v37 = vrot.slane %v15483_v26, %v16745_v33  ;;  %v3284_v59 = vcombine.low %v23923_v22, %v3244_v39  ;;  %v3285_v16 = vcombine.high %v23923_v22, %v3244_v39  ;;  %v3101_v15 = vcombine.high %v23920_v58, %v813_v4  ;;  %v23926_v23 = vld [vmem:[#allocation130_spill] sm:$0xff] }
 0x2af   : > { %23921 = vst [vmem:[#allocation67_spill] sm:$0xff] %v19750_v27  ;;  %v19762_v46 = vrot.slane %v15485_v0, %v16745_v33  ;;  %v19765_v19 = vrot.slane %v15487_v41, %v16745_v33  ;;  %v15477_v14 = vcombine.low %v2900_v9, %v2907_v7  ;;  %v3300_v32 = vcombine.low %v23926_v23, %v3251_v24 }
 0x2b0   : > { %23922 = vst [vmem:[#allocation27_spill] sm:$0xff] %v19754_v37  ;;  %v3301_v31 = vcombine.high %v23926_v23, %v3251_v24  ;;  %v3108_v39 = vrot.slane %v3100_v48, %v16745_v33  ;;  %v19775_v58 = vrot.slane %v15473_v20, %v16745_v33  ;;  %v19778_v0 = vrot.slane %v15475_v18, %v16745_v33 }
 0x2b1   : > { %23924 = vst [vmem:[#allocation73_spill] sm:$0xff] %v19762_v46  ;;  %23925 = vst [vmem:[#allocation52_spill] sm:$0xff] %v19765_v19  ;;  %v15479_v41 = vcombine.high %v2900_v9, %v2907_v7  ;;  %v3292_v26 = vrot.slane %v3284_v59, %v23420_v63  ;;  %v3299_v49 = vrot.slane %v3285_v16, %v23420_v63  ;;  %v819_v7 = vpop.permute.xlu1 %818  ;;  %v23929_v16 = vld [vmem:[#allocation69_spill] sm:$0xff]  ;;  %v23932_v19 = vld [vmem:[#allocation28_spill] sm:$0xff] }
 0x2b2   : > { %23927 = vst [vmem:[#allocation24_spill] sm:$0xff] %v19775_v58  ;;  %23928 = vst [vmem:[#allocation119_spill] sm:$0xff] %v19778_v0  ;;  %v3115_v24 = vrot.slane %v3101_v15, %v16745_v33  ;;  %v19792_v9 = vrot.slane %v15477_v14, %v16745_v33  ;;  %v3308_v23 = vrot.slane %v3300_v32, %v23420_v63  ;;  %v817_v14 = vpop.permute.xlu0 %816 }
 0x2b3   : > { %v3315_v59 = vrot.slane %v3301_v31, %v23420_v63  ;;  %v3148_v22 = vcombine.low %v23929_v16, %v3108_v39  ;;  %v3149_v15 = vcombine.high %v23929_v16, %v3108_v39  ;;  %v19799_v48 = vrot.slane %v15479_v41, %v16745_v33  ;;  %v23933_v16 = vld [vmem:[#allocation180_spill] sm:$0xff] }
 0x2b4   : > { %v23931_v32 = vcombine.low %v19248_v56, %v19251_v38  ;;  %v15497_v31 = vcombine.low %v3292_v26, %v3299_v49  ;;  %v3164_v46 = vcombine.low %v23932_v19, %v3115_v24  ;;  %v3165_v39 = vcombine.high %v23932_v19, %v3115_v24 }
 0x2b5   : > { %23930 = vst [vmem:[#allocation118_spill] sm:$0xff] %v19799_v48  ;;  %v3508_v41 = vcombine.low %v23933_v16, %v819_v7  ;;  %v15499_v37 = vcombine.high %v3292_v26, %v3299_v49  ;;  %v3509_v27 = vcombine.high %v23933_v16, %v819_v7  ;;  %v23934_v18 = vcombine.high %v19248_v56, %v19251_v38 }
 0x2b6   : > { %v5484_v4 = vrot.slane %v23931_v32, %v23420_v63  ;;  %v9847_v0 = vcombine.high %v23919_v13, %v19732_v5  ;;  %v15501_v58 = vcombine.low %v3308_v23, %v3315_v59  ;;  %v3156_v32 = vrot.slane %v3148_v22, %v23420_v63 }
 0x2b7   : > { %v5491_v20 = vrot.slane %v23934_v18, %v23420_v63  ;;  %v3163_v52 = vrot.slane %v3149_v15, %v23420_v63  ;;  %v3372_v19 = vcombine.low %v23935_v61, %v817_v14  ;;  %v15503_v24 = vcombine.high %v3308_v23, %v3315_v59 }
 0x2b8   : > { %v3373_v49 = vcombine.high %v23935_v61, %v817_v14  ;;  %13973 = vrot.lane.b32.xlu0 %v9847_v0, %s23014_s23  ;;  %v19825_v56 = vrot.slane %v15497_v31, %v16745_v33  ;;  %v3172_v38 = vrot.slane %v3164_v46, %v23420_v63  ;;  %v3179_v5 = vrot.slane %v3165_v39, %v23420_v63  ;;  %v23941_v0 = vld [vmem:[#allocation96_spill] sm:$0xff]  ;;  %s23020_s23 = smov 28  }
 0x2b9   : > { %v15629_v26 = vcombine.low %v5484_v4, %v5491_v20  ;;  %v15631_v7 = vcombine.high %v5484_v4, %v5491_v20  ;;  %v3516_v13 = vrot.slane %v3508_v41, %v16745_v33  ;;  %v19831_v22 = vrot.slane %v15499_v37, %v16745_v33  ;;  %v823_v41 = vpop.permute.xlu1 %822  ;;  %v23943_v20 = vld [vmem:[#allocation106_spill] sm:$0xff] }
 0x2ba   : > { %23936 = vst [vmem:[#allocation40_spill] sm:$0xff] %v19825_v56  ;;  %v3523_v18 = vrot.slane %v3509_v27, %v16745_v33  ;;  %v15489_v46 = vcombine.low %v3156_v32, %v3163_v52  ;;  %v3380_v23 = vrot.slane %v3372_v19, %v16745_v33  ;;  %v19842_v59 = vrot.slane %v15501_v58, %v16745_v33  ;;  %v23960_v56 = vld [vmem:[#allocation98_spill] sm:$0xff] }
 0x2bb   : > { %23937 = vst [vmem:[#allocation121_spill] sm:$0xff] %v19831_v22  ;;  %v9763_v61 = vrot.slane %v15629_v26, %v16745_v33  ;;  %v9779_v4 = vrot.slane %v15631_v7, %v16745_v33  ;;  %v15491_v37 = vcombine.high %v3156_v32, %v3163_v52  ;;  %v3387_v15 = vrot.slane %v3373_v49, %v16745_v33  ;;  %v23942_v26 = vld [vmem:[#allocation68_spill] sm:$0xff] }
 0x2bc   : > { %23938 = vst [vmem:[#allocation130_spill] sm:$0xff] %v19842_v59  ;;  %v19846_v14 = vrot.slane %v15503_v24, %v16745_v33  ;;  %v15493_v31 = vcombine.low %v3172_v38, %v3179_v5  ;;  %v3556_v39 = vcombine.low %v19000_v35, %v3516_v13  ;;  %v3557_v16 = vcombine.high %v19000_v35, %v3516_v13  ;;  %v23940_v35 = vld [vmem:[#allocation133_spill] sm:$0xff] }
 0x2bd   : > { %v9828_v27 = vcombine.low %v9763_v61, %v9779_v4  ;;  %v15495_v19 = vcombine.high %v3172_v38, %v3179_v5  ;;  %v3572_v58 = vcombine.low %v19005_v40, %v3523_v18  ;;  %v3573_v32 = vcombine.high %v19005_v40, %v3523_v18  ;;  %v23948_v59 = vld [vmem:[#allocation65_spill] sm:$0xff] }
 0x2be   : > { %23939 = vst [vmem:[#allocation69_spill] sm:$0xff] %v19846_v14  ;;  %v3420_v49 = vcombine.low %v19008_v51, %v3380_v23  ;;  %v3421_v24 = vcombine.high %v19008_v51, %v3380_v23  ;;  %v9829_v7 = vcombine.high %v9763_v61, %v9779_v4  ;;  %v3436_v13 = vcombine.low %v23940_v35, %v3387_v15  ;;  %v821_v51 = vpop.permute.xlu0 %820 }
 0x2bf   : > { %v9836_v52 = vrot.slane %v9828_v27, %v23420_v63  ;;  %v3780_v48 = vcombine.low %v23941_v0, %v823_v41  ;;  %v19863_v5 = vrot.slane %v15489_v46, %v16745_v33  ;;  %v3564_v27 = vrot.slane %v3556_v39, %v23420_v63 }
 0x2c0   : > { %v3571_v40 = vrot.slane %v3557_v16, %v23420_v63  ;;  %v3437_v18 = vcombine.high %v23940_v35, %v3387_v15  ;;  %v19871_v61 = vrot.slane %v15491_v37, %v16745_v33  ;;  %v3580_v4 = vrot.slane %v3572_v58, %v23420_v63 }
 0x2c1   : > { %v9848_v38 = vcombine.low %v23942_v26, %v9836_v52  ;;  %v3781_v23 = vcombine.high %v23941_v0, %v823_v41  ;;  %v3587_v46 = vrot.slane %v3573_v32, %v23420_v63  ;;  %v3428_v39 = vrot.slane %v3420_v49, %v23420_v63 }
 0x2c2   : > { %v3435_v16 = vrot.slane %v3421_v24, %v23420_v63  ;;  %v9843_v15 = vrot.slane %v9829_v7, %v23420_v63  ;;  %v3444_v37 = vrot.slane %v3436_v13, %v23420_v63  ;;  %v3788_v58 = vrot.slane %v3780_v48, %v16745_v33 }
 0x2c3   : > { %13977 = vrot.lane.b32.xlu1 %v9848_v38, %s23012_s24  ;;  %v9849_v0 = vcombine.high %v23942_v26, %v9836_v52  ;;  %v15513_v41 = vcombine.low %v3564_v27, %v3571_v40  ;;  %v15515_v38 = vcombine.high %v3564_v27, %v3571_v40  ;;  %v3451_v32 = vrot.slane %v3437_v18, %v23420_v63  ;;  %s23058_s24 = smov 26   ;;  %v23945_v40 = vld [vmem:[#allocation42_spill] sm:$0xff] }
 0x2c4   : > { %v9850_v49 = vcombine.low %v23943_v20, %v9843_v15  ;;  %v19888_v24 = vrot.slane %v15493_v31, %v16745_v33  ;;  %v19891_v7 = vrot.slane %v15495_v19, %v16745_v33  ;;  %v3795_v48 = vrot.slane %v3781_v23, %v16745_v33 }
 0x2c5   : > { %13981 = vrot.lane.b32.xlu0 %v9849_v0, %s23058_s24  ;;  %v15517_v26 = vcombine.low %v3580_v4, %v3587_v46  ;;  %v15519_v52 = vcombine.high %v3580_v4, %v3587_v46  ;;  %v15505_v27 = vcombine.low %v3428_v39, %v3435_v16  ;;  %v3644_v18 = vcombine.low %v23945_v40, %v821_v51  ;;  %s23070_s24 = smov 38  }
 0x2c6   : > { %23944 = vst [vmem:[#allocation28_spill] sm:$0xff] %v19891_v7  ;;  %v15507_v31 = vcombine.high %v3428_v39, %v3435_v16  ;;  %v3828_v19 = vcombine.low %v19020_v60, %v3788_v58  ;;  %v3829_v35 = vcombine.high %v19020_v60, %v3788_v58  ;;  %v9851_v13 = vcombine.high %v23943_v20, %v9843_v15  ;;  %v23973_v7 = vld [vmem:[#allocation74_spill] sm:$0xff] }
 0x2c7   : > { %13985 = vrot.lane.b32.xlu1 %v9850_v49, %s23020_s23  ;;  %v19903_v23 = vrot.slane %v15513_v41, %v16745_v33  ;;  %v19906_v0 = vrot.slane %v15515_v38, %v16745_v33  ;;  %v15509_v4 = vcombine.low %v3444_v37, %v3451_v32  ;;  %v15511_v46 = vcombine.high %v3444_v37, %v3451_v32  ;;  %s23046_s23 = smov 30  }
 0x2c8   : > { %v3844_v49 = vcombine.low %v23948_v59, %v3795_v48  ;;  %v3845_v39 = vcombine.high %v23948_v59, %v3795_v48  ;;  %v3645_v16 = vcombine.high %v23945_v40, %v821_v51  ;;  %v19917_v20 = vrot.slane %v15517_v26, %v16745_v33  ;;  %v827_v40 = vpop.permute.xlu1 %826 }
 0x2c9   : > { %23946 = vst [vmem:[#allocation180_spill] sm:$0xff] %v19903_v23  ;;  %23947 = vst [vmem:[#allocation185_spill] sm:$0xff] %v19906_v0  ;;  %13989 = vrot.lane.b32.xlu0 %v9851_v13, %s23046_s23  ;;  %v19920_v15 = vrot.slane %v15519_v52, %v16745_v33  ;;  %v3652_v37 = vrot.slane %v3644_v18, %v16745_v33  ;;  %v19926_v59 = vrot.slane %v15505_v27, %v16745_v33  ;;  %v23958_v0 = vld [vmem:[#allocation97_spill] sm:$0xff]  ;;  %s23048_s23 = smov 32  }
 0x2ca   : > { %23949 = vst [vmem:[#allocation133_spill] sm:$0xff] %v19917_v20  ;;  %v3836_v51 = vrot.slane %v3828_v19, %v23420_v63  ;;  %v3843_v41 = vrot.slane %v3829_v35, %v23420_v63  ;;  %v19933_v32 = vrot.slane %v15507_v31, %v16745_v33  ;;  %v19936_v13 = vrot.slane %v15509_v4, %v16745_v33  ;;  %v23955_v31 = vld [vmem:[#allocation115_spill] sm:$0xff]  ;;  %v825_v4 = vpop.permute.xlu0 %824 }
 0x2cb   : > { %23950 = vst [vmem:[#allocation96_spill] sm:$0xff] %v19920_v15  ;;  %23951 = vst [vmem:[#allocation68_spill] sm:$0xff] %v19926_v59  ;;  %v19939_v48 = vrot.slane %v15511_v46, %v16745_v33  ;;  %v3852_v52 = vrot.slane %v3844_v49, %v23420_v63  ;;  %v3859_v27 = vrot.slane %v3845_v39, %v23420_v63  ;;  %v23966_v15 = vld [vmem:[#allocation31_spill] sm:$0xff] }
 0x2cc   : > { %23952 = vst [vmem:[#allocation106_spill] sm:$0xff] %v19933_v32  ;;  %23953 = vst [vmem:[#allocation42_spill] sm:$0xff] %v19936_v13  ;;  %v3659_v35 = vrot.slane %v3645_v16, %v16745_v33  ;;  %v3692_v19 = vcombine.low %v23955_v31, %v3652_v37  ;;  %v23956_v46 = vcombine.low %v19328_v6, %v19331_v21 }
 0x2cd   : > { %23954 = vst [vmem:[#allocation65_spill] sm:$0xff] %v19939_v48  ;;  %v23957_v49 = vcombine.high %v19328_v6, %v19331_v21  ;;  %v15529_v16 = vcombine.low %v3836_v51, %v3843_v41  ;;  %v15531_v58 = vcombine.high %v3836_v51, %v3843_v41  ;;  %v3693_v18 = vcombine.high %v23955_v31, %v3652_v37  ;;  %v23959_v21 = vld [vmem:[#allocation116_spill] sm:$0xff]  ;;  %v23967_v48 = vld [vmem:[#allocation125_spill] sm:$0xff] }
 0x2ce   : > { %v5588_v38 = vrot.slane %v23956_v46, %v23420_v63  ;;  %v4052_v46 = vcombine.low %v23958_v0, %v827_v40  ;;  %v4053_v23 = vcombine.high %v23958_v0, %v827_v40  ;;  %v15533_v22 = vcombine.low %v3852_v52, %v3859_v27 }
 0x2cf   : > { %v5595_v26 = vrot.slane %v23957_v49, %v23420_v63  ;;  %v15535_v6 = vcombine.high %v3852_v52, %v3859_v27  ;;  %v3708_v49 = vcombine.low %v23959_v21, %v3659_v35  ;;  %v3916_v39 = vcombine.low %v23960_v56, %v825_v4 }
 0x2d0   : > { %v3700_v51 = vrot.slane %v3692_v19, %v23420_v63  ;;  %v3917_v37 = vcombine.high %v23960_v56, %v825_v4  ;;  %v19971_v60 = vrot.slane %v15529_v16, %v16745_v33  ;;  %v19974_v14 = vrot.slane %v15531_v58, %v16745_v33 }
 0x2d1   : > { %v15636_v41 = vcombine.low %v5588_v38, %v5595_v26  ;;  %v15638_v31 = vcombine.high %v5588_v38, %v5595_v26  ;;  %v3707_v0 = vrot.slane %v3693_v18, %v23420_v63  ;;  %v3709_v52 = vcombine.high %v23959_v21, %v3659_v35  ;;  %v831_v35 = vpop.permute.xlu1 %830 }
 0x2d2   : > { %23961 = vst [vmem:[#allocation115_spill] sm:$0xff] %v19971_v60  ;;  %23962 = vst [vmem:[#allocation97_spill] sm:$0xff] %v19974_v14  ;;  %v4060_v40 = vrot.slane %v4052_v46, %v16745_v33  ;;  %v19984_v38 = vrot.slane %v15533_v22, %v16745_v33  ;;  %v19987_v26 = vrot.slane %v15535_v6, %v16745_v33  ;;  %v23968_v14 = vld [vmem:[#allocation126_spill] sm:$0xff]  ;;  %v23969_v60 = vld [vmem:[#allocation120_spill] sm:$0xff] }
 0x2d3   : > { %v9892_v19 = vrot.slane %v15636_v41, %v16745_v33  ;;  %v9908_v56 = vrot.slane %v15638_v31, %v16745_v33  ;;  %v4067_v58 = vrot.slane %v4053_v23, %v16745_v33  ;;  %v3924_v18 = vrot.slane %v3916_v39, %v16745_v33  ;;  %v23965_v31 = vld [vmem:[#allocation71_spill] sm:$0xff] }
 0x2d4   : > { %23963 = vst [vmem:[#allocation116_spill] sm:$0xff] %v19984_v38  ;;  %23964 = vst [vmem:[#allocation98_spill] sm:$0xff] %v19987_v26  ;;  %v3716_v4 = vrot.slane %v3708_v49, %v23420_v63  ;;  %v3931_v16 = vrot.slane %v3917_v37, %v16745_v33  ;;  %v3723_v6 = vrot.slane %v3709_v52, %v23420_v63  ;;  %v23970_v37 = vld [vmem:[#allocation99_spill] sm:$0xff] }
 0x2d5   : > { %v9948_v46 = vcombine.low %v9892_v19, %v9908_v56  ;;  %v15521_v41 = vcombine.low %v3700_v51, %v3707_v0  ;;  %v15523_v23 = vcombine.high %v3700_v51, %v3707_v0  ;;  %v4100_v39 = vcombine.low %v23965_v31, %v4060_v40 }
 0x2d6   : > { %v4101_v27 = vcombine.high %v23965_v31, %v4060_v40  ;;  %v4116_v20 = vcombine.low %v23966_v15, %v4067_v58  ;;  %v4117_v21 = vcombine.high %v23966_v15, %v4067_v58  ;;  %v3964_v22 = vcombine.low %v23967_v48, %v3924_v18 }
 0x2d7   : > { %v9956_v49 = vrot.slane %v9948_v46, %v23420_v63  ;;  %v3965_v52 = vcombine.high %v23967_v48, %v3924_v18  ;;  %v3980_v51 = vcombine.low %v23968_v14, %v3931_v16  ;;  %v3981_v0 = vcombine.high %v23968_v14, %v3931_v16 }
 0x2d8   : > { %v20013_v31 = vrot.slane %v15521_v41, %v16745_v33  ;;  %v15525_v46 = vcombine.low %v3716_v4, %v3723_v6  ;;  %v15527_v13 = vcombine.high %v3716_v4, %v3723_v6  ;;  %v4324_v32 = vcombine.low %v23970_v37, %v831_v35 }
 0x2d9   : > { %v9980_v40 = vcombine.low %v23969_v60, %v9956_v49  ;;  %v20017_v59 = vrot.slane %v15523_v23, %v16745_v33  ;;  %v4108_v15 = vrot.slane %v4100_v39, %v23420_v63  ;;  %v4115_v48 = vrot.slane %v4101_v27, %v23420_v63 }
 0x2da   : > { %v9981_v14 = vcombine.high %v23969_v60, %v9956_v49  ;;  %v4124_v18 = vrot.slane %v4116_v20, %v23420_v63  ;;  %v4131_v4 = vrot.slane %v4117_v21, %v23420_v63  ;;  %v4325_v16 = vcombine.high %v23970_v37, %v831_v35  ;;  %v829_v35 = vpop.permute.xlu0 %828 }
 0x2db   : > { %13993 = vrot.lane.b32.xlu1 %v9980_v40, %s23048_s23  ;;  %v3972_v6 = vrot.slane %v3964_v22, %v23420_v63  ;;  %v3979_v41 = vrot.slane %v3965_v52, %v23420_v63  ;;  %v3988_v27 = vrot.slane %v3980_v51, %v23420_v63  ;;  %v3995_v23 = vrot.slane %v3981_v0, %v23420_v63  ;;  %s23056_s23 = smov 34  }
 0x2dc   : > { %13997 = vrot.lane.b32.xlu0 %v9981_v14, %s23056_s23  ;;  %v20034_v60 = vrot.slane %v15525_v46, %v16745_v33  ;;  %v20037_v20 = vrot.slane %v15527_v13, %v16745_v33  ;;  %v4332_v21 = vrot.slane %v4324_v32, %v16745_v33  ;;  %v9949_v39 = vcombine.high %v9892_v19, %v9908_v56  ;;  %v23971_v32 = vld [vmem:[#allocation43_spill] sm:$0xff]  ;;  %s23072_s23 = smov 36  }
 0x2dd   : > { %v15545_v37 = vcombine.low %v4108_v15, %v4115_v48  ;;  %v15547_v52 = vcombine.high %v4108_v15, %v4115_v48  ;;  %v15549_v51 = vcombine.low %v4124_v18, %v4131_v4  ;;  %v15551_v0 = vcombine.high %v4124_v18, %v4131_v4  ;;  %v23972_v56 = vld [vmem:[#allocation139_spill] sm:$0xff] }
 0x2de   : > { %v4339_v40 = vrot.slane %v4325_v16, %v16745_v33  ;;  %v9963_v46 = vrot.slane %v9949_v39, %v23420_v63  ;;  %v15537_v13 = vcombine.low %v3972_v6, %v3979_v41  ;;  %v15539_v14 = vcombine.high %v3972_v6, %v3979_v41  ;;  %v23977_v41 = vld [vmem:[#allocation127_spill] sm:$0xff] }
 0x2df   : > { %v15541_v58 = vcombine.low %v3988_v27, %v3995_v23  ;;  %v4188_v26 = vcombine.low %v23971_v32, %v829_v35  ;;  %v15543_v19 = vcombine.high %v3988_v27, %v3995_v23  ;;  %v4372_v38 = vcombine.low %v23972_v56, %v4332_v21 }
 0x2e0   : > { %v4373_v22 = vcombine.high %v23972_v56, %v4332_v21  ;;  %v9982_v49 = vcombine.low %v23973_v7, %v9963_v46  ;;  %v20051_v15 = vrot.slane %v15545_v37, %v16745_v33  ;;  %v20054_v48 = vrot.slane %v15547_v52, %v16745_v33 }
 0x2e1   : > { %v4189_v18 = vcombine.high %v23971_v32, %v829_v35  ;;  %v9983_v4 = vcombine.high %v23973_v7, %v9963_v46  ;;  %v20059_v16 = vrot.slane %v15549_v51, %v16745_v33  ;;  %v20062_v6 = vrot.slane %v15551_v0, %v16745_v33 }
 0x2e2   : > { %23974 = vst [vmem:[#allocation71_spill] sm:$0xff] %v20054_v48  ;;  %v4388_v27 = vcombine.low %v23977_v41, %v4339_v40  ;;  %v4389_v23 = vcombine.high %v23977_v41, %v4339_v40  ;;  %14001 = vrot.lane.b32.xlu1 %v9982_v49, %s23072_s23  ;;  %v20070_v35 = vrot.slane %v15537_v13, %v16745_v33  ;;  %s23074_s23 = smov 42  }
 0x2e3   : > { %23975 = vst [vmem:[#allocation31_spill] sm:$0xff] %v20059_v16  ;;  %23976 = vst [vmem:[#allocation125_spill] sm:$0xff] %v20062_v6  ;;  %v20073_v7 = vrot.slane %v15539_v14, %v16745_v33  ;;  %v4196_v39 = vrot.slane %v4188_v26, %v16745_v33  ;;  %14005 = vrot.lane.b32.xlu0 %v9983_v4, %s23070_s24  ;;  %v20078_v37 = vrot.slane %v15541_v58, %v16745_v33  ;;  %v23979_v58 = vld [vmem:[#allocation140_spill] sm:$0xff]  ;;  %s23076_s24 = smov 40  }
 0x2e4   : > { %v20081_v52 = vrot.slane %v15543_v19, %v16745_v33  ;;  %v4380_v49 = vrot.slane %v4372_v38, %v23420_v63  ;;  %v4387_v51 = vrot.slane %v4373_v22, %v23420_v63  ;;  %v4203_v46 = vrot.slane %v4189_v18, %v16745_v33  ;;  %v23978_v19 = vld [vmem:[#allocation128_spill] sm:$0xff] }
 0x2e5   : > { %v4396_v38 = vrot.slane %v4388_v27, %v23420_v63  ;;  %v4403_v22 = vrot.slane %v4389_v23, %v23420_v63  ;;  %v4236_v56 = vcombine.low %v23978_v19, %v4196_v39  ;;  %v4237_v18 = vcombine.high %v23978_v19, %v4196_v39 }
 0x2e6   : > { %v15561_v13 = vcombine.low %v4380_v49, %v4387_v51  ;;  %v15563_v27 = vcombine.high %v4380_v49, %v4387_v51  ;;  %v4252_v23 = vcombine.low %v23979_v58, %v4203_v46  ;;  %v4253_v26 = vcombine.high %v23979_v58, %v4203_v46 }
 0x2e7   : > { %v23980_v40 = vcombine.low %v19334_v57, %v19337_v62  ;;  %v23981_v39 = vcombine.high %v19334_v57, %v19337_v62  ;;  %v15565_v4 = vcombine.low %v4396_v38, %v4403_v22  ;;  %v15567_v14 = vcombine.high %v4396_v38, %v4403_v22 }
 0x2e8   : > { %v23982_v49 = vcombine.low %v19308_v25, %v19311_v11  ;;  %v23983_v46 = vcombine.high %v19308_v25, %v19311_v11  ;;  %v4244_v41 = vrot.slane %v4236_v56, %v23420_v63  ;;  %v20129_v57 = vrot.slane %v15561_v13, %v16745_v33  ;;  %v835_v25 = vpop.permute.xlu1 %834 }
 0x2e9   : > { %v5620_v32 = vrot.slane %v23980_v40, %v23420_v63  ;;  %v5627_v19 = vrot.slane %v23981_v39, %v23420_v63  ;;  %v4251_v40 = vrot.slane %v4237_v18, %v23420_v63  ;;  %v20132_v62 = vrot.slane %v15563_v27, %v16745_v33 }
 0x2ea   : > { %v5724_v51 = vrot.slane %v23982_v49, %v23420_v63  ;;  %v5731_v58 = vrot.slane %v23983_v46, %v23420_v63  ;;  %23984 = vst [vmem:[#allocation126_spill] sm:$0xff] %v20129_v57  ;;  %v4260_v39 = vrot.slane %v4252_v23, %v23420_v63  ;;  %v4267_v49 = vrot.slane %v4253_v26, %v23420_v63  ;;  %v23992_v57 = vld [vmem:[#allocation191_spill] sm:$0xff] }
 0x2eb   : > { %v15637_v0 = vcombine.low %v5620_v32, %v5627_v19  ;;  %v15639_v21 = vcombine.high %v5620_v32, %v5627_v19  ;;  %23985 = vst [vmem:[#allocation120_spill] sm:$0xff] %v20132_v62  ;;  %v20139_v18 = vrot.slane %v15565_v4, %v16745_v33  ;;  %v20142_v13 = vrot.slane %v15567_v14, %v16745_v33  ;;  %v23991_v14 = vld [vmem:[#allocation122_spill] sm:$0xff] }
 0x2ec   : > { %v15644_v38 = vcombine.low %v5724_v51, %v5731_v58  ;;  %v15646_v22 = vcombine.high %v5724_v51, %v5731_v58  ;;  %v23988_v32 = vcombine.low %v19316_v30, %v19319_v54  ;;  %v23989_v26 = vcombine.high %v19316_v30, %v19319_v54  ;;  %v23990_v58 = vld [vmem:[#allocation190_spill] sm:$0xff]  ;;  %v833_v54 = vpop.permute.xlu0 %832 }
 0x2ed   : > { %v9899_v11 = vrot.slane %v15637_v0, %v16745_v33  ;;  %v9915_v56 = vrot.slane %v15639_v21, %v16745_v33  ;;  %23986 = vst [vmem:[#allocation99_spill] sm:$0xff] %v20139_v18  ;;  %23987 = vst [vmem:[#allocation43_spill] sm:$0xff] %v20142_v13  ;;  %v15553_v46 = vcombine.low %v4244_v41, %v4251_v40 }
 0x2ee   : > { %v5756_v27 = vrot.slane %v23988_v32, %v23420_v63  ;;  %v5763_v23 = vrot.slane %v23989_v26, %v23420_v63  ;;  %v10028_v21 = vrot.slane %v15644_v38, %v16745_v33  ;;  %v10044_v4 = vrot.slane %v15646_v22, %v16745_v33 }
 0x2ef   : > { %v9964_v19 = vcombine.low %v9899_v11, %v9915_v56  ;;  %v9965_v0 = vcombine.high %v9899_v11, %v9915_v56  ;;  %v4596_v32 = vcombine.low %v23990_v58, %v835_v25  ;;  %v15555_v6 = vcombine.high %v4244_v41, %v4251_v40 }
 0x2f0   : > { %v15557_v16 = vcombine.low %v4260_v39, %v4267_v49  ;;  %v4597_v30 = vcombine.high %v23990_v58, %v835_v25  ;;  %v15645_v56 = vcombine.low %v5756_v27, %v5763_v23  ;;  %v15647_v26 = vcombine.high %v5756_v27, %v5763_v23 }
 0x2f1   : > { %v9972_v11 = vrot.slane %v9964_v19, %v23420_v63  ;;  %v9979_v41 = vrot.slane %v9965_v0, %v23420_v63  ;;  %v10084_v40 = vcombine.low %v10028_v21, %v10044_v4  ;;  %v20169_v25 = vrot.slane %v15553_v46, %v16745_v33  ;;  %v23997_v46 = vld [vmem:[#allocation129_spill] sm:$0xff] }
 0x2f2   : > { %v15559_v58 = vcombine.high %v4260_v39, %v4267_v49  ;;  %v4604_v19 = vrot.slane %v4596_v32, %v16745_v33  ;;  %v4460_v38 = vcombine.low %v23992_v57, %v833_v54  ;;  %v20174_v48 = vrot.slane %v15555_v6, %v16745_v33 }
 0x2f3   : > { %v9984_v51 = vcombine.low %v23991_v14, %v9972_v11  ;;  %v9985_v62 = vcombine.high %v23991_v14, %v9972_v11  ;;  %v20177_v27 = vrot.slane %v15557_v16, %v16745_v33  ;;  %v4611_v23 = vrot.slane %v4597_v30, %v16745_v33 }
 0x2f4   : > { %23993 = vst [vmem:[#allocation139_spill] sm:$0xff] %v20174_v48  ;;  %v10085_v0 = vcombine.high %v10028_v21, %v10044_v4  ;;  %v10035_v39 = vrot.slane %v15645_v56, %v16745_v33  ;;  %v23995_v49 = vcombine.low %v19384_v53, %v19387_v8  ;;  %v23996_v16 = vcombine.high %v19384_v53, %v19387_v8 }
 0x2f5   : > { %23994 = vst [vmem:[#allocation74_spill] sm:$0xff] %v20177_v27  ;;  %14009 = vrot.lane.b32.xlu1 %v9984_v51, %s23076_s24  ;;  %14013 = vrot.lane.b32.xlu0 %v9985_v62, %s23074_s23  ;;  %v9986_v32 = vcombine.low %v23997_v46, %v9979_v41  ;;  %v9987_v51 = vcombine.high %v23997_v46, %v9979_v41  ;;  %s23080_s23 = smov 44   ;;  %s23078_s24 = smov 46  }
 0x2f6   : > { %v5860_v6 = vrot.slane %v23995_v49, %v23420_v63  ;;  %v5867_v14 = vrot.slane %v23996_v16, %v23420_v63  ;;  %v10092_v30 = vrot.slane %v10084_v40, %v23420_v63  ;;  %v10051_v62 = vrot.slane %v15647_v26, %v16745_v33 }
 0x2f7   : > { %v20196_v21 = vrot.slane %v15559_v58, %v16745_v33  ;;  %v4644_v4 = vcombine.low %v19135_v55, %v4604_v19  ;;  %v4461_v11 = vcombine.high %v23992_v57, %v833_v54  ;;  %v4468_v56 = vrot.slane %v4460_v38, %v16745_v33  ;;  %v23999_v38 = vld [vmem:[#allocation25_spill] sm:$0xff] }
 0x2f8   : > { %v4645_v53 = vcombine.high %v19135_v55, %v4604_v19  ;;  %v4660_v8 = vcombine.low %v19142_v28, %v4611_v23  ;;  %v4661_v49 = vcombine.high %v19142_v28, %v4611_v23  ;;  %v10099_v41 = vrot.slane %v10085_v0, %v23420_v63  ;;  %v24018_v55 = vld [vmem:[#allocation45_spill] sm:$0xff] }
 0x2f9   : > { %23998 = vst [vmem:[#allocation127_spill] sm:$0xff] %v20196_v21  ;;  %14017 = vrot.lane.b32.xlu1 %v9986_v32, %s23080_s23  ;;  %14021 = vrot.lane.b32.xlu0 %v9987_v51, %s23078_s24  ;;  %v15652_v57 = vcombine.low %v5860_v6, %v5867_v14  ;;  %v15654_v54 = vcombine.high %v5860_v6, %v5867_v14  ;;  %s23084_s24 = smov 48   ;;  %s23082_s23 = smov 50   ;;  %v24000_v32 = vld [vmem:[#allocation134_spill] sm:$0xff] }
 0x2fa   : > { %v10116_v40 = vcombine.low %v23999_v38, %v10092_v30  ;;  %v10117_v28 = vcombine.high %v23999_v38, %v10092_v30  ;;  %v10100_v58 = vcombine.low %v10035_v39, %v10051_v62  ;;  %v4652_v19 = vrot.slane %v4644_v4, %v23420_v63 }
 0x2fb   : > { %v4475_v23 = vrot.slane %v4461_v11, %v16745_v33  ;;  %v4508_v16 = vcombine.low %v19149_v50, %v4468_v56  ;;  %v4509_v46 = vcombine.high %v19149_v50, %v4468_v56  ;;  %v4659_v0 = vrot.slane %v4645_v53, %v23420_v63 }
 0x2fc   : > { %v4668_v6 = vrot.slane %v4660_v8, %v23420_v63  ;;  %v4675_v14 = vrot.slane %v4661_v49, %v23420_v63  ;;  %v10118_v51 = vcombine.low %v24000_v32, %v10099_v41  ;;  %v10101_v30 = vcombine.high %v10035_v39, %v10051_v62 }
 0x2fd   : > { %14025 = vrot.lane.b32.xlu1 %v10116_v40, %s23084_s24  ;;  %14029 = vrot.lane.b32.xlu0 %v10117_v28, %s23082_s23  ;;  %v10164_v4 = vrot.slane %v15652_v57, %v16745_v33  ;;  %v10180_v11 = vrot.slane %v15654_v54, %v16745_v33  ;;  %v10119_v50 = vcombine.high %v24000_v32, %v10099_v41  ;;  %v24003_v41 = vld [vmem:[#allocation75_spill] sm:$0xff]  ;;  %s23088_s23 = smov 52   ;;  %s23086_s24 = smov 54  }
 0x2fe   : > { %v10108_v56 = vrot.slane %v10100_v58, %v23420_v63  ;;  %v24001_v53 = vcombine.low %v19396_v2, %v19399_v10  ;;  %v24002_v49 = vcombine.high %v19396_v2, %v19399_v10  ;;  %v4516_v62 = vrot.slane %v4508_v16, %v23420_v63 }
 0x2ff   : > { %v4523_v57 = vrot.slane %v4509_v46, %v23420_v63  ;;  %v4524_v54 = vcombine.low %v24003_v41, %v4475_v23  ;;  %v15577_v40 = vcombine.low %v4652_v19, %v4659_v0  ;;  %v15579_v28 = vcombine.high %v4652_v19, %v4659_v0  ;;  %v24004_v46 = vld [vmem:[#allocation30_spill] sm:$0xff] }
 0x300   : > { %v5892_v8 = vrot.slane %v24001_v53, %v23420_v63  ;;  %v5899_v38 = vrot.slane %v24002_v49, %v23420_v63  ;;  %v4525_v58 = vcombine.high %v24003_v41, %v4475_v23  ;;  %v15581_v10 = vcombine.low %v4668_v6, %v4675_v14 }
 0x301   : > { %14033 = vrot.lane.b32.xlu1 %v10118_v51, %s23088_s23  ;;  %14037 = vrot.lane.b32.xlu0 %v10119_v50, %s23086_s24  ;;  %v10115_v16 = vrot.slane %v10101_v30, %v23420_v63  ;;  %v10220_v32 = vcombine.low %v10164_v4, %v10180_v11  ;;  %v10120_v53 = vcombine.low %v24004_v46, %v10108_v56  ;;  %s23092_s24 = smov 56   ;;  %s23090_s23 = smov 58  }
 0x302   : > { %v10121_v49 = vcombine.high %v24004_v46, %v10108_v56  ;;  %v15653_v19 = vcombine.low %v5892_v8, %v5899_v38  ;;  %v15655_v0 = vcombine.high %v5892_v8, %v5899_v38  ;;  %v15583_v23 = vcombine.high %v4668_v6, %v4675_v14  ;;  %v839_v56 = vpop.permute.xlu1 %838  ;;  %v24007_v6 = vld [vmem:[#allocation72_spill] sm:$0xff] }
 0x303   : > { %v4532_v41 = vrot.slane %v4524_v54, %v23420_v63  ;;  %v15569_v51 = vcombine.low %v4516_v62, %v4523_v57  ;;  %v15571_v22 = vcombine.high %v4516_v62, %v4523_v57  ;;  %v20250_v50 = vrot.slane %v15577_v40, %v16745_v33  ;;  %v24008_v62 = vld [vmem:[#allocation136_spill] sm:$0xff]  ;;  %v24009_v57 = vld [vmem:[#allocation170_spill] sm:$0xff] }
 0x304   : > { %v20253_v2 = vrot.slane %v15579_v28, %v16745_v33  ;;  %v4539_v30 = vrot.slane %v4525_v58, %v23420_v63  ;;  %v10122_v14 = vcombine.low %v24007_v6, %v10115_v16  ;;  %v10228_v8 = vrot.slane %v10220_v32, %v23420_v63 }
 0x305   : > { %24005 = vst [vmem:[#allocation128_spill] sm:$0xff] %v20250_v50  ;;  %14041 = vrot.lane.b32.xlu1 %v10120_v53, %s23092_s24  ;;  %14045 = vrot.lane.b32.xlu0 %v10121_v49, %s23090_s23  ;;  %v10221_v38 = vcombine.high %v10164_v4, %v10180_v11  ;;  %v24010_v54 = vcombine.low %v24008_v62, %v24009_v57  ;;  %s23096_s23 = smov 60   ;;  %s23094_s24 = smov 62  }
 0x306   : > { %24006 = vst [vmem:[#allocation140_spill] sm:$0xff] %v20253_v2  ;;  %v10123_v28 = vcombine.high %v24007_v6, %v10115_v16  ;;  %v10171_v58 = vrot.slane %v15653_v19, %v16745_v33  ;;  %v10187_v46 = vrot.slane %v15655_v0, %v16745_v33  ;;  %v24011_v53 = vcombine.high %v24008_v62, %v24009_v57  ;;  %v24016_v0 = vld [vmem:[#allocation44_spill] sm:$0xff]  ;;  %v24029_v2 = vld [vmem:[#allocation123_spill] sm:$0xff] }
 0x307   : > { %v5996_v40 = vrot.slane %v24010_v54, %v23420_v63  ;;  %v20272_v39 = vrot.slane %v15581_v10, %v16745_v33  ;;  %v20275_v4 = vrot.slane %v15583_v23, %v16745_v33  ;;  %v20278_v11 = vrot.slane %v15569_v51, %v16745_v33  ;;  %v837_v54 = vpop.permute.xlu0 %836  ;;  %v24017_v51 = vld [vmem:[#allocation149_spill] sm:$0xff] }
 0x308   : > { %v6003_v49 = vrot.slane %v24011_v53, %v23420_v63  ;;  %v20281_v16 = vrot.slane %v15571_v22, %v16745_v33  ;;  %v15573_v32 = vcombine.low %v4532_v41, %v4539_v30  ;;  %v15575_v19 = vcombine.high %v4532_v41, %v4539_v30 }
 0x309   : > { %24012 = vst [vmem:[#allocation190_spill] sm:$0xff] %v20272_v39  ;;  %24013 = vst [vmem:[#allocation122_spill] sm:$0xff] %v20275_v4  ;;  %v4868_v6 = vcombine.low %v24016_v0, %v839_v56  ;;  %14049 = vrot.lane.b32.xlu1 %v10122_v14, %s23096_s23  ;;  %14053 = vrot.lane.b32.xlu0 %v10123_v28, %s23094_s24  ;;  %v10252_v22 = vcombine.low %v24017_v51, %v10228_v8  ;;  %s23104_s24 = smov 64   ;;  %s23102_s23 = smov 66  }
 0x30a   : > { %24014 = vst [vmem:[#allocation191_spill] sm:$0xff] %v20278_v11  ;;  %24015 = vst [vmem:[#allocation129_spill] sm:$0xff] %v20281_v16  ;;  %v10235_v62 = vrot.slane %v10221_v38, %v23420_v63  ;;  %v10253_v41 = vcombine.high %v24017_v51, %v10228_v8  ;;  %v10236_v30 = vcombine.low %v10171_v58, %v10187_v46  ;;  %v24023_v51 = vld [vmem:[#allocation202_spill] sm:$0xff] }
 0x30b   : > { %v15660_v57 = vcombine.low %v5996_v40, %v6003_v49  ;;  %v15662_v53 = vcombine.high %v5996_v40, %v6003_v49  ;;  %v4869_v10 = vcombine.high %v24016_v0, %v839_v56  ;;  %v4732_v26 = vcombine.low %v24018_v55, %v837_v54  ;;  %v24021_v40 = vld [vmem:[#allocation150_spill] sm:$0xff]  ;;  %v24022_v0 = vld [vmem:[#allocation175_spill] sm:$0xff]  ;;  %v20461_v13 = vpop.permute.xlu0 %840 }
 0x30c   : > { %v20300_v23 = vrot.slane %v15573_v32, %v16745_v33  ;;  %v20303_v38 = vrot.slane %v15575_v19, %v16745_v33  ;;  %v4876_v8 = vrot.slane %v4868_v6, %v16745_v33  ;;  %v10254_v49 = vcombine.low %v24021_v40, %v10235_v62 }
 0x30d   : > { %14057 = vrot.lane.b32.xlu1 %v10252_v22, %s23104_s24  ;;  %14061 = vrot.lane.b32.xlu0 %v10253_v41, %s23102_s23  ;;  %v10255_v56 = vcombine.high %v24021_v40, %v10235_v62  ;;  %v24024_v32 = vcombine.low %v24022_v0, %v24023_v51  ;;  %v24025_v19 = vcombine.high %v24022_v0, %v24023_v51  ;;  %s23112_s23 = smov 68   ;;  %s23110_s24 = smov 70   ;;  %v24028_v0 = vld [vmem:[#allocation153_spill] sm:$0xff] }
 0x30e   : > { %24019 = vst [vmem:[#allocation25_spill] sm:$0xff] %v20300_v23  ;;  %24020 = vst [vmem:[#allocation134_spill] sm:$0xff] %v20303_v38  ;;  %v10244_v14 = vrot.slane %v10236_v30, %v23420_v63  ;;  %v10237_v22 = vcombine.high %v10171_v58, %v10187_v46  ;;  %v10300_v4 = vrot.slane %v15660_v57, %v16745_v33  ;;  %v24026_v58 = vld [vmem:[#allocation76_spill] sm:$0xff]  ;;  %v24027_v57 = vld [vmem:[#allocation77_spill] sm:$0xff] }
 0x30f   : > { %v6028_v28 = vrot.slane %v24024_v32, %v23420_v63  ;;  %v6035_v6 = vrot.slane %v24025_v19, %v23420_v63  ;;  %v10316_v41 = vrot.slane %v15662_v53, %v16745_v33  ;;  %v4883_v40 = vrot.slane %v4869_v10, %v16745_v33 }
 0x310   : > { %v4733_v39 = vcombine.high %v24018_v55, %v837_v54  ;;  %v4740_v32 = vrot.slane %v4732_v26, %v16745_v33  ;;  %v4916_v46 = vcombine.low %v24026_v58, %v4876_v8  ;;  %v4917_v55 = vcombine.high %v24026_v58, %v4876_v8  ;;  %v24032_v58 = vld [vmem:[#allocation32_spill] sm:$0xff] }
 0x311   : > { %14065 = vrot.lane.b32.xlu1 %v10254_v49, %s23112_s23  ;;  %14069 = vrot.lane.b32.xlu0 %v10255_v56, %s23110_s24  ;;  %v15661_v26 = vcombine.low %v6028_v28, %v6035_v6  ;;  %v15663_v54 = vcombine.high %v6028_v28, %v6035_v6  ;;  %v10256_v53 = vcombine.low %v24027_v57, %v10244_v14  ;;  %v20345_v28 = vpop.permute.xlu1 %842  ;;  %s23116_s24 = smov 72   ;;  %s23114_s23 = smov 74  }
 0x312   : > { %v10257_v51 = vcombine.high %v24027_v57, %v10244_v14  ;;  %v10251_v19 = vrot.slane %v10237_v22, %v23420_v63  ;;  %v10356_v30 = vcombine.low %v10300_v4, %v10316_v41  ;;  %v4932_v62 = vcombine.low %v24028_v0, %v4883_v40 }
 0x313   : > { %v4933_v49 = vcombine.high %v24028_v0, %v4883_v40  ;;  %v4747_v56 = vrot.slane %v4733_v39, %v16745_v33  ;;  %v4780_v50 = vcombine.low %v24029_v2, %v4740_v32  ;;  %v4924_v10 = vrot.slane %v4916_v46, %v23420_v63 }
 0x314   : > { %v4781_v8 = vcombine.high %v24029_v2, %v4740_v32  ;;  %v24030_v14 = vcombine.low %v19464_v17, %v19467_v44  ;;  %v10357_v39 = vcombine.high %v10300_v4, %v10316_v41  ;;  %v10307_v22 = vrot.slane %v15661_v26, %v16745_v33  ;;  %v24033_v41 = vld [vmem:[#allocation124_spill] sm:$0xff] }
 0x315   : > { %14073 = vrot.lane.b32.xlu1 %v10256_v53, %s23116_s24  ;;  %14077 = vrot.lane.b32.xlu0 %v10257_v51, %s23114_s23  ;;  %v10323_v40 = vrot.slane %v15663_v54, %v16745_v33  ;;  %v24031_v2 = vcombine.high %v19464_v17, %v19467_v44  ;;  %v4931_v0 = vrot.slane %v4917_v55, %v23420_v63  ;;  %v24034_v54 = vld [vmem:[#allocation196_spill] sm:$0xff]  ;;  %s23122_s23 = smov 76   ;;  %s23120_s24 = smov 78  }
 0x316   : > { %v6132_v6 = vrot.slane %v24030_v14, %v23420_v63  ;;  %v10258_v46 = vcombine.low %v24032_v58, %v10251_v19  ;;  %v10259_v57 = vcombine.high %v24032_v58, %v10251_v19  ;;  %v10364_v53 = vrot.slane %v10356_v30, %v23420_v63 }
 0x317   : > { %v6139_v32 = vrot.slane %v24031_v2, %v23420_v63  ;;  %v4940_v51 = vrot.slane %v4932_v62, %v23420_v63  ;;  %v4947_v4 = vrot.slane %v4933_v49, %v23420_v63  ;;  %v4796_v26 = vcombine.low %v24033_v41, %v4747_v56  ;;  %v24035_v2 = vld [vmem:[#allocation34_spill] sm:$0xff] }
 0x318   : > { %v20369_v17 = vrot.slane %v4780_v50, %v23420_v63  ;;  %v20372_v44 = vrot.slane %v4781_v8, %v23420_v63  ;;  %v4797_v55 = vcombine.high %v24033_v41, %v4747_v56  ;;  %v10371_v30 = vrot.slane %v10357_v39, %v23420_v63 }
 0x319   : > { %14081 = vrot.lane.b32.xlu1 %v10258_v46, %s23122_s23  ;;  %14085 = vrot.lane.b32.xlu0 %v10259_v57, %s23120_s24  ;;  %v10372_v19 = vcombine.low %v10307_v22, %v10323_v40  ;;  %v15668_v49 = vcombine.low %v6132_v6, %v6139_v32  ;;  %v15593_v50 = vcombine.low %v4924_v10, %v4931_v0  ;;  %s23130_s24 = smov 80   ;;  %s23128_s23 = smov 82  }
 0x31a   : > { %v10388_v58 = vcombine.low %v24035_v2, %v10364_v53  ;;  %v10389_v8 = vcombine.high %v24035_v2, %v10364_v53  ;;  %v15670_v14 = vcombine.high %v6132_v6, %v6139_v32  ;;  %v15595_v56 = vcombine.high %v4924_v10, %v4931_v0  ;;  %v24036_v53 = vld [vmem:[#allocation81_spill] sm:$0xff]  ;;  %v24037_v6 = vld [vmem:[#allocation80_spill] sm:$0xff]  ;;  %v24038_v32 = vld [vmem:[#allocation82_spill] sm:$0xff] }
 0x31b   : > { %v15597_v41 = vcombine.low %v4940_v51, %v4947_v4  ;;  %v15599_v38 = vcombine.high %v4940_v51, %v4947_v4  ;;  %v20383_v46 = vrot.slane %v4796_v26, %v23420_v63  ;;  %v20386_v57 = vrot.slane %v4797_v55, %v23420_v63 }
 0x31c   : > { %v15585_v39 = vcombine.low %v20369_v17, %v20372_v44  ;;  %v15666_v10 = vcombine.high %v24037_v6, %v24036_v53  ;;  %v10390_v0 = vcombine.low %v24038_v32, %v10371_v30  ;;  %v10380_v51 = vrot.slane %v10372_v19, %v23420_v63 }
 0x31d   : > { %14089 = vrot.lane.b32.xlu1 %v10388_v58, %s23130_s24  ;;  %14093 = vrot.lane.b32.xlu0 %v10389_v8, %s23128_s23  ;;  %v10373_v4 = vcombine.high %v10307_v22, %v10323_v40  ;;  %v10436_v26 = vrot.slane %v15668_v49, %v16745_v33  ;;  %v10391_v55 = vcombine.high %v24038_v32, %v10371_v30  ;;  %v24043_v40 = vld [vmem:[#allocation137_spill] sm:$0xff]  ;;  %v24044_v30 = vld [vmem:[#allocation138_spill] sm:$0xff]  ;;  %s23134_s23 = smov 84   ;;  %s23132_s24 = smov 86  }
 0x31e   : > { %v10452_v2 = vrot.slane %v15670_v14, %v16745_v33  ;;  %v24039_v58 = vcombine.low %v19470_v3, %v19473_v12  ;;  %v24040_v8 = vcombine.high %v19470_v3, %v19473_v12  ;;  %v20408_v16 = vrot.slane %v15593_v50, %v16745_v33 }
 0x31f   : > { %v20411_v22 = vrot.slane %v15595_v56, %v16745_v33  ;;  %v24045_v14 = vcombine.low %v24043_v40, %v24044_v30  ;;  %v24046_v49 = vcombine.high %v24043_v40, %v24044_v30  ;;  %v15587_v3 = vcombine.high %v20369_v17, %v20372_v44  ;;  %v24048_v17 = vld [vmem:[#allocation167_spill] sm:$0xff] }
 0x320   : > { %v6164_v62 = vrot.slane %v24039_v58, %v23420_v63  ;;  %v6171_v23 = vrot.slane %v24040_v8, %v23420_v63  ;;  %24041 = vst [vmem:[#allocation75_spill] sm:$0xff] %v20408_v16  ;;  %v24047_v12 = vcombine.low %v24037_v6, %v24036_v53  ;;  %v10420_v56 = vrot.slane %v15666_v10, %v16745_v33 }
 0x321   : > { %24042 = vst [vmem:[#allocation30_spill] sm:$0xff] %v20411_v22  ;;  %v6148_v19 = vrot.slane %v24045_v14, %v23420_v63  ;;  %v6155_v32 = vrot.slane %v24046_v49, %v23420_v63  ;;  %14097 = vrot.lane.b32.xlu1 %v10390_v0, %s23134_s23  ;;  %14101 = vrot.lane.b32.xlu0 %v10391_v55, %s23132_s24  ;;  %s23142_s24 = smov 88   ;;  %s23140_s23 = smov 90  }
 0x322   : > { %v10404_v50 = vrot.slane %v24047_v12, %v16745_v33  ;;  %v20431_v58 = vrot.slane %v15597_v41, %v16745_v33  ;;  %v20434_v8 = vrot.slane %v15599_v38, %v16745_v33  ;;  %v10392_v44 = vcombine.low %v24048_v17, %v10380_v51  ;;  %v24049_v41 = vld [vmem:[#allocation203_spill] sm:$0xff] }
 0x323   : > { %v10387_v0 = vrot.slane %v10373_v4, %v23420_v63  ;;  %v10393_v40 = vcombine.high %v24048_v17, %v10380_v51  ;;  %v10492_v55 = vcombine.low %v10436_v26, %v10452_v2  ;;  %v15669_v30 = vcombine.low %v6164_v62, %v6171_v23  ;;  %v24050_v4 = vld [vmem:[#allocation204_spill] sm:$0xff] }
 0x324   : > { %v15671_v14 = vcombine.high %v6164_v62, %v6171_v23  ;;  %v20440_v53 = vrot.slane %v15585_v39, %v16745_v33  ;;  %v10493_v6 = vcombine.high %v10436_v26, %v10452_v2  ;;  %v15665_v10 = vcombine.low %v6148_v19, %v6155_v32  ;;  %v24053_v39 = vld [vmem:[#allocation135_spill] sm:$0xff] }
 0x325   : > { %v15667_v49 = vcombine.high %v6148_v19, %v6155_v32  ;;  %14105 = vrot.lane.b32.xlu1 %v10392_v44, %s23142_s24  ;;  %14109 = vrot.lane.b32.xlu0 %v10393_v40, %s23140_s23  ;;  %v10460_v38 = vcombine.low %v10404_v50, %v10420_v56  ;;  %v24051_v51 = vcombine.low %v24049_v41, %v24050_v4  ;;  %v24054_v19 = vld [vmem:[#allocation70_spill] sm:$0xff]  ;;  %v24055_v32 = vld [vmem:[#allocation29_spill] sm:$0xff]  ;;  %s23148_s23 = smov 92   ;;  %s23146_s24 = smov 94  }
 0x326   : > { %v24052_v23 = vcombine.high %v24049_v41, %v24050_v4  ;;  %v10394_v26 = vcombine.low %v24053_v39, %v10387_v0  ;;  %v10461_v2 = vcombine.high %v10404_v50, %v10420_v56  ;;  %v24056_v17 = vcombine.low %v24054_v19, %v24055_v32  ;;  %v13934_v56 = vpop.permute.xlu0 %13933 }
 0x327   : > { %v6268_v12 = vrot.slane %v24051_v51, %v23420_v63  ;;  %v24057_v40 = vcombine.high %v24054_v19, %v24055_v32  ;;  %v10395_v51 = vcombine.high %v24053_v39, %v10387_v0  ;;  %v10500_v41 = vrot.slane %v10492_v55, %v23420_v63 }
 0x328   : > { %v6275_v62 = vrot.slane %v24052_v23, %v23420_v63  ;;  %v6252_v44 = vrot.slane %v24056_v17, %v23420_v63  ;;  %v10443_v4 = vrot.slane %v15669_v30, %v16745_v33  ;;  %v10459_v50 = vrot.slane %v15671_v14, %v16745_v33 }
 0x329   : > { %v6259_v11 = vrot.slane %v24057_v40, %v23420_v63  ;;  %v10507_v23 = vrot.slane %v10493_v6, %v23420_v63  ;;  %v10411_v17 = vrot.slane %v15665_v10, %v16745_v33  ;;  %v10427_v19 = vrot.slane %v15667_v49, %v16745_v33  ;;  %14113 = vrot.lane.b32.xlu1 %v10394_v26, %s23148_s23  ;;  %s23152_s23 = smov 98  }
 0x32a   : > { %14117 = vrot.lane.b32.xlu0 %v10395_v51, %s23146_s24  ;;  %v10468_v0 = vrot.slane %v10460_v38, %v23420_v63  ;;  %v15676_v55 = vcombine.low %v6268_v12, %v6275_v62  ;;  %v15678_v30 = vcombine.high %v6268_v12, %v6275_v62  ;;  %v10475_v39 = vrot.slane %v10461_v2, %v23420_v63  ;;  %s23154_s24 = smov 96  }
 0x32b   : > { %v15672_v6 = vcombine.low %v6252_v44, %v6259_v11  ;;  %v15674_v32 = vcombine.high %v6252_v44, %v6259_v11  ;;  %v10508_v26 = vcombine.low %v10443_v4, %v10459_v50  ;;  %v20481_v51 = vrot.slane %v15587_v3, %v16745_v33  ;;  %v24058_v3 = vld [vmem:[#allocation205_spill] sm:$0xff] }
 0x32c   : > { %v10524_v49 = vcombine.low %v10468_v0, %v10500_v41  ;;  %v10525_v40 = vcombine.high %v10468_v0, %v10500_v41  ;;  %v10526_v38 = vcombine.low %v10475_v39, %v10507_v23  ;;  %v10476_v18 = vcombine.low %v10411_v17, %v10427_v19  ;;  %v24059_v0 = vld [vmem:[#allocation206_spill] sm:$0xff] }
 0x32d   : > { %v10509_v12 = vcombine.high %v10443_v4, %v10459_v50  ;;  %v10477_v11 = vcombine.high %v10411_v17, %v10427_v19  ;;  %v10572_v62 = vrot.slane %v15676_v55, %v16745_v33  ;;  %v10588_v2 = vrot.slane %v15678_v30, %v16745_v33  ;;  %v24062_v19 = vld [vmem:[#allocation131_spill] sm:$0xff]  ;;  %v24063_v55 = vld [vmem:[#allocation132_spill] sm:$0xff] }
 0x32e   : > { %14121 = vrot.lane.b32.xlu1 %v10524_v49, %s23154_s24  ;;  %14125 = vrot.lane.b32.xlu0 %v10525_v40, %s23152_s23  ;;  %v10540_v44 = vrot.slane %v15672_v6, %v16745_v33  ;;  %v10556_v41 = vrot.slane %v15674_v32, %v16745_v33  ;;  %v24060_v10 = vcombine.low %v24058_v3, %v24059_v0  ;;  %s23166_s23 = smov 100   ;;  %s23164_s24 = smov 102  }
 0x32f   : > { %v24061_v50 = vcombine.high %v24058_v3, %v24059_v0  ;;  %v10527_v40 = vcombine.high %v10475_v39, %v10507_v23  ;;  %v10516_v17 = vrot.slane %v10508_v26, %v23420_v63  ;;  %v24064_v30 = vcombine.low %v24062_v19, %v24063_v55  ;;  %v13938_v26 = vpop.permute.xlu1 %13937  ;;  %v24066_v0 = vld [vmem:[#allocation207_spill] sm:$0xff] }
 0x330   : > { %v6300_v4 = vrot.slane %v24060_v10, %v23420_v63  ;;  %v24065_v32 = vcombine.high %v24062_v19, %v24063_v55  ;;  %v10484_v22 = vrot.slane %v10476_v18, %v23420_v63  ;;  %v10523_v3 = vrot.slane %v10509_v12, %v23420_v63  ;;  %v13942_v55 = vpop.permute.xlu0 %13941 }
 0x331   : > { %v6307_v49 = vrot.slane %v24061_v50, %v23420_v63  ;;  %v6284_v6 = vrot.slane %v24064_v30, %v23420_v63  ;;  %v10491_v23 = vrot.slane %v10477_v11, %v23420_v63  ;;  %v10628_v39 = vcombine.low %v10572_v62, %v10588_v2  ;;  %v24067_v50 = vld [vmem:[#allocation110_spill] sm:$0xff] }
 0x332   : > { %v6291_v14 = vrot.slane %v24065_v32, %v23420_v63  ;;  %14129 = vrot.lane.b32.xlu1 %v10526_v38, %s23166_s23  ;;  %14133 = vrot.lane.b32.xlu0 %v10527_v40, %s23164_s24  ;;  %v9708_v19 = vcombine.low %v24067_v50, %v24066_v0  ;;  %v10596_v30 = vcombine.low %v10540_v44, %v10556_v41  ;;  %s23170_s24 = smov 104   ;;  %s23168_s23 = smov 106  }
 0x333   : > { %v10597_v18 = vcombine.high %v10540_v44, %v10556_v41  ;;  %v15677_v32 = vcombine.low %v6300_v4, %v6307_v49  ;;  %v15679_v12 = vcombine.high %v6300_v4, %v6307_v49  ;;  %v10528_v10 = vcombine.low %v10484_v22, %v10516_v17  ;;  %v24070_v41 = vld [vmem:[#allocation145_spill] sm:$0xff] }
 0x334   : > { %v10529_v16 = vcombine.high %v10484_v22, %v10516_v17  ;;  %v15673_v21 = vcombine.low %v6284_v6, %v6291_v14  ;;  %v15675_v38 = vcombine.high %v6284_v6, %v6291_v14  ;;  %v10530_v27 = vcombine.low %v10491_v23, %v10523_v3 }
 0x335   : > { %v10531_v48 = vcombine.high %v10491_v23, %v10523_v3  ;;  %v10629_v40 = vcombine.high %v10572_v62, %v10588_v2  ;;  %v14941_v11 = vsel %vm14940_vm0, %v9708_v19, %v13934_v56  ;;  %v10636_v0 = vrot.slane %v10628_v39, %v23420_v63  ;;  %v13946_v23 = vpop.permute.xlu1 %13945  ;;  %v13950_v39 = vpop.permute.xlu0 %13949 }
 0x336   : > { %14137 = vrot.lane.b32.xlu1 %v10528_v10, %s23170_s24  ;;  %14141 = vrot.lane.b32.xlu0 %v10529_v16, %s23168_s23  ;;  %v24068_v22 = vcombine.low %v19554_v47, %v19559_v42  ;;  %v24069_v14 = vcombine.high %v19554_v47, %v19559_v42  ;;  %v10579_v56 = vrot.slane %v15677_v32, %v16745_v33  ;;  %v24071_v16 = vld [vmem:[#allocation146_spill] sm:$0xff]  ;;  %s23230_s23 = smov 108   ;;  %s23172_s24 = smov 110  }
 0x337   : > { %v10595_v2 = vrot.slane %v15679_v12, %v16745_v33  ;;  %v24072_v4 = vcombine.low %v24070_v41, %v24071_v16  ;;  %v24073_v17 = vcombine.high %v24070_v41, %v24071_v16  ;;  %v10604_v10 = vrot.slane %v10596_v30, %v23420_v63 }
 0x338   : > { %v6404_v44 = vrot.slane %v24068_v22, %v23420_v63  ;;  %v6411_v62 = vrot.slane %v24069_v14, %v23420_v63  ;;  %v14943_v3 = vsel %vm14942_vm1, %v14941_v11, %v13938_v26  ;;  %v10547_v47 = vrot.slane %v15673_v21, %v16745_v33 }
 0x339   : > { %v6388_v49 = vrot.slane %v24072_v4, %v23420_v63  ;;  %v6395_v6 = vrot.slane %v24073_v17, %v23420_v63  ;;  %v10563_v42 = vrot.slane %v15675_v38, %v16745_v33  ;;  %v10611_v50 = vrot.slane %v10597_v18, %v23420_v63  ;;  %v13954_v17 = vpop.permute.xlu1 %13953 }
 0x33a   : > { %v10643_v19 = vrot.slane %v10629_v40, %v23420_v63  ;;  %v14945_v32 = vsel %vm14944_vm2, %v14943_v3, %v13942_v55  ;;  %14145 = vrot.lane.b32.xlu1 %v10530_v27, %s23230_s23  ;;  %14149 = vrot.lane.b32.xlu0 %v10531_v48, %s23172_s24  ;;  %v10660_v26 = vcombine.low %v10604_v10, %v10636_v0  ;;  %s23227_s24 = smov 112   ;;  %s24164_s23 = smov 58  }
 0x33b   : > { %v15684_v21 = vcombine.low %v6404_v44, %v6411_v62  ;;  %v15686_v30 = vcombine.high %v6404_v44, %v6411_v62  ;;  %v10661_v12 = vcombine.high %v10604_v10, %v10636_v0  ;;  %v10644_v38 = vcombine.low %v10579_v56, %v10595_v2  ;;  %v24076_v44 = vld [vmem:[#allocation147_spill] sm:$0xff]  ;;  %v24077_v62 = vld [vmem:[#allocation148_spill] sm:$0xff] }
 0x33c   : > { %v15680_v11 = vcombine.low %v6388_v49, %v6395_v6  ;;  %v15682_v22 = vcombine.high %v6388_v49, %v6395_v6  ;;  %v10612_v18 = vcombine.low %v10547_v47, %v10563_v42  ;;  %v14947_v40 = vsel %vm14946_vm3, %v14945_v32, %v13946_v23 }
 0x33d   : > { %v24074_v55 = vcombine.low %v19562_v29, %v19567_v45  ;;  %v24075_v48 = vcombine.high %v19562_v29, %v19567_v45  ;;  %v10613_v41 = vcombine.high %v10547_v47, %v10563_v42  ;;  %v10645_v16 = vcombine.high %v10579_v56, %v10595_v2  ;;  %v13958_v45 = vpop.permute.xlu0 %13957 }
 0x33e   : > { %v14949_v0 = vsel %vm14948_vm4, %v14947_v40, %v13950_v39  ;;  %v24078_v4 = vcombine.low %v24076_v44, %v24077_v62  ;;  %14153 = vrot.lane.b32.xlu1 %v10660_v26, %s23227_s24  ;;  %14157 = vrot.lane.b32.xlu0 %v10661_v12, %s23225_s2  ;;  %v10708_v6 = vrot.slane %v15684_v21, %v16745_v33  ;;  %s24158_s2 = smov 54   ;;  %s24159_s24 = smov 56  }
 0x33f   : > { %v6436_v14 = vrot.slane %v24074_v55, %v23420_v63  ;;  %v6443_v27 = vrot.slane %v24075_v48, %v23420_v63  ;;  %v10724_v29 = vrot.slane %v15686_v30, %v16745_v33  ;;  %v24079_v56 = vcombine.high %v24076_v44, %v24077_v62 }
 0x340   : > { %v6420_v49 = vrot.slane %v24078_v4, %v23420_v63  ;;  %v10652_v10 = vrot.slane %v10644_v38, %v23420_v63  ;;  %v10676_v3 = vrot.slane %v15680_v11, %v16745_v33  ;;  %v10692_v47 = vrot.slane %v15682_v22, %v16745_v33 }
 0x341   : > { %v6427_v2 = vrot.slane %v24079_v56, %v23420_v63  ;;  %v10662_v42 = vcombine.low %v10611_v50, %v10643_v19  ;;  %v10663_v23 = vcombine.high %v10611_v50, %v10643_v19  ;;  %v15685_v39 = vcombine.low %v6436_v14, %v6443_v27 }
 0x342   : > { %v15687_v32 = vcombine.high %v6436_v14, %v6443_v27  ;;  %v10620_v26 = vrot.slane %v10612_v18, %v23420_v63  ;;  %v10627_v21 = vrot.slane %v10613_v41, %v23420_v63  ;;  %v10659_v30 = vrot.slane %v10645_v16, %v23420_v63  ;;  %v13962_v14 = vpop.permute.xlu1 %13961  ;;  %v13966_v18 = vpop.permute.xlu0 %13965  ;;  %v24080_v41 = vld [vmem:[#allocation88_spill] sm:$0xff] }
 0x343   : > { %v14951_v12 = vsel %vm14950_vm5, %v14949_v0, %v13954_v17  ;;  %14161 = vrot.lane.b32.xlu1 %v10662_v42, %s23221_s30  ;;  %14165 = vrot.lane.b32.xlu0 %v10663_v23, %s23219_s29  ;;  %v10764_v38 = vcombine.low %v10708_v6, %v10724_v29  ;;  %v15681_v11 = vcombine.low %v6420_v49, %v6427_v2  ;;  %v24081_v16 = vld [vmem:[#allocation100_spill] sm:$0xff]  ;;  %s24156_s29 = smov 50   ;;  %s24157_s30 = smov 52  }
 0x344   : > { %v15683_v22 = vcombine.high %v6420_v49, %v6427_v2  ;;  %v10664_v40 = vcombine.low %v10620_v26, %v10652_v10  ;;  %v10665_v50 = vcombine.high %v10620_v26, %v10652_v10  ;;  %v10732_v19 = vcombine.low %v10676_v3, %v10692_v47 }
 0x345   : > { %v10765_v55 = vcombine.high %v10708_v6, %v10724_v29  ;;  %v10715_v48 = vrot.slane %v15685_v39, %v16745_v33  ;;  %v10731_v27 = vrot.slane %v15687_v32, %v16745_v33  ;;  %v24082_v0 = vcombine.low %v24080_v41, %v24081_v16  ;;  %v24084_v6 = vld [vmem:[#allocation141_spill] sm:$0xff]  ;;  %v24085_v29 = vld [vmem:[#allocation142_spill] sm:$0xff] }
 0x346   : > { %v24083_v62 = vcombine.high %v24080_v41, %v24081_v16  ;;  %v14953_v49 = vsel %vm14952_vm6, %v14951_v12, %v13958_v45  ;;  %v10733_v17 = vcombine.high %v10676_v3, %v10692_v47  ;;  %v24086_v56 = vcombine.low %v24084_v6, %v24085_v29 }
 0x347   : > { %v6540_v44 = vrot.slane %v24082_v0, %v23420_v63  ;;  %v24087_v10 = vcombine.high %v24084_v6, %v24085_v29  ;;  %14169 = vrot.lane.b32.xlu1 %v10664_v40, %s23215_s28  ;;  %14173 = vrot.lane.b32.xlu0 %v10665_v50, %s23213_s27  ;;  %v20599_v23 = vrot.slane %v10764_v38, %v23420_v63  ;;  %s24148_s27 = smov 46   ;;  %s24149_s28 = smov 48  }
 0x348   : > { %v6547_v4 = vrot.slane %v24083_v62, %v23420_v63  ;;  %v6524_v2 = vrot.slane %v24086_v56, %v23420_v63  ;;  %v10683_v45 = vrot.slane %v15681_v11, %v16745_v33  ;;  %v10699_v3 = vrot.slane %v15683_v22, %v16745_v33  ;;  %v24088_v62 = vld [vmem:[#allocation111_spill] sm:$0xff] }
 0x349   : > { %v6531_v42 = vrot.slane %v24087_v10, %v23420_v63  ;;  %v10666_v47 = vcombine.low %v10627_v21, %v10659_v30  ;;  %v10667_v39 = vcombine.high %v10627_v21, %v10659_v30  ;;  %v10779_v32 = vrot.slane %v10765_v55, %v23420_v63  ;;  %v13970_v30 = vpop.permute.xlu1 %13969 }
 0x34a   : > { %v20605_v26 = vrot.slane %v10732_v19, %v23420_v63  ;;  %v10780_v12 = vcombine.low %v10715_v48, %v10731_v27  ;;  %v15692_v40 = vcombine.low %v6540_v44, %v6547_v4  ;;  %v15694_v41 = vcombine.high %v6540_v44, %v6547_v4  ;;  %v13974_v19 = vpop.permute.xlu0 %13973 }
 0x34b   : > { %v10747_v50 = vrot.slane %v10733_v17, %v23420_v63  ;;  %v14955_v38 = vsel %vm14954_vm7, %v14953_v49, %v13962_v14  ;;  %v15688_v16 = vcombine.low %v6524_v2, %v6531_v42  ;;  %v15690_v0 = vcombine.high %v6524_v2, %v6531_v42  ;;  %14177 = vrot.lane.b32.xlu1 %v10666_v47, %s23208_s26  ;;  %v24089_v14 = vld [vmem:[#allocation64_spill] sm:$0xff]  ;;  %s24147_s26 = smov 44  }
 0x34c   : > { %14181 = vrot.lane.b32.xlu0 %v10667_v39, %s23206_s25  ;;  %v10797_v21 = vcombine.high %v20605_v26, %v20599_v23  ;;  %v14957_v11 = vsel %vm14956_vm8, %v14955_v38, %v13966_v18  ;;  %v10748_v22 = vcombine.low %v10683_v45, %v10699_v3  ;;  %v10781_v44 = vcombine.high %v10715_v48, %v10731_v27  ;;  %v24092_v27 = vld [vmem:[#allocation143_spill] sm:$0xff]  ;;  %v24093_v42 = vld [vmem:[#allocation144_spill] sm:$0xff]  ;;  %s24146_s25 = smov 42  }
 0x34d   : > { %v10798_v55 = vcombine.low %v10747_v50, %v10779_v32  ;;  %v24090_v4 = vcombine.low %v24088_v62, %v24089_v14  ;;  %v24091_v17 = vcombine.high %v24088_v62, %v24089_v14  ;;  %v10788_v29 = vrot.slane %v10780_v12, %v23420_v63 }
 0x34e   : > { %v10749_v56 = vcombine.high %v10683_v45, %v10699_v3  ;;  %v10844_v18 = vrot.slane %v15692_v40, %v16745_v33  ;;  %v10860_v2 = vrot.slane %v15694_v41, %v16745_v33  ;;  %v10812_v10 = vrot.slane %v15688_v16, %v16745_v33 }
 0x34f   : > { %v6572_v49 = vrot.slane %v24090_v4, %v23420_v63  ;;  %v6579_v6 = vrot.slane %v24091_v17, %v23420_v63  ;;  %v10828_v48 = vrot.slane %v15690_v0, %v16745_v33  ;;  %v24094_v47 = vcombine.low %v24092_v27, %v24093_v42  ;;  %14185 = vrot.lane.b32.xlu1 %v10797_v21, %s23202_s4  ;;  %v13978_v4 = vpop.permute.xlu1 %13977  ;;  %s24139_s4 = smov 40  }
 0x350   : > { %v24095_v38 = vcombine.high %v24092_v27, %v24093_v42  ;;  %14189 = vrot.lane.b32.xlu0 %v10798_v55, %s23200_s3  ;;  %v10799_v3 = vcombine.high %v10747_v50, %v10779_v32  ;;  %v10756_v12 = vrot.slane %v10748_v22, %v23420_v63  ;;  %v14959_v40 = vsel %vm23273_vm9, %v14957_v11, %v13970_v30  ;;  %v13982_v42 = vpop.permute.xlu0 %13981  ;;  %s24138_s3 = smov 38  }
 0x351   : > { %v6556_v39 = vrot.slane %v24094_v47, %v23420_v63  ;;  %v10795_v41 = vrot.slane %v10781_v44, %v23420_v63  ;;  %v15693_v16 = vcombine.low %v6572_v49, %v6579_v6  ;;  %v15695_v0 = vcombine.high %v6572_v49, %v6579_v6 }
 0x352   : > { %v6563_v62 = vrot.slane %v24095_v38, %v23420_v63  ;;  %v10800_v14 = vcombine.low %v10756_v12, %v10788_v29  ;;  %v14961_v17 = vsel %vm23272_vm10, %v14959_v40, %v13974_v19  ;;  %v10763_v27 = vrot.slane %v10749_v56, %v23420_v63  ;;  %v24098_v38 = vld [vmem:[#allocation26_spill] sm:$0xff] }
 0x353   : > { %v10900_v21 = vcombine.low %v10844_v18, %v10860_v2  ;;  %v10868_v47 = vcombine.low %v10812_v10, %v10828_v48  ;;  %v10901_v55 = vcombine.high %v10844_v18, %v10860_v2  ;;  %v24096_v30 = vcombine.low %v20383_v46, %v20386_v57  ;;  %14193 = vrot.lane.b32.xlu1 %v10799_v3, %s23196_s5  ;;  %s24133_s5 = smov 36  }
 0x354   : > { %v15689_v32 = vcombine.low %v6556_v39, %v6563_v62  ;;  %v15691_v50 = vcombine.high %v6556_v39, %v6563_v62  ;;  %14197 = vrot.lane.b32.xlu0 %v10800_v14, %s23194_s12  ;;  %v10801_v19 = vcombine.high %v10756_v12, %v10788_v29  ;;  %v10802_v44 = vcombine.low %v10763_v27, %v10795_v41  ;;  %v24097_v39 = vld [vmem:[#allocation112_spill] sm:$0xff]  ;;  %s24132_s12 = smov 34  }
 0x355   : > { %v20650_v11 = vrot.slane %v24096_v30, %v16745_v33  ;;  %v10869_v49 = vcombine.high %v10812_v10, %v10828_v48  ;;  %v10851_v6 = vrot.slane %v15693_v16, %v16745_v33  ;;  %v10867_v56 = vrot.slane %v15695_v0, %v16745_v33  ;;  %v13986_v0 = vpop.permute.xlu1 %13985 }
 0x356   : > { %v14963_v18 = vsel %vm23181_vm11, %v14961_v17, %v13978_v4  ;;  %v10908_v2 = vrot.slane %v10900_v21, %v23420_v63  ;;  %v24099_v62 = vcombine.low %v24097_v39, %v24098_v38  ;;  %v24100_v29 = vcombine.high %v24097_v39, %v24098_v38  ;;  %v13990_v4 = vpop.permute.xlu0 %13989  ;;  %v24101_v17 = vld [vmem:[#allocation155_spill] sm:$0xff]  ;;  %v24102_v21 = vld [vmem:[#allocation156_spill] sm:$0xff] }
 0x357   : > { %v10876_v10 = vrot.slane %v10868_v47, %v23420_v63  ;;  %v10915_v48 = vrot.slane %v10901_v55, %v23420_v63  ;;  %v10819_v12 = vrot.slane %v15689_v32, %v16745_v33  ;;  %v10835_v16 = vrot.slane %v15691_v50, %v16745_v33  ;;  %14201 = vrot.lane.b32.xlu1 %v10801_v19, %s23191_s13  ;;  %s24127_s13 = smov 32  }
 0x358   : > { %v6676_v40 = vrot.slane %v24099_v62, %v23420_v63  ;;  %v6683_v3 = vrot.slane %v24100_v29, %v23420_v63  ;;  %14205 = vrot.lane.b32.xlu0 %v10802_v44, %s23189_s15  ;;  %v14965_v14 = vsel %vm23176_vm12, %v14963_v18, %v13982_v42  ;;  %v24103_v30 = vcombine.low %v24101_v17, %v24102_v21  ;;  %s24126_s15 = smov 30  }
 0x359   : > { %v24104_v55 = vcombine.high %v24101_v17, %v24102_v21  ;;  %v24105_v50 = vcombine.high %v20383_v46, %v20386_v57  ;;  %v9116_v42 = vcombine.low %v20440_v53, %v20481_v51  ;;  %v10883_v44 = vrot.slane %v10869_v49, %v23420_v63 }
 0x35a   : > { %v6660_v47 = vrot.slane %v24103_v30, %v23420_v63  ;;  %v10916_v18 = vcombine.low %v10851_v6, %v10867_v56  ;;  %v10803_v39 = vcombine.high %v10763_v27, %v10795_v41  ;;  %v10932_v38 = vcombine.low %v10876_v10, %v10908_v2  ;;  %v24106_v41 = vld [vmem:[#allocation157_spill] sm:$0xff]  ;;  %v24107_v27 = vld [vmem:[#allocation158_spill] sm:$0xff] }
 0x35b   : > { %v6667_v32 = vrot.slane %v24104_v55, %v23420_v63  ;;  %v20685_v19 = vrot.slane %v24105_v50, %v16745_v33  ;;  %v15700_v62 = vcombine.low %v6676_v40, %v6683_v3  ;;  %v15702_v29 = vcombine.high %v6676_v40, %v6683_v3 }
 0x35c   : > { %v10933_v30 = vcombine.high %v10876_v10, %v10908_v2  ;;  %v14967_v17 = vsel %vm23174_vm13, %v14965_v14, %v13986_v0  ;;  %v10934_v21 = vcombine.low %v10883_v44, %v10915_v48  ;;  %v10884_v55 = vcombine.low %v10819_v12, %v10835_v16  ;;  %14209 = vrot.lane.b32.xlu1 %v10803_v39, %s23185_s17  ;;  %v13994_v0 = vpop.permute.xlu1 %13993  ;;  %v13998_v14 = vpop.permute.xlu0 %13997  ;;  %s24125_s17 = smov 28  }
 0x35d   : > { %14213 = vrot.lane.b32.xlu0 %v10932_v38, %s23183_s20  ;;  %v10917_v46 = vcombine.high %v10851_v6, %v10867_v56  ;;  %v15696_v57 = vcombine.low %v6660_v47, %v6667_v32  ;;  %v15698_v50 = vcombine.high %v6660_v47, %v6667_v32  ;;  %v10924_v49 = vrot.slane %v10916_v18, %v23420_v63  ;;  %v24110_v56 = vld [vmem:[#allocation208_spill] sm:$0xff]  ;;  %v24111_v47 = vld [vmem:[#allocation209_spill] sm:$0xff]  ;;  %s24124_s20 = smov 26  }
 0x35e   : > { %v10885_v22 = vcombine.high %v10819_v12, %v10835_v16  ;;  %v24108_v40 = vcombine.low %v24106_v41, %v24107_v27  ;;  %v24109_v3 = vcombine.high %v24106_v41, %v24107_v27  ;;  %v10980_v39 = vrot.slane %v15700_v62, %v16745_v33 }
 0x35f   : > { %v10996_v6 = vrot.slane %v15702_v29, %v16745_v33  ;;  %v24112_v12 = vcombine.low %v24110_v56, %v24111_v47  ;;  %v24113_v32 = vcombine.high %v24110_v56, %v24111_v47  ;;  %v9117_v38 = vcombine.high %v20440_v53, %v20481_v51 }
 0x360   : > { %v6692_v2 = vrot.slane %v24108_v40, %v23420_v63  ;;  %v6699_v10 = vrot.slane %v24109_v3, %v23420_v63  ;;  %v14969_v41 = vsel %vm23175_vm14, %v14967_v17, %v13990_v4  ;;  %v10892_v62 = vrot.slane %v10884_v55, %v23420_v63  ;;  %14217 = vrot.lane.b32.xlu1 %v10933_v30, %s23179_s21  ;;  %s24115_s21 = smov 24  }
 0x361   : > { %v6708_v16 = vrot.slane %v24112_v12, %v23420_v63  ;;  %v6715_v18 = vrot.slane %v24113_v32, %v23420_v63  ;;  %14221 = vrot.lane.b32.xlu0 %v10934_v21, %s23177_s22  ;;  %vm23182_vm13 = vcmask 277504   ;;  %v10931_v29 = vrot.slane %v10917_v46, %v23420_v63  ;;  %s24114_s22 = smov 22   ;;  %v14002_v21 = vpop.permute.xlu1 %14001 }
 0x362   : > { %v10948_v27 = vrot.slane %v15696_v57, %v16745_v33  ;;  %v10964_v40 = vrot.slane %v15698_v50, %v16745_v33  ;;  %v10935_v3 = vcombine.high %v10883_v44, %v10915_v48  ;;  %v10936_v56 = vcombine.low %v10892_v62, %v10924_v49  ;;  %v14006_v48 = vpop.permute.xlu0 %14005 }
 0x363   : > { %v10899_v47 = vrot.slane %v10885_v22, %v23420_v63  ;;  %v15697_v12 = vcombine.low %v6692_v2, %v6699_v10  ;;  %v11036_v4 = vcombine.low %v10980_v39, %v10996_v6  ;;  %v15699_v17 = vcombine.high %v6692_v2, %v6699_v10  ;;  %v24116_v2 = vld [vmem:[#allocation117_spill] sm:$0xff]  ;;  %v24117_v10 = vld [vmem:[#allocation66_spill] sm:$0xff] }
 0x364   : > { %v15701_v32 = vcombine.low %v6708_v16, %v6715_v18  ;;  %v15703_v55 = vcombine.high %v6708_v16, %v6715_v18  ;;  %v14971_v30 = vsel %vm23188_vm15, %v14969_v41, %v13994_v0  ;;  %v10937_v45 = vcombine.high %v10892_v62, %v10924_v49  ;;  %14225 = vrot.lane.b32.xlu1 %v10935_v3, %s24114_s22  ;;  %v24120_v3 = vld [vmem:[#allocation78_spill] sm:$0xff] }
 0x365   : > { %vm23187_vm14 = vcmask 293888   ;;  %vm23193_vm12 = vcmask 310272   ;;  %v14973_v46 = vsel %vm23182_vm13, %v14971_v30, %v13998_v14  ;;  %14229 = vrot.lane.b32.xlu0 %v10936_v56, %s24115_s21  ;;  %v10938_v44 = vcombine.low %v10899_v47, %v10931_v29  ;;  %v24121_v56 = vld [vmem:[#allocation33_spill] sm:$0xff] }
 0x366   : > { %vm23217_vm11 = vcmask 326656   ;;  %v11004_v22 = vcombine.low %v10948_v27, %v10964_v40  ;;  %v11037_v57 = vcombine.high %v10980_v39, %v10996_v6  ;;  %v10955_v50 = vrot.slane %v15697_v12, %v16745_v33 }
 0x367   : > { %v24118_v49 = vcombine.low %v24116_v2, %v24117_v10  ;;  %v24119_v16 = vcombine.high %v24116_v2, %v24117_v10  ;;  %v11044_v14 = vrot.slane %v11036_v4, %v23420_v63  ;;  %v10971_v41 = vrot.slane %v15699_v17, %v16745_v33 }
 0x368   : > { %v10987_v62 = vrot.slane %v15701_v32, %v16745_v33  ;;  %v11003_v39 = vrot.slane %v15703_v55, %v16745_v33  ;;  %v14975_v6 = vsel %vm23187_vm14, %v14973_v46, %v14002_v21  ;;  %vm23198_vm13 = vcmask 343040   ;;  %14233 = vrot.lane.b32.xlu1 %v10937_v45, %s24124_s20 }
 0x369   : > { %v6812_v0 = vrot.slane %v24118_v49, %v23420_v63  ;;  %v6819_v18 = vrot.slane %v24119_v16, %v23420_v63  ;;  %v24122_v12 = vcombine.low %v24120_v3, %v24121_v56  ;;  %v24123_v2 = vcombine.high %v24120_v3, %v24121_v56  ;;  %14237 = vrot.lane.b32.xlu0 %v10938_v44, %s24125_s17  ;;  %v14010_v49 = vpop.permute.xlu1 %14009  ;;  %v14014_v16 = vpop.permute.xlu0 %14013 }
 0x36a   : > { %v14977_v4 = vsel %vm23193_vm12, %v14975_v6, %v14006_v48  ;;  %v11012_v17 = vrot.slane %v11004_v22, %v23420_v63  ;;  %vm23204_vm14 = vcmask 359424   ;;  %v11005_v32 = vcombine.high %v10948_v27, %v10964_v40 }
 0x36b   : > { %v6796_v30 = vrot.slane %v24122_v12, %v23420_v63  ;;  %v6803_v10 = vrot.slane %v24123_v2, %v23420_v63  ;;  %v10939_v55 = vcombine.high %v10899_v47, %v10931_v29  ;;  %vm23199_vm15 = vcmask 375808  }
 0x36c   : > { %v15708_v21 = vcombine.low %v6812_v0, %v6819_v18  ;;  %v15710_v46 = vcombine.high %v6812_v0, %v6819_v18  ;;  %v11068_v12 = vcombine.low %v11012_v17, %v11044_v14  ;;  %v11051_v3 = vrot.slane %v11037_v57, %v23420_v63  ;;  %v24128_v57 = vld [vmem:[#allocation38_spill] sm:$0xff]  ;;  %v24129_v0 = vld [vmem:[#allocation89_spill] sm:$0xff] }
 0x36d   : > { %v11020_v56 = vcombine.low %v10955_v50, %v10971_v41  ;;  %v11052_v2 = vcombine.low %v10987_v62, %v11003_v39  ;;  %v14979_v45 = vsel %vm23217_vm11, %v14977_v4, %v14010_v49  ;;  %v11053_v48 = vcombine.high %v10987_v62, %v11003_v39  ;;  %14241 = vrot.lane.b32.xlu1 %v10939_v55, %s24126_s15  ;;  %v14022_v55 = vpop.permute.xlu0 %14021 }
 0x36e   : > { %v15704_v6 = vcombine.low %v6796_v30, %v6803_v10  ;;  %v15706_v44 = vcombine.high %v6796_v30, %v6803_v10  ;;  %v14981_v27 = vsel %vm23198_vm13, %v14979_v45, %v14014_v16  ;;  %14245 = vrot.lane.b32.xlu0 %v11068_v12, %s24127_s13  ;;  %v11019_v29 = vrot.slane %v11005_v32, %v23420_v63  ;;  %v14018_v10 = vpop.permute.xlu1 %14017 }
 0x36f   : > { %vm23210_vm12 = vcmask 392192   ;;  %v11021_v40 = vcombine.high %v10955_v50, %v10971_v41  ;;  %v11116_v47 = vrot.slane %v15708_v21, %v16745_v33  ;;  %v11132_v22 = vrot.slane %v15710_v46, %v16745_v33 }
 0x370   : > { %v24130_v18 = vcombine.low %v24128_v57, %v24129_v0  ;;  %v24131_v39 = vcombine.high %v24128_v57, %v24129_v0  ;;  %v11069_v4 = vcombine.high %v11012_v17, %v11044_v14  ;;  %v11070_v32 = vcombine.low %v11019_v29, %v11051_v3  ;;  %v24134_v14 = vld [vmem:[#allocation151_spill] sm:$0xff]  ;;  %v24135_v17 = vld [vmem:[#allocation152_spill] sm:$0xff] }
 0x371   : > { %v11028_v50 = vrot.slane %v11020_v56, %v23420_v63  ;;  %v11060_v41 = vrot.slane %v11052_v2, %v23420_v63  ;;  %v14983_v21 = vsel %vm23204_vm14, %v14981_v27, %v14018_v10  ;;  %v20772_v46 = vrot.slane %v11053_v48, %v23420_v63 }
 0x372   : > { %v6844_v62 = vrot.slane %v24130_v18, %v23420_v63  ;;  %v6851_v30 = vrot.slane %v24131_v39, %v23420_v63  ;;  %v11084_v49 = vrot.slane %v15704_v6, %v16745_v33  ;;  %v11100_v16 = vrot.slane %v15706_v44, %v16745_v33  ;;  %14249 = vrot.lane.b32.xlu1 %v11069_v4, %s24132_s12  ;;  %v14026_v0 = vpop.permute.xlu1 %14025  ;;  %v14030_v39 = vpop.permute.xlu0 %14029 }
 0x373   : > { %v14985_v12 = vsel %vm23199_vm15, %v14983_v21, %v14022_v55  ;;  %14253 = vrot.lane.b32.xlu0 %v11070_v32, %s24133_s5  ;;  %vm23205_vm13 = vcmask 408576   ;;  %v24136_v56 = vcombine.low %v24134_v14, %v24135_v17  ;;  %v24137_v45 = vcombine.high %v24134_v14, %v24135_v17 }
 0x374   : > { %v11035_v6 = vrot.slane %v11021_v40, %v23420_v63  ;;  %v11172_v44 = vcombine.low %v11116_v47, %v11132_v22  ;;  %v15709_v27 = vcombine.low %v6844_v62, %v6851_v30  ;;  %v15711_v57 = vcombine.high %v6844_v62, %v6851_v30 }
 0x375   : > { %v6828_v2 = vrot.slane %v24136_v56, %v23420_v63  ;;  %v6835_v48 = vrot.slane %v24137_v45, %v23420_v63  ;;  %v11071_v18 = vcombine.high %v11019_v29, %v11051_v3  ;;  %v11073_v10 = vcombine.high %v11028_v50, %v11060_v41 }
 0x376   : > { %v11072_v4 = vcombine.low %v11028_v50, %v11060_v41  ;;  %vm23212_vm15 = vcmask 424960   ;;  %v14987_v55 = vsel %vm23210_vm12, %v14985_v12, %v14026_v0  ;;  %v11074_v32 = vcombine.low %v11035_v6, %v20772_v46  ;;  %v14034_v41 = vpop.permute.xlu1 %14033  ;;  %v24141_v12 = vld [vmem:[#allocation162_spill] sm:$0xff] }
 0x377   : > { %v11140_v21 = vcombine.low %v11084_v49, %v11100_v16  ;;  %v11173_v56 = vcombine.high %v11116_v47, %v11132_v22  ;;  %14257 = vrot.lane.b32.xlu1 %v11071_v18, %s24138_s3  ;;  %v14989_v14 = vsel %vm23205_vm13, %v14987_v55, %v14030_v39  ;;  %vm23211_vm14 = vcmask 441344   ;;  %v14038_v47 = vpop.permute.xlu0 %14037  ;;  %v24140_v22 = vld [vmem:[#allocation161_spill] sm:$0xff] }
 0x378   : > { %14261 = vrot.lane.b32.xlu0 %v11072_v4, %s24139_s4  ;;  %v15705_v40 = vcombine.low %v6828_v2, %v6835_v48  ;;  %v15707_v62 = vcombine.high %v6828_v2, %v6835_v48  ;;  %v11180_v3 = vrot.slane %v11172_v44, %v23420_v63  ;;  %v11141_v29 = vcombine.high %v11084_v49, %v11100_v16 }
 0x379   : > { %v20795_v30 = vrot.slane %v15709_v27, %v16745_v33  ;;  %v20798_v50 = vrot.slane %v15711_v57, %v16745_v33  ;;  %v24142_v17 = vcombine.low %v24140_v22, %v24141_v12  ;;  %v24143_v2 = vcombine.high %v24140_v22, %v24141_v12 }
 0x37a   : > { %v24144_v49 = vcombine.low %v19701_v43, %v19713_v36  ;;  %v24145_v44 = vcombine.high %v19701_v43, %v19713_v36  ;;  %v14991_v57 = vsel %vm23212_vm15, %v14989_v14, %v14034_v41  ;;  %vm23224_vm13 = vcmask 457728  }
 0x37b   : > { %v6932_v45 = vrot.slane %v24142_v17, %v23420_v63  ;;  %v6939_v48 = vrot.slane %v24143_v2, %v23420_v63  ;;  %v11148_v0 = vrot.slane %v11140_v21, %v23420_v63  ;;  %v11187_v18 = vrot.slane %v11173_v56, %v23420_v63  ;;  %14265 = vrot.lane.b32.xlu1 %v11073_v10, %s24146_s25  ;;  %v14042_v56 = vpop.permute.xlu1 %14041  ;;  %v14046_v41 = vpop.permute.xlu0 %14045 }
 0x37c   : > { %v6948_v16 = vrot.slane %v24144_v49, %v23420_v63  ;;  %v6955_v27 = vrot.slane %v24145_v44, %v23420_v63  ;;  %v14993_v39 = vsel %vm23211_vm14, %v14991_v57, %v14038_v47  ;;  %14269 = vrot.lane.b32.xlu0 %v11074_v32, %s24147_s26  ;;  %vm23218_vm12 = vcmask 474112  }
 0x37d   : > { %v11091_v4 = vrot.slane %v15705_v40, %v16745_v33  ;;  %v11107_v55 = vrot.slane %v15707_v62, %v16745_v33  ;;  %v11075_v43 = vcombine.high %v11035_v6, %v20772_v46  ;;  %v11204_v36 = vcombine.low %v11148_v0, %v11180_v3 }
 0x37e   : > { %v11155_v14 = vrot.slane %v11141_v29, %v23420_v63  ;;  %v11188_v21 = vcombine.low %v20795_v30, %v20798_v50  ;;  %v15712_v10 = vcombine.low %v6932_v45, %v6939_v48  ;;  %v15714_v22 = vcombine.high %v6932_v45, %v6939_v48 }
 0x37f   : > { %v15716_v47 = vcombine.low %v6948_v16, %v6955_v27  ;;  %v15718_v12 = vcombine.high %v6948_v16, %v6955_v27  ;;  %v14995_v32 = vsel %vm23224_vm13, %v14993_v39, %v14042_v56  ;;  %v11205_v17 = vcombine.high %v11148_v0, %v11180_v3  ;;  %14273 = vrot.lane.b32.xlu1 %v11075_v43, %s24148_s27  ;;  %v14050_v49 = vpop.permute.xlu1 %14049  ;;  %v14054_v16 = vpop.permute.xlu0 %14053  ;;  %v24152_v0 = vld [vmem:[#allocation164_spill] sm:$0xff]  ;;  %v24153_v39 = vld [vmem:[#allocation165_spill] sm:$0xff] }
 0x380   : > { %vm23223_vm14 = vcmask 490496   ;;  %vm23229_vm15 = vcmask 506880   ;;  %v14997_v46 = vsel %vm23218_vm12, %v14995_v32, %v14046_v41  ;;  %14277 = vrot.lane.b32.xlu0 %v11204_v36, %s24149_s28  ;;  %v11206_v6 = vcombine.low %v11155_v14, %v11187_v18 }
 0x381   : > { %vm23254_vm11 = vcmask 523264   ;;  %v11156_v40 = vcombine.low %v11091_v4, %v11107_v55  ;;  %v11196_v62 = vrot.slane %v11188_v21, %v23420_v63  ;;  %v11189_v29 = vcombine.high %v20795_v30, %v20798_v50 }
 0x382   : > { %v24150_v3 = vcombine.low %v19716_v34, %v19725_v1  ;;  %v24151_v2 = vcombine.high %v19716_v34, %v19725_v1  ;;  %v11220_v44 = vrot.slane %v15712_v10, %v16745_v33  ;;  %v11236_v27 = vrot.slane %v15714_v22, %v16745_v33 }
 0x383   : > { %v11252_v57 = vrot.slane %v15716_v47, %v16745_v33  ;;  %v11268_v30 = vrot.slane %v15718_v12, %v16745_v33  ;;  %v14999_v50 = vsel %vm23223_vm14, %v14997_v46, %v14050_v49  ;;  %vm23232_vm12 = vcmask 539648   ;;  %14281 = vrot.lane.b32.xlu1 %v11205_v17, %s24156_s29  ;;  %v14058_v12 = vpop.permute.xlu1 %14057  ;;  %v14062_v32 = vpop.permute.xlu0 %14061 }
 0x384   : > { %v6980_v45 = vrot.slane %v24150_v3, %v23420_v63  ;;  %v6987_v48 = vrot.slane %v24151_v2, %v23420_v63  ;;  %v24154_v43 = vcombine.low %v24152_v0, %v24153_v39  ;;  %v24155_v34 = vcombine.high %v24152_v0, %v24153_v39  ;;  %14285 = vrot.lane.b32.xlu0 %v11206_v6, %s24157_s30 }
 0x385   : > { %v15001_v21 = vsel %vm23229_vm15, %v14999_v50, %v14054_v16  ;;  %v11164_v56 = vrot.slane %v11156_v40, %v23420_v63  ;;  %vm23236_vm14 = vcmask 556032   ;;  %v11157_v41 = vcombine.high %v11091_v4, %v11107_v55 }
 0x386   : > { %v6964_v36 = vrot.slane %v24154_v43, %v23420_v63  ;;  %v6971_v1 = vrot.slane %v24155_v34, %v23420_v63  ;;  %v11207_v10 = vcombine.high %v11155_v14, %v11187_v18  ;;  %vm23233_vm13 = vcmask 572416  }
 0x387   : > { %v15717_v22 = vcombine.low %v6980_v45, %v6987_v48  ;;  %v15719_v47 = vcombine.high %v6980_v45, %v6987_v48  ;;  %v11208_v46 = vcombine.low %v11164_v56, %v11196_v62  ;;  %v11203_v3 = vrot.slane %v11189_v29, %v23420_v63  ;;  %v24160_v29 = vld [vmem:[#allocation107_spill] sm:$0xff]  ;;  %v24161_v45 = vld [vmem:[#allocation108_spill] sm:$0xff]  ;;  %v14066_v39 = vpop.permute.xlu1 %14065 }
 0x388   : > { %v11276_v2 = vcombine.low %v11220_v44, %v11236_v27  ;;  %v11308_v49 = vcombine.low %v11252_v57, %v11268_v30  ;;  %v15003_v17 = vsel %vm23254_vm11, %v15001_v21, %v14058_v12  ;;  %v11309_v16 = vcombine.high %v11252_v57, %v11268_v30  ;;  %14289 = vrot.lane.b32.xlu1 %v11207_v10, %s24158_s2 }
 0x389   : > { %v15713_v50 = vcombine.low %v6964_v36, %v6971_v1  ;;  %v15715_v6 = vcombine.high %v6964_v36, %v6971_v1  ;;  %v15005_v4 = vsel %vm23232_vm12, %v15003_v17, %v14062_v32  ;;  %14293 = vrot.lane.b32.xlu0 %v11208_v46, %s24159_s24  ;;  %v11171_v18 = vrot.slane %v11157_v41, %v23420_v63  ;;  %v14070_v36 = vpop.permute.xlu0 %14069 }
 0x38a   : > { %vm23239_vm15 = vcmask 588800   ;;  %v11277_v55 = vcombine.high %v11220_v44, %v11236_v27  ;;  %v11259_v14 = vrot.slane %v15717_v22, %v16745_v33  ;;  %v11275_v40 = vrot.slane %v15719_v47, %v16745_v33 }
 0x38b   : > { %v24162_v48 = vcombine.low %v24160_v29, %v24161_v45  ;;  %v24163_v30 = vcombine.high %v24160_v29, %v24161_v45  ;;  %v11209_v43 = vcombine.high %v11164_v56, %v11196_v62  ;;  %v11210_v34 = vcombine.low %v11171_v18, %v11203_v3  ;;  %v24166_v62 = vld [vmem:[#allocation83_spill] sm:$0xff]  ;;  %v24167_v56 = vld [vmem:[#allocation84_spill] sm:$0xff] }
 0x38c   : > { %v11284_v44 = vrot.slane %v11276_v2, %v23420_v63  ;;  %v11316_v27 = vrot.slane %v11308_v49, %v23420_v63  ;;  %v15007_v1 = vsel %vm23236_vm14, %v15005_v4, %v14066_v39  ;;  %v20880_v21 = vrot.slane %v11309_v16, %v23420_v63 }
 0x38d   : > { %v7084_v57 = vrot.slane %v24162_v48, %v23420_v63  ;;  %v7091_v0 = vrot.slane %v24163_v30, %v23420_v63  ;;  %v11227_v41 = vrot.slane %v15713_v50, %v16745_v33  ;;  %v11243_v10 = vrot.slane %v15715_v6, %v16745_v33  ;;  %14297 = vrot.lane.b32.xlu1 %v11209_v43, %s24164_s23  ;;  %v14074_v50 = vpop.permute.xlu1 %14073  ;;  %v14078_v4 = vpop.permute.xlu0 %14077 }
 0x38e   : > { %v15009_v22 = vsel %vm23233_vm13, %v15007_v1, %v14070_v36  ;;  %14301 = vrot.lane.b32.xlu0 %v11210_v34, %s24165_s0  ;;  %vm23237_vm12 = vcmask 605184   ;;  %v24168_v47 = vcombine.low %v24166_v62, %v24167_v56  ;;  %v24169_v32 = vcombine.high %v24166_v62, %v24167_v56 }
 0x38f   : > { %v11291_v2 = vrot.slane %v11277_v55, %v23420_v63  ;;  %v11324_v49 = vcombine.low %v11259_v14, %v11275_v40  ;;  %v15724_v17 = vcombine.low %v7084_v57, %v7091_v0  ;;  %v15726_v16 = vcombine.high %v7084_v57, %v7091_v0 }
 0x390   : > { %v7068_v12 = vrot.slane %v24168_v47, %v23420_v63  ;;  %v7075_v46 = vrot.slane %v24169_v32, %v23420_v63  ;;  %v11211_v6 = vcombine.high %v11171_v18, %v11203_v3  ;;  %v11341_v29 = vcombine.high %v11284_v44, %v11316_v27  ;;  %v24176_v47 = vld [vmem:[#allocation176_spill] sm:$0xff] }
 0x391   : > { %v11340_v45 = vcombine.low %v11284_v44, %v11316_v27  ;;  %vm23243_vm13 = vcmask 621568   ;;  %v15011_v48 = vsel %vm23239_vm15, %v15009_v22, %v14074_v50  ;;  %v11342_v30 = vcombine.low %v11291_v2, %v20880_v21  ;;  %v14082_v44 = vpop.permute.xlu1 %14081  ;;  %v14086_v27 = vpop.permute.xlu0 %14085 }
 0x392   : > { %v11292_v39 = vcombine.low %v11227_v41, %v11243_v10  ;;  %v11325_v43 = vcombine.high %v11259_v14, %v11275_v40  ;;  %14305 = vrot.lane.b32.xlu1 %v11211_v6, %s24170_s14  ;;  %v15013_v36 = vsel %vm23237_vm12, %v15011_v48, %v14078_v4  ;;  %vm23240_vm14 = vcmask 637952   ;;  %v24172_v14 = vld [vmem:[#allocation159_spill] sm:$0xff]  ;;  %v24173_v40 = vld [vmem:[#allocation160_spill] sm:$0xff] }
 0x393   : > { %14309 = vrot.lane.b32.xlu0 %v11340_v45, %s24171_s10  ;;  %v15720_v55 = vcombine.low %v7068_v12, %v7075_v46  ;;  %v15722_v57 = vcombine.high %v7068_v12, %v7075_v46  ;;  %v11332_v3 = vrot.slane %v11324_v49, %v23420_v63  ;;  %v11293_v18 = vcombine.high %v11227_v41, %v11243_v10  ;;  %v24177_v12 = vld [vmem:[#allocation177_spill] sm:$0xff] }
 0x394   : > { %v11388_v0 = vrot.slane %v15724_v17, %v16745_v33  ;;  %v11404_v34 = vrot.slane %v15726_v16, %v16745_v33  ;;  %v24174_v1 = vcombine.low %v24172_v14, %v24173_v40  ;;  %v24175_v62 = vcombine.high %v24172_v14, %v24173_v40 }
 0x395   : > { %v24178_v41 = vcombine.low %v24176_v47, %v24177_v12  ;;  %v24179_v32 = vcombine.high %v24176_v47, %v24177_v12  ;;  %v15015_v49 = vsel %vm23243_vm13, %v15013_v36, %v14082_v44  ;;  %vm23248_vm12 = vcmask 654336   ;;  %v14094_v14 = vpop.permute.xlu0 %14093 }
 0x396   : > { %v7100_v22 = vrot.slane %v24174_v1, %v23420_v63  ;;  %v7107_v56 = vrot.slane %v24175_v62, %v23420_v63  ;;  %v11300_v17 = vrot.slane %v11292_v39, %v23420_v63  ;;  %v11339_v16 = vrot.slane %v11325_v43, %v23420_v63  ;;  %14313 = vrot.lane.b32.xlu1 %v11341_v29, %s24180_s19  ;;  %v14090_v39 = vpop.permute.xlu1 %14089 }
 0x397   : > { %v7116_v10 = vrot.slane %v24178_v41, %v23420_v63  ;;  %v7123_v46 = vrot.slane %v24179_v32, %v23420_v63  ;;  %v15017_v50 = vsel %vm23240_vm14, %v15015_v49, %v14086_v27  ;;  %14317 = vrot.lane.b32.xlu0 %v11342_v30, %s24181_s8  ;;  %vm23244_vm15 = vcmask 670720  }
 0x398   : > { %v11356_v6 = vrot.slane %v15720_v55, %v16745_v33  ;;  %v11372_v4 = vrot.slane %v15722_v57, %v16745_v33  ;;  %v11343_v45 = vcombine.high %v11291_v2, %v20880_v21  ;;  %v11344_v48 = vcombine.low %v11300_v17, %v11332_v3 }
 0x399   : > { %v11307_v36 = vrot.slane %v11293_v18, %v23420_v63  ;;  %v11444_v44 = vcombine.low %v11388_v0, %v11404_v34  ;;  %v15721_v43 = vcombine.low %v7100_v22, %v7107_v56  ;;  %v15723_v40 = vcombine.high %v7100_v22, %v7107_v56  ;;  %v24184_v22 = vld [vmem:[#allocation24_spill] sm:$0xff]  ;;  %v24185_v56 = vld [vmem:[#allocation119_spill] sm:$0xff]  ;;  %v14102_v32 = vpop.permute.xlu0 %14101 }
 0x39a   : > { %v15725_v29 = vcombine.low %v7116_v10, %v7123_v46  ;;  %v15727_v1 = vcombine.high %v7116_v10, %v7123_v46  ;;  %v15019_v27 = vsel %vm23248_vm12, %v15017_v50, %v14090_v39  ;;  %v11345_v30 = vcombine.high %v11300_v17, %v11332_v3  ;;  %14321 = vrot.lane.b32.xlu1 %v11343_v45, %s24182_s18  ;;  %v14098_v10 = vpop.permute.xlu1 %14097  ;;  %v24188_v50 = vld [vmem:[#allocation171_spill] sm:$0xff] }
 0x39b   : > { %vm23249_vm14 = vcmask 687104   ;;  %v11346_v62 = vcombine.low %v11307_v36, %v11339_v16  ;;  %v15021_v55 = vsel %vm23244_vm15, %v15019_v27, %v14094_v14  ;;  %14325 = vrot.lane.b32.xlu0 %v11344_v48, %s24183_s6  ;;  %vm23253_vm13 = vcmask 703488  }
 0x39c   : > { %v11412_v21 = vcombine.low %v11356_v6, %v11372_v4  ;;  %v11413_v2 = vcombine.high %v11356_v6, %v11372_v4  ;;  %v11452_v57 = vrot.slane %v11444_v44, %v23420_v63  ;;  %v11445_v18 = vcombine.high %v11388_v0, %v11404_v34  ;;  %v24189_v6 = vld [vmem:[#allocation172_spill] sm:$0xff] }
 0x39d   : > { %v24186_v47 = vcombine.low %v24184_v22, %v24185_v56  ;;  %v24187_v3 = vcombine.high %v24184_v22, %v24185_v56  ;;  %v11363_v46 = vrot.slane %v15721_v43, %v16745_v33  ;;  %v11379_v49 = vrot.slane %v15723_v40, %v16745_v33 }
 0x39e   : > { %v11395_v17 = vrot.slane %v15725_v29, %v16745_v33  ;;  %v11411_v0 = vrot.slane %v15727_v1, %v16745_v33  ;;  %v15023_v34 = vsel %vm23249_vm14, %v15021_v55, %v14098_v10  ;;  %vm15026_vm15 = vcmask 719872   ;;  %14329 = vrot.lane.b32.xlu1 %v11345_v30, %s24192_s11  ;;  %v14106_v27 = vpop.permute.xlu1 %14105  ;;  %v14110_v55 = vpop.permute.xlu0 %14109  ;;  %s24241_s11 = smov 112  }
 0x39f   : > { %v7220_v12 = vrot.slane %v24186_v47, %v23420_v63  ;;  %v7227_v41 = vrot.slane %v24187_v3, %v23420_v63  ;;  %v24190_v4 = vcombine.low %v24188_v50, %v24189_v6  ;;  %v24191_v48 = vcombine.high %v24188_v50, %v24189_v6  ;;  %14333 = vrot.lane.b32.xlu0 %v11346_v62, %s24193_s1  ;;  %v24196_v50 = vld [vmem:[#allocation118_spill] sm:$0xff]  ;;  %s23270_s1 = sand.u32 1, %s16093_s7   ;;  %s24246_s7 = smov 116  }
 0x3a0   : > { %v15025_v39 = vsel %vm23253_vm13, %v15023_v34, %v14102_v32  ;;  %vm23255_vm12 = vcmask 736256   ;;  %v11420_v14 = vrot.slane %v11412_v21, %v23420_v63  ;;  %vm23256_vm14 = vcmask 752640  }
 0x3a1   : > { %v7204_v45 = vrot.slane %v24190_v4, %v23420_v63  ;;  %v7211_v44 = vrot.slane %v24191_v48, %v23420_v63  ;;  %v11347_v43 = vcombine.high %v11307_v36, %v11339_v16  ;;  %v11459_v40 = vrot.slane %v11445_v18, %v23420_v63 }
 0x3a2   : > { %v15732_v29 = vcombine.low %v7220_v12, %v7227_v41  ;;  %v15734_v1 = vcombine.high %v7220_v12, %v7227_v41  ;;  %v11476_v22 = vcombine.low %v11420_v14, %v11452_v57  ;;  %v11427_v56 = vrot.slane %v11413_v2, %v23420_v63  ;;  %v14114_v41 = vpop.permute.xlu1 %14113  ;;  %v14118_v34 = vpop.permute.xlu0 %14117 }
 0x3a3   : > { %v11428_v47 = vcombine.low %v11363_v46, %v11379_v49  ;;  %v11460_v30 = vcombine.low %v11395_v17, %v11411_v0  ;;  %v15027_v3 = vsel %vm15026_vm15, %v15025_v39, %v14106_v27  ;;  %v11461_v10 = vcombine.high %v11395_v17, %v11411_v0  ;;  %14337 = vrot.lane.b32.xlu1 %v11347_v43, %s24194_s16  ;;  %s24200_s16 = smov 84  }
 0x3a4   : > { %v15728_v62 = vcombine.low %v7204_v45, %v7211_v44  ;;  %v15730_v32 = vcombine.high %v7204_v45, %v7211_v44  ;;  %v15029_v16 = vsel %vm23255_vm12, %v15027_v3, %v14110_v55  ;;  %v11477_v36 = vcombine.high %v11420_v14, %v11452_v57  ;;  %14341 = vrot.lane.b32.xlu0 %v11476_v22, %s24195_s9  ;;  %s24199_s9 = smov 82   ;;  %v24201_v14 = vld [vmem:[#allocation173_spill] sm:$0xff] }
 0x3a5   : > { %vm23257_vm13 = vcmask 769024   ;;  %vm23259_vm11 = vcmask 785408   ;;  %v11478_v21 = vcombine.low %v11427_v56, %v11459_v40  ;;  %v11429_v18 = vcombine.high %v11363_v46, %v11379_v49 }
 0x3a6   : > { %v11524_v2 = vrot.slane %v15732_v29, %v16745_v33  ;;  %v11540_v12 = vrot.slane %v15734_v1, %v16745_v33  ;;  %v11436_v17 = vrot.slane %v11428_v47, %v23420_v63  ;;  %v11468_v0 = vrot.slane %v11460_v30, %v23420_v63  ;;  %v14122_v30 = vpop.permute.xlu1 %14121  ;;  %v14126_v3 = vpop.permute.xlu0 %14125 }
 0x3a7   : > { %v24197_v57 = vcombine.low %v19792_v9, %v24196_v50  ;;  %v24198_v4 = vcombine.high %v19792_v9, %v24196_v50  ;;  %v15031_v49 = vsel %vm23256_vm14, %v15029_v16, %v14114_v41  ;;  %v20980_v45 = vrot.slane %v11461_v10, %v23420_v63  ;;  %14345 = vrot.lane.b32.xlu1 %v11477_v36, %s24199_s9  ;;  %v24202_v9 = vld [vmem:[#allocation174_spill] sm:$0xff]  ;;  %s24206_s9 = smov 88  }
 0x3a8   : > { %v11492_v48 = vrot.slane %v15728_v62, %v16745_v33  ;;  %v11508_v44 = vrot.slane %v15730_v32, %v16745_v33  ;;  %v15033_v39 = vsel %vm23257_vm13, %v15031_v49, %v14118_v34  ;;  %14349 = vrot.lane.b32.xlu0 %v11478_v21, %s24200_s16  ;;  %vm23258_vm12 = vcmask 801792   ;;  %s24205_s16 = smov 86  }
 0x3a9   : > { %v7252_v6 = vrot.slane %v24197_v57, %v23420_v63  ;;  %v7259_v46 = vrot.slane %v24198_v4, %v23420_v63  ;;  %v24203_v43 = vcombine.low %v24201_v14, %v24202_v9  ;;  %v24204_v1 = vcombine.high %v24201_v14, %v24202_v9  ;;  %v24208_v57 = vld [vmem:[#allocation37_spill] sm:$0xff]  ;;  %v24211_v9 = vld [vmem:[#allocation67_spill] sm:$0xff] }
 0x3aa   : > { %v11479_v55 = vcombine.high %v11427_v56, %v11459_v40  ;;  %vm23261_vm14 = vcmask 818176   ;;  %v11443_v22 = vrot.slane %v11429_v18, %v23420_v63  ;;  %v11580_v47 = vcombine.low %v11524_v2, %v11540_v12  ;;  %v14134_v49 = vpop.permute.xlu0 %14133 }
 0x3ab   : > { %v7236_v29 = vrot.slane %v24203_v43, %v23420_v63  ;;  %v7243_v27 = vrot.slane %v24204_v1, %v23420_v63  ;;  %v11481_v10 = vcombine.high %v11436_v17, %v11468_v0  ;;  %v11480_v62 = vcombine.low %v11436_v17, %v11468_v0  ;;  %v24207_v0 = vld [vmem:[#allocation87_spill] sm:$0xff] }
 0x3ac   : > { %v15733_v32 = vcombine.low %v7252_v6, %v7259_v46  ;;  %v15735_v16 = vcombine.high %v7252_v6, %v7259_v46  ;;  %v15035_v36 = vsel %vm23259_vm11, %v15033_v39, %v14122_v30  ;;  %v11482_v21 = vcombine.low %v11443_v22, %v20980_v45  ;;  %14353 = vrot.lane.b32.xlu1 %v11479_v55, %s24205_s16  ;;  %v14130_v46 = vpop.permute.xlu1 %14129  ;;  %v24212_v43 = vld [vmem:[#allocation27_spill] sm:$0xff]  ;;  %s24216_s16 = smov 92  }
 0x3ad   : > { %v11548_v41 = vcombine.low %v11492_v48, %v11508_v44  ;;  %v11581_v34 = vcombine.high %v11524_v2, %v11540_v12  ;;  %v15037_v40 = vsel %vm23258_vm12, %v15035_v36, %v14126_v3  ;;  %14357 = vrot.lane.b32.xlu0 %v11480_v62, %s24206_s9  ;;  %vm23260_vm13 = vcmask 834560   ;;  %s24215_s9 = smov 90  }
 0x3ae   : > { %v15729_v56 = vcombine.low %v7236_v29, %v7243_v27  ;;  %v15731_v18 = vcombine.high %v7236_v29, %v7243_v27  ;;  %v11588_v50 = vrot.slane %v11580_v47, %v23420_v63  ;;  %v11549_v17 = vcombine.high %v11492_v48, %v11508_v44 }
 0x3af   : > { %v24209_v6 = vcombine.low %v24207_v0, %v24208_v57  ;;  %v24210_v2 = vcombine.high %v24207_v0, %v24208_v57  ;;  %v11531_v39 = vrot.slane %v15733_v32, %v16745_v33  ;;  %v11547_v14 = vrot.slane %v15735_v16, %v16745_v33  ;;  %v14142_v0 = vpop.permute.xlu0 %14141 }
 0x3b0   : > { %v24213_v48 = vcombine.low %v24211_v9, %v24212_v43  ;;  %v24214_v29 = vcombine.high %v24211_v9, %v24212_v43  ;;  %v15039_v27 = vsel %vm23261_vm14, %v15037_v40, %v14130_v46  ;;  %vm23263_vm12 = vcmask 850944   ;;  %14361 = vrot.lane.b32.xlu1 %v11481_v10, %s24215_s9  ;;  %s24218_s9 = smov 96  }
 0x3b1   : > { %v7340_v4 = vrot.slane %v24209_v6, %v23420_v63  ;;  %v7347_v12 = vrot.slane %v24210_v2, %v23420_v63  ;;  %v11556_v55 = vrot.slane %v11548_v41, %v23420_v63  ;;  %v11595_v47 = vrot.slane %v11581_v34, %v23420_v63  ;;  %14365 = vrot.lane.b32.xlu0 %v11482_v21, %s24216_s16  ;;  %v14138_v41 = vpop.permute.xlu1 %14137  ;;  %s24217_s16 = smov 94  }
 0x3b2   : > { %v7356_v44 = vrot.slane %v24213_v48, %v23420_v63  ;;  %v7363_v1 = vrot.slane %v24214_v29, %v23420_v63  ;;  %v15041_v30 = vsel %vm23260_vm13, %v15039_v27, %v14134_v49  ;;  %vm23262_vm11 = vcmask 867328  }
 0x3b3   : > { %v11499_v3 = vrot.slane %v15729_v56, %v16745_v33  ;;  %v11515_v62 = vrot.slane %v15731_v18, %v16745_v33  ;;  %v11483_v32 = vcombine.high %v11443_v22, %v20980_v45  ;;  %v11612_v16 = vcombine.low %v11556_v55, %v11588_v50 }
 0x3b4   : > { %v11563_v36 = vrot.slane %v11549_v17, %v23420_v63  ;;  %v15736_v40 = vcombine.low %v7340_v4, %v7347_v12  ;;  %v11596_v34 = vcombine.low %v11531_v39, %v11547_v14  ;;  %v15738_v57 = vcombine.high %v7340_v4, %v7347_v12  ;;  %v24219_v4 = vld [vmem:[#allocation73_spill] sm:$0xff]  ;;  %v24220_v12 = vld [vmem:[#allocation52_spill] sm:$0xff] }
 0x3b5   : > { %v15740_v10 = vcombine.low %v7356_v44, %v7363_v1  ;;  %v15742_v6 = vcombine.high %v7356_v44, %v7363_v1  ;;  %v15043_v2 = vsel %vm23263_vm12, %v15041_v30, %v14138_v41  ;;  %v11613_v21 = vcombine.high %v11556_v55, %v11588_v50  ;;  %14369 = vrot.lane.b32.xlu1 %v11483_v32, %s24217_s16  ;;  %v14146_v48 = vpop.permute.xlu1 %14145  ;;  %v14150_v44 = vpop.permute.xlu0 %14149  ;;  %v24223_v55 = vld [vmem:[#allocation168_spill] sm:$0xff]  ;;  %v24224_v30 = vld [vmem:[#allocation169_spill] sm:$0xff]  ;;  %s24228_s16 = smov 100  }
 0x3b6   : > { %vm23264_vm13 = vcmask 883712   ;;  %v11614_v46 = vcombine.low %v11563_v36, %v11595_v47  ;;  %v15045_v56 = vsel %vm23262_vm11, %v15043_v2, %v14142_v0  ;;  %14373 = vrot.lane.b32.xlu0 %v11612_v16, %s24218_s9  ;;  %vm23265_vm14 = vcmask 900096   ;;  %s24227_s9 = smov 98  }
 0x3b7   : > { %v11564_v45 = vcombine.low %v11499_v3, %v11515_v62  ;;  %v11597_v22 = vcombine.high %v11531_v39, %v11547_v14  ;;  %v11565_v18 = vcombine.high %v11499_v3, %v11515_v62  ;;  %v21035_v17 = vrot.slane %v15736_v40, %v16745_v33 }
 0x3b8   : > { %v24221_v49 = vcombine.low %v24219_v4, %v24220_v12  ;;  %v24222_v9 = vcombine.high %v24219_v4, %v24220_v12  ;;  %v11604_v29 = vrot.slane %v11596_v34, %v23420_v63  ;;  %v11644_v39 = vrot.slane %v15738_v57, %v16745_v33 }
 0x3b9   : > { %v11660_v14 = vrot.slane %v15740_v10, %v16745_v33  ;;  %v11676_v1 = vrot.slane %v15742_v6, %v16745_v33  ;;  %v15047_v27 = vsel %vm23264_vm13, %v15045_v56, %v14146_v48  ;;  %vm23267_vm11 = vcmask 916480   ;;  %14377 = vrot.lane.b32.xlu1 %v11613_v21, %s24227_s9  ;;  %v14154_v6 = vpop.permute.xlu1 %14153  ;;  %v14158_v2 = vpop.permute.xlu0 %14157  ;;  %s24230_s9 = smov 104  }
 0x3ba   : > { %v7388_v50 = vrot.slane %v24221_v49, %v23420_v63  ;;  %v7395_v43 = vrot.slane %v24222_v9, %v23420_v63  ;;  %v24225_v3 = vcombine.low %v24223_v55, %v24224_v30  ;;  %v24226_v32 = vcombine.high %v24223_v55, %v24224_v30  ;;  %14381 = vrot.lane.b32.xlu0 %v11614_v46, %s24228_s16  ;;  %s24229_s16 = smov 102  }
 0x3bb   : > { %v15049_v40 = vsel %vm23265_vm14, %v15047_v27, %v14150_v44  ;;  %vm23266_vm12 = vcmask 932864   ;;  %v11572_v41 = vrot.slane %v11564_v45, %v23420_v63  ;;  %v11611_v0 = vrot.slane %v11597_v22, %v23420_v63 }
 0x3bc   : > { %v7372_v62 = vrot.slane %v24225_v3, %v23420_v63  ;;  %v7379_v16 = vrot.slane %v24226_v32, %v23420_v63  ;;  %v11615_v34 = vcombine.high %v11563_v36, %v11595_v47  ;;  %vm23269_vm13 = vcmask 949248  }
 0x3bd   : > { %v15741_v57 = vcombine.low %v7388_v50, %v7395_v43  ;;  %v15743_v10 = vcombine.high %v7388_v50, %v7395_v43  ;;  %v11616_v56 = vcombine.low %v11572_v41, %v11604_v29  ;;  %v11579_v4 = vrot.slane %v11565_v18, %v23420_v63  ;;  %v24231_v50 = vld [vmem:[#allocation92_spill] sm:$0xff]  ;;  %v24232_v43 = vld [vmem:[#allocation93_spill] sm:$0xff]  ;;  %v14162_v30 = vpop.permute.xlu1 %14161  ;;  %v14166_v3 = vpop.permute.xlu0 %14165 }
 0x3be   : > { %v11684_v21 = vcombine.low %v21035_v17, %v11644_v39  ;;  %v11716_v12 = vcombine.low %v11660_v14, %v11676_v1  ;;  %v15051_v49 = vsel %vm23267_vm11, %v15049_v40, %v14154_v6  ;;  %v11617_v46 = vcombine.high %v11572_v41, %v11604_v29  ;;  %14385 = vrot.lane.b32.xlu1 %v11615_v34, %s24229_s16  ;;  %s24238_s16 = smov 108  }
 0x3bf   : > { %v15737_v9 = vcombine.low %v7372_v62, %v7379_v16  ;;  %v15739_v48 = vcombine.high %v7372_v62, %v7379_v16  ;;  %v15053_v47 = vsel %vm23266_vm12, %v15051_v49, %v14158_v2  ;;  %14389 = vrot.lane.b32.xlu0 %v11616_v56, %s24230_s9  ;;  %vm23268_vm14 = vcmask 965632   ;;  %s24237_s9 = smov 106  }
 0x3c0   : > { %v11618_v36 = vcombine.low %v11579_v4, %v11611_v0  ;;  %v11717_v45 = vcombine.high %v11660_v14, %v11676_v1  ;;  %v21070_v22 = vrot.slane %v15741_v57, %v16745_v33  ;;  %v21073_v18 = vrot.slane %v15743_v10, %v16745_v33 }
 0x3c1   : > { %v24233_v44 = vcombine.low %v24231_v50, %v24232_v43  ;;  %v24234_v27 = vcombine.high %v24231_v50, %v24232_v43  ;;  %v11724_v14 = vrot.slane %v11716_v12, %v23420_v63  ;;  %v11685_v1 = vcombine.high %v21035_v17, %v11644_v39  ;;  %v14170_v56 = vpop.permute.xlu1 %14169  ;;  %v14174_v12 = vpop.permute.xlu0 %14173 }
 0x3c2   : > { %v24235_v62 = vcombine.low %v19863_v5, %v19871_v61  ;;  %v24236_v16 = vcombine.high %v19863_v5, %v19871_v61  ;;  %v15055_v41 = vsel %vm23269_vm13, %v15053_v47, %v14162_v30  ;;  %vm15058_vm12 = vcmask 982016   ;;  %14393 = vrot.lane.b32.xlu1 %v11617_v46, %s24237_s9  ;;  %s24240_s9 = smov 110  }
 0x3c3   : > { %v7476_v29 = vrot.slane %v24233_v44, %v23420_v63  ;;  %v7483_v55 = vrot.slane %v24234_v27, %v23420_v63  ;;  %v21095_v34 = vrot.slane %v15737_v9, %v16745_v33  ;;  %v21098_v57 = vrot.slane %v15739_v48, %v16745_v33  ;;  %14397 = vrot.lane.b32.xlu0 %v11618_v36, %s24238_s16  ;;  %s15357_s16 = sshll.u32 %s23270_s1, 5  ;;  %s24245_s1 = smov 114  }
 0x3c4   : > { %v7492_v32 = vrot.slane %v24235_v62, %v23420_v63  ;;  %v7499_v40 = vrot.slane %v24236_v16, %v23420_v63  ;;  %v15057_v17 = vsel %vm23268_vm14, %v15055_v41, %v14166_v3  ;;  %vm15060_vm11 = vcmask 998400  }
 0x3c5   : > { %v11692_v39 = vrot.slane %v11684_v21, %v23420_v63  ;;  %v11731_v5 = vrot.slane %v11717_v45, %v23420_v63  ;;  %v11619_v61 = vcombine.high %v11579_v4, %v11611_v0  ;;  %v11732_v10 = vcombine.low %v21070_v22, %v21073_v18  ;;  %v14182_v30 = vpop.permute.xlu0 %14181 }
 0x3c6   : > { %v15744_v6 = vcombine.low %v7476_v29, %v7483_v55  ;;  %v15746_v2 = vcombine.high %v7476_v29, %v7483_v55  ;;  %v11699_v46 = vrot.slane %v11685_v1, %v23420_v63  ;;  %v15748_v9 = vcombine.low %v7492_v32, %v7499_v40  ;;  %v14178_v55 = vpop.permute.xlu1 %14177 }
 0x3c7   : > { %v11748_v49 = vcombine.low %v11692_v39, %v11724_v14  ;;  %v15750_v48 = vcombine.high %v7492_v32, %v7499_v40  ;;  %v24239_v21 = vcombine.low %v24034_v54, %v20345_v28  ;;  %v15059_v0 = vsel %vm15058_vm12, %v15057_v17, %v14170_v56  ;;  %14401 = vrot.lane.b32.xlu1 %v11619_v61, %s24240_s9  ;;  %v24247_v61 = vld [vmem:[#allocation94_spill] sm:$0xff] }
 0x3c8   : > { %vm15062_vm14 = vcmask 1014784   ;;  %v11700_v4 = vcombine.low %v21095_v34, %v21098_v57  ;;  %v15061_v36 = vsel %vm15060_vm11, %v15059_v0, %v14174_v12  ;;  %v11749_v45 = vcombine.high %v11692_v39, %v11724_v14  ;;  %v24242_v14 = vld [vmem:[#allocation28_spill] sm:$0xff] }
 0x3c9   : > { %v21113_v47 = vrot.slane %v24239_v21, %v16745_v33  ;;  %14405 = vrot.lane.b32.xlu0 %v11748_v49, %s24241_s11  ;;  %vm15064_vm13 = vcmask 1031168   ;;  %v11750_v50 = vcombine.low %v11699_v46, %v11731_v5  ;;  %v11740_v43 = vrot.slane %v11732_v10, %v23420_v63  ;;  %s21155_s11 = scalar_lea.vmem [#allocation2], %s15357_s16  ;;  %v14190_v49 = vpop.permute.xlu0 %14189  ;;  %s24251_s16 = smov 118  }
 0x3ca   : > { %v11733_v44 = vcombine.high %v21070_v22, %v21073_v18  ;;  %v11764_v29 = vrot.slane %v15744_v6, %v16745_v33  ;;  %v11780_v27 = vrot.slane %v15746_v2, %v16745_v33  ;;  %v11796_v3 = vrot.slane %v15748_v9, %v16745_v33  ;;  %v14186_v12 = vpop.permute.xlu1 %14185 }
 0x3cb   : > { %v11812_v1 = vrot.slane %v15750_v48, %v16745_v33  ;;  %v24243_v62 = vcombine.low %v19888_v24, %v24242_v14  ;;  %v24244_v16 = vcombine.high %v19888_v24, %v24242_v14  ;;  %v10796_v18 = vcombine.low %v20605_v26, %v20599_v23  ;;  %14409 = vrot.lane.b32.xlu1 %v11749_v45, %s24245_s1  ;;  %v24248_v24 = vld [vmem:[#allocation95_spill] sm:$0xff] }
 0x3cc   : > { %v15063_v40 = vsel %vm15062_vm14, %v15061_v36, %v14178_v55  ;;  %v11708_v41 = vrot.slane %v11700_v4, %v23420_v63  ;;  %v11701_v17 = vcombine.high %v21095_v34, %v21098_v57  ;;  %v24249_v10 = vcombine.low %v24247_v61, %v24248_v24 }
 0x3cd   : > { %v7524_v32 = vrot.slane %v24243_v62, %v23420_v63  ;;  %v7531_v22 = vrot.slane %v24244_v16, %v23420_v63  ;;  %v15065_v39 = vsel %vm15064_vm13, %v15063_v40, %v14182_v30  ;;  %14413 = vrot.lane.b32.xlu0 %v11750_v50, %s24246_s7  ;;  %v24250_v23 = vcombine.high %v24247_v61, %v24248_v24  ;;  %s24252_s7 = smov 120   ;;  %v24258_v61 = vld [vmem:[#allocation91_spill] sm:$0xff] }
 0x3ce   : > { %v7508_v6 = vrot.slane %v24249_v10, %v23420_v63  ;;  %15255 = vst [vmem:[%s21155_s11] sm:$0xff] %v15065_v39  ;;  %v11751_v34 = vcombine.high %v11699_v46, %v11731_v5  ;;  %v11752_v57 = vcombine.low %v11708_v41, %v11740_v43  ;;  %v11747_v2 = vrot.slane %v11733_v44, %v23420_v63  ;;  %v24257_v39 = vld [vmem:[#allocation90_spill] sm:$0xff] }
 0x3cf   : > { %v7515_v26 = vrot.slane %v24250_v23, %v23420_v63  ;;  %v11821_v56 = vcombine.high %v11764_v29, %v11780_v27  ;;  %v11853_v9 = vcombine.high %v11796_v3, %v11812_v1  ;;  %v11852_v48 = vcombine.low %v11796_v3, %v11812_v1  ;;  %v24253_v3 = vld [vmem:[#allocation40_spill] sm:$0xff]  ;;  %v24254_v1 = vld [vmem:[#allocation121_spill] sm:$0xff] }
 0x3d0   : > { %v15749_v21 = vcombine.low %v7524_v32, %v7531_v22  ;;  %v15751_v0 = vcombine.high %v7524_v32, %v7531_v22  ;;  %v15066_v4 = vsel %vm14940_vm0, %v10796_v18, %v14186_v12  ;;  %v11753_v36 = vcombine.high %v11708_v41, %v11740_v43  ;;  %14417 = vrot.lane.b32.xlu1 %v11751_v34, %s24251_s16  ;;  %v14198_v32 = vpop.permute.xlu0 %14197  ;;  %s24262_s16 = smov 124  }
 0x3d1   : > { %v11715_v45 = vrot.slane %v11701_v17, %v23420_v63  ;;  %v11820_v50 = vcombine.low %v11764_v29, %v11780_v27  ;;  %v15067_v5 = vsel %vm14942_vm1, %v15066_v4, %v14190_v49  ;;  %14421 = vrot.lane.b32.xlu0 %v11752_v57, %s24252_s7  ;;  %v15745_v46 = vcombine.low %v7508_v6, %v7515_v26  ;;  %v14194_v27 = vpop.permute.xlu1 %14193  ;;  %s24261_s7 = smov 122   ;;  %v24264_v49 = vld [vmem:[#allocation201_spill] sm:$0xff] }
 0x3d2   : > { %v15747_v44 = vcombine.high %v7508_v6, %v7515_v26  ;;  %v11835_v30 = vrot.slane %v11821_v56, %v23420_v63  ;;  %v24255_v14 = vcombine.low %v24253_v3, %v24254_v1  ;;  %v24256_v43 = vcombine.high %v24253_v3, %v24254_v1 }
 0x3d3   : > { %v11754_v55 = vcombine.low %v11715_v45, %v11747_v2  ;;  %v11867_v16 = vrot.slane %v11853_v9, %v23420_v63  ;;  %v21175_v22 = vrot.slane %v11852_v48, %v23420_v63  ;;  %v11803_v18 = vrot.slane %v15749_v21, %v16745_v33 }
 0x3d4   : > { %v7628_v62 = vrot.slane %v24255_v14, %v23420_v63  ;;  %v7635_v29 = vrot.slane %v24256_v43, %v23420_v63  ;;  %v11819_v40 = vrot.slane %v15751_v0, %v16745_v33  ;;  %v15068_v41 = vsel %vm14944_vm2, %v15067_v5, %v14194_v27  ;;  %14425 = vrot.lane.b32.xlu1 %v11753_v36, %s24261_s7  ;;  %v14206_v36 = vpop.permute.xlu0 %14205  ;;  %s24266_s7 = smov 2   ;;  %v24268_v43 = vld [vmem:[#allocation39_spill] sm:$0xff] }
 0x3d5   : > { %v21181_v17 = vrot.slane %v11820_v50, %v23420_v63  ;;  %v24259_v24 = vcombine.low %v24257_v39, %v24258_v61  ;;  %v24260_v6 = vcombine.high %v24257_v39, %v24258_v61  ;;  %v15069_v26 = vsel %vm14946_vm3, %v15068_v41, %v14198_v32  ;;  %14429 = vrot.lane.b32.xlu0 %v11754_v55, %s24262_s16  ;;  %v14202_v0 = vpop.permute.xlu1 %14201  ;;  %s24265_s16 = smov 126  }
 0x3d6   : > { %v11771_v34 = vrot.slane %v15745_v46, %v16745_v33  ;;  %v11787_v57 = vrot.slane %v15747_v44, %v16745_v33  ;;  %v24263_v56 = vcombine.high %v24034_v54, %v20345_v28  ;;  %v5004_v9 = vcombine.low %v24264_v49, %v20461_v13 }
 0x3d7   : > { %v7612_v10 = vrot.slane %v24259_v24, %v23420_v63  ;;  %v7619_v23 = vrot.slane %v24260_v6, %v23420_v63  ;;  %v15756_v48 = vcombine.low %v7628_v62, %v7635_v29  ;;  %v15758_v21 = vcombine.high %v7628_v62, %v7635_v29  ;;  %v24267_v62 = vld [vmem:[#allocation101_spill] sm:$0xff]  ;;  %v24271_v24 = vld [vmem:[#allocation130_spill] sm:$0xff] }
 0x3d8   : > { %v21200_v12 = vrot.slane %v24263_v56, %v16745_v33  ;;  %v11755_v4 = vcombine.high %v11715_v45, %v11747_v2  ;;  %v11886_v50 = vcombine.low %v11835_v30, %v11867_v16  ;;  %v11885_v5 = vcombine.high %v21181_v17, %v21175_v22  ;;  %v14214_v41 = vpop.permute.xlu0 %14213 }
 0x3d9   : > { %v11868_v46 = vcombine.low %v11803_v18, %v11819_v40  ;;  %v15070_v44 = vsel %vm14948_vm4, %v15069_v26, %v14202_v0  ;;  %v11869_v55 = vcombine.high %v11803_v18, %v11819_v40  ;;  %v15752_v3 = vcombine.low %v7612_v10, %v7619_v23  ;;  %v14210_v40 = vpop.permute.xlu1 %14209 }
 0x3da   : > { %v15754_v28 = vcombine.high %v7612_v10, %v7619_v23  ;;  %14433 = vrot.lane.b32.xlu1 %v11755_v4, %s24265_s16  ;;  %v15071_v54 = vsel %vm14950_vm5, %v15070_v44, %v14206_v36  ;;  %14437 = vrot.lane.b32.xlu0 %v11885_v5, %s24266_s7  ;;  %v11836_v1 = vcombine.low %v11771_v34, %v11787_v57  ;;  %v24272_v10 = vld [vmem:[#allocation69_spill] sm:$0xff]  ;;  %s24275_s7 = smov 4   ;;  %s24276_s16 = smov 6  }
 0x3db   : > { %v11837_v14 = vcombine.high %v11771_v34, %v11787_v57  ;;  %v11932_v2 = vrot.slane %v15756_v48, %v16745_v33  ;;  %v11948_v45 = vrot.slane %v15758_v21, %v16745_v33  ;;  %v24269_v29 = vcombine.low %v24267_v62, %v24268_v43 }
 0x3dc   : > { %v24270_v32 = vcombine.high %v24267_v62, %v24268_v43  ;;  %v11876_v39 = vrot.slane %v11868_v46, %v23420_v63  ;;  %v11887_v61 = vcombine.high %v11835_v30, %v11867_v16  ;;  %v24273_v6 = vcombine.low %v24271_v24, %v24272_v10 }
 0x3dd   : > { %v7644_v27 = vrot.slane %v24269_v29, %v23420_v63  ;;  %v24274_v26 = vcombine.high %v24271_v24, %v24272_v10  ;;  %v15072_v57 = vsel %vm14952_vm6, %v15071_v54, %v14210_v40  ;;  %v11883_v56 = vrot.slane %v11869_v55, %v23420_v63  ;;  %v14218_v44 = vpop.permute.xlu1 %14217 }
 0x3de   : > { %v7651_v18 = vrot.slane %v24270_v32, %v23420_v63  ;;  %v7660_v23 = vrot.slane %v24273_v6, %v23420_v63  ;;  %v11900_v48 = vrot.slane %v15752_v3, %v16745_v33  ;;  %v11916_v21 = vrot.slane %v15754_v28, %v16745_v33  ;;  %14441 = vrot.lane.b32.xlu1 %v11886_v50, %s24275_s7  ;;  %v14222_v3 = vpop.permute.xlu0 %14221  ;;  %s24277_s7 = smov 8  }
 0x3df   : > { %v7667_v34 = vrot.slane %v24274_v26, %v23420_v63  ;;  %v5005_v30 = vcombine.high %v24264_v49, %v20461_v13  ;;  %v15073_v16 = vsel %vm14954_vm7, %v15072_v57, %v14214_v41  ;;  %v11844_v0 = vrot.slane %v11836_v1, %v23420_v63  ;;  %14445 = vrot.lane.b32.xlu0 %v11887_v61, %s24276_s16  ;;  %s24278_s16 = smov 10   ;;  %v24280_v26 = vld [vmem:[#allocation106_spill] sm:$0xff] }
 0x3e0   : > { %v11851_v4 = vrot.slane %v11837_v14, %v23420_v63  ;;  %v11988_v36 = vcombine.low %v11932_v2, %v11948_v45  ;;  %v15753_v5 = vcombine.low %v7644_v27, %v7651_v18  ;;  %v15755_v46 = vcombine.high %v7644_v27, %v7651_v18 }
 0x3e1   : > { %v11888_v55 = vcombine.low %v11844_v0, %v11876_v39  ;;  %v11889_v28 = vcombine.high %v11844_v0, %v11876_v39  ;;  %v15757_v54 = vcombine.low %v7660_v23, %v7667_v34  ;;  %v15759_v62 = vcombine.high %v7660_v23, %v7667_v34  ;;  %v14226_v61 = vpop.permute.xlu1 %14225  ;;  %v24279_v23 = vld [vmem:[#allocation68_spill] sm:$0xff] }
 0x3e2   : > { %v15074_v43 = vsel %vm14956_vm8, %v15073_v16, %v14218_v44  ;;  %v11890_v29 = vcombine.low %v11851_v4, %v11883_v56  ;;  %v11956_v1 = vcombine.low %v11900_v48, %v11916_v21  ;;  %v11891_v27 = vcombine.high %v11851_v4, %v11883_v56  ;;  %v14230_v24 = vpop.permute.xlu0 %14229  ;;  %v24284_v16 = vld [vmem:[#allocation182_spill] sm:$0xff]  ;;  %v24287_v44 = vld [vmem:[#allocation35_spill] sm:$0xff] }
 0x3e3   : > { %14449 = vrot.lane.b32.xlu1 %v11888_v55, %s24277_s7  ;;  %v15075_v14 = vsel %vm23273_vm9, %v15074_v43, %v14222_v3  ;;  %14453 = vrot.lane.b32.xlu0 %v11889_v28, %s24278_s16  ;;  %v11957_v32 = vcombine.high %v11900_v48, %v11916_v21  ;;  %v11996_v18 = vrot.slane %v11988_v36, %v23420_v63  ;;  %v24283_v21 = vld [vmem:[#allocation181_spill] sm:$0xff]  ;;  %s24288_s16 = smov 12   ;;  %s24290_s7 = smov 14   ;;  %vm24291_vm9 = vcmask 211968  }
 0x3e4   : > { %v11989_v40 = vcombine.high %v11932_v2, %v11948_v45  ;;  %v21248_v41 = vrot.slane %v15753_v5, %v16745_v33  ;;  %v21251_v39 = vrot.slane %v15755_v46, %v16745_v33  ;;  %v11939_v10 = vrot.slane %v15757_v54, %v16745_v33 }
 0x3e5   : > { %v11955_v6 = vrot.slane %v15759_v62, %v16745_v33  ;;  %v24281_v34 = vcombine.low %v24279_v23, %v24280_v26  ;;  %v24282_v2 = vcombine.high %v24279_v23, %v24280_v26  ;;  %v15076_v56 = vsel %vm23272_vm10, %v15075_v14, %v14226_v61 }
 0x3e6   : > { %v11964_v48 = vrot.slane %v11956_v1, %v23420_v63  ;;  %v24285_v0 = vcombine.low %v24283_v21, %v24284_v16  ;;  %v24286_v36 = vcombine.high %v24283_v21, %v24284_v16  ;;  %v5188_v55 = vcombine.low %v24287_v44, %v21113_v47  ;;  %v14234_v1 = vpop.permute.xlu1 %14233  ;;  %v14238_v14 = vpop.permute.xlu0 %14237  ;;  %v24300_v16 = vld [vmem:[#allocation65_spill] sm:$0xff] }
 0x3e7   : > { %v7764_v57 = vrot.slane %v24281_v34, %v23420_v63  ;;  %v7771_v45 = vrot.slane %v24282_v2, %v23420_v63  ;;  %14457 = vrot.lane.b32.xlu1 %v11890_v29, %s24288_s16  ;;  %vm24289_vm10 = vcmask 195584   ;;  %14461 = vrot.lane.b32.xlu0 %v11891_v27, %s24290_s7  ;;  %v11971_v54 = vrot.slane %v11957_v32, %v23420_v63  ;;  %s24292_s7 = smov 16   ;;  %s24294_s16 = smov 18  }
 0x3e8   : > { %v7748_v4 = vrot.slane %v24285_v0, %v23420_v63  ;;  %v7755_v5 = vrot.slane %v24286_v36, %v23420_v63  ;;  %v15077_v3 = vsel %vm24289_vm10, %v15076_v56, %v14230_v24  ;;  %v12020_v28 = vcombine.low %v11964_v48, %v11996_v18  ;;  %v24296_v56 = vld [vmem:[#allocation184_spill] sm:$0xff] }
 0x3e9   : > { %v12003_v62 = vrot.slane %v11989_v40, %v23420_v63  ;;  %v11972_v43 = vcombine.low %v21248_v41, %v21251_v39  ;;  %v12021_v61 = vcombine.high %v11964_v48, %v11996_v18  ;;  %v12004_v23 = vcombine.low %v11939_v10, %v11955_v6  ;;  %v24295_v40 = vld [vmem:[#allocation183_spill] sm:$0xff] }
 0x3ea   : > { %v15764_v26 = vcombine.low %v7764_v57, %v7771_v45  ;;  %v15766_v34 = vcombine.high %v7764_v57, %v7771_v45  ;;  %v15078_v29 = vsel %vm24291_vm9, %v15077_v3, %v14234_v1  ;;  %v11973_v24 = vcombine.high %v21248_v41, %v21251_v39  ;;  %v24299_v39 = vld [vmem:[#allocation42_spill] sm:$0xff]  ;;  %v14242_v3 = vpop.permute.xlu1 %14241 }
 0x3eb   : > { %v15760_v27 = vcombine.low %v7748_v4, %v7755_v5  ;;  %v15762_v2 = vcombine.high %v7748_v4, %v7755_v5  ;;  %14465 = vrot.lane.b32.xlu1 %v12020_v28, %s24292_s7  ;;  %vm24293_vm10 = vcmask 228352   ;;  %14469 = vrot.lane.b32.xlu0 %v12021_v61, %s24294_s16  ;;  %v24297_v18 = vcombine.low %v24295_v40, %v24296_v56  ;;  %v14246_v28 = vpop.permute.xlu0 %14245  ;;  %s24304_s16 = smov 20  }
 0x3ec   : > { %v15079_v32 = vsel %vm24293_vm10, %v15078_v29, %v14238_v14  ;;  %v24298_v57 = vcombine.high %v24295_v40, %v24296_v56  ;;  %v12022_v21 = vcombine.low %v11971_v54, %v12003_v62  ;;  %v12005_v41 = vcombine.high %v11939_v10, %v11955_v6 }
 0x3ed   : > { %v7780_v48 = vrot.slane %v24297_v18, %v23420_v63  ;;  %v24301_v0 = vcombine.low %v24299_v39, %v24300_v16  ;;  %v24302_v36 = vcombine.high %v24299_v39, %v24300_v16  ;;  %v12012_v1 = vrot.slane %v12004_v23, %v23420_v63 }
 0x3ee   : > { %v7787_v45 = vrot.slane %v24298_v57, %v23420_v63  ;;  %v12023_v14 = vcombine.high %v11971_v54, %v12003_v62  ;;  %v12068_v61 = vrot.slane %v15764_v26, %v16745_v33  ;;  %v12084_v29 = vrot.slane %v15766_v34, %v16745_v33 }
 0x3ef   : > { %v7796_v4 = vrot.slane %v24301_v0, %v23420_v63  ;;  %v7803_v5 = vrot.slane %v24302_v36, %v23420_v63  ;;  %vm24303_vm9 = vcmask 244736   ;;  %v11980_v6 = vrot.slane %v11972_v43, %v23420_v63  ;;  %14473 = vrot.lane.b32.xlu1 %v12022_v21, %s24304_s16  ;;  %v14250_v43 = vpop.permute.xlu1 %14249 }
 0x3f0   : > { %v15080_v10 = vsel %vm24303_vm9, %v15079_v32, %v14242_v3  ;;  %v12036_v40 = vrot.slane %v15760_v27, %v16745_v33  ;;  %v12052_v56 = vrot.slane %v15762_v2, %v16745_v33  ;;  %vm24305_vm10 = vcmask 261120   ;;  %14477 = vrot.lane.b32.xlu0 %v12023_v14, %s24114_s22  ;;  %v14254_v27 = vpop.permute.xlu0 %14253 }
 0x3f1   : > { %v15081_v18 = vsel %vm24305_vm10, %v15080_v10, %v14246_v28  ;;  %v15761_v23 = vcombine.low %v7780_v48, %v7787_v45  ;;  %v15763_v54 = vcombine.high %v7780_v48, %v7787_v45  ;;  %v5189_v62 = vcombine.high %v24287_v44, %v21113_v47  ;;  %v24308_v28 = vld [vmem:[#allocation180_spill] sm:$0xff] }
 0x3f2   : > { %v12019_v26 = vrot.slane %v12005_v41, %v23420_v63  ;;  %v15765_v34 = vcombine.low %v7796_v4, %v7803_v5  ;;  %v15767_v32 = vcombine.high %v7796_v4, %v7803_v5  ;;  %v12024_v57 = vcombine.low %v11980_v6, %v12012_v1 }
 0x3f3   : > { %v12025_v39 = vcombine.high %v11980_v6, %v12012_v1  ;;  %v12124_v2 = vcombine.low %v12068_v61, %v12084_v29  ;;  %v12125_v16 = vcombine.high %v12068_v61, %v12084_v29  ;;  %vm24306_vm9 = vcmask 277504   ;;  %v24309_v1 = vld [vmem:[#allocation185_spill] sm:$0xff]  ;;  %v14258_v10 = vpop.permute.xlu1 %14257 }
 0x3f4   : > { %v15082_v21 = vsel %vm24306_vm9, %v15081_v18, %v14250_v43  ;;  %v11987_v0 = vrot.slane %v11973_v24, %v23420_v63  ;;  %v12092_v36 = vcombine.low %v12036_v40, %v12052_v56  ;;  %v12093_v3 = vcombine.high %v12036_v40, %v12052_v56  ;;  %14481 = vrot.lane.b32.xlu1 %v12024_v57, %s24115_s21  ;;  %v14262_v40 = vpop.permute.xlu0 %14261  ;;  %v24314_v43 = vld [vmem:[#allocation15_spill] sm:$0xff]  ;;  %v24315_v57 = vld [vmem:[#allocation41_spill] sm:$0xff] }
 0x3f5   : > { %vm24307_vm10 = vcmask 293888   ;;  %14485 = vrot.lane.b32.xlu0 %v12025_v39, %s24124_s20  ;;  %v12043_v45 = vrot.slane %v15761_v23, %v16745_v33  ;;  %v12059_v41 = vrot.slane %v15763_v54, %v16745_v33  ;;  %v12075_v4 = vrot.slane %v15765_v34, %v16745_v33  ;;  %v24312_v54 = vld [vmem:[#allocation154_spill] sm:$0xff] }
 0x3f6   : > { %v15083_v48 = vsel %vm24307_vm10, %v15082_v21, %v14254_v27  ;;  %v12091_v5 = vrot.slane %v15767_v32, %v16745_v33  ;;  %v24310_v24 = vcombine.low %v24308_v28, %v24309_v1  ;;  %v24311_v61 = vcombine.high %v24308_v28, %v24309_v1 }
 0x3f7   : > { %v12026_v6 = vcombine.low %v11987_v0, %v12019_v26  ;;  %v12132_v56 = vrot.slane %v12124_v2, %v23420_v63  ;;  %v12027_v18 = vcombine.high %v11987_v0, %v12019_v26  ;;  %v12139_v23 = vrot.slane %v12125_v16, %v23420_v63 }
 0x3f8   : > { %v7900_v14 = vrot.slane %v24310_v24, %v23420_v63  ;;  %v7907_v29 = vrot.slane %v24311_v61, %v23420_v63  ;;  %v5204_v34 = vcombine.low %v24312_v54, %v21200_v12  ;;  %vm24313_vm9 = vcmask 310272  }
 0x3f9   : > { %v15084_v32 = vsel %vm24313_vm9, %v15083_v48, %v14258_v10  ;;  %v24316_v27 = vcombine.low %v24314_v43, %v24315_v57  ;;  %v24317_v21 = vcombine.high %v24314_v43, %v24315_v57  ;;  %14489 = vrot.lane.b32.xlu1 %v12026_v6, %s24125_s17  ;;  %vm24318_vm10 = vcmask 326656   ;;  %14493 = vrot.lane.b32.xlu0 %v12027_v18, %s24126_s15  ;;  %v14266_v10 = vpop.permute.xlu1 %14265  ;;  %v14270_v57 = vpop.permute.xlu0 %14269 }
 0x3fa   : > { %v15085_v26 = vsel %vm24318_vm10, %v15084_v32, %v14262_v40  ;;  %v12100_v2 = vrot.slane %v12092_v36, %v23420_v63  ;;  %v12107_v16 = vrot.slane %v12093_v3, %v23420_v63  ;;  %v12108_v0 = vcombine.low %v12043_v45, %v12059_v41 }
 0x3fb   : > { %v7884_v39 = vrot.slane %v24316_v27, %v23420_v63  ;;  %v7891_v28 = vrot.slane %v24317_v21, %v23420_v63  ;;  %v12140_v48 = vcombine.low %v12075_v4, %v12091_v5  ;;  %v15772_v1 = vcombine.low %v7900_v14, %v7907_v29 }
 0x3fc   : > { %v15774_v24 = vcombine.high %v7900_v14, %v7907_v29  ;;  %v5205_v61 = vcombine.high %v24312_v54, %v21200_v12  ;;  %v12156_v43 = vcombine.low %v12100_v2, %v12132_v56  ;;  %v12158_v27 = vcombine.low %v12107_v16, %v12139_v23 }
 0x3fd   : > { %v12157_v6 = vcombine.high %v12100_v2, %v12132_v56  ;;  %vm24319_vm9 = vcmask 343040   ;;  %v12141_v32 = vcombine.high %v12075_v4, %v12091_v5  ;;  %v15768_v36 = vcombine.low %v7884_v39, %v7891_v28  ;;  %v14278_v4 = vpop.permute.xlu0 %14277  ;;  %v24321_v5 = vld [vmem:[#allocation178_spill] sm:$0xff] }
 0x3fe   : > { %v15086_v40 = vsel %vm24319_vm9, %v15085_v26, %v14266_v10  ;;  %v15770_v21 = vcombine.high %v7884_v39, %v7891_v28  ;;  %14497 = vrot.lane.b32.xlu1 %v12156_v43, %s24127_s13  ;;  %vm24320_vm10 = vcmask 359424   ;;  %v12159_v14 = vcombine.high %v12107_v16, %v12139_v23  ;;  %v14274_v26 = vpop.permute.xlu1 %14273  ;;  %v24322_v39 = vld [vmem:[#allocation179_spill] sm:$0xff]  ;;  %v24326_v16 = vld [vmem:[#allocation96_spill] sm:$0xff] }
 0x3ff   : > { %v15087_v3 = vsel %vm24320_vm10, %v15086_v40, %v14270_v57  ;;  %14501 = vrot.lane.b32.xlu0 %v12157_v6, %s24132_s12  ;;  %v12109_v29 = vcombine.high %v12043_v45, %v12059_v41  ;;  %v12116_v18 = vrot.slane %v12108_v0, %v23420_v63  ;;  %v12148_v46 = vrot.slane %v12140_v48, %v23420_v63  ;;  %v24325_v41 = vld [vmem:[#allocation133_spill] sm:$0xff] }
 0x400   : > { %v12204_v50 = vrot.slane %v15772_v1, %v16745_v33  ;;  %v12220_v56 = vrot.slane %v15774_v24, %v16745_v33  ;;  %v24323_v28 = vcombine.low %v24321_v5, %v24322_v39  ;;  %v24324_v23 = vcombine.high %v24321_v5, %v24322_v39 }
 0x401   : > { %v24327_v0 = vcombine.low %v24325_v41, %v24326_v16  ;;  %v24328_v1 = vcombine.high %v24325_v41, %v24326_v16  ;;  %vm24329_vm9 = vcmask 375808   ;;  %v12155_v43 = vrot.slane %v12141_v32, %v23420_v63 }
 0x402   : > { %v7916_v2 = vrot.slane %v24323_v28, %v23420_v63  ;;  %v7923_v45 = vrot.slane %v24324_v23, %v23420_v63  ;;  %v15088_v10 = vsel %vm24329_vm9, %v15087_v3, %v14274_v26  ;;  %v12172_v57 = vrot.slane %v15768_v36, %v16745_v33  ;;  %14505 = vrot.lane.b32.xlu1 %v12158_v27, %s24133_s5  ;;  %v14282_v39 = vpop.permute.xlu1 %14281 }
 0x403   : > { %v7932_v48 = vrot.slane %v24327_v0, %v23420_v63  ;;  %v7939_v24 = vrot.slane %v24328_v1, %v23420_v63  ;;  %v12188_v6 = vrot.slane %v15770_v21, %v16745_v33  ;;  %v21388_v40 = vrot.slane %v5188_v55, %v23420_v63  ;;  %14509 = vrot.lane.b32.xlu0 %v12159_v14, %s24138_s3  ;;  %v14286_v55 = vpop.permute.xlu0 %14285 }
 0x404   : > { %v21394_v5 = vrot.slane %v5004_v9, %v16745_v33  ;;  %vm24330_vm10 = vcmask 392192   ;;  %v12160_v36 = vcombine.low %v12116_v18, %v12148_v46  ;;  %v12123_v21 = vrot.slane %v12109_v29, %v23420_v63 }
 0x405   : > { %v15089_v32 = vsel %vm24330_vm10, %v15088_v10, %v14278_v4  ;;  %v12161_v3 = vcombine.high %v12116_v18, %v12148_v46  ;;  %v12260_v26 = vcombine.low %v12204_v50, %v12220_v56  ;;  %v15769_v28 = vcombine.low %v7916_v2, %v7923_v45 }
 0x406   : > { %v15771_v23 = vcombine.high %v7916_v2, %v7923_v45  ;;  %v15773_v41 = vcombine.low %v7932_v48, %v7939_v24  ;;  %v15775_v16 = vcombine.high %v7932_v48, %v7939_v24  ;;  %v21404_v9 = vrot.slane %v5189_v62, %v23420_v63  ;;  %14513 = vrot.lane.b32.xlu1 %v12160_v36, %s24139_s4  ;;  %v14290_v48 = vpop.permute.xlu1 %14289 }
 0x407   : > { %vm24331_vm9 = vcmask 408576   ;;  %v12162_v14 = vcombine.low %v12123_v21, %v12155_v43  ;;  %v12228_v4 = vcombine.low %v12172_v57, %v12188_v6  ;;  %vm24332_vm10 = vcmask 424960   ;;  %14517 = vrot.lane.b32.xlu0 %v12161_v3, %s24146_s25  ;;  %v14294_v1 = vpop.permute.xlu0 %14293 }
 0x408   : > { %v15090_v27 = vsel %vm24331_vm9, %v15089_v32, %v14282_v39  ;;  %v12163_v29 = vcombine.high %v12123_v21, %v12155_v43  ;;  %v12229_v18 = vcombine.high %v12172_v57, %v12188_v6  ;;  %v12268_v2 = vrot.slane %v12260_v26, %v23420_v63  ;;  %v24336_v6 = vld [vmem:[#allocation186_spill] sm:$0xff]  ;;  %v24337_v32 = vld [vmem:[#allocation187_spill] sm:$0xff] }
 0x409   : > { %v15091_v46 = vsel %vm24332_vm10, %v15090_v27, %v14286_v55  ;;  %v12261_v45 = vcombine.high %v12204_v50, %v12220_v56  ;;  %v24333_v47 = vcombine.low %v20013_v31, %v20017_v59  ;;  %v24334_v62 = vcombine.high %v20013_v31, %v20017_v59 }
 0x40a   : > { %v12179_v24 = vrot.slane %v15769_v28, %v16745_v33  ;;  %v12195_v10 = vrot.slane %v15771_v23, %v16745_v33  ;;  %v12211_v43 = vrot.slane %v15773_v41, %v16745_v33  ;;  %v12227_v50 = vrot.slane %v15775_v16, %v16745_v33  ;;  %14521 = vrot.lane.b32.xlu1 %v12162_v14, %s24147_s26  ;;  %v14298_v16 = vpop.permute.xlu1 %14297 }
 0x40b   : > { %v8036_v44 = vrot.slane %v24333_v47, %v23420_v63  ;;  %v8043_v0 = vrot.slane %v24334_v62, %v23420_v63  ;;  %vm24335_vm9 = vcmask 441344   ;;  %v12236_v57 = vrot.slane %v12228_v4, %v23420_v63  ;;  %14525 = vrot.lane.b32.xlu0 %v12163_v29, %s24148_s27  ;;  %v14302_v27 = vpop.permute.xlu0 %14301 }
 0x40c   : > { %v15092_v56 = vsel %vm24335_vm9, %v15091_v46, %v14290_v48  ;;  %v24338_v36 = vcombine.low %v24336_v6, %v24337_v32  ;;  %v24339_v31 = vcombine.high %v24336_v6, %v24337_v32  ;;  %v21437_v3 = vrot.slane %v5005_v30, %v16745_v33 }
 0x40d   : > { %vm24340_vm10 = vcmask 457728   ;;  %v12243_v39 = vrot.slane %v12229_v18, %v23420_v63  ;;  %v12292_v55 = vcombine.low %v12236_v57, %v12268_v2  ;;  %v12275_v28 = vrot.slane %v12261_v45, %v23420_v63  ;;  %v24343_v18 = vld [vmem:[#allocation188_spill] sm:$0xff]  ;;  %v24344_v45 = vld [vmem:[#allocation189_spill] sm:$0xff] }
 0x40e   : > { %v8020_v59 = vrot.slane %v24338_v36, %v23420_v63  ;;  %v8027_v21 = vrot.slane %v24339_v31, %v23420_v63  ;;  %v15093_v26 = vsel %vm24340_vm10, %v15092_v56, %v14294_v1  ;;  %v15780_v23 = vcombine.low %v8036_v44, %v8043_v0 }
 0x40f   : > { %v15782_v41 = vcombine.high %v8036_v44, %v8043_v0  ;;  %v12293_v4 = vcombine.high %v12236_v57, %v12268_v2  ;;  %v12244_v46 = vcombine.low %v12179_v24, %v12195_v10  ;;  %v12276_v13 = vcombine.low %v12211_v43, %v12227_v50  ;;  %14529 = vrot.lane.b32.xlu1 %v12292_v55, %s24149_s28  ;;  %v14306_v57 = vpop.permute.xlu1 %14305  ;;  %v14310_v32 = vpop.permute.xlu0 %14309 }
 0x410   : > { %v12277_v49 = vcombine.high %v12211_v43, %v12227_v50  ;;  %vm24341_vm9 = vcmask 474112   ;;  %v12245_v14 = vcombine.high %v12179_v24, %v12195_v10  ;;  %v15776_v47 = vcombine.low %v8020_v59, %v8027_v21 }
 0x411   : > { %v15094_v30 = vsel %vm24341_vm9, %v15093_v26, %v14298_v16  ;;  %v15778_v62 = vcombine.high %v8020_v59, %v8027_v21  ;;  %vm24342_vm10 = vcmask 490496   ;;  %14533 = vrot.lane.b32.xlu0 %v12293_v4, %s24156_s29  ;;  %v24345_v44 = vcombine.low %v24343_v18, %v24344_v45 }
 0x412   : > { %v15095_v29 = vsel %vm24342_vm10, %v15094_v30, %v14302_v27  ;;  %v24346_v2 = vcombine.high %v24343_v18, %v24344_v45  ;;  %v12340_v1 = vrot.slane %v15780_v23, %v16745_v33  ;;  %v12356_v24 = vrot.slane %v15782_v41, %v16745_v33 }
 0x413   : > { %v8052_v0 = vrot.slane %v24345_v44, %v23420_v63  ;;  %v24347_v10 = vcombine.low %v20034_v60, %v20037_v20  ;;  %v24348_v50 = vcombine.high %v20034_v60, %v20037_v20  ;;  %v12294_v6 = vcombine.low %v12243_v39, %v12275_v28 }
 0x414   : > { %v8059_v48 = vrot.slane %v24346_v2, %v23420_v63  ;;  %v12284_v36 = vrot.slane %v12276_v13, %v23420_v63  ;;  %v12295_v59 = vcombine.high %v12243_v39, %v12275_v28  ;;  %v12291_v31 = vrot.slane %v12277_v49, %v23420_v63  ;;  %v14318_v49 = vpop.permute.xlu0 %14317 }
 0x415   : > { %v8068_v43 = vrot.slane %v24347_v10, %v23420_v63  ;;  %v8075_v56 = vrot.slane %v24348_v50, %v23420_v63  ;;  %vm24349_vm9 = vcmask 506880   ;;  %v12252_v26 = vrot.slane %v12244_v46, %v23420_v63  ;;  %14537 = vrot.lane.b32.xlu1 %v12294_v6, %s24157_s30  ;;  %v14314_v46 = vpop.permute.xlu1 %14313 }
 0x416   : > { %v15096_v21 = vsel %vm24349_vm9, %v15095_v29, %v14306_v57  ;;  %v12308_v55 = vrot.slane %v15776_v47, %v16745_v33  ;;  %v12324_v23 = vrot.slane %v15778_v62, %v16745_v33  ;;  %vm24350_vm10 = vcmask 523264   ;;  %14541 = vrot.lane.b32.xlu0 %v12295_v59, %s24158_s2  ;;  %v24354_v57 = vld [vmem:[#allocation103_spill] sm:$0xff]  ;;  %v24358_v59 = vld [vmem:[#allocation97_spill] sm:$0xff] }
 0x417   : > { %v15097_v60 = vsel %vm24350_vm10, %v15096_v21, %v14310_v32  ;;  %v12259_v20 = vrot.slane %v12245_v14, %v23420_v63  ;;  %v15777_v41 = vcombine.low %v8052_v0, %v8059_v48  ;;  %v12396_v39 = vcombine.low %v12340_v1, %v12356_v24 }
 0x418   : > { %v15779_v28 = vcombine.high %v8052_v0, %v8059_v48  ;;  %v15781_v16 = vcombine.low %v8068_v43, %v8075_v56  ;;  %v15783_v27 = vcombine.high %v8068_v43, %v8075_v56  ;;  %v21480_v4 = vrot.slane %v5204_v34, %v23420_v63  ;;  %v14326_v50 = vpop.permute.xlu0 %14325  ;;  %v24353_v56 = vld [vmem:[#allocation102_spill] sm:$0xff] }
 0x419   : > { %v12296_v13 = vcombine.low %v12252_v26, %v12284_v36  ;;  %v12298_v30 = vcombine.low %v12259_v20, %v12291_v31  ;;  %v12297_v47 = vcombine.high %v12252_v26, %v12284_v36  ;;  %vm24351_vm9 = vcmask 539648   ;;  %v14322_v43 = vpop.permute.xlu1 %14321  ;;  %v24357_v36 = vld [vmem:[#allocation115_spill] sm:$0xff] }
 0x41a   : > { %v15098_v62 = vsel %vm24351_vm9, %v15097_v60, %v14314_v46  ;;  %v12364_v29 = vcombine.low %v12308_v55, %v12324_v23  ;;  %v12299_v14 = vcombine.high %v12259_v20, %v12291_v31  ;;  %v12365_v18 = vcombine.high %v12308_v55, %v12324_v23  ;;  %v24361_v60 = vld [vmem:[#allocation79_spill] sm:$0xff] }
 0x41b   : > { %14545 = vrot.lane.b32.xlu1 %v12296_v13, %s24159_s24  ;;  %vm24352_vm10 = vcmask 556032   ;;  %14549 = vrot.lane.b32.xlu0 %v12297_v47, %s24164_s23  ;;  %v12397_v44 = vcombine.high %v12340_v1, %v12356_v24  ;;  %v12315_v34 = vrot.slane %v15777_v41, %v16745_v33  ;;  %v12404_v0 = vrot.slane %v12396_v39, %v23420_v63 }
 0x41c   : > { %v15099_v45 = vsel %vm24352_vm10, %v15098_v62, %v14318_v49  ;;  %v12331_v2 = vrot.slane %v15779_v28, %v16745_v33  ;;  %v12347_v48 = vrot.slane %v15781_v16, %v16745_v33  ;;  %v12363_v10 = vrot.slane %v15783_v27, %v16745_v33  ;;  %v14334_v49 = vpop.permute.xlu0 %14333 }
 0x41d   : > { %v24355_v6 = vcombine.low %v24353_v56, %v24354_v57  ;;  %v24356_v1 = vcombine.high %v24353_v56, %v24354_v57  ;;  %v24359_v31 = vcombine.low %v24357_v36, %v24358_v59  ;;  %v24360_v26 = vcombine.high %v24357_v36, %v24358_v59  ;;  %v14330_v13 = vpop.permute.xlu1 %14329 }
 0x41e   : > { %v21511_v23 = vrot.slane %v5205_v61, %v23420_v63  ;;  %v5052_v20 = vcombine.low %v24361_v60, %v21394_v5  ;;  %vm24362_vm9 = vcmask 572416   ;;  %v12372_v39 = vrot.slane %v12364_v29, %v23420_v63 }
 0x41f   : > { %v8156_v32 = vrot.slane %v24355_v6, %v23420_v63  ;;  %v8163_v24 = vrot.slane %v24356_v1, %v23420_v63  ;;  %v8172_v21 = vrot.slane %v24359_v31, %v23420_v63  ;;  %v8179_v55 = vrot.slane %v24360_v26, %v23420_v63  ;;  %14553 = vrot.lane.b32.xlu1 %v12298_v30, %s24165_s0  ;;  %v24370_v1 = vld [vmem:[#allocation104_spill] sm:$0xff] }
 0x420   : > { %v15100_v41 = vsel %vm24362_vm9, %v15099_v45, %v14322_v43  ;;  %vm24363_vm10 = vcmask 588800   ;;  %14557 = vrot.lane.b32.xlu0 %v12299_v14, %s24170_s14  ;;  %v12379_v16 = vrot.slane %v12365_v18, %v23420_v63  ;;  %v12411_v27 = vrot.slane %v12397_v44, %v23420_v63  ;;  %v24366_v14 = vld [vmem:[#allocation98_spill] sm:$0xff] }
 0x421   : > { %v15101_v28 = vsel %vm24363_vm10, %v15100_v41, %v14326_v50  ;;  %v12428_v12 = vcombine.low %v12372_v39, %v12404_v0  ;;  %v12429_v54 = vcombine.high %v12372_v39, %v12404_v0  ;;  %v12380_v61 = vcombine.low %v12315_v34, %v12331_v2  ;;  %v24365_v50 = vld [vmem:[#allocation116_spill] sm:$0xff]  ;;  %v14338_v26 = vpop.permute.xlu1 %14337 }
 0x422   : > { %v12412_v46 = vcombine.low %v12347_v48, %v12363_v10  ;;  %v15784_v47 = vcombine.low %v8156_v32, %v8163_v24  ;;  %v15786_v62 = vcombine.high %v8156_v32, %v8163_v24  ;;  %v15788_v45 = vcombine.low %v8172_v21, %v8179_v55  ;;  %v24371_v24 = vld [vmem:[#allocation105_spill] sm:$0xff] }
 0x423   : > { %v15790_v29 = vcombine.high %v8172_v21, %v8179_v55  ;;  %vm24364_vm9 = vcmask 605184   ;;  %v12381_v43 = vcombine.high %v12315_v34, %v12331_v2  ;;  %v24367_v56 = vcombine.low %v24365_v50, %v24366_v14  ;;  %14561 = vrot.lane.b32.xlu1 %v12428_v12, %s24171_s10  ;;  %v14342_v55 = vpop.permute.xlu0 %14341 }
 0x424   : > { %v15102_v30 = vsel %vm24364_vm9, %v15101_v28, %v14330_v13  ;;  %v24368_v44 = vcombine.high %v24365_v50, %v24366_v14  ;;  %vm24369_vm10 = vcmask 621568   ;;  %v12430_v6 = vcombine.low %v12379_v16, %v12411_v27  ;;  %14565 = vrot.lane.b32.xlu0 %v12429_v54, %s24180_s19 }
 0x425   : > { %v8204_v18 = vrot.slane %v24367_v56, %v23420_v63  ;;  %v15103_v57 = vsel %vm24369_vm10, %v15102_v30, %v14334_v49  ;;  %v12431_v32 = vcombine.high %v12379_v16, %v12411_v27  ;;  %v12420_v34 = vrot.slane %v12412_v46, %v23420_v63 }
 0x426   : > { %v8211_v0 = vrot.slane %v24368_v44, %v23420_v63  ;;  %v12413_v2 = vcombine.high %v12347_v48, %v12363_v10  ;;  %v24372_v36 = vcombine.low %v24370_v1, %v24371_v24  ;;  %v24373_v31 = vcombine.high %v24370_v1, %v24371_v24 }
 0x427   : > { %v12444_v41 = vrot.slane %v15784_v47, %v16745_v33  ;;  %v12460_v39 = vrot.slane %v15786_v62, %v16745_v33  ;;  %v12476_v28 = vrot.slane %v15788_v45, %v16745_v33  ;;  %v12492_v48 = vrot.slane %v15790_v29, %v16745_v33  ;;  %14569 = vrot.lane.b32.xlu1 %v12430_v6, %s24181_s8  ;;  %v14346_v29 = vpop.permute.xlu1 %14345 }
 0x428   : > { %v8188_v59 = vrot.slane %v24372_v36, %v23420_v63  ;;  %v8195_v21 = vrot.slane %v24373_v31, %v23420_v63  ;;  %vm24374_vm9 = vcmask 637952   ;;  %v12388_v16 = vrot.slane %v12380_v61, %v23420_v63  ;;  %14573 = vrot.lane.b32.xlu0 %v12431_v32, %s24182_s18  ;;  %v14350_v61 = vpop.permute.xlu0 %14349  ;;  %s24378_s18 = smov 74   ;;  %v24381_v36 = vld [vmem:[#allocation197_spill] sm:$0xff] }
 0x429   : > { %v15104_v10 = vsel %vm24374_vm9, %v15103_v57, %v14338_v26  ;;  %v15789_v27 = vcombine.low %v8204_v18, %v8211_v0  ;;  %v15791_v12 = vcombine.high %v8204_v18, %v8211_v0  ;;  %v5053_v54 = vcombine.high %v24361_v60, %v21394_v5 }
 0x42a   : > { %vm24375_vm10 = vcmask 654336   ;;  %v12395_v13 = vrot.slane %v12381_v43, %v23420_v63  ;;  %v12432_v49 = vcombine.low %v12388_v16, %v12420_v34  ;;  %v12427_v47 = vrot.slane %v12413_v2, %v23420_v63 }
 0x42b   : > { %v15105_v46 = vsel %vm24375_vm10, %v15104_v10, %v14342_v55  ;;  %v12433_v62 = vcombine.high %v12388_v16, %v12420_v34  ;;  %v15785_v45 = vcombine.low %v8188_v59, %v8195_v21  ;;  %v12500_v30 = vcombine.low %v12444_v41, %v12460_v39 }
 0x42c   : > { %v12532_v50 = vcombine.low %v12476_v28, %v12492_v48  ;;  %v12533_v14 = vcombine.high %v12476_v28, %v12492_v48  ;;  %v15787_v56 = vcombine.high %v8188_v59, %v8195_v21  ;;  %vm24376_vm9 = vcmask 670720   ;;  %14577 = vrot.lane.b32.xlu1 %v12432_v49, %s24183_s6  ;;  %v24382_v59 = vld [vmem:[#allocation198_spill] sm:$0xff]  ;;  %s24387_s6 = smov 78  }
 0x42d   : > { %v15106_v18 = vsel %vm24376_vm9, %v15105_v46, %v14346_v29  ;;  %v12501_v44 = vcombine.high %v12444_v41, %v12460_v39  ;;  %v12483_v0 = vrot.slane %v15789_v27, %v16745_v33  ;;  %v12499_v57 = vrot.slane %v15791_v12, %v16745_v33  ;;  %14581 = vrot.lane.b32.xlu0 %v12433_v62, %s24378_s18  ;;  %v14354_v41 = vpop.permute.xlu1 %14353  ;;  %v14358_v39 = vpop.permute.xlu0 %14357  ;;  %s24386_s18 = smov 76  }
 0x42e   : > { %vm24377_vm10 = vcmask 687104   ;;  %v24379_v6 = vcombine.low %v20070_v35, %v20073_v7  ;;  %v24380_v34 = vcombine.high %v20070_v35, %v20073_v7  ;;  %v12434_v1 = vcombine.low %v12395_v13, %v12427_v47 }
 0x42f   : > { %v15107_v43 = vsel %vm24377_vm10, %v15106_v18, %v14350_v61  ;;  %v12435_v24 = vcombine.high %v12395_v13, %v12427_v47  ;;  %v24383_v31 = vcombine.low %v24381_v36, %v24382_v59  ;;  %v24384_v26 = vcombine.high %v24381_v36, %v24382_v59 }
 0x430   : > { %v8308_v32 = vrot.slane %v24379_v6, %v23420_v63  ;;  %v8315_v2 = vrot.slane %v24380_v34, %v23420_v63  ;;  %v12540_v28 = vrot.slane %v12532_v50, %v23420_v63  ;;  %v12547_v48 = vrot.slane %v12533_v14, %v23420_v63  ;;  %14585 = vrot.lane.b32.xlu1 %v12434_v1, %s24386_s18  ;;  %s24391_s18 = smov 82  }
 0x431   : > { %v8292_v21 = vrot.slane %v24383_v31, %v23420_v63  ;;  %v8299_v55 = vrot.slane %v24384_v26, %v23420_v63  ;;  %v12451_v35 = vrot.slane %v15785_v45, %v16745_v33  ;;  %v12467_v7 = vrot.slane %v15787_v56, %v16745_v33  ;;  %14589 = vrot.lane.b32.xlu0 %v12435_v24, %s24387_s6  ;;  %v14362_v61 = vpop.permute.xlu1 %14361  ;;  %v14366_v50 = vpop.permute.xlu0 %14365  ;;  %s24389_s6 = smov 80  }
 0x432   : > { %vm24385_vm9 = vcmask 703488   ;;  %v12508_v16 = vrot.slane %v12500_v30, %v23420_v63  ;;  %v12515_v27 = vrot.slane %v12501_v44, %v23420_v63  ;;  %v12548_v12 = vcombine.low %v12483_v0, %v12499_v57 }
 0x433   : > { %v15108_v10 = vsel %vm24385_vm9, %v15107_v43, %v14354_v41  ;;  %v15796_v13 = vcombine.low %v8308_v32, %v8315_v2  ;;  %v15798_v49 = vcombine.high %v8308_v32, %v8315_v2  ;;  %v15609_v47 = vcombine.low %v21388_v40, %v21404_v9 }
 0x434   : > { %v15109_v46 = vsel %vm15026_vm15, %v15108_v10, %v14358_v39  ;;  %v15611_v62 = vcombine.high %v21388_v40, %v21404_v9  ;;  %v15792_v45 = vcombine.low %v8292_v21, %v8299_v55  ;;  %v15794_v29 = vcombine.high %v8292_v21, %v8299_v55  ;;  %v24394_v39 = vld [vmem:[#allocation199_spill] sm:$0xff] }
 0x435   : > { %v12564_v30 = vcombine.low %v12508_v16, %v12540_v28  ;;  %v12566_v14 = vcombine.low %v12515_v27, %v12547_v48  ;;  %v12565_v56 = vcombine.high %v12508_v16, %v12540_v28  ;;  %v12516_v18 = vcombine.low %v12451_v35, %v12467_v7  ;;  %v14370_v21 = vpop.permute.xlu1 %14369  ;;  %v14374_v26 = vpop.permute.xlu0 %14373  ;;  %v24395_v28 = vld [vmem:[#allocation200_spill] sm:$0xff] }
 0x436   : > { %vm24388_vm10 = vcmask 736256   ;;  %v12556_v43 = vrot.slane %v12548_v12, %v23420_v63  ;;  %v12517_v6 = vcombine.high %v12451_v35, %v12467_v7  ;;  %v12549_v32 = vcombine.high %v12483_v0, %v12499_v57  ;;  %v24398_v12 = vld [vmem:[#allocation166_spill] sm:$0xff] }
 0x437   : > { %v15110_v44 = vsel %vm24388_vm10, %v15109_v46, %v14362_v61  ;;  %14593 = vrot.lane.b32.xlu1 %v12564_v30, %s24389_s6  ;;  %vm24390_vm9 = vcmask 752640   ;;  %14597 = vrot.lane.b32.xlu0 %v12565_v56, %s24391_s18  ;;  %v12612_v2 = vrot.slane %v15796_v13, %v16745_v33  ;;  %v12628_v1 = vrot.slane %v15798_v49, %v16745_v33  ;;  %s24400_s18 = smov 84   ;;  %s24402_s6 = smov 86  }
 0x438   : > { %v15111_v34 = vsel %vm24390_vm9, %v15110_v44, %v14366_v50  ;;  %v12580_v24 = vrot.slane %v15792_v45, %v16745_v33  ;;  %v12596_v36 = vrot.slane %v15794_v29, %v16745_v33  ;;  %v24392_v59 = vcombine.low %v20078_v37, %v20081_v52 }
 0x439   : > { %v24393_v0 = vcombine.high %v20078_v37, %v20081_v52  ;;  %v12524_v55 = vrot.slane %v12516_v18, %v23420_v63  ;;  %v12567_v41 = vcombine.high %v12515_v27, %v12547_v48  ;;  %v24396_v35 = vcombine.low %v24394_v39, %v24395_v28  ;;  %v14378_v50 = vpop.permute.xlu1 %14377  ;;  %v14382_v56 = vpop.permute.xlu0 %14381 }
 0x43a   : > { %v8340_v31 = vrot.slane %v24392_v59, %v23420_v63  ;;  %v24397_v10 = vcombine.high %v24394_v39, %v24395_v28  ;;  %v5068_v46 = vcombine.low %v24398_v12, %v21437_v3  ;;  %vm24399_vm10 = vcmask 769024   ;;  %v24411_v28 = vld [vmem:[#allocation193_spill] sm:$0xff] }
 0x43b   : > { %v8347_v57 = vrot.slane %v24393_v0, %v23420_v63  ;;  %v8324_v7 = vrot.slane %v24396_v35, %v23420_v63  ;;  %v15112_v37 = vsel %vm24399_vm10, %v15111_v34, %v14370_v21  ;;  %v12531_v52 = vrot.slane %v12517_v6, %v23420_v63  ;;  %14601 = vrot.lane.b32.xlu1 %v12566_v14, %s24400_s18  ;;  %v24403_v6 = vld [vmem:[#allocation71_spill] sm:$0xff]  ;;  %s24409_s18 = smov 90  }
 0x43c   : > { %v8331_v16 = vrot.slane %v24397_v10, %v23420_v63  ;;  %v12563_v13 = vrot.slane %v12549_v32, %v23420_v63  ;;  %vm24401_vm9 = vcmask 785408   ;;  %v12568_v27 = vcombine.low %v12524_v55, %v12556_v43  ;;  %14605 = vrot.lane.b32.xlu0 %v12567_v41, %s24402_s6  ;;  %s24407_s6 = smov 88  }
 0x43d   : > { %v15113_v48 = vsel %vm24401_vm9, %v15112_v37, %v14374_v26  ;;  %v12668_v49 = vcombine.low %v12612_v2, %v12628_v1  ;;  %v12569_v45 = vcombine.high %v12524_v55, %v12556_v43  ;;  %v12636_v29 = vcombine.low %v12580_v24, %v12596_v36  ;;  %v14386_v10 = vpop.permute.xlu1 %14385 }
 0x43e   : > { %v15797_v61 = vcombine.low %v8340_v31, %v8347_v57  ;;  %v15799_v30 = vcombine.high %v8340_v31, %v8347_v57  ;;  %v15793_v18 = vcombine.low %v8324_v7, %v8331_v16  ;;  %v15795_v44 = vcombine.high %v8324_v7, %v8331_v16  ;;  %v14390_v16 = vpop.permute.xlu0 %14389 }
 0x43f   : > { %v24404_v32 = vcombine.low %v20051_v15, %v24403_v6  ;;  %v24405_v14 = vcombine.high %v20051_v15, %v24403_v6  ;;  %vm24406_vm10 = vcmask 801792   ;;  %v12570_v43 = vcombine.low %v12531_v52, %v12563_v13  ;;  %14609 = vrot.lane.b32.xlu1 %v12568_v27, %s24407_s6  ;;  %v24410_v15 = vld [vmem:[#allocation192_spill] sm:$0xff]  ;;  %s24417_s6 = smov 94  }
 0x440   : > { %v15114_v0 = vsel %vm24406_vm10, %v15113_v48, %v14378_v50  ;;  %v12571_v21 = vcombine.high %v12531_v52, %v12563_v13  ;;  %v12637_v26 = vcombine.high %v12580_v24, %v12596_v36  ;;  %vm24408_vm9 = vcmask 818176   ;;  %14613 = vrot.lane.b32.xlu0 %v12569_v45, %s24409_s18  ;;  %s24415_s18 = smov 92  }
 0x441   : > { %v8444_v34 = vrot.slane %v24404_v32, %v23420_v63  ;;  %v8451_v59 = vrot.slane %v24405_v14, %v23420_v63  ;;  %v15115_v31 = vsel %vm24408_vm9, %v15114_v0, %v14382_v56  ;;  %v12676_v57 = vrot.slane %v12668_v49, %v23420_v63 }
 0x442   : > { %v12669_v55 = vcombine.high %v12612_v2, %v12628_v1  ;;  %v12619_v41 = vrot.slane %v15797_v61, %v16745_v33  ;;  %v12635_v39 = vrot.slane %v15799_v30, %v16745_v33  ;;  %v24412_v35 = vcombine.low %v24410_v15, %v24411_v28  ;;  %v14398_v6 = vpop.permute.xlu0 %14397 }
 0x443   : > { %v24413_v24 = vcombine.high %v24410_v15, %v24411_v28  ;;  %v12644_v37 = vrot.slane %v12636_v29, %v23420_v63  ;;  %v12587_v2 = vrot.slane %v15793_v18, %v16745_v33  ;;  %v12603_v1 = vrot.slane %v15795_v44, %v16745_v33  ;;  %14617 = vrot.lane.b32.xlu1 %v12570_v43, %s24415_s18  ;;  %v14394_v44 = vpop.permute.xlu1 %14393  ;;  %v24424_v15 = vld [vmem:[#allocation125_spill] sm:$0xff]  ;;  %s24429_s18 = smov 98  }
 0x444   : > { %v8428_v7 = vrot.slane %v24412_v35, %v23420_v63  ;;  %v15804_v52 = vcombine.low %v8444_v34, %v8451_v59  ;;  %v5069_v13 = vcombine.high %v24398_v12, %v21437_v3  ;;  %vm24414_vm10 = vcmask 834560   ;;  %14621 = vrot.lane.b32.xlu0 %v12571_v21, %s24417_s6  ;;  %s24427_s6 = smov 96  }
 0x445   : > { %v8435_v36 = vrot.slane %v24413_v24, %v23420_v63  ;;  %v15116_v48 = vsel %vm24414_vm10, %v15115_v31, %v14386_v10  ;;  %v12651_v27 = vrot.slane %v12637_v26, %v23420_v63  ;;  %v15806_v49 = vcombine.high %v8444_v34, %v8451_v59  ;;  %v24418_v34 = vld [vmem:[#allocation194_spill] sm:$0xff]  ;;  %v24419_v59 = vld [vmem:[#allocation195_spill] sm:$0xff] }
 0x446   : > { %vm24416_vm9 = vcmask 850944   ;;  %v12700_v61 = vcombine.low %v12644_v37, %v12676_v57  ;;  %v12683_v29 = vrot.slane %v12669_v55, %v23420_v63  ;;  %v12701_v30 = vcombine.high %v12644_v37, %v12676_v57  ;;  %v24423_v55 = vld [vmem:[#allocation31_spill] sm:$0xff] }
 0x447   : > { %v15117_v45 = vsel %vm24416_vm9, %v15116_v48, %v14390_v16  ;;  %v12684_v50 = vcombine.low %v12619_v41, %v12635_v39  ;;  %v15800_v56 = vcombine.low %v8428_v7, %v8435_v36  ;;  %v15802_v18 = vcombine.high %v8428_v7, %v8435_v36 }
 0x448   : > { %v12652_v32 = vcombine.low %v12587_v2, %v12603_v1  ;;  %v21661_v14 = vrot.slane %v15804_v52, %v16745_v33  ;;  %v24420_v0 = vcombine.low %v24418_v34, %v24419_v59  ;;  %v24421_v21 = vcombine.high %v24418_v34, %v24419_v59  ;;  %14625 = vrot.lane.b32.xlu1 %v12700_v61, %s24427_s6  ;;  %s24433_s6 = smov 102  }
 0x449   : > { %vm24422_vm10 = vcmask 867328   ;;  %v12764_v57 = vrot.slane %v15806_v49, %v16745_v33  ;;  %v24425_v28 = vcombine.low %v24423_v55, %v24424_v15  ;;  %v24426_v7 = vcombine.high %v24423_v55, %v24424_v15  ;;  %14629 = vrot.lane.b32.xlu0 %v12701_v30, %s24429_s18  ;;  %s24431_s18 = smov 100  }
 0x44a   : > { %v8460_v43 = vrot.slane %v24420_v0, %v23420_v63  ;;  %v8467_v26 = vrot.slane %v24421_v21, %v23420_v63  ;;  %v15118_v31 = vsel %vm24422_vm10, %v15117_v45, %v14394_v44  ;;  %vm24428_vm9 = vcmask 883712   ;;  %v14402_v45 = vpop.permute.xlu1 %14401  ;;  %v14406_v44 = vpop.permute.xlu0 %14405 }
 0x44b   : > { %v8476_v35 = vrot.slane %v24425_v28, %v23420_v63  ;;  %v8483_v24 = vrot.slane %v24426_v7, %v23420_v63  ;;  %v15119_v36 = vsel %vm24428_vm9, %v15118_v31, %v14398_v6  ;;  %v12702_v10 = vcombine.low %v12651_v27, %v12683_v29 }
 0x44c   : > { %v12653_v16 = vcombine.high %v12587_v2, %v12603_v1  ;;  %v12692_v37 = vrot.slane %v12684_v50, %v23420_v63  ;;  %v12685_v52 = vcombine.high %v12619_v41, %v12635_v39  ;;  %v12716_v48 = vrot.slane %v15800_v56, %v16745_v33 }
 0x44d   : > { %v12732_v49 = vrot.slane %v15802_v18, %v16745_v33  ;;  %v12660_v34 = vrot.slane %v12652_v32, %v23420_v63  ;;  %v12703_v59 = vcombine.high %v12651_v27, %v12683_v29  ;;  %v15801_v0 = vcombine.low %v8460_v43, %v8467_v26  ;;  %14633 = vrot.lane.b32.xlu1 %v12702_v10, %s24431_s18  ;;  %s24437_s18 = smov 106  }
 0x44e   : > { %v15803_v61 = vcombine.high %v8460_v43, %v8467_v26  ;;  %vm24430_vm10 = vcmask 900096   ;;  %v12804_v21 = vcombine.low %v21661_v14, %v12764_v57  ;;  %v15805_v30 = vcombine.low %v8476_v35, %v8483_v24  ;;  %v14410_v18 = vpop.permute.xlu1 %14409  ;;  %v14414_v32 = vpop.permute.xlu0 %14413 }
 0x44f   : > { %v15120_v6 = vsel %vm24430_vm10, %v15119_v36, %v14402_v45  ;;  %v15807_v2 = vcombine.high %v8476_v35, %v8483_v24  ;;  %v15613_v41 = vcombine.low %v21480_v4, %v21511_v23  ;;  %vm24432_vm9 = vcmask 916480   ;;  %14637 = vrot.lane.b32.xlu0 %v12703_v59, %s24433_s6  ;;  %s24435_s6 = smov 104  }
 0x450   : > { %v15121_v39 = vsel %vm24432_vm9, %v15120_v6, %v14406_v44  ;;  %v12667_v1 = vrot.slane %v12653_v16, %v23420_v63  ;;  %v12704_v27 = vcombine.low %v12660_v34, %v12692_v37  ;;  %v12699_v29 = vrot.slane %v12685_v52, %v23420_v63 }
 0x451   : > { %v12705_v50 = vcombine.high %v12660_v34, %v12692_v37  ;;  %v12772_v56 = vcombine.low %v12716_v48, %v12732_v49  ;;  %v12773_v43 = vcombine.high %v12716_v48, %v12732_v49  ;;  %v12805_v26 = vcombine.high %v21661_v14, %v12764_v57  ;;  %v24438_v14 = vld [vmem:[#allocation139_spill] sm:$0xff]  ;;  %v24441_v48 = vld [vmem:[#allocation54_spill] sm:$0xff] }
 0x452   : > { %v12723_v31 = vrot.slane %v15801_v0, %v16745_v33  ;;  %v12739_v55 = vrot.slane %v15803_v61, %v16745_v33  ;;  %vm24434_vm10 = vcmask 932864   ;;  %v12812_v28 = vrot.slane %v12804_v21, %v23420_v63  ;;  %14641 = vrot.lane.b32.xlu1 %v12704_v27, %s24435_s6  ;;  %v24442_v49 = vld [vmem:[#allocation22_spill] sm:$0xff]  ;;  %v14418_v0 = vpop.permute.xlu1 %14417  ;;  %v14422_v61 = vpop.permute.xlu0 %14421 }
 0x453   : > { %v15122_v15 = vsel %vm24434_vm10, %v15121_v39, %v14410_v18  ;;  %v12755_v35 = vrot.slane %v15805_v30, %v16745_v33  ;;  %v12771_v7 = vrot.slane %v15807_v2, %v16745_v33  ;;  %vm24436_vm9 = vcmask 949248   ;;  %14645 = vrot.lane.b32.xlu0 %v12705_v50, %s24437_s18  ;;  %s24446_s18 = smov 108  }
 0x454   : > { %v15123_v24 = vsel %vm24436_vm9, %v15122_v15, %v14414_v32  ;;  %v24439_v57 = vcombine.low %v20169_v25, %v24438_v14  ;;  %v24440_v10 = vcombine.high %v20169_v25, %v24438_v14  ;;  %v12706_v37 = vcombine.low %v12667_v1, %v12699_v29 }
 0x455   : > { %v12780_v52 = vrot.slane %v12772_v56, %v23420_v63  ;;  %v24443_v45 = vcombine.low %v24441_v48, %v24442_v49  ;;  %v24444_v34 = vcombine.high %v24441_v48, %v24442_v49  ;;  %v12707_v6 = vcombine.high %v12667_v1, %v12699_v29 }
 0x456   : > { %v8580_v36 = vrot.slane %v24439_v57, %v23420_v63  ;;  %v8587_v16 = vrot.slane %v24440_v10, %v23420_v63  ;;  %v12787_v21 = vrot.slane %v12773_v43, %v23420_v63  ;;  %v11884_v25 = vcombine.low %v21181_v17, %v21175_v22  ;;  %14649 = vrot.lane.b32.xlu1 %v12706_v37, %s24446_s18  ;;  %v24447_v43 = vld [vmem:[#allocation74_spill] sm:$0xff]  ;;  %v24448_v22 = vld [vmem:[#allocation127_spill] sm:$0xff]  ;;  %v14426_v14 = vpop.permute.xlu1 %14425  ;;  %v14430_v57 = vpop.permute.xlu0 %14429 }
 0x457   : > { %v8564_v44 = vrot.slane %v24443_v45, %v23420_v63  ;;  %v8571_v59 = vrot.slane %v24444_v34, %v23420_v63  ;;  %v12788_v30 = vcombine.low %v12723_v31, %v12739_v55  ;;  %vm24445_vm10 = vcmask 965632   ;;  %14653 = vrot.lane.b32.xlu0 %v12707_v6, %s24240_s9  ;;  %v24451_v45 = vld [vmem:[#allocation47_spill] sm:$0xff]  ;;  %s24455_s9 = smov 112  }
 0x458   : > { %v15124_v2 = vsel %vm24445_vm10, %v15123_v24, %v14418_v0  ;;  %v12836_v39 = vcombine.low %v12780_v52, %v12812_v28  ;;  %v12819_v27 = vrot.slane %v12805_v26, %v23420_v63  ;;  %v12820_v50 = vcombine.low %v12755_v35, %v12771_v7 }
 0x459   : > { %v15125_v56 = vsel %vm15058_vm12, %v15124_v2, %v14422_v61  ;;  %v15812_v18 = vcombine.low %v8580_v36, %v8587_v16  ;;  %v15814_v1 = vcombine.high %v8580_v36, %v8587_v16  ;;  %v15808_v29 = vcombine.low %v8564_v44, %v8571_v59 }
 0x45a   : > { %v15810_v32 = vcombine.high %v8564_v44, %v8571_v59  ;;  %v24449_v17 = vcombine.low %v24447_v43, %v24448_v22  ;;  %v24450_v26 = vcombine.high %v24447_v43, %v24448_v22  ;;  %v12837_v10 = vcombine.high %v12780_v52, %v12812_v28  ;;  %v24452_v44 = vld [vmem:[#allocation85_spill] sm:$0xff]  ;;  %14657 = vrot.lane.b32.xlu1 %v12836_v39, %s24455_s9  ;;  %s24457_s9 = smov 118  }
 0x45b   : > { %v12796_v37 = vrot.slane %v12788_v30, %v23420_v63  ;;  %v12789_v48 = vcombine.high %v12723_v31, %v12739_v55  ;;  %v12821_v49 = vcombine.high %v12755_v35, %v12771_v7  ;;  %v15126_v36 = vsel %vm15060_vm11, %v15125_v56, %v14426_v14  ;;  %v14434_v30 = vpop.permute.xlu1 %14433 }
 0x45c   : > { %v8612_v15 = vrot.slane %v24449_v17, %v23420_v63  ;;  %v8619_v24 = vrot.slane %v24450_v26, %v23420_v63  ;;  %v12828_v16 = vrot.slane %v12820_v50, %v23420_v63  ;;  %v24453_v34 = vcombine.low %v24451_v45, %v24452_v44  ;;  %14661 = vrot.lane.b32.xlu0 %v12837_v10, %s24245_s1  ;;  %v14438_v50 = vpop.permute.xlu0 %14437  ;;  %s24456_s1 = smov 116  }
 0x45d   : > { %v24454_v0 = vcombine.high %v24451_v45, %v24452_v44  ;;  %v15127_v28 = vsel %vm15062_vm14, %v15126_v36, %v14430_v57  ;;  %v12884_v31 = vrot.slane %v15812_v18, %v16745_v33  ;;  %v12900_v55 = vrot.slane %v15814_v1, %v16745_v33  ;;  %v24462_v44 = vld [vmem:[#allocation120_spill] sm:$0xff] }
 0x45e   : > { %v8596_v59 = vrot.slane %v24453_v34, %v23420_v63  ;;  %v12852_v35 = vrot.slane %v15808_v29, %v16745_v33  ;;  %v12868_v7 = vrot.slane %v15810_v32, %v16745_v33  ;;  %v15813_v52 = vcombine.low %v8612_v15, %v8619_v24 }
 0x45f   : > { %v8603_v61 = vrot.slane %v24454_v0, %v23420_v63  ;;  %v15815_v6 = vcombine.high %v8612_v15, %v8619_v24  ;;  %v12838_v2 = vcombine.low %v12787_v21, %v12819_v27  ;;  %v12839_v56 = vcombine.high %v12787_v21, %v12819_v27  ;;  %v14442_v14 = vpop.permute.xlu1 %14441 }
 0x460   : > { %v12803_v39 = vrot.slane %v12789_v48, %v23420_v63  ;;  %v12835_v43 = vrot.slane %v12821_v49, %v23420_v63  ;;  %v15128_v22 = vsel %vm15064_vm13, %v15127_v28, %v14434_v30  ;;  %v12840_v18 = vcombine.low %v12796_v37, %v12828_v16  ;;  %v14446_v57 = vpop.permute.xlu0 %14445  ;;  %v24458_v48 = vld [vmem:[#allocation53_spill] sm:$0xff]  ;;  %v24459_v49 = vld [vmem:[#allocation46_spill] sm:$0xff] }
 0x461   : > { %v15809_v17 = vcombine.low %v8596_v59, %v8603_v61  ;;  %v15811_v26 = vcombine.high %v8596_v59, %v8603_v61  ;;  %15256 = vst [vmem:[%s21155_s11 + $0x8] sm:$0xff] %v15128_v22  ;;  %14665 = vrot.lane.b32.xlu1 %v12838_v2, %s24456_s1  ;;  %v15129_v1 = vsel %vm14940_vm0, %v11884_v25, %v14438_v50  ;;  %v24461_v25 = vld [vmem:[#allocation126_spill] sm:$0xff]  ;;  %s24467_s1 = smov 122   ;;  %vm24490_vm9 = vcmask 162816  }
 0x462   : > { %14669 = vrot.lane.b32.xlu0 %v12839_v56, %s24457_s9  ;;  %v12841_v29 = vcombine.high %v12796_v37, %v12828_v16  ;;  %v12940_v32 = vcombine.low %v12884_v31, %v12900_v55  ;;  %v12908_v15 = vcombine.low %v12852_v35, %v12868_v7  ;;  %v12941_v21 = vcombine.high %v12884_v31, %v12900_v55  ;;  %s24466_s9 = smov 120  }
 0x463   : > { %v12891_v27 = vrot.slane %v15813_v52, %v16745_v33  ;;  %v12907_v24 = vrot.slane %v15815_v6, %v16745_v33  ;;  %v12909_v10 = vcombine.high %v12852_v35, %v12868_v7  ;;  %v24460_v36 = vcombine.low %v24458_v48, %v24459_v49  ;;  %v14450_v56 = vpop.permute.xlu1 %14449 }
 0x464   : > { %v24463_v34 = vcombine.low %v24461_v25, %v24462_v44  ;;  %v24464_v16 = vcombine.high %v24461_v25, %v24462_v44  ;;  %v15130_v0 = vsel %vm14942_vm1, %v15129_v1, %v14442_v14  ;;  %v12859_v61 = vrot.slane %v15809_v17, %v16745_v33  ;;  %v14454_v22 = vpop.permute.xlu0 %14453 }
 0x465   : > { %v8700_v45 = vrot.slane %v24460_v36, %v23420_v63  ;;  %v12875_v28 = vrot.slane %v15811_v26, %v16745_v33  ;;  %v24465_v31 = vcombine.high %v24458_v48, %v24459_v49  ;;  %14673 = vrot.lane.b32.xlu1 %v12840_v18, %s24466_s9  ;;  %v15131_v35 = vsel %vm14944_vm2, %v15130_v0, %v14446_v57  ;;  %s24469_s9 = smov 126   ;;  %v24475_v0 = vld [vmem:[#allocation23_spill] sm:$0xff] }
 0x466   : > { %v8716_v37 = vrot.slane %v24463_v34, %v23420_v63  ;;  %v8723_v59 = vrot.slane %v24464_v16, %v23420_v63  ;;  %v12842_v7 = vcombine.low %v12803_v39, %v12835_v43  ;;  %14677 = vrot.lane.b32.xlu0 %v12841_v29, %s24467_s1  ;;  %v21790_v52 = vrot.slane %v12940_v32, %v23420_v63  ;;  %s24468_s1 = smov 124  }
 0x467   : > { %v8707_v55 = vrot.slane %v24465_v31, %v23420_v63  ;;  %v21793_v6 = vrot.slane %v12908_v15, %v23420_v63  ;;  %v12843_v30 = vcombine.high %v12803_v39, %v12835_v43  ;;  %v12955_v2 = vrot.slane %v12941_v21, %v23420_v63  ;;  %v14458_v25 = vpop.permute.xlu1 %14457 }
 0x468   : > { %v12956_v50 = vcombine.low %v12891_v27, %v12907_v24  ;;  %v12923_v17 = vrot.slane %v12909_v10, %v23420_v63  ;;  %v12957_v18 = vcombine.high %v12891_v27, %v12907_v24  ;;  %v15820_v26 = vcombine.low %v8716_v37, %v8723_v59  ;;  %v24470_v24 = vld [vmem:[#allocation99_spill] sm:$0xff]  ;;  %v14462_v44 = vpop.permute.xlu0 %14461 }
 0x469   : > { %v15822_v1 = vcombine.high %v8716_v37, %v8723_v59  ;;  %v15132_v14 = vsel %vm14946_vm3, %v15131_v35, %v14450_v56  ;;  %v12924_v29 = vcombine.low %v12859_v61, %v12875_v28  ;;  %v15816_v57 = vcombine.low %v8700_v45, %v8707_v55  ;;  %14681 = vrot.lane.b32.xlu1 %v12842_v7, %s24468_s1  ;;  %v24471_v10 = vld [vmem:[#allocation43_spill] sm:$0xff]  ;;  %v24474_v59 = vld [vmem:[#allocation60_spill] sm:$0xff]  ;;  %s24479_s1 = smov 4  }
 0x46a   : > { %v15818_v32 = vcombine.high %v8700_v45, %v8707_v55  ;;  %v15133_v15 = vsel %vm14948_vm4, %v15132_v14, %v14454_v22  ;;  %v12973_v39 = vcombine.high %v21793_v6, %v21790_v52  ;;  %14685 = vrot.lane.b32.xlu0 %v12843_v30, %s24469_s9  ;;  %v12925_v43 = vcombine.high %v12859_v61, %v12875_v28  ;;  %s24478_s9 = smov 2  }
 0x46b   : > { %v12974_v21 = vcombine.low %v12923_v17, %v12955_v2  ;;  %v12964_v27 = vrot.slane %v12956_v50, %v23420_v63  ;;  %v24472_v48 = vcombine.low %v24470_v24, %v24471_v10  ;;  %v24473_v36 = vcombine.high %v24470_v24, %v24471_v10 }
 0x46c   : > { %v21813_v34 = vrot.slane %v12957_v18, %v23420_v63  ;;  %v13020_v37 = vrot.slane %v15820_v26, %v16745_v33  ;;  %v13036_v16 = vrot.slane %v15822_v1, %v16745_v33  ;;  %v24476_v61 = vcombine.low %v24474_v59, %v24475_v0 }
 0x46d   : > { %v8748_v49 = vrot.slane %v24472_v48, %v23420_v63  ;;  %v8755_v45 = vrot.slane %v24473_v36, %v23420_v63  ;;  %v15134_v31 = vsel %vm14950_vm5, %v15133_v15, %v14458_v25  ;;  %v12988_v55 = vrot.slane %v15816_v57, %v16745_v33  ;;  %14689 = vrot.lane.b32.xlu1 %v12973_v39, %s24478_s9  ;;  %v14466_v57 = vpop.permute.xlu1 %14465  ;;  %v14470_v15 = vpop.permute.xlu0 %14469  ;;  %s24481_s9 = smov 8  }
 0x46e   : > { %v8732_v28 = vrot.slane %v24476_v61, %v23420_v63  ;;  %v13004_v35 = vrot.slane %v15818_v32, %v16745_v33  ;;  %v24477_v7 = vcombine.high %v24474_v59, %v24475_v0  ;;  %v15615_v50 = vcombine.high %v21480_v4, %v21511_v23  ;;  %14693 = vrot.lane.b32.xlu0 %v12974_v21, %s24479_s1  ;;  %s24480_s1 = smov 6  }
 0x46f   : > { %v15135_v56 = vsel %vm14952_vm6, %v15134_v31, %v14462_v44  ;;  %v12932_v22 = vrot.slane %v12924_v29, %v23420_v63  ;;  %v21838_v18 = vrot.slane %v5052_v20, %v23420_v63  ;;  %v12939_v26 = vrot.slane %v12925_v43, %v23420_v63 }
 0x470   : > { %v8739_v30 = vrot.slane %v24477_v7, %v23420_v63  ;;  %v15821_v1 = vcombine.low %v8748_v49, %v8755_v45  ;;  %v15823_v14 = vcombine.high %v8748_v49, %v8755_v45  ;;  %v12975_v32 = vcombine.high %v12923_v17, %v12955_v2  ;;  %v24483_v45 = vld [vmem:[#allocation21_spill] sm:$0xff] }
 0x471   : > { %v12977_v39 = vcombine.high %v12932_v22, %v12964_v27  ;;  %v12976_v24 = vcombine.low %v12932_v22, %v12964_v27  ;;  %v13076_v10 = vcombine.low %v13020_v37, %v13036_v16  ;;  %v15136_v21 = vsel %vm14954_vm7, %v15135_v56, %v14466_v57  ;;  %v24482_v27 = vld [vmem:[#allocation36_spill] sm:$0xff]  ;;  %v14474_v61 = vpop.permute.xlu1 %14473  ;;  %v14478_v31 = vpop.permute.xlu0 %14477 }
 0x472   : > { %v12978_v29 = vcombine.low %v12939_v26, %v21813_v34  ;;  %v13044_v48 = vcombine.low %v12988_v55, %v13004_v35  ;;  %v15817_v36 = vcombine.low %v8732_v28, %v8739_v30  ;;  %14697 = vrot.lane.b32.xlu1 %v12975_v32, %s24480_s1  ;;  %v15137_v20 = vsel %vm14956_vm8, %v15136_v21, %v14470_v15  ;;  %s24491_s1 = smov 10  }
 0x473   : > { %14701 = vrot.lane.b32.xlu0 %v12976_v24, %s24481_s9  ;;  %v13077_v43 = vcombine.high %v13020_v37, %v13036_v16  ;;  %v15819_v49 = vcombine.high %v8732_v28, %v8739_v30  ;;  %v13027_v2 = vrot.slane %v15821_v1, %v16745_v33  ;;  %v13043_v17 = vrot.slane %v15823_v14, %v16745_v33  ;;  %v24486_v16 = vld [vmem:[#allocation191_spill] sm:$0xff]  ;;  %v24487_v28 = vld [vmem:[#allocation129_spill] sm:$0xff]  ;;  %s24493_s9 = smov 12  }
 0x474   : > { %v24484_v25 = vcombine.low %v24482_v27, %v24483_v45  ;;  %v24485_v59 = vcombine.high %v24482_v27, %v24483_v45  ;;  %v13084_v7 = vrot.slane %v13076_v10, %v23420_v63  ;;  %v13045_v37 = vcombine.high %v12988_v55, %v13004_v35 }
 0x475   : > { %v24488_v30 = vcombine.low %v24486_v16, %v24487_v28  ;;  %v24489_v22 = vcombine.high %v24486_v16, %v24487_v28  ;;  %v21869_v14 = vrot.slane %v5053_v54, %v23420_v63  ;;  %v15138_v57 = vsel %vm24490_vm9, %v15137_v20, %v14474_v61  ;;  %v14482_v21 = vpop.permute.xlu1 %14481 }
 0x476   : > { %v8836_v44 = vrot.slane %v24484_v25, %v23420_v63  ;;  %v8843_v0 = vrot.slane %v24485_v59, %v23420_v63  ;;  %v13052_v55 = vrot.slane %v13044_v48, %v23420_v63  ;;  %v12995_v35 = vrot.slane %v15817_v36, %v16745_v33  ;;  %14705 = vrot.lane.b32.xlu1 %v12977_v39, %s24491_s1  ;;  %v14486_v39 = vpop.permute.xlu0 %14485  ;;  %s24495_s1 = smov 14  }
 0x477   : > { %v8852_v56 = vrot.slane %v24488_v30, %v23420_v63  ;;  %v8859_v1 = vrot.slane %v24489_v22, %v23420_v63  ;;  %vm24492_vm10 = vcmask 179200   ;;  %14709 = vrot.lane.b32.xlu0 %v12978_v29, %s24493_s9  ;;  %v13091_v15 = vrot.slane %v13077_v43, %v23420_v63  ;;  %v24503_v22 = vld [vmem:[#allocation63_spill] sm:$0xff]  ;;  %s24677_s9 = sld [smem:[#allocation8_spill]] }
 0x478   : > { %v15139_v32 = vsel %vm24492_vm10, %v15138_v57, %v14478_v31  ;;  %v13011_v24 = vrot.slane %v15819_v49, %v16745_v33  ;;  %v21883_v5 = vrot.slane %v15609_v47, %v16745_v33  ;;  %v12979_v60 = vcombine.high %v12939_v26, %v21813_v34 }
 0x479   : > { %v13092_v54 = vcombine.low %v13027_v2, %v13043_v17  ;;  %v15824_v10 = vcombine.low %v8836_v44, %v8843_v0  ;;  %v13108_v48 = vcombine.low %v13052_v55, %v13084_v7  ;;  %v13059_v36 = vrot.slane %v13045_v37, %v23420_v63  ;;  %v14490_v9 = vpop.permute.xlu1 %14489 }
 0x47a   : > { %v15828_v29 = vcombine.low %v8852_v56, %v8859_v1  ;;  %v15830_v20 = vcombine.high %v8852_v56, %v8859_v1  ;;  %v21891_v43 = vrot.slane %v15611_v62, %v16745_v33  ;;  %vm24494_vm9 = vcmask 195584   ;;  %14713 = vrot.lane.b32.xlu1 %v12979_v60, %s24495_s1  ;;  %v14494_v62 = vpop.permute.xlu0 %14493  ;;  %v24502_v56 = vld [vmem:[#allocation55_spill] sm:$0xff]  ;;  %s24682_s1 = sld [smem:[#allocation6_spill]] }
 0x47b   : > { %v15140_v47 = vsel %vm24494_vm9, %v15139_v32, %v14482_v21  ;;  %v13109_v49 = vcombine.high %v13052_v55, %v13084_v7  ;;  %v15826_v27 = vcombine.high %v8836_v44, %v8843_v0  ;;  %vm24496_vm10 = vcmask 211968   ;;  %14717 = vrot.lane.b32.xlu0 %v13108_v48, %s24292_s7  ;;  %v24497_v0 = vld [vmem:[#allocation25_spill] sm:$0xff]  ;;  %v24498_v7 = vld [vmem:[#allocation134_spill] sm:$0xff]  ;;  %s24506_s7 = smov 18  }
 0x47c   : > { %v15141_v34 = vsel %vm24496_vm10, %v15140_v47, %v14486_v39  ;;  %v13110_v26 = vcombine.low %v13059_v36, %v13091_v15  ;;  %v13060_v45 = vcombine.low %v12995_v35, %v13011_v24  ;;  %v13100_v25 = vrot.slane %v13092_v54, %v23420_v63 }
 0x47d   : > { %v13061_v59 = vcombine.high %v12995_v35, %v13011_v24  ;;  %v13093_v61 = vcombine.high %v13027_v2, %v13043_v17  ;;  %v13124_v40 = vrot.slane %v15824_v10, %v16745_v33  ;;  %v13156_v31 = vrot.slane %v15828_v29, %v16745_v33  ;;  %v14498_v39 = vpop.permute.xlu1 %14497 }
 0x47e   : > { %v13172_v44 = vrot.slane %v15830_v20, %v16745_v33  ;;  %v24499_v37 = vcombine.low %v24497_v0, %v24498_v7  ;;  %v24500_v28 = vcombine.high %v24497_v0, %v24498_v7  ;;  %vm24501_vm9 = vcmask 228352   ;;  %14721 = vrot.lane.b32.xlu1 %v13109_v49, %s24506_s7  ;;  %v14502_v48 = vpop.permute.xlu0 %14501 }
 0x47f   : > { %v15142_v2 = vsel %vm24501_vm9, %v15141_v34, %v14490_v9  ;;  %v13140_v17 = vrot.slane %v15826_v27, %v16745_v33  ;;  %v24504_v1 = vcombine.low %v24502_v56, %v24503_v22  ;;  %v24505_v55 = vcombine.high %v24502_v56, %v24503_v22  ;;  %14725 = vrot.lane.b32.xlu0 %v13110_v26, %s24304_s16  ;;  %s24632_s16 = smov 126  }
 0x480   : > { %v8884_v16 = vrot.slane %v24499_v37, %v23420_v63  ;;  %v8891_v30 = vrot.slane %v24500_v28, %v23420_v63  ;;  %v21923_v32 = vrot.slane %v5068_v46, %v23420_v63  ;;  %vm24507_vm10 = vcmask 244736  }
 0x481   : > { %v8868_v57 = vrot.slane %v24504_v1, %v23420_v63  ;;  %v8875_v35 = vrot.slane %v24505_v55, %v23420_v63  ;;  %v15143_v24 = vsel %vm24507_vm10, %v15142_v2, %v14494_v62  ;;  %v13068_v60 = vrot.slane %v13060_v45, %v23420_v63  ;;  %v14506_v37 = vpop.permute.xlu1 %14505 }
 0x482   : > { %v21933_v54 = vrot.slane %v5069_v13, %v23420_v63  ;;  %v13111_v10 = vcombine.high %v13059_v36, %v13091_v15  ;;  %v13075_v21 = vrot.slane %v13061_v59, %v23420_v63  ;;  %v13107_v46 = vrot.slane %v13093_v61, %v23420_v63  ;;  %v24510_v59 = vld [vmem:[#allocation128_spill] sm:$0xff] }
 0x483   : > { %v13112_v29 = vcombine.low %v13068_v60, %v13100_v25  ;;  %v13212_v20 = vcombine.low %v13156_v31, %v13172_v44  ;;  %v15829_v47 = vcombine.low %v8884_v16, %v8891_v30  ;;  %v15831_v49 = vcombine.high %v8884_v16, %v8891_v30  ;;  %v24511_v61 = vld [vmem:[#allocation140_spill] sm:$0xff]  ;;  %v14510_v16 = vpop.permute.xlu0 %14509 }
 0x484   : > { %vm24508_vm9 = vcmask 261120   ;;  %v13180_v34 = vcombine.low %v13124_v40, %v13140_v17  ;;  %v15825_v26 = vcombine.low %v8868_v57, %v8875_v35  ;;  %v15827_v45 = vcombine.high %v8868_v57, %v8875_v35  ;;  %14729 = vrot.lane.b32.xlu1 %v13111_v10, %s24114_s22  ;;  %s24629_s22 = smov 120  }
 0x485   : > { %v15144_v27 = vsel %vm24508_vm9, %v15143_v24, %v14498_v39  ;;  %vm24509_vm10 = vcmask 277504   ;;  %v13113_v12 = vcombine.high %v13068_v60, %v13100_v25  ;;  %14733 = vrot.lane.b32.xlu0 %v13112_v29, %s24115_s21  ;;  %v13181_v13 = vcombine.high %v13124_v40, %v13140_v17  ;;  %v14514_v29 = vpop.permute.xlu1 %14513  ;;  %s24628_s21 = smov 118  }
 0x486   : > { %v15145_v3 = vsel %vm24509_vm10, %v15144_v27, %v14502_v48  ;;  %v13114_v15 = vcombine.low %v13075_v21, %v13107_v46  ;;  %v13213_v36 = vcombine.high %v13156_v31, %v13172_v44  ;;  %v24512_v9 = vcombine.low %v24510_v59, %v24511_v61  ;;  %v24514_v31 = vld [vmem:[#allocation163_spill] sm:$0xff]  ;;  %v24515_v44 = vld [vmem:[#allocation16_spill] sm:$0xff] }
 0x487   : > { %v24513_v0 = vcombine.high %v24510_v59, %v24511_v61  ;;  %v13220_v28 = vrot.slane %v13212_v20, %v23420_v63  ;;  %v13163_v25 = vrot.slane %v15829_v47, %v16745_v33  ;;  %v13179_v40 = vrot.slane %v15831_v49, %v16745_v33  ;;  %v14518_v20 = vpop.permute.xlu0 %14517 }
 0x488   : > { %v8988_v62 = vrot.slane %v24512_v9, %v23420_v63  ;;  %v24516_v30 = vcombine.low %v24514_v31, %v24515_v44  ;;  %vm24517_vm9 = vcmask 293888   ;;  %v13131_v56 = vrot.slane %v15825_v26, %v16745_v33  ;;  %14737 = vrot.lane.b32.xlu1 %v13113_v12, %s24124_s20  ;;  %s24627_s20 = smov 116  }
 0x489   : > { %v8995_v7 = vrot.slane %v24513_v0, %v23420_v63  ;;  %v15146_v17 = vsel %vm24517_vm9, %v15145_v3, %v14506_v37  ;;  %v13147_v22 = vrot.slane %v15827_v45, %v16745_v33  ;;  %v24518_v1 = vcombine.high %v24514_v31, %v24515_v44  ;;  %14741 = vrot.lane.b32.xlu0 %v13114_v15, %s24125_s17  ;;  %v14522_v61 = vpop.permute.xlu1 %14521  ;;  %v24523_v37 = vld [vmem:[#allocation122_spill] sm:$0xff]  ;;  %s24625_s17 = smov 112  }
 0x48a   : > { %v8972_v2 = vrot.slane %v24516_v30, %v23420_v63  ;;  %v21967_v55 = vrot.slane %v15613_v41, %v16745_v33  ;;  %vm24519_vm10 = vcmask 310272   ;;  %v13188_v24 = vrot.slane %v13180_v34, %v23420_v63 }
 0x48b   : > { %v8979_v57 = vrot.slane %v24518_v1, %v23420_v63  ;;  %v15147_v35 = vsel %vm24519_vm10, %v15146_v17, %v14510_v16  ;;  %v15601_v60 = vcombine.low %v21838_v18, %v21869_v14  ;;  %v13115_v10 = vcombine.high %v13075_v21, %v13107_v46  ;;  %v14526_v9 = vpop.permute.xlu0 %14525 }
 0x48c   : > { %v13227_v39 = vrot.slane %v13213_v36, %v23420_v63  ;;  %v15836_v48 = vcombine.low %v8988_v62, %v8995_v7  ;;  %v13244_v47 = vcombine.low %v13188_v24, %v13220_v28  ;;  %v13195_v41 = vrot.slane %v13181_v13, %v23420_v63 }
 0x48d   : > { %v13228_v49 = vcombine.low %v13163_v25, %v13179_v40  ;;  %v15838_v27 = vcombine.high %v8988_v62, %v8995_v7  ;;  %vm24520_vm9 = vcmask 326656   ;;  %v13196_v45 = vcombine.low %v13131_v56, %v13147_v22  ;;  %14745 = vrot.lane.b32.xlu1 %v13115_v10, %s24126_s15  ;;  %v24522_v7 = vld [vmem:[#allocation190_spill] sm:$0xff]  ;;  %s24622_s15 = smov 106  }
 0x48e   : > { %v15148_v26 = vsel %vm24520_vm9, %v15147_v35, %v14514_v29  ;;  %v15832_v3 = vcombine.low %v8972_v2, %v8979_v57  ;;  %v15834_v12 = vcombine.high %v8972_v2, %v8979_v57  ;;  %v15603_v34 = vcombine.high %v21838_v18, %v21869_v14  ;;  %14749 = vrot.lane.b32.xlu0 %v13244_v47, %s24127_s13  ;;  %v14530_v47 = vpop.permute.xlu1 %14529  ;;  %s24619_s13 = smov 102  }
 0x48f   : > { %vm24521_vm10 = vcmask 343040   ;;  %v13197_v46 = vcombine.high %v13131_v56, %v13147_v22  ;;  %v13245_v15 = vcombine.high %v13188_v24, %v13220_v28  ;;  %v13246_v36 = vcombine.low %v13195_v41, %v13227_v39  ;;  %v24528_v56 = vld [vmem:[#allocation86_spill] sm:$0xff]  ;;  %v24529_v22 = vld [vmem:[#allocation61_spill] sm:$0xff] }
 0x490   : > { %v15149_v21 = vsel %vm24521_vm10, %v15148_v26, %v14518_v20  ;;  %v13229_v13 = vcombine.high %v13163_v25, %v13179_v40  ;;  %v21984_v59 = vrot.slane %v15836_v48, %v16745_v33  ;;  %v13236_v62 = vrot.slane %v13228_v49, %v23420_v63  ;;  %v14534_v49 = vpop.permute.xlu0 %14533 }
 0x491   : > { %v13308_v0 = vrot.slane %v15838_v27, %v16745_v33  ;;  %v24524_v16 = vcombine.low %v24522_v7, %v24523_v37  ;;  %v24525_v28 = vcombine.high %v24522_v7, %v24523_v37  ;;  %vm24526_vm9 = vcmask 359424   ;;  %14753 = vrot.lane.b32.xlu1 %v13245_v15, %s24132_s12  ;;  %s24616_s12 = smov 100  }
 0x492   : > { %v15150_v25 = vsel %vm24526_vm9, %v15149_v21, %v14522_v61  ;;  %v13204_v40 = vrot.slane %v13196_v45, %v23420_v63  ;;  %v13260_v30 = vrot.slane %v15832_v3, %v16745_v33  ;;  %v13276_v2 = vrot.slane %v15834_v12, %v16745_v33  ;;  %14757 = vrot.lane.b32.xlu0 %v13246_v36, %s24133_s5  ;;  %v14538_v37 = vpop.permute.xlu1 %14537  ;;  %s24614_s5 = smov 98  }
 0x493   : > { %v9020_v31 = vrot.slane %v24524_v16, %v23420_v63  ;;  %v9027_v44 = vrot.slane %v24525_v28, %v23420_v63  ;;  %vm24527_vm10 = vcmask 375808   ;;  %v24530_v1 = vcombine.low %v24528_v56, %v24529_v22 }
 0x494   : > { %v15151_v17 = vsel %vm24527_vm10, %v15150_v25, %v14526_v9  ;;  %v24531_v35 = vcombine.high %v24528_v56, %v24529_v22  ;;  %v15605_v10 = vcombine.low %v21923_v32, %v21933_v54  ;;  %v15607_v48 = vcombine.high %v21923_v32, %v21933_v54  ;;  %v14542_v16 = vpop.permute.xlu0 %14541 }
 0x495   : > { %v9004_v57 = vrot.slane %v24530_v1, %v23420_v63  ;;  %v13247_v29 = vcombine.high %v13195_v41, %v13227_v39  ;;  %v13243_v20 = vrot.slane %v13229_v13, %v23420_v63  ;;  %v13248_v27 = vcombine.low %v13204_v40, %v13236_v62 }
 0x496   : > { %v9011_v24 = vrot.slane %v24531_v35, %v23420_v63  ;;  %v13348_v26 = vcombine.low %v21984_v59, %v13308_v0  ;;  %v15837_v45 = vcombine.low %v9020_v31, %v9027_v44  ;;  %v15839_v3 = vcombine.high %v9020_v31, %v9027_v44  ;;  %v14546_v35 = vpop.permute.xlu1 %14545 }
 0x497   : > { %vm24532_vm9 = vcmask 392192   ;;  %v13211_v21 = vrot.slane %v13197_v46, %v23420_v63  ;;  %v13316_v15 = vcombine.low %v13260_v30, %v13276_v2  ;;  %v13317_v36 = vcombine.high %v13260_v30, %v13276_v2  ;;  %14761 = vrot.lane.b32.xlu1 %v13247_v29, %s24138_s3  ;;  %14765 = vrot.lane.b32.xlu0 %v13248_v27, %s24139_s4  ;;  %v24536_v30 = vld [vmem:[#allocation50_spill] sm:$0xff]  ;;  %s24610_s3 = smov 94   ;;  %s24612_s4 = smov 96  }
 0x498   : > { %v15152_v12 = vsel %vm24532_vm9, %v15151_v17, %v14530_v47  ;;  %vm24533_vm10 = vcmask 408576   ;;  %v15833_v39 = vcombine.low %v9004_v57, %v9011_v24  ;;  %v15835_v41 = vcombine.high %v9004_v57, %v9011_v24  ;;  %v14550_v24 = vpop.permute.xlu0 %14549 }
 0x499   : > { %v15153_v61 = vsel %vm24533_vm10, %v15152_v12, %v14534_v49  ;;  %v13249_v13 = vcombine.high %v13204_v40, %v13236_v62  ;;  %v13250_v9 = vcombine.low %v13211_v21, %v13243_v20  ;;  %v9124_v7 = vrot.slane %v9116_v42, %v23420_v63  ;;  %v24535_v42 = vld [vmem:[#allocation113_spill] sm:$0xff] }
 0x49a   : > { %v9131_v46 = vrot.slane %v9117_v38, %v23420_v63  ;;  %v13356_v31 = vrot.slane %v13348_v26, %v23420_v63  ;;  %v13349_v28 = vcombine.high %v21984_v59, %v13308_v0  ;;  %v13299_v44 = vrot.slane %v15837_v45, %v16745_v33 }
 0x49b   : > { %v13315_v62 = vrot.slane %v15839_v3, %v16745_v33  ;;  %vm24534_vm9 = vcmask 424960   ;;  %v13324_v40 = vrot.slane %v13316_v15, %v23420_v63  ;;  %v24537_v2 = vcombine.low %v24535_v42, %v24536_v30  ;;  %14769 = vrot.lane.b32.xlu1 %v13249_v13, %s24146_s25  ;;  %14773 = vrot.lane.b32.xlu0 %v13250_v9, %s24147_s26  ;;  %v14554_v9 = vpop.permute.xlu1 %14553  ;;  %s24586_s25 = smov 80   ;;  %s24592_s26 = smov 82  }
 0x49c   : > { %v15154_v25 = vsel %vm24534_vm9, %v15153_v61, %v14538_v37  ;;  %v24538_v51 = vcombine.high %v24535_v42, %v24536_v30  ;;  %vm24539_vm10 = vcmask 441344   ;;  %v13267_v0 = vrot.slane %v15833_v39, %v16745_v33 }
 0x49d   : > { %v9108_v53 = vrot.slane %v24537_v2, %v23420_v63  ;;  %v15155_v59 = vsel %vm24539_vm10, %v15154_v25, %v14542_v16  ;;  %v13283_v17 = vrot.slane %v15835_v41, %v16745_v33  ;;  %v22053_v56 = vrot.slane %v15601_v60, %v16745_v33 }
 0x49e   : > { %v9115_v38 = vrot.slane %v24538_v51, %v23420_v63  ;;  %v13251_v22 = vcombine.high %v13211_v21, %v13243_v20  ;;  %v15844_v1 = vcombine.low %v9124_v7, %v9131_v46  ;;  %v15846_v57 = vcombine.high %v9124_v7, %v9131_v46  ;;  %v14558_v46 = vpop.permute.xlu0 %14557 }
 0x49f   : > { %v13380_v29 = vcombine.low %v13324_v40, %v13356_v31  ;;  %v13331_v47 = vrot.slane %v13317_v36, %v23420_v63  ;;  %v13363_v49 = vrot.slane %v13349_v28, %v23420_v63  ;;  %v13364_v27 = vcombine.low %v13299_v44, %v13315_v62  ;;  %v24544_v28 = vld [vmem:[#allocation114_spill] sm:$0xff] }
 0x4a0   : > { %vm24540_vm9 = vcmask 457728   ;;  %v13365_v45 = vcombine.high %v13299_v44, %v13315_v62  ;;  %v15840_v3 = vcombine.low %v9108_v53, %v9115_v38  ;;  %v15842_v12 = vcombine.high %v9108_v53, %v9115_v38  ;;  %14777 = vrot.lane.b32.xlu1 %v13251_v22, %s24148_s27  ;;  %v24545_v44 = vld [vmem:[#allocation51_spill] sm:$0xff]  ;;  %v14562_v22 = vpop.permute.xlu1 %14561  ;;  %s24594_s27 = smov 84  }
 0x4a1   : > { %v15156_v26 = vsel %vm24540_vm9, %v15155_v59, %v14546_v35  ;;  %vm24541_vm10 = vcmask 474112   ;;  %14781 = vrot.lane.b32.xlu0 %v13380_v29, %s24149_s28  ;;  %v13332_v20 = vcombine.low %v13267_v0, %v13283_v17  ;;  %v13333_v21 = vcombine.high %v13267_v0, %v13283_v17  ;;  %s24596_s28 = smov 86  }
 0x4a2   : > { %v15157_v60 = vsel %vm24541_vm10, %v15156_v26, %v14550_v24  ;;  %v13428_v15 = vrot.slane %v15844_v1, %v16745_v33  ;;  %v13444_v36 = vrot.slane %v15846_v57, %v16745_v33  ;;  %v24542_v61 = vcombine.low %v20650_v11, %v20685_v19  ;;  %v14566_v57 = vpop.permute.xlu0 %14565 }
 0x4a3   : > { %v24543_v41 = vcombine.high %v20650_v11, %v20685_v19  ;;  %v13381_v7 = vcombine.high %v13324_v40, %v13356_v31  ;;  %v13382_v37 = vcombine.low %v13331_v47, %v13363_v49  ;;  %v13372_v16 = vrot.slane %v13364_v27, %v23420_v63 }
 0x4a4   : > { %v9156_v39 = vrot.slane %v24542_v61, %v23420_v63  ;;  %v24546_v62 = vcombine.low %v24544_v28, %v24545_v44  ;;  %vm24547_vm9 = vcmask 490496   ;;  %v13379_v30 = vrot.slane %v13365_v45, %v23420_v63 }
 0x4a5   : > { %v9163_v13 = vrot.slane %v24543_v41, %v23420_v63  ;;  %v15158_v42 = vsel %vm24547_vm9, %v15157_v60, %v14554_v9  ;;  %v13396_v2 = vrot.slane %v15840_v3, %v16745_v33  ;;  %v13412_v11 = vrot.slane %v15842_v12, %v16745_v33  ;;  %14785 = vrot.lane.b32.xlu1 %v13381_v7, %s24156_s29  ;;  %v14570_v60 = vpop.permute.xlu1 %14569  ;;  %v24557_v9 = vld [vmem:[#allocation30_spill] sm:$0xff]  ;;  %s24598_s29 = smov 88  }
 0x4a6   : > { %v9140_v25 = vrot.slane %v24546_v62, %v23420_v63  ;;  %vm24548_vm10 = vcmask 506880   ;;  %14789 = vrot.lane.b32.xlu0 %v13382_v37, %s24157_s30  ;;  %v13340_v31 = vrot.slane %v13332_v20, %v23420_v63  ;;  %v24549_v40 = vcombine.high %v24544_v28, %v24545_v44  ;;  %v14574_v20 = vpop.permute.xlu0 %14573  ;;  %s24604_s30 = smov 90  }
 0x4a7   : > { %v15159_v19 = vsel %vm24548_vm10, %v15158_v42, %v14558_v46  ;;  %v13347_v51 = vrot.slane %v13333_v21, %v23420_v63  ;;  %v13484_v38 = vcombine.low %v13428_v15, %v13444_v36  ;;  %v15845_v59 = vcombine.low %v9156_v39, %v9163_v13  ;;  %v24552_v21 = vld [vmem:[#allocation48_spill] sm:$0xff] }
 0x4a8   : > { %v9147_v53 = vrot.slane %v24549_v40, %v23420_v63  ;;  %v15847_v0 = vcombine.high %v9156_v39, %v9163_v13  ;;  %v22093_v17 = vrot.slane %v15603_v34, %v16745_v33  ;;  %v13383_v1 = vcombine.high %v13331_v47, %v13363_v49  ;;  %v24556_v13 = vld [vmem:[#allocation75_spill] sm:$0xff] }
 0x4a9   : > { %v13385_v35 = vcombine.high %v13340_v31, %v13372_v16  ;;  %v13384_v24 = vcombine.low %v13340_v31, %v13372_v16  ;;  %vm24550_vm9 = vcmask 523264   ;;  %v13386_v27 = vcombine.low %v13347_v51, %v13379_v30 }
 0x4aa   : > { %v15160_v29 = vsel %vm24550_vm9, %v15159_v19, %v14562_v22  ;;  %v13452_v26 = vcombine.low %v13396_v2, %v13412_v11  ;;  %v13485_v45 = vcombine.high %v13428_v15, %v13444_v36  ;;  %14793 = vrot.lane.b32.xlu1 %v13383_v1, %s24158_s2  ;;  %vm24551_vm10 = vcmask 539648   ;;  %v24553_v15 = vld [vmem:[#allocation20_spill] sm:$0xff]  ;;  %s24606_s2 = smov 92  }
 0x4ab   : > { %v15161_v3 = vsel %vm24551_vm10, %v15160_v29, %v14566_v57  ;;  %14797 = vrot.lane.b32.xlu0 %v13384_v24, %s24159_s24  ;;  %v15841_v12 = vcombine.low %v9140_v25, %v9147_v53  ;;  %v15843_v18 = vcombine.high %v9140_v25, %v9147_v53  ;;  %v13492_v14 = vrot.slane %v13484_v38, %v23420_v63  ;;  %v14578_v53 = vpop.permute.xlu1 %14577  ;;  %v14582_v38 = vpop.permute.xlu0 %14581  ;;  %s24631_s24 = smov 124  }
 0x4ac   : > { %v13453_v34 = vcombine.high %v13396_v2, %v13412_v11  ;;  %v13435_v47 = vrot.slane %v15845_v59, %v16745_v33  ;;  %v13451_v49 = vrot.slane %v15847_v0, %v16745_v33  ;;  %v24554_v36 = vcombine.low %v24552_v21, %v24553_v15 }
 0x4ad   : > { %v24555_v39 = vcombine.high %v24552_v21, %v24553_v15  ;;  %v24558_v7 = vcombine.low %v24556_v13, %v24557_v9  ;;  %v24559_v37 = vcombine.high %v24556_v13, %v24557_v9  ;;  %v22122_v28 = vrot.slane %v15605_v10, %v16745_v33  ;;  %v24567_v21 = vld [vmem:[#allocation49_spill] sm:$0xff] }
 0x4ae   : > { %v9244_v61 = vrot.slane %v24554_v36, %v23420_v63  ;;  %vm24560_vm9 = vcmask 556032   ;;  %v13460_v62 = vrot.slane %v13452_v26, %v23420_v63  ;;  %v13499_v25 = vrot.slane %v13485_v45, %v23420_v63  ;;  %14801 = vrot.lane.b32.xlu1 %v13385_v35, %s24164_s23  ;;  %v24568_v15 = vld [vmem:[#allocation17_spill] sm:$0xff]  ;;  %s24630_s23 = smov 122  }
 0x4af   : > { %v9251_v41 = vrot.slane %v24555_v39, %v23420_v63  ;;  %v9260_v46 = vrot.slane %v24558_v7, %v23420_v63  ;;  %v9267_v16 = vrot.slane %v24559_v37, %v23420_v63  ;;  %v15162_v44 = vsel %vm24560_vm9, %v15161_v3, %v14570_v60  ;;  %14805 = vrot.lane.b32.xlu0 %v13386_v27, %s24165_s0  ;;  %s24573_s0 = smov 70  }
 0x4b0   : > { %vm24561_vm10 = vcmask 572416   ;;  %v13403_v2 = vrot.slane %v15841_v12, %v16745_v33  ;;  %v13419_v11 = vrot.slane %v15843_v18, %v16745_v33  ;;  %v13387_v19 = vcombine.high %v13347_v51, %v13379_v30  ;;  %v14586_v12 = vpop.permute.xlu1 %14585  ;;  %v14590_v18 = vpop.permute.xlu0 %14589 }
 0x4b1   : > { %v15163_v42 = vsel %vm24561_vm10, %v15162_v44, %v14574_v20  ;;  %v13516_v31 = vcombine.low %v13460_v62, %v13492_v14  ;;  %v13467_v10 = vrot.slane %v13453_v34, %v23420_v63  ;;  %v13500_v40 = vcombine.low %v13435_v47, %v13451_v49 }
 0x4b2   : > { %v15848_v59 = vcombine.low %v9244_v61, %v9251_v41  ;;  %v15850_v0 = vcombine.high %v9244_v61, %v9251_v41  ;;  %v15852_v22 = vcombine.low %v9260_v46, %v9267_v16  ;;  %v15854_v1 = vcombine.high %v9260_v46, %v9267_v16  ;;  %14809 = vrot.lane.b32.xlu1 %v13387_v19, %s24170_s14  ;;  %s24579_s14 = smov 76  }
 0x4b3   : > { %v22137_v57 = vrot.slane %v15607_v48, %v16745_v33  ;;  %vm24562_vm9 = vcmask 588800   ;;  %v13517_v24 = vcombine.high %v13460_v62, %v13492_v14  ;;  %v13518_v30 = vcombine.low %v13467_v10, %v13499_v25  ;;  %14813 = vrot.lane.b32.xlu0 %v13516_v31, %s24171_s10  ;;  %s24577_s10 = smov 74  }
 0x4b4   : > { %v15164_v35 = vsel %vm24562_vm9, %v15163_v42, %v14578_v53  ;;  %vm24563_vm10 = vcmask 605184   ;;  %v13468_v29 = vcombine.low %v13403_v2, %v13419_v11  ;;  %v13469_v27 = vcombine.high %v13403_v2, %v13419_v11  ;;  %v14594_v16 = vpop.permute.xlu1 %14593  ;;  %v14598_v44 = vpop.permute.xlu0 %14597 }
 0x4b5   : > { %v15165_v51 = vsel %vm24563_vm10, %v15164_v35, %v14582_v38  ;;  %v13508_v26 = vrot.slane %v13500_v40, %v23420_v63  ;;  %v13501_v45 = vcombine.high %v13435_v47, %v13451_v49  ;;  %v24564_v32 = vcombine.low %v20431_v58, %v20434_v8 }
 0x4b6   : > { %v24565_v48 = vcombine.high %v20431_v58, %v20434_v8  ;;  %v13532_v14 = vrot.slane %v15848_v59, %v16745_v33  ;;  %v13548_v34 = vrot.slane %v15850_v0, %v16745_v33  ;;  %v13564_v60 = vrot.slane %v15852_v22, %v16745_v33  ;;  %14817 = vrot.lane.b32.xlu1 %v13517_v24, %s24180_s19  ;;  %s24584_s19 = smov 78  }
 0x4b7   : > { %v9292_v54 = vrot.slane %v24564_v32, %v23420_v63  ;;  %v13580_v47 = vrot.slane %v15854_v1, %v16745_v33  ;;  %v9388_v49 = vcombine.low %v22053_v56, %v22093_v17  ;;  %vm24566_vm9 = vcmask 621568   ;;  %14821 = vrot.lane.b32.xlu0 %v13518_v30, %s24181_s8  ;;  %s24575_s8 = smov 72  }
 0x4b8   : > { %v9299_v3 = vrot.slane %v24565_v48, %v23420_v63  ;;  %v15166_v20 = vsel %vm24566_vm9, %v15165_v51, %v14586_v12  ;;  %v24569_v58 = vcombine.low %v24567_v21, %v24568_v15  ;;  %v24570_v36 = vcombine.high %v24567_v21, %v24568_v15  ;;  %v14602_v22 = vpop.permute.xlu1 %14601  ;;  %v14606_v1 = vpop.permute.xlu0 %14605  ;;  %v24581_v48 = vld [vmem:[#allocation59_spill] sm:$0xff] }
 0x4b9   : > { %v9389_v39 = vcombine.high %v22053_v56, %v22093_v17  ;;  %vm24571_vm10 = vcmask 637952   ;;  %v13476_v13 = vrot.slane %v13468_v29, %v23420_v63  ;;  %v13519_v9 = vcombine.high %v13467_v10, %v13499_v25 }
 0x4ba   : > { %v9276_v8 = vrot.slane %v24569_v58, %v23420_v63  ;;  %v9283_v61 = vrot.slane %v24570_v36, %v23420_v63  ;;  %v15167_v41 = vsel %vm24571_vm10, %v15166_v20, %v14590_v18  ;;  %v13515_v7 = vrot.slane %v13501_v45, %v23420_v63 }
 0x4bb   : > { %v15853_v46 = vcombine.low %v9292_v54, %v9299_v3  ;;  %v15855_v37 = vcombine.high %v9292_v54, %v9299_v3  ;;  %v13520_v62 = vcombine.low %v13476_v13, %v13508_v26  ;;  %v13483_v42 = vrot.slane %v13469_v27, %v23420_v63  ;;  %14825 = vrot.lane.b32.xlu1 %v13519_v9, %s24573_s0  ;;  %v24580_v54 = vld [vmem:[#allocation62_spill] sm:$0xff]  ;;  %s15878_s0 = sshll.u32 %s24677_s9, 9 }
 0x4bc   : > { %v13588_v2 = vcombine.low %v13532_v14, %v13548_v34  ;;  %v13620_v56 = vcombine.low %v13564_v60, %v13580_v47  ;;  %vm24572_vm9 = vcmask 654336   ;;  %v13621_v11 = vcombine.high %v13564_v60, %v13580_v47  ;;  %v14610_v20 = vpop.permute.xlu1 %14609  ;;  %v14614_v21 = vpop.permute.xlu0 %14613 }
 0x4bd   : > { %v15168_v17 = vsel %vm24572_vm9, %v15167_v41, %v14594_v16  ;;  %v15849_v19 = vcombine.low %v9276_v8, %v9283_v61  ;;  %v15851_v31 = vcombine.high %v9276_v8, %v9283_v61  ;;  %v9420_v40 = vcombine.low %v22122_v28, %v22137_v57  ;;  %14829 = vrot.lane.b32.xlu0 %v13520_v62, %s24575_s8  ;;  %s15276_s8 = sshll.u32 %s21155_s11, 4  ;;  %s22397_s8 = int_to_ptr.vmem [resolvable:$true] %s15276_s8 }
 0x4be   : > { %vm24574_vm10 = vcmask 670720   ;;  %v13521_v10 = vcombine.high %v13476_v13, %v13508_v26  ;;  %v13522_v53 = vcombine.low %v13483_v42, %v13515_v7  ;;  %v13589_v38 = vcombine.high %v13532_v14, %v13548_v34 }
 0x4bf   : > { %v15169_v25 = vsel %vm24574_vm10, %v15168_v17, %v14598_v44  ;;  %v13571_v59 = vrot.slane %v15853_v46, %v16745_v33  ;;  %v13587_v0 = vrot.slane %v15855_v37, %v16745_v33  ;;  %v13596_v35 = vrot.slane %v13588_v2, %v23420_v63  ;;  %v24588_v17 = vld [vmem:[#allocation109_spill] sm:$0xff] }
 0x4c0   : > { %v13628_v24 = vrot.slane %v13620_v56, %v23420_v63  ;;  %v9396_v30 = vrot.slane %v9388_v49, %v23420_v63  ;;  %v9403_v51 = vrot.slane %v9389_v39, %v23420_v63  ;;  %vm24576_vm9 = vcmask 687104   ;;  %14833 = vrot.lane.b32.xlu1 %v13521_v10, %s24577_s10  ;;  %v14618_v44 = vpop.permute.xlu1 %14617  ;;  %v14622_v62 = vpop.permute.xlu0 %14621  ;;  %v24587_v56 = vld [vmem:[#allocation19_spill] sm:$0xff] }
 0x4c1   : > { %v15170_v29 = vsel %vm24576_vm9, %v15169_v25, %v14602_v22  ;;  %v13635_v27 = vrot.slane %v13621_v11, %v23420_v63  ;;  %v13539_v26 = vrot.slane %v15849_v19, %v16745_v33  ;;  %v13555_v45 = vrot.slane %v15851_v31, %v16745_v33  ;;  %14837 = vrot.lane.b32.xlu0 %v13522_v53, %s24579_s14 }
 0x4c2   : > { %vm24578_vm10 = vcmask 703488   ;;  %v24582_v3 = vcombine.low %v24580_v54, %v24581_v48  ;;  %v24583_v18 = vcombine.high %v24580_v54, %v24581_v48  ;;  %v9421_v34 = vcombine.high %v22122_v28, %v22137_v57 }
 0x4c3   : > { %v15171_v32 = vsel %vm24578_vm10, %v15170_v29, %v14606_v1  ;;  %v13523_v60 = vcombine.high %v13483_v42, %v13515_v7  ;;  %v13603_v47 = vrot.slane %v13589_v38, %v23420_v63  ;;  %v13636_v49 = vcombine.low %v13571_v59, %v13587_v0 }
 0x4c4   : > { %v9380_v12 = vrot.slane %v24582_v3, %v23420_v63  ;;  %v9387_v14 = vrot.slane %v24583_v18, %v23420_v63  ;;  %v13653_v15 = vcombine.high %v13596_v35, %v13628_v24  ;;  %v13652_v58 = vcombine.low %v13596_v35, %v13628_v24  ;;  %v14630_v29 = vpop.permute.xlu0 %14629 }
 0x4c5   : > { %v15860_v8 = vcombine.low %v9396_v30, %v9403_v51  ;;  %v15862_v36 = vcombine.high %v9396_v30, %v9403_v51  ;;  %v15172_v61 = vsel %vm15026_vm15, %v15171_v32, %v14610_v20  ;;  %v13654_v39 = vcombine.low %v13603_v47, %v13635_v27  ;;  %14841 = vrot.lane.b32.xlu1 %v13523_v60, %s24584_s19  ;;  %v14626_v51 = vpop.permute.xlu1 %14625  ;;  %s24685_s19 = sld [smem:[#allocation211_spill]] }
 0x4c6   : > { %v13604_v41 = vcombine.low %v13539_v26, %v13555_v45  ;;  %v13637_v13 = vcombine.high %v13571_v59, %v13587_v0  ;;  %vm24585_vm9 = vcmask 736256   ;;  %14845 = vrot.lane.b32.xlu0 %v13652_v58, %s24586_s25  ;;  %v15856_v28 = vcombine.low %v9380_v12, %v9387_v14 }
 0x4c7   : > { %v15173_v9 = vsel %vm24585_vm9, %v15172_v61, %v14614_v21  ;;  %v15858_v57 = vcombine.high %v9380_v12, %v9387_v14  ;;  %v13644_v7 = vrot.slane %v13636_v49, %v23420_v63  ;;  %v13605_v46 = vcombine.high %v13539_v26, %v13555_v45 }
 0x4c8   : > { %v9428_v37 = vrot.slane %v9420_v40, %v23420_v63  ;;  %v9435_v16 = vrot.slane %v9421_v34, %v23420_v63  ;;  %v13700_v42 = vrot.slane %v15860_v8, %v16745_v33  ;;  %v13716_v2 = vrot.slane %v15862_v36, %v16745_v33  ;;  %v14638_v23 = vpop.permute.xlu0 %14637  ;;  %v24600_v8 = vld [vmem:[#allocation56_spill] sm:$0xff]  ;;  %v24601_v36 = vld [vmem:[#allocation57_spill] sm:$0xff] }
 0x4c9   : > { %v24589_v11 = vcombine.low %v24587_v56, %v24588_v17  ;;  %v24590_v31 = vcombine.high %v24587_v56, %v24588_v17  ;;  %v9524_v40 = vcombine.low %v21883_v5, %v21891_v43  ;;  %vm24591_vm10 = vcmask 752640   ;;  %14849 = vrot.lane.b32.xlu1 %v13653_v15, %s24592_s26  ;;  %v14634_v4 = vpop.permute.xlu1 %14633  ;;  %s24686_s26 = sand.u32 1, %s24682_s1  }
 0x4ca   : > { %v15174_v10 = vsel %vm24591_vm10, %v15173_v9, %v14618_v44  ;;  %v13612_v53 = vrot.slane %v13604_v41, %v23420_v63  ;;  %v13651_v38 = vrot.slane %v13637_v13, %v23420_v63  ;;  %vm24593_vm9 = vcmask 769024   ;;  %14853 = vrot.lane.b32.xlu0 %v13654_v39, %s24594_s27  ;;  %s15260_s27 = scalar_lea.sflag [#allocation3], %s24686_s26 }
 0x4cb   : > { %v9412_v19 = vrot.slane %v24589_v11, %v23420_v63  ;;  %v9419_v25 = vrot.slane %v24590_v31, %v23420_v63  ;;  %v15175_v59 = vsel %vm24593_vm9, %v15174_v10, %v14622_v62  ;;  %v13668_v0 = vrot.slane %v15856_v28, %v16745_v33  ;;  %v24609_v10 = vld [vmem:[#allocation18_spill] sm:$0xff]  ;;  %s22395_s25 = scalar_lea.hbm %s24685_s19, %s15878_s0 }
 0x4cc   : > { %v13684_v22 = vrot.slane %v15858_v57, %v16745_v33  ;;  %v9525_v1 = vcombine.high %v21883_v5, %v21891_v43  ;;  %v13655_v35 = vcombine.high %v13603_v47, %v13635_v27  ;;  %v15861_v24 = vcombine.low %v9428_v37, %v9435_v16  ;;  %v14646_v62 = vpop.permute.xlu0 %14645 }
 0x4cd   : > { %v15863_v30 = vcombine.high %v9428_v37, %v9435_v16  ;;  %v13656_v26 = vcombine.low %v13612_v53, %v13644_v7  ;;  %v13619_v45 = vrot.slane %v13605_v46, %v23420_v63  ;;  %v13756_v32 = vcombine.low %v13700_v42, %v13716_v2  ;;  %v14642_v44 = vpop.permute.xlu1 %14641 }
 0x4ce   : > { %v15857_v54 = vcombine.low %v9412_v19, %v9419_v25  ;;  %v9507_v48 = vrot.slane %v15615_v50, %v16745_v33  ;;  %vm24595_vm10 = vcmask 785408   ;;  %v13657_v12 = vcombine.high %v13612_v53, %v13644_v7  ;;  %14857 = vrot.lane.b32.xlu1 %v13655_v35, %s24596_s28  ;;  %s16031_s28 = scalar_lea.vmem %s22397_s8, 512 }
 0x4cf   : > { %v15176_v3 = vsel %vm24595_vm10, %v15175_v59, %v14626_v51  ;;  %v15859_v18 = vcombine.high %v9412_v19, %v9419_v25  ;;  %vm24597_vm9 = vcmask 801792   ;;  %14861 = vrot.lane.b32.xlu0 %v13656_v26, %s24598_s29  ;;  %v13658_v43 = vcombine.low %v13619_v45, %v13651_v38  ;;  %p16032_p12 = scmp.ne.s32.totalorder %s22397_s8, %s16031_s28  ;;  %s16176_s29 = smov [#allocation2]  }
 0x4d0   : > { %v15177_v5 = vsel %vm24597_vm9, %v15176_v3, %v14630_v29  ;;  %v13724_v27 = vcombine.low %v13668_v0, %v13684_v22  ;;  %v13725_v14 = vcombine.high %v13668_v0, %v13684_v22  ;;  %v13757_v34 = vcombine.high %v13700_v42, %v13716_v2 }
 0x4d1   : > { %v13707_v60 = vrot.slane %v15861_v24, %v16745_v33  ;;  %v13723_v47 = vrot.slane %v15863_v30, %v16745_v33  ;;  %v13764_v50 = vrot.slane %v13756_v32, %v23420_v63  ;;  %v13675_v49 = vrot.slane %v15857_v54, %v16745_v33  ;;  %v14650_v35 = vpop.permute.xlu1 %14649  ;;  %v14654_v24 = vpop.permute.xlu0 %14653  ;;  %p16033_p13 = pnand %p16032_p12, %p16227_p4 }
 0x4d2   : > { %v9532_v20 = vrot.slane %v9524_v40, %v23420_v63  ;;  %v9539_v21 = vrot.slane %v9525_v1, %v23420_v63  ;;  %vm24599_vm10 = vcmask 818176   ;;  %v13691_v58 = vrot.slane %v15859_v18, %v16745_v33  ;;  %14865 = vrot.lane.b32.xlu1 %v13657_v12, %s24604_s30  ;;  %v24608_v40 = vld [vmem:[#allocation58_spill] sm:$0xff]  ;;  %s16035_s30 = sshll.u32 %s16176_s29, 4  ;;  %s16036_s30 = int_to_ptr.vmem [resolvable:$false] %s16035_s30 }
 0x4d3   : > { %v15178_v15 = vsel %vm24599_vm10, %v15177_v5, %v14634_v4  ;;  %v24602_v61 = vcombine.low %v24600_v8, %v24601_v36  ;;  %v24603_v41 = vcombine.high %v24600_v8, %v24601_v36  ;;  %v9556_v9 = vcombine.low %v21967_v55, %v9507_v48  ;;  %14869 = vrot.lane.b32.xlu0 %v13658_v43, %s24606_s2  ;;  %p16034_p0 = pneg %p16033_p13  ;;  %s16037_s2 = scalar_lea.vmem %s16036_s30, 1024 }
 0x4d4   : > { %vm24605_vm9 = vcmask 834560   ;;  %v13732_v57 = vrot.slane %v13724_v27, %v23420_v63  ;;  %v9557_v7 = vcombine.high %v21967_v55, %v9507_v48  ;;  %v13659_v46 = vcombine.high %v13619_v45, %v13651_v38  ;;  %p16038_p1 = scmp.lt.s32.totalorder %s22397_s8, %s16036_s30  ;;  %p16039_p2 = scmp.lt.s32.totalorder %s16037_s2, %s16031_s28 }
 0x4d5   : > { %v9516_v39 = vrot.slane %v24602_v61, %v23420_v63  ;;  %v9523_v13 = vrot.slane %v24603_v41, %v23420_v63  ;;  %v15179_v28 = vsel %vm24605_vm9, %v15178_v15, %v14638_v23  ;;  %v13771_v37 = vrot.slane %v13757_v34, %v23420_v63  ;;  %v14662_v34 = vpop.permute.xlu0 %14661 }
 0x4d6   : > { %v13772_v16 = vcombine.low %v13707_v60, %v13723_v47  ;;  %v13788_v42 = vcombine.low %v13732_v57, %v13764_v50  ;;  %v13739_v2 = vrot.slane %v13725_v14, %v23420_v63  ;;  %v15868_v56 = vcombine.low %v9532_v20, %v9539_v21  ;;  %14873 = vrot.lane.b32.xlu1 %v13659_v46, %s24610_s3  ;;  %v14658_v14 = vpop.permute.xlu1 %14657  ;;  %p16040_p3 = por %p16039_p2, %p16038_p1 }
 0x4d7   : > { %v15870_v17 = vcombine.high %v9532_v20, %v9539_v21  ;;  %vm24607_vm10 = vcmask 850944   ;;  %v13740_v19 = vcombine.low %v13675_v49, %v13691_v58  ;;  %v15864_v31 = vcombine.low %v9516_v39, %v9523_v13 }
 0x4d8   : > { %v15180_v11 = vsel %vm24607_vm10, %v15179_v28, %v14642_v44  ;;  %v15866_v25 = vcombine.high %v9516_v39, %v9523_v13  ;;  %v9541_v53 = vcombine.high %v24609_v10, %v24608_v40  ;;  %vm24611_vm9 = vcmask 867328   ;;  %14877 = vrot.lane.b32.xlu0 %v13788_v42, %s24612_s4  ;;  %p16041_p5 = pnand %p16040_p3, %p16034_p0 }
 0x4d9   : > { %v15181_v55 = vsel %vm24611_vm9, %v15180_v11, %v14646_v62  ;;  %v13741_v38 = vcombine.high %v13675_v49, %v13691_v58  ;;  %v13789_v59 = vcombine.high %v13732_v57, %v13764_v50  ;;  %v13790_v0 = vcombine.low %v13739_v2, %v13771_v37  ;;  %v14670_v39 = vpop.permute.xlu0 %14669 }
 0x4da   : > { %v13780_v22 = vrot.slane %v13772_v16, %v23420_v63  ;;  %v13773_v1 = vcombine.high %v13707_v60, %v13723_v47  ;;  %v13836_v30 = vrot.slane %v15868_v56, %v16745_v33  ;;  %v13852_v51 = vrot.slane %v15870_v17, %v16745_v33  ;;  %v14666_v61 = vpop.permute.xlu1 %14665 }
 0x4db   : > { %v9564_v29 = vrot.slane %v9556_v9, %v23420_v63  ;;  %v9571_v26 = vrot.slane %v9557_v7, %v23420_v63  ;;  %vm24613_vm10 = vcmask 883712   ;;  %v13748_v32 = vrot.slane %v13740_v19, %v23420_v63  ;;  %14881 = vrot.lane.b32.xlu1 %v13789_v59, %s24614_s5 }
 0x4dc   : > { %v15182_v45 = vsel %vm24613_vm10, %v15181_v55, %v14650_v35  ;;  %v13804_v54 = vrot.slane %v15864_v31, %v16745_v33  ;;  %v13820_v48 = vrot.slane %v15866_v25, %v16745_v33  ;;  %vm24615_vm9 = vcmask 900096   ;;  %14885 = vrot.lane.b32.xlu0 %v13790_v0, %s24616_s12 }
 0x4dd   : > { %v15183_v3 = vsel %vm24615_vm9, %v15182_v45, %v14654_v24  ;;  %v24617_v12 = vcombine.low %v24609_v10, %v24608_v40  ;;  %v9555_v5 = vrot.slane %v9541_v53, %v23420_v63  ;;  %v13791_v43 = vcombine.high %v13739_v2, %v13771_v37  ;;  %v14678_v2 = vpop.permute.xlu0 %14677 }
 0x4de   : > { %v13787_v27 = vrot.slane %v13773_v1, %v23420_v63  ;;  %v13792_v60 = vcombine.low %v13748_v32, %v13780_v22  ;;  %v13892_v47 = vcombine.low %v13836_v30, %v13852_v51  ;;  %v15869_v4 = vcombine.low %v9564_v29, %v9571_v26  ;;  %v14674_v62 = vpop.permute.xlu1 %14673 }
 0x4df   : > { %v9548_v18 = vrot.slane %v24617_v12, %v23420_v63  ;;  %v15871_v23 = vcombine.high %v9564_v29, %v9571_v26  ;;  %vm24618_vm10 = vcmask 916480   ;;  %v13755_v49 = vrot.slane %v13741_v38, %v23420_v63  ;;  %14889 = vrot.lane.b32.xlu1 %v13791_v43, %s24619_s13 }
 0x4e0   : > { %v15184_v50 = vsel %vm24618_vm10, %v15183_v3, %v14658_v14  ;;  %v13860_v20 = vcombine.low %v13804_v54, %v13820_v48  ;;  %vm24620_vm9 = vcmask 932864   ;;  %14893 = vrot.lane.b32.xlu0 %v13792_v60, %s24435_s6  ;;  %v13793_v8 = vcombine.high %v13748_v32, %v13780_v22  ;;  %s24624_s6 = smov 110  }
 0x4e1   : > { %v15185_v21 = vsel %vm24620_vm9, %v15184_v50, %v14662_v34  ;;  %v15865_v15 = vcombine.low %v9548_v18, %v9555_v5  ;;  %v15867_v58 = vcombine.high %v9548_v18, %v9555_v5  ;;  %v13794_v36 = vcombine.low %v13755_v49, %v13787_v27  ;;  %v14686_v53 = vpop.permute.xlu0 %14685 }
 0x4e2   : > { %v13900_v41 = vrot.slane %v13892_v47, %v23420_v63  ;;  %v13893_v13 = vcombine.high %v13836_v30, %v13852_v51  ;;  %v13843_v9 = vrot.slane %v15869_v4, %v16745_v33  ;;  %v13859_v28 = vrot.slane %v15871_v23, %v16745_v33 }
 0x4e3   : > { %vm24621_vm10 = vcmask 949248   ;;  %v13868_v7 = vrot.slane %v13860_v20, %v23420_v63  ;;  %v13861_v46 = vcombine.high %v13804_v54, %v13820_v48  ;;  %14897 = vrot.lane.b32.xlu1 %v13793_v8, %s24622_s15  ;;  %vm24623_vm9 = vcmask 965632  }
 0x4e4   : > { %v15186_v57 = vsel %vm24621_vm10, %v15185_v21, %v14666_v61  ;;  %14901 = vrot.lane.b32.xlu0 %v13794_v36, %s24446_s18  ;;  %v13811_v16 = vrot.slane %v15865_v15, %v16745_v33  ;;  %v13827_v44 = vrot.slane %v15867_v58, %v16745_v33  ;;  %v13795_v42 = vcombine.high %v13755_v49, %v13787_v27  ;;  %v14682_v33 = vpop.permute.xlu1 %14681  ;;  %s24626_s18 = smov 114  }
 0x4e5   : > { %v15187_v37 = vsel %vm24623_vm9, %v15186_v57, %v14670_v39  ;;  %v13924_v56 = vcombine.low %v13868_v7, %v13900_v41  ;;  %v13907_v17 = vrot.slane %v13893_v13, %v23420_v63  ;;  %v13908_v11 = vcombine.low %v13843_v9, %v13859_v28  ;;  %v14694_v29 = vpop.permute.xlu0 %14693 }
 0x4e6   : > { %v15188_v19 = vsel %vm15058_vm12, %v15187_v37, %v14674_v62  ;;  %v13875_v25 = vrot.slane %v13861_v46, %v23420_v63  ;;  %v13876_v40 = vcombine.low %v13811_v16, %v13827_v44  ;;  %v13925_v10 = vcombine.high %v13868_v7, %v13900_v41 }
 0x4e7   : > { %14905 = vrot.lane.b32.xlu1 %v13795_v42, %s24624_s6  ;;  %v15189_v31 = vsel %vm15060_vm11, %v15188_v19, %v14678_v2  ;;  %v13916_v38 = vrot.slane %v13908_v11, %v23420_v63  ;;  %v13909_v59 = vcombine.high %v13843_v9, %v13859_v28  ;;  %v13877_v35 = vcombine.high %v13811_v16, %v13827_v44 }
 0x4e8   : > { %14909 = vrot.lane.b32.xlu0 %v13924_v56, %s24625_s17  ;;  %v13926_v55 = vcombine.low %v13875_v25, %v13907_v17  ;;  %v15190_v0 = vsel %vm15062_vm14, %v15189_v31, %v14682_v33  ;;  %v13884_v1 = vrot.slane %v13876_v40, %v23420_v63  ;;  %v12972_v24 = vcombine.low %v21793_v6, %v21790_v52  ;;  %v14690_v30 = vpop.permute.xlu1 %14689 }
 0x4e9   : > { %v15191_v22 = vsel %vm15064_vm13, %v15190_v0, %v14686_v53  ;;  %v13927_v51 = vcombine.high %v13875_v25, %v13907_v17  ;;  %v13923_v45 = vrot.slane %v13909_v59, %v23420_v63  ;;  %v13891_v48 = vrot.slane %v13877_v35, %v23420_v63  ;;  %v14702_v52 = vpop.permute.xlu0 %14701 }
 0x4ea   : > { %15257 = vst [vmem:[%s21155_s11 + $0x10] sm:$0xff] %v15191_v22  ;;  %v13928_v26 = vcombine.low %v13884_v1, %v13916_v38  ;;  %v15192_v32 = vsel %vm14940_vm0, %v12972_v24, %v14690_v30  ;;  %v13929_v12 = vcombine.high %v13884_v1, %v13916_v38  ;;  %vm24633_vm0 = vcmask 162816  }
 0x4eb   : > { %14913 = vrot.lane.b32.xlu1 %v13925_v10, %s24626_s18  ;;  %v15193_v54 = vsel %vm14942_vm1, %v15192_v32, %v14694_v29  ;;  %v13930_v6 = vcombine.low %v13891_v48, %v13923_v45  ;;  %v13931_v27 = vcombine.high %v13891_v48, %v13923_v45  ;;  %vm24634_vm1 = vcmask 179200  }
 0x4ec   : > { %14917 = vrot.lane.b32.xlu0 %v13926_v55, %s24627_s20  ;;  %v14698_v3 = vpop.permute.xlu1 %14697  ;;  %vm24642_vm10 = vcmask 310272   ;;  %vm24643_vm9 = vcmask 326656  }
 0x4ed   : > { %v15194_v18 = vsel %vm14944_vm2, %v15193_v54, %v14698_v3  ;;  %v14710_v14 = vpop.permute.xlu0 %14709  ;;  %vm24635_vm2 = vcmask 195584  }
 0x4ee   : > { %v15195_v5 = vsel %vm14946_vm3, %v15194_v18, %v14702_v52  ;;  %vm24636_vm3 = vcmask 211968  }
 0x4ef   : > { %14921 = vrot.lane.b32.xlu1 %v13927_v51, %s24628_s21 }
 0x4f0   : > { %14925 = vrot.lane.b32.xlu0 %v13928_v26, %s24629_s22  ;;  %v14706_v43 = vpop.permute.xlu1 %14705 }
 0x4f1   : > { %v15196_v34 = vsel %vm14948_vm4, %v15195_v5, %v14706_v43  ;;  %v14718_v47 = vpop.permute.xlu0 %14717  ;;  %vm24637_vm4 = vcmask 228352  }
 0x4f2   : > { %v15197_v63 = vsel %vm14950_vm5, %v15196_v34, %v14710_v14  ;;  %vm24638_vm5 = vcmask 244736  }
 0x4f3   : > { %14929 = vrot.lane.b32.xlu1 %v13929_v12, %s24630_s23 }
 0x4f4   : > { %14933 = vrot.lane.b32.xlu0 %v13930_v6, %s24631_s24  ;;  %v14714_v60 = vpop.permute.xlu1 %14713 }
 0x4f5   : > { %v15198_v4 = vsel %vm14952_vm6, %v15197_v63, %v14714_v60  ;;  %v14726_v49 = vpop.permute.xlu0 %14725  ;;  %vm24639_vm6 = vcmask 261120  }
 0x4f6   : > { %v15199_v23 = vsel %vm14954_vm7, %v15198_v4, %v14718_v47  ;;  %vm24640_vm7 = vcmask 277504  }
 0x4f7   : > { %14937 = vrot.lane.b32.xlu1 %v13931_v27, %s24632_s16 }
 0x4f8   : > { %v14722_v50 = vpop.permute.xlu1 %14721 }
 0x4f9   : > { %v15200_v20 = vsel %vm14956_vm8, %v15199_v23, %v14722_v50  ;;  %v14734_v58 = vpop.permute.xlu0 %14733  ;;  %vm24641_vm8 = vcmask 293888  }
 0x4fa   : > { %v15201_v21 = vsel %vm24633_vm0, %v15200_v20, %v14726_v49  ;;  %vm24644_vm0 = vcmask 343040  }
 0x4fc   : > { %v14730_v15 = vpop.permute.xlu1 %14729 }
 0x4fd   : > { %v15202_v8 = vsel %vm24634_vm1, %v15201_v21, %v14730_v15  ;;  %v14742_v39 = vpop.permute.xlu0 %14741  ;;  %vm24645_vm1 = vcmask 359424  }
 0x4fe   : > { %v15203_v36 = vsel %vm24635_vm2, %v15202_v8, %v14734_v58  ;;  %vm24646_vm2 = vcmask 375808  }
 0x500   : > { %v14738_v61 = vpop.permute.xlu1 %14737 }
 0x501   : > { %v15204_v41 = vsel %vm24636_vm3, %v15203_v36, %v14738_v61  ;;  %v14750_v28 = vpop.permute.xlu0 %14749  ;;  %vm24647_vm3 = vcmask 392192  }
 0x502   : > { %v15205_v13 = vsel %vm24637_vm4, %v15204_v41, %v14742_v39  ;;  %vm24648_vm4 = vcmask 408576  }
 0x504   : > { %v14746_v9 = vpop.permute.xlu1 %14745 }
 0x505   : > { %v15206_v57 = vsel %vm24638_vm5, %v15205_v13, %v14746_v9  ;;  %v14758_v37 = vpop.permute.xlu0 %14757  ;;  %vm24649_vm5 = vcmask 424960  }
 0x506   : > { %v15207_v7 = vsel %vm24639_vm6, %v15206_v57, %v14750_v28  ;;  %vm24650_vm6 = vcmask 441344  }
 0x508   : > { %v14754_v46 = vpop.permute.xlu1 %14753 }
 0x509   : > { %v15208_v16 = vsel %vm24640_vm7, %v15207_v7, %v14754_v46  ;;  %v14766_v42 = vpop.permute.xlu0 %14765  ;;  %vm24651_vm7 = vcmask 457728  }
 0x50a   : > { %v15209_v44 = vsel %vm24641_vm8, %v15208_v16, %v14758_v37  ;;  %vm24652_vm8 = vcmask 474112  }
 0x50c   : > { %v14762_v62 = vpop.permute.xlu1 %14761 }
 0x50d   : > { %v15210_v2 = vsel %vm24642_vm10, %v15209_v44, %v14762_v62  ;;  %v14774_v11 = vpop.permute.xlu0 %14773  ;;  %vm24653_vm10 = vcmask 490496  }
 0x50e   : > { %v15211_v56 = vsel %vm24643_vm9, %v15210_v2, %v14766_v42  ;;  %vm24654_vm9 = vcmask 506880  }
 0x510   : > { %v14770_v17 = vpop.permute.xlu1 %14769 }
 0x511   : > { %v15212_v19 = vsel %vm24644_vm0, %v15211_v56, %v14770_v17  ;;  %vm24655_vm0 = vcmask 523264  }
 0x512   : > { %v15213_v31 = vsel %vm24645_vm1, %v15212_v19, %v14774_v11  ;;  %vm24656_vm1 = vcmask 539648  }
 0x513   : > { %v14782_v40 = vpop.permute.xlu0 %14781 }
 0x514   : > { %v14778_v25 = vpop.permute.xlu1 %14777 }
 0x515   : > { %v15214_v33 = vsel %vm24646_vm2, %v15213_v31, %v14778_v25  ;;  %vm24657_vm2 = vcmask 556032  }
 0x516   : > { %v15215_v10 = vsel %vm24647_vm3, %v15214_v33, %v14782_v40  ;;  %vm24658_vm3 = vcmask 572416  }
 0x518   : > { %v14786_v53 = vpop.permute.xlu1 %14785  ;;  %v14790_v55 = vpop.permute.xlu0 %14789 }
 0x519   : > { %v15216_v38 = vsel %vm24648_vm4, %v15215_v10, %v14786_v53  ;;  %vm24659_vm4 = vcmask 588800  }
 0x51a   : > { %v15217_v59 = vsel %vm24649_vm5, %v15216_v38, %v14790_v55  ;;  %vm24660_vm5 = vcmask 605184  }
 0x51c   : > { %v14794_v0 = vpop.permute.xlu1 %14793 }
 0x51d   : > { %v14798_v22 = vpop.permute.xlu0 %14797  ;;  %v15218_v1 = vsel %vm24650_vm6, %v15217_v59, %v14794_v0  ;;  %vm24661_vm6 = vcmask 621568  }
 0x51e   : > { %v15219_v35 = vsel %vm24651_vm7, %v15218_v1, %v14798_v22  ;;  %vm24662_vm7 = vcmask 637952  }
 0x520   : > { %v14802_v24 = vpop.permute.xlu1 %14801 }
 0x521   : > { %v14806_v30 = vpop.permute.xlu0 %14805  ;;  %v15220_v51 = vsel %vm24652_vm8, %v15219_v35, %v14802_v24  ;;  %vm24663_vm8 = vcmask 654336  }
 0x522   : > { %v15221_v29 = vsel %vm24653_vm10, %v15220_v51, %v14806_v30  ;;  %vm24664_vm10 = vcmask 670720  }
 0x524   : > { %v14810_v26 = vpop.permute.xlu1 %14809 }
 0x525   : > { %v14814_v45 = vpop.permute.xlu0 %14813  ;;  %v15222_v32 = vsel %vm24654_vm9, %v15221_v29, %v14810_v26  ;;  %vm24665_vm9 = vcmask 687104  }
 0x526   : > { %v15223_v54 = vsel %vm24655_vm0, %v15222_v32, %v14814_v45  ;;  %vm24666_vm0 = vcmask 703488  }
 0x528   : > { %v14818_v48 = vpop.permute.xlu1 %14817 }
 0x529   : > { %v14822_v3 = vpop.permute.xlu0 %14821  ;;  %v15224_v12 = vsel %vm24656_vm1, %v15223_v54, %v14818_v48  ;;  %vm24667_vm1 = vcmask 736256  }
 0x52a   : > { %v15225_v52 = vsel %vm24657_vm2, %v15224_v12, %v14822_v3  ;;  %vm24668_vm2 = vcmask 752640  }
 0x52d   : > { %v14826_v6 = vpop.permute.xlu1 %14825 }
 0x52e   : > { %v15226_v5 = vsel %vm24658_vm3, %v15225_v52, %v14826_v6  ;;  %vm24669_vm3 = vcmask 769024  }
 0x52f   : > { %v14830_v18 = vpop.permute.xlu0 %14829 }
 0x530   : > { %v15227_v43 = vsel %vm24659_vm4, %v15226_v5, %v14830_v18  ;;  %vm24670_vm4 = vcmask 785408  }
 0x532   : > { %v14834_v27 = vpop.permute.xlu1 %14833 }
 0x533   : > { %v14838_v14 = vpop.permute.xlu0 %14837  ;;  %v15228_v34 = vsel %vm24660_vm5, %v15227_v43, %v14834_v27  ;;  %vm24671_vm5 = vcmask 801792  }
 0x534   : > { %v15229_v63 = vsel %vm24661_vm6, %v15228_v34, %v14838_v14  ;;  %vm24672_vm6 = vcmask 818176  }
 0x537   : > { %v14842_v60 = vpop.permute.xlu1 %14841 }
 0x538   : > { %v14846_v47 = vpop.permute.xlu0 %14845  ;;  %v15230_v4 = vsel %vm24662_vm7, %v15229_v63, %v14842_v60  ;;  %vm24674_vm7 = vcmask 850944  }
 0x539   : > { %v15231_v23 = vsel %vm24663_vm8, %v15230_v4, %v14846_v47  ;;  %vm24675_vm8 = vcmask 867328  }
 0x53b   : > { %v14850_v50 = vpop.permute.xlu1 %14849 }
 0x53c   : > { %v14854_v49 = vpop.permute.xlu0 %14853  ;;  %v15232_v20 = vsel %vm24664_vm10, %v15231_v23, %v14850_v50  ;;  %vm24676_vm10 = vcmask 883712  }
 0x53d   : > { %v15233_v21 = vsel %vm24665_vm9, %v15232_v20, %v14854_v49  ;;  %vm24678_vm9 = vcmask 900096  }
 0x540   : > { %v14858_v15 = vpop.permute.xlu1 %14857 }
 0x541   : > { %v14862_v58 = vpop.permute.xlu0 %14861  ;;  %v15234_v8 = vsel %vm24666_vm0, %v15233_v21, %v14858_v15  ;;  %vm24679_vm0 = vcmask 916480  }
 0x542   : > { %v15235_v36 = vsel %vm15026_vm15, %v15234_v8, %v14862_v58  ;;  %vm24673_vm15 = vcmask 834560  }
 0x544   : > { %v14866_v61 = vpop.permute.xlu1 %14865 }
 0x545   : > { %v14870_v39 = vpop.permute.xlu0 %14869  ;;  %v15236_v41 = vsel %vm24667_vm1, %v15235_v36, %v14866_v61  ;;  %vm24680_vm1 = vcmask 932864  }
 0x546   : > { %v15237_v13 = vsel %vm24668_vm2, %v15236_v41, %v14870_v39  ;;  %vm24681_vm2 = vcmask 949248  }
 0x548   : > { %v14874_v9 = vpop.permute.xlu1 %14873 }
 0x549   : > { %v15238_v57 = vsel %vm24669_vm3, %v15237_v13, %v14874_v9  ;;  %vm24683_vm3 = vcmask 965632  }
 0x54a   : > { %v14878_v28 = vpop.permute.xlu0 %14877 }
 0x54b   : > { %v15239_v7 = vsel %vm24670_vm4, %v15238_v57, %v14878_v28 }
 0x54d   : > { %v14882_v46 = vpop.permute.xlu1 %14881 }
 0x54e   : > { %v14886_v37 = vpop.permute.xlu0 %14885  ;;  %v15240_v16 = vsel %vm24671_vm5, %v15239_v7, %v14882_v46 }
 0x54f   : > { %v15241_v44 = vsel %vm24672_vm6, %v15240_v16, %v14886_v37 }
 0x551   : > { %v14890_v62 = vpop.permute.xlu1 %14889 }
 0x552   : > { %v14894_v42 = vpop.permute.xlu0 %14893  ;;  %v15242_v2 = vsel %vm24673_vm15, %v15241_v44, %v14890_v62 }
 0x553   : > { %v15243_v56 = vsel %vm24674_vm7, %v15242_v2, %v14894_v42 }
 0x555   : > { %v14898_v17 = vpop.permute.xlu1 %14897 }
 0x556   : > { %v14902_v11 = vpop.permute.xlu0 %14901  ;;  %v15244_v19 = vsel %vm24675_vm8, %v15243_v56, %v14898_v17 }
 0x557   : > { %v15245_v31 = vsel %vm24676_vm10, %v15244_v19, %v14902_v11 }
 0x559   : > { %v14906_v25 = vpop.permute.xlu1 %14905 }
 0x55a   : > { %v14910_v40 = vpop.permute.xlu0 %14909  ;;  %v15246_v33 = vsel %vm24678_vm9, %v15245_v31, %v14906_v25 }
 0x55b   : > { %v15247_v10 = vsel %vm24679_vm0, %v15246_v33, %v14910_v40 }
 0x55d   : > { %v14914_v53 = vpop.permute.xlu1 %14913 }
 0x55e   : > { %v14918_v55 = vpop.permute.xlu0 %14917  ;;  %v15248_v38 = vsel %vm24680_vm1, %v15247_v10, %v14914_v53 }
 0x55f   : > { %v15249_v59 = vsel %vm24681_vm2, %v15248_v38, %v14918_v55 }
 0x561   : > { %v14922_v0 = vpop.permute.xlu1 %14921 }
 0x562   : > { %v14926_v22 = vpop.permute.xlu0 %14925  ;;  %v15250_v1 = vsel %vm24683_vm3, %v15249_v59, %v14922_v0 }
 0x563   : > { %v15251_v35 = vsel %vm15058_vm12, %v15250_v1, %v14926_v22 }
 0x565   : > { %v14930_v24 = vpop.permute.xlu1 %14929 }
 0x566   : > { %v14934_v30 = vpop.permute.xlu0 %14933  ;;  %v15252_v51 = vsel %vm15060_vm11, %v15251_v35, %v14930_v24 }
 0x567   : > { %v15253_v29 = vsel %vm15062_vm14, %v15252_v51, %v14934_v30 }
 0x569   : > { %v14938_v26 = vpop.permute.xlu1 %14937 }
 0x56a   : > { %v15254_v45 = vsel %vm15064_vm13, %v15253_v29, %v14938_v26 }
 0x56b   : > { %15258 = vst [vmem:[%s21155_s11 + $0x18] sm:$0xff] %v15254_v45 }
 0x56c   : > { %16044 = shalt.err (!%p16041_p5)
}
 0x56d   : > { %s16045_s11 = scalar_lea.hbm %s22395_s25, 512  ;;  %s16049_s5 = scalar_lea.hbm %s24685_s19, 1024 }
 0x56e   : > { %p16046_p6 = scmp.ne.s32.totalorder %s22395_s25, %s16045_s11  ;;  %p16050_p10 = scmp.lt.u32.totalorder %s22395_s25, %s24685_s19 }
 0x56f   : > { %p16051_p11 = scmp.lt.u32.totalorder %s16049_s5, %s16045_s11  ;;  %p16053_p13 = scmp.lt.u32.totalorder %s16045_s11, %s22395_s25 }
 0x570   : > { %p16047_p7 = pnand %p16046_p6, %p16227_p4 }
 0x571   : > { %p16052_p12 = por %p16051_p11, %p16050_p10 }
 0x572   : > { %p16048_p9 = pneg %p16047_p7 }
 0x573   : > { %p16054_p0 = por %p16053_p13, %p16052_p12 }
 0x575   : > { %p16055_p1 = pnand %p16054_p0, %p16048_p9 }
 0x577   : > { %16058 = shalt.err (!%p16055_p1)
}
 0x578   : > { %15879 = dma.vmem_to_hbm [thread:$0]  (%p16227_p4), %s22397_s8, 512, %s22395_s25, %s15260_s27  }
 0x579 PF: > { %s24687_s15 = sld [smem:[#allocation10_spill]]  ;;  %s24688_s6 = sld [smem:[#allocation5_spill]] }
 0x57f   : > { %p15885_p2 = scmp.ge.s32.totalorder %s24687_s15, 2  ;;  %s15288_s18 = sand.u32 1, %s24688_s6  }
 0x580   : > { %s15289_s20 = scalar_lea.sflag [#allocation3], %s15288_s18 }
 0x581   : > { %p15882_p3 = pnand %p15885_p2, %p16234_p8 }
 0x583   : > { %16084 = dma.done.wait (!%p15882_p3), %s15289_s20, 512  }
 0x584   : > { %16086 = vsyncadd (!%p15882_p3), %s15289_s20, 4294966784  ;;  %s14_s11 = sadd.s32 1, %s24687_s15   ;;  %s24690_s6 = sld [smem:[#allocation6_spill]] }
 0x585   : > { %p11_p5 = scmp.ge.s32.totalorder %s14_s11, 4   ;;  %s24691_s7 = sld [smem:[#allocation7_spill]] }
 0x586   : > { %s24692_s8 = sld [smem:[#allocation14_spill]]  ;;  %s24693_s9 = sld [smem:[#allocation9_spill]] }
 0x587   : > { %s24694_s10 = sld [smem:[#allocation11_spill]]  ;;  %13 = sbr.rel (!%p11_p5) target bundleno = 7 (0x7), region = 59 }
 0x58e   :  { %15294 = vsyncpa [#allocation3], 1 }
 0x58f   :  { %15296 = vsyncpa [#allocation3 + $0x1], 1 }

// kernel: tpu_custom_call.1
= control target key start
LH: loop header
LB: loop body
LE: loop exit
PB: predicated region body
PF: predicated region fallthrough
CT: control target
= control target key end

     0   :  { %s1449_s6 = smov 0   ;;  %s2558_s0 = inlined_call_operand.vmem [shape: f32[2,256,16], index: 0, kind: input, shape index: {}]   ;;  %s2559_s1 = inlined_call_operand.vmem [shape: f32[2,8,256,2], index: 1, kind: output, shape index: {}]  }
   0x1 LB: > { %s1172_s7 = sadd.s32 4294967295, %s1430_s6   ;;  %p1176_p0 = scmp.ge.s32.totalorder %s1430_s6, 1  ;;  %s1430_s6 = sphi %s1449_s6, %s11_s6  }
   0x2   : > { %p87_p1 = scmp.lt.s32.totalorder %s1430_s6, 3 }
   0x4   : > { %p88_p2 = pnand %p1176_p0, %p87_p1 }
   0x5   : > { %p107_p3 = scmp.lt.s32.totalorder (!%p88_p2), %s1172_s7, 1  ;;  %vm149_vm0 = vcmask (!%p88_p2), 15360   ;;  %s1432_s16 = smov (!%p88_p2), 126  }
   0x6   : > { %91 = sbr.rel (%p88_p2) target bundleno = 581 (0x245), region = 24  ;;  %s1433_s17 = smov (!%p88_p2), 124  }
   0x7   : > { %s1434_s18 = smov (!%p88_p2), 122   ;;  %s1435_s19 = smov (!%p88_p2), 120  }
   0x8   : > { %s1436_s20 = smov (!%p88_p2), 118   ;;  %s1437_s21 = smov (!%p88_p2), 116  }
   0x9   : > { %s1438_s22 = smov (!%p88_p2), 114  }
   0xd   : > { %s2561_s7 = smov (!%p107_p3, %s1172_s7), 1 }
   0xe   : > { %s1407_s8 = sshll.u32 %s2561_s7, 8  ;;  %s1408_s9 = sshll.u32 %s2561_s7, 11 }
   0xf   : > { %s1460_s12 = scalar_lea.vmem %s2558_s0, %s1407_s8  ;;  %s1465_s15 = scalar_lea.vmem %s2559_s1, %s1408_s9 }
  0x10   : > { %v1468_v0 = vld [vmem:[%s1460_s12 + $0x10] sm:$0xff]  ;;  %v1471_v1 = vld [vmem:[%s1460_s12] sm:$0xff]  ;;  %v1474_v2 = vld [vmem:[%s1460_s12 + $0x18] sm:$0xff] }
  0x11   : > { %218 = vrot.lane.b32.xlu1 %v1468_v0, %s1432_s16  ;;  %152 = vst.msk [vmem:[%s1465_s15 + $0x10] sm:$0xff] %vm149_vm0, %v1468_v0  ;;  %214 = vrot.lane.b32.xlu0 %v1471_v1, %s1432_s16  ;;  %150 = vst.msk [vmem:[%s1465_s15] sm:$0xff] %vm149_vm0, %v1471_v1 }
  0x12   : > { %153 = vst.msk [vmem:[%s1465_s15 + $0x18] sm:$0xff] %vm149_vm0, %v1474_v2  ;;  %v1490_v3 = vld [vmem:[%s1460_s12 + $0x8] sm:$0xff]  ;;  %v1502_v5 = vld [vmem:[%s1460_s12 + $0x20] sm:$0xff]  ;;  %v1505_v6 = vld [vmem:[%s1460_s12 + $0x38] sm:$0xff] }
  0x13   : > { %v1493_v4 = vld [vmem:[%s1460_s12 + $0x28] sm:$0xff]  ;;  %151 = vst.msk [vmem:[%s1465_s15 + $0x8] sm:$0xff] %vm149_vm0, %v1490_v3  ;;  %v1508_v7 = vld [vmem:[%s1460_s12 + $0x30] sm:$0xff]  ;;  %154 = vst.msk [vmem:[%s1465_s15 + $0x20] sm:$0xff] %vm149_vm0, %v1502_v5 }
  0x14   : > { %155 = vst.msk [vmem:[%s1465_s15 + $0x28] sm:$0xff] %vm149_vm0, %v1493_v4  ;;  %157 = vst.msk [vmem:[%s1465_s15 + $0x38] sm:$0xff] %vm149_vm0, %v1505_v6  ;;  %v1520_v8 = vld [vmem:[%s1460_s12 + $0x48] sm:$0xff]  ;;  %v1523_v9 = vld [vmem:[%s1460_s12 + $0x40] sm:$0xff] }
  0x15   : > { %156 = vst.msk [vmem:[%s1465_s15 + $0x30] sm:$0xff] %vm149_vm0, %v1508_v7  ;;  %v1526_v10 = vld [vmem:[%s1460_s12 + $0x58] sm:$0xff]  ;;  %159 = vst.msk [vmem:[%s1465_s15 + $0x48] sm:$0xff] %vm149_vm0, %v1520_v8  ;;  %v1538_v11 = vld [vmem:[%s1460_s12 + $0x50] sm:$0xff] }
  0x16   : > { %158 = vst.msk [vmem:[%s1465_s15 + $0x40] sm:$0xff] %vm149_vm0, %v1523_v9  ;;  %161 = vst.msk [vmem:[%s1465_s15 + $0x58] sm:$0xff] %vm149_vm0, %v1526_v10  ;;  %v1541_v12 = vld [vmem:[%s1460_s12 + $0x68] sm:$0xff]  ;;  %v1544_v13 = vld [vmem:[%s1460_s12 + $0x60] sm:$0xff] }
  0x17   : > { %220 = vrot.lane.b32.xlu1 %v1474_v2, %s1432_s16  ;;  %216 = vrot.lane.b32.xlu0 %v1490_v3, %s1432_s16  ;;  %160 = vst.msk [vmem:[%s1465_s15 + $0x50] sm:$0xff] %vm149_vm0, %v1538_v11  ;;  %163 = vst.msk [vmem:[%s1465_s15 + $0x68] sm:$0xff] %vm149_vm0, %v1541_v12 }
  0x18   : > { %162 = vst.msk [vmem:[%s1465_s15 + $0x60] sm:$0xff] %vm149_vm0, %v1544_v13  ;;  %v1560_v14 = vld [vmem:[%s1460_s12 + $0x78] sm:$0xff]  ;;  %v1563_v15 = vld [vmem:[%s1460_s12 + $0x70] sm:$0xff]  ;;  %v1572_v16 = vld [vmem:[%s1460_s12 + $0x88] sm:$0xff] }
  0x19   : > { %165 = vst.msk [vmem:[%s1465_s15 + $0x78] sm:$0xff] %vm149_vm0, %v1560_v14  ;;  %164 = vst.msk [vmem:[%s1465_s15 + $0x70] sm:$0xff] %vm149_vm0, %v1563_v15  ;;  %v1575_v17 = vld [vmem:[%s1460_s12 + $0x80] sm:$0xff]  ;;  %v1578_v18 = vld [vmem:[%s1460_s12 + $0x98] sm:$0xff] }
  0x1a   : > { %167 = vst.msk [vmem:[%s1465_s15 + $0x88] sm:$0xff] %vm149_vm0, %v1572_v16  ;;  %166 = vst.msk [vmem:[%s1465_s15 + $0x80] sm:$0xff] %vm149_vm0, %v1575_v17  ;;  %v1590_v19 = vld [vmem:[%s1460_s12 + $0x90] sm:$0xff]  ;;  %v1593_v20 = vld [vmem:[%s1460_s12 + $0xa8] sm:$0xff] }
  0x1b   : > { %169 = vst.msk [vmem:[%s1465_s15 + $0x98] sm:$0xff] %vm149_vm0, %v1578_v18  ;;  %v1596_v21 = vld [vmem:[%s1460_s12 + $0xa0] sm:$0xff]  ;;  %168 = vst.msk [vmem:[%s1465_s15 + $0x90] sm:$0xff] %vm149_vm0, %v1590_v19  ;;  %v1608_v22 = vld [vmem:[%s1460_s12 + $0xb8] sm:$0xff] }
  0x1c   : > { %171 = vst.msk [vmem:[%s1465_s15 + $0xa8] sm:$0xff] %vm149_vm0, %v1593_v20  ;;  %170 = vst.msk [vmem:[%s1465_s15 + $0xa0] sm:$0xff] %vm149_vm0, %v1596_v21  ;;  %v1611_v23 = vld [vmem:[%s1460_s12 + $0xb0] sm:$0xff]  ;;  %v1614_v24 = vld [vmem:[%s1460_s12 + $0xc8] sm:$0xff] }
  0x1d   : > { %224 = vrot.lane.b32.xlu1 %v1493_v4, %s1432_s16  ;;  %222 = vrot.lane.b32.xlu0 %v1502_v5, %s1432_s16  ;;  %173 = vst.msk [vmem:[%s1465_s15 + $0xb8] sm:$0xff] %vm149_vm0, %v1608_v22  ;;  %172 = vst.msk [vmem:[%s1465_s15 + $0xb0] sm:$0xff] %vm149_vm0, %v1611_v23 }
  0x1e   : > { %175 = vst.msk [vmem:[%s1465_s15 + $0xc8] sm:$0xff] %vm149_vm0, %v1614_v24  ;;  %v1630_v25 = vld [vmem:[%s1460_s12 + $0xc0] sm:$0xff]  ;;  %v1633_v26 = vld [vmem:[%s1460_s12 + $0xd8] sm:$0xff]  ;;  %v1642_v27 = vld [vmem:[%s1460_s12 + $0xd0] sm:$0xff] }
  0x1f   : > { %174 = vst.msk [vmem:[%s1465_s15 + $0xc0] sm:$0xff] %vm149_vm0, %v1630_v25  ;;  %177 = vst.msk [vmem:[%s1465_s15 + $0xd8] sm:$0xff] %vm149_vm0, %v1633_v26  ;;  %v1645_v28 = vld [vmem:[%s1460_s12 + $0xe8] sm:$0xff]  ;;  %v1648_v29 = vld [vmem:[%s1460_s12 + $0xe0] sm:$0xff] }
  0x20   : > { %176 = vst.msk [vmem:[%s1465_s15 + $0xd0] sm:$0xff] %vm149_vm0, %v1642_v27  ;;  %179 = vst.msk [vmem:[%s1465_s15 + $0xe8] sm:$0xff] %vm149_vm0, %v1645_v28  ;;  %v1660_v30 = vld [vmem:[%s1460_s12 + $0xf8] sm:$0xff]  ;;  %v1663_v31 = vld [vmem:[%s1460_s12 + $0xf0] sm:$0xff] }
  0x21   : > { %178 = vst.msk [vmem:[%s1465_s15 + $0xe0] sm:$0xff] %vm149_vm0, %v1648_v29  ;;  %181 = vst.msk [vmem:[%s1465_s15 + $0xf8] sm:$0xff] %vm149_vm0, %v1660_v30  ;;  %228 = vrot.lane.b32.xlu1 %v1505_v6, %s1432_s16  ;;  %226 = vrot.lane.b32.xlu0 %v1508_v7, %s1432_s16 }
  0x22   : > { %180 = vst.msk [vmem:[%s1465_s15 + $0xf0] sm:$0xff] %vm149_vm0, %v1663_v31 }
  0x25   : > { %232 = vrot.lane.b32.xlu1 %v1520_v8, %s1432_s16  ;;  %230 = vrot.lane.b32.xlu0 %v1523_v9, %s1432_s16 }
  0x29   : > { %236 = vrot.lane.b32.xlu1 %v1526_v10, %s1432_s16  ;;  %234 = vrot.lane.b32.xlu0 %v1538_v11, %s1432_s16 }
  0x2d   : > { %240 = vrot.lane.b32.xlu1 %v1541_v12, %s1432_s16  ;;  %238 = vrot.lane.b32.xlu0 %v1544_v13, %s1432_s16 }
  0x31   : > { %244 = vrot.lane.b32.xlu1 %v1560_v14, %s1432_s16  ;;  %242 = vrot.lane.b32.xlu0 %v1563_v15, %s1432_s16 }
  0x35   : > { %248 = vrot.lane.b32.xlu1 %v1572_v16, %s1432_s16  ;;  %246 = vrot.lane.b32.xlu0 %v1575_v17, %s1432_s16 }
  0x39   : > { %252 = vrot.lane.b32.xlu1 %v1578_v18, %s1432_s16  ;;  %250 = vrot.lane.b32.xlu0 %v1590_v19, %s1432_s16 }
  0x3d   : > { %256 = vrot.lane.b32.xlu1 %v1593_v20, %s1432_s16  ;;  %254 = vrot.lane.b32.xlu0 %v1596_v21, %s1432_s16 }
  0x41   : > { %260 = vrot.lane.b32.xlu1 %v1608_v22, %s1432_s16  ;;  %258 = vrot.lane.b32.xlu0 %v1611_v23, %s1432_s16 }
  0x45   : > { %264 = vrot.lane.b32.xlu1 %v1614_v24, %s1432_s16  ;;  %262 = vrot.lane.b32.xlu0 %v1630_v25, %s1432_s16 }
  0x49   : > { %268 = vrot.lane.b32.xlu1 %v1633_v26, %s1432_s16  ;;  %266 = vrot.lane.b32.xlu0 %v1642_v27, %s1432_s16 }
  0x4d   : > { %272 = vrot.lane.b32.xlu1 %v1645_v28, %s1432_s16  ;;  %270 = vrot.lane.b32.xlu0 %v1648_v29, %s1432_s16 }
  0x51   : > { %276 = vrot.lane.b32.xlu1 %v1660_v30, %s1432_s16  ;;  %274 = vrot.lane.b32.xlu0 %v1663_v31, %s1432_s16 }
  0x55   : > { %345 = vrot.lane.b32.xlu1 %v1490_v3, %s1433_s17  ;;  %343 = vrot.lane.b32.xlu0 %v1471_v1, %s1433_s17 }
  0x59   : > { %349 = vrot.lane.b32.xlu1 %v1474_v2, %s1433_s17  ;;  %347 = vrot.lane.b32.xlu0 %v1468_v0, %s1433_s17 }
  0x5d   : > { %353 = vrot.lane.b32.xlu1 %v1493_v4, %s1433_s17  ;;  %351 = vrot.lane.b32.xlu0 %v1502_v5, %s1433_s17 }
  0x61   : > { %357 = vrot.lane.b32.xlu1 %v1505_v6, %s1433_s17  ;;  %355 = vrot.lane.b32.xlu0 %v1508_v7, %s1433_s17 }
  0x65   : > { %361 = vrot.lane.b32.xlu1 %v1520_v8, %s1433_s17  ;;  %359 = vrot.lane.b32.xlu0 %v1523_v9, %s1433_s17 }
  0x69   : > { %365 = vrot.lane.b32.xlu1 %v1526_v10, %s1433_s17  ;;  %363 = vrot.lane.b32.xlu0 %v1538_v11, %s1433_s17 }
  0x6d   : > { %369 = vrot.lane.b32.xlu1 %v1541_v12, %s1433_s17  ;;  %367 = vrot.lane.b32.xlu0 %v1544_v13, %s1433_s17 }
  0x71   : > { %373 = vrot.lane.b32.xlu1 %v1560_v14, %s1433_s17  ;;  %371 = vrot.lane.b32.xlu0 %v1563_v15, %s1433_s17 }
  0x75   : > { %377 = vrot.lane.b32.xlu1 %v1572_v16, %s1433_s17  ;;  %375 = vrot.lane.b32.xlu0 %v1575_v17, %s1433_s17 }
  0x79   : > { %381 = vrot.lane.b32.xlu1 %v1578_v18, %s1433_s17  ;;  %379 = vrot.lane.b32.xlu0 %v1590_v19, %s1433_s17 }
  0x7d   : > { %385 = vrot.lane.b32.xlu1 %v1593_v20, %s1433_s17  ;;  %383 = vrot.lane.b32.xlu0 %v1596_v21, %s1433_s17 }
  0x81   : > { %389 = vrot.lane.b32.xlu1 %v1608_v22, %s1433_s17  ;;  %387 = vrot.lane.b32.xlu0 %v1611_v23, %s1433_s17 }
  0x83   : > { %v219_v32 = vpop.permute.xlu1 %218  ;;  %v215_v33 = vpop.permute.xlu0 %214 }
  0x84   : > { %1183 = vst.msk [vmem:[%s1465_s15 + $0x110] sm:$0xff] %vm149_vm0, %v219_v32  ;;  %1181 = vst.msk [vmem:[%s1465_s15 + $0x100] sm:$0xff] %vm149_vm0, %v215_v33 }
  0x85   : > { %393 = vrot.lane.b32.xlu1 %v1614_v24, %s1433_s17  ;;  %391 = vrot.lane.b32.xlu0 %v1630_v25, %s1433_s17 }
  0x89   : > { %397 = vrot.lane.b32.xlu1 %v1633_v26, %s1433_s17  ;;  %395 = vrot.lane.b32.xlu0 %v1642_v27, %s1433_s17  ;;  %v221_v34 = vpop.permute.xlu1 %220  ;;  %v217_v35 = vpop.permute.xlu0 %216 }
  0x8a   : > { %1184 = vst.msk [vmem:[%s1465_s15 + $0x118] sm:$0xff] %vm149_vm0, %v221_v34  ;;  %1182 = vst.msk [vmem:[%s1465_s15 + $0x108] sm:$0xff] %vm149_vm0, %v217_v35 }
  0x8d   : > { %401 = vrot.lane.b32.xlu1 %v1645_v28, %s1433_s17  ;;  %399 = vrot.lane.b32.xlu0 %v1648_v29, %s1433_s17 }
  0x8f   : > { %v225_v36 = vpop.permute.xlu1 %224  ;;  %v223_v37 = vpop.permute.xlu0 %222 }
  0x90   : > { %1186 = vst.msk [vmem:[%s1465_s15 + $0x128] sm:$0xff] %vm149_vm0, %v225_v36  ;;  %1185 = vst.msk [vmem:[%s1465_s15 + $0x120] sm:$0xff] %vm149_vm0, %v223_v37 }
  0x91   : > { %405 = vrot.lane.b32.xlu1 %v1660_v30, %s1433_s17  ;;  %403 = vrot.lane.b32.xlu0 %v1663_v31, %s1433_s17 }
  0x93   : > { %v229_v38 = vpop.permute.xlu1 %228  ;;  %v227_v39 = vpop.permute.xlu0 %226 }
  0x94   : > { %1188 = vst.msk [vmem:[%s1465_s15 + $0x138] sm:$0xff] %vm149_vm0, %v229_v38  ;;  %1187 = vst.msk [vmem:[%s1465_s15 + $0x130] sm:$0xff] %vm149_vm0, %v227_v39 }
  0x95   : > { %474 = vrot.lane.b32.xlu1 %v1490_v3, %s1434_s18  ;;  %472 = vrot.lane.b32.xlu0 %v1471_v1, %s1434_s18 }
  0x97   : > { %v233_v40 = vpop.permute.xlu1 %232  ;;  %v231_v41 = vpop.permute.xlu0 %230 }
  0x98   : > { %1190 = vst.msk [vmem:[%s1465_s15 + $0x148] sm:$0xff] %vm149_vm0, %v233_v40  ;;  %1189 = vst.msk [vmem:[%s1465_s15 + $0x140] sm:$0xff] %vm149_vm0, %v231_v41 }
  0x99   : > { %478 = vrot.lane.b32.xlu1 %v1474_v2, %s1434_s18  ;;  %476 = vrot.lane.b32.xlu0 %v1468_v0, %s1434_s18 }
  0x9b   : > { %v237_v42 = vpop.permute.xlu1 %236  ;;  %v235_v43 = vpop.permute.xlu0 %234 }
  0x9c   : > { %1192 = vst.msk [vmem:[%s1465_s15 + $0x158] sm:$0xff] %vm149_vm0, %v237_v42  ;;  %1191 = vst.msk [vmem:[%s1465_s15 + $0x150] sm:$0xff] %vm149_vm0, %v235_v43 }
  0x9d   : > { %482 = vrot.lane.b32.xlu1 %v1493_v4, %s1434_s18  ;;  %480 = vrot.lane.b32.xlu0 %v1502_v5, %s1434_s18 }
  0x9f   : > { %v241_v44 = vpop.permute.xlu1 %240  ;;  %v239_v45 = vpop.permute.xlu0 %238 }
  0xa0   : > { %1194 = vst.msk [vmem:[%s1465_s15 + $0x168] sm:$0xff] %vm149_vm0, %v241_v44  ;;  %1193 = vst.msk [vmem:[%s1465_s15 + $0x160] sm:$0xff] %vm149_vm0, %v239_v45 }
  0xa1   : > { %486 = vrot.lane.b32.xlu1 %v1505_v6, %s1434_s18  ;;  %484 = vrot.lane.b32.xlu0 %v1508_v7, %s1434_s18 }
  0xa3   : > { %v245_v46 = vpop.permute.xlu1 %244  ;;  %v243_v47 = vpop.permute.xlu0 %242 }
  0xa4   : > { %1196 = vst.msk [vmem:[%s1465_s15 + $0x178] sm:$0xff] %vm149_vm0, %v245_v46  ;;  %1195 = vst.msk [vmem:[%s1465_s15 + $0x170] sm:$0xff] %vm149_vm0, %v243_v47 }
  0xa5   : > { %490 = vrot.lane.b32.xlu1 %v1520_v8, %s1434_s18  ;;  %488 = vrot.lane.b32.xlu0 %v1523_v9, %s1434_s18 }
  0xa7   : > { %v249_v48 = vpop.permute.xlu1 %248  ;;  %v247_v49 = vpop.permute.xlu0 %246 }
  0xa8   : > { %1198 = vst.msk [vmem:[%s1465_s15 + $0x188] sm:$0xff] %vm149_vm0, %v249_v48  ;;  %1197 = vst.msk [vmem:[%s1465_s15 + $0x180] sm:$0xff] %vm149_vm0, %v247_v49 }
  0xa9   : > { %494 = vrot.lane.b32.xlu1 %v1526_v10, %s1434_s18  ;;  %492 = vrot.lane.b32.xlu0 %v1538_v11, %s1434_s18 }
  0xab   : > { %v253_v50 = vpop.permute.xlu1 %252  ;;  %v251_v51 = vpop.permute.xlu0 %250 }
  0xac   : > { %1200 = vst.msk [vmem:[%s1465_s15 + $0x198] sm:$0xff] %vm149_vm0, %v253_v50  ;;  %1199 = vst.msk [vmem:[%s1465_s15 + $0x190] sm:$0xff] %vm149_vm0, %v251_v51 }
  0xad   : > { %498 = vrot.lane.b32.xlu1 %v1541_v12, %s1434_s18  ;;  %496 = vrot.lane.b32.xlu0 %v1544_v13, %s1434_s18 }
  0xaf   : > { %v257_v52 = vpop.permute.xlu1 %256  ;;  %v255_v53 = vpop.permute.xlu0 %254 }
  0xb0   : > { %1202 = vst.msk [vmem:[%s1465_s15 + $0x1a8] sm:$0xff] %vm149_vm0, %v257_v52  ;;  %1201 = vst.msk [vmem:[%s1465_s15 + $0x1a0] sm:$0xff] %vm149_vm0, %v255_v53 }
  0xb1   : > { %502 = vrot.lane.b32.xlu1 %v1560_v14, %s1434_s18  ;;  %500 = vrot.lane.b32.xlu0 %v1563_v15, %s1434_s18 }
  0xb3   : > { %v261_v54 = vpop.permute.xlu1 %260  ;;  %v259_v55 = vpop.permute.xlu0 %258 }
  0xb4   : > { %1204 = vst.msk [vmem:[%s1465_s15 + $0x1b8] sm:$0xff] %vm149_vm0, %v261_v54  ;;  %1203 = vst.msk [vmem:[%s1465_s15 + $0x1b0] sm:$0xff] %vm149_vm0, %v259_v55 }
  0xb5   : > { %506 = vrot.lane.b32.xlu1 %v1572_v16, %s1434_s18  ;;  %504 = vrot.lane.b32.xlu0 %v1575_v17, %s1434_s18 }
  0xb7   : > { %v265_v56 = vpop.permute.xlu1 %264  ;;  %v263_v57 = vpop.permute.xlu0 %262 }
  0xb8   : > { %1206 = vst.msk [vmem:[%s1465_s15 + $0x1c8] sm:$0xff] %vm149_vm0, %v265_v56  ;;  %1205 = vst.msk [vmem:[%s1465_s15 + $0x1c0] sm:$0xff] %vm149_vm0, %v263_v57 }
  0xb9   : > { %510 = vrot.lane.b32.xlu1 %v1578_v18, %s1434_s18  ;;  %508 = vrot.lane.b32.xlu0 %v1590_v19, %s1434_s18 }
  0xbb   : > { %v269_v58 = vpop.permute.xlu1 %268  ;;  %v267_v59 = vpop.permute.xlu0 %266 }
  0xbc   : > { %1208 = vst.msk [vmem:[%s1465_s15 + $0x1d8] sm:$0xff] %vm149_vm0, %v269_v58  ;;  %1207 = vst.msk [vmem:[%s1465_s15 + $0x1d0] sm:$0xff] %vm149_vm0, %v267_v59 }
  0xbd   : > { %514 = vrot.lane.b32.xlu1 %v1593_v20, %s1434_s18  ;;  %512 = vrot.lane.b32.xlu0 %v1596_v21, %s1434_s18 }
  0xbf   : > { %v273_v60 = vpop.permute.xlu1 %272  ;;  %v271_v61 = vpop.permute.xlu0 %270 }
  0xc0   : > { %1210 = vst.msk [vmem:[%s1465_s15 + $0x1e8] sm:$0xff] %vm149_vm0, %v273_v60  ;;  %1209 = vst.msk [vmem:[%s1465_s15 + $0x1e0] sm:$0xff] %vm149_vm0, %v271_v61 }
  0xc1   : > { %518 = vrot.lane.b32.xlu1 %v1608_v22, %s1434_s18  ;;  %516 = vrot.lane.b32.xlu0 %v1611_v23, %s1434_s18 }
  0xc3   : > { %v277_v62 = vpop.permute.xlu1 %276  ;;  %v275_v63 = vpop.permute.xlu0 %274 }
  0xc4   : > { %1212 = vst.msk [vmem:[%s1465_s15 + $0x1f8] sm:$0xff] %vm149_vm0, %v277_v62  ;;  %1211 = vst.msk [vmem:[%s1465_s15 + $0x1f0] sm:$0xff] %vm149_vm0, %v275_v63 }
  0xc5   : > { %522 = vrot.lane.b32.xlu1 %v1614_v24, %s1434_s18  ;;  %520 = vrot.lane.b32.xlu0 %v1630_v25, %s1434_s18 }
  0xc7   : > { %v346_v32 = vpop.permute.xlu1 %345  ;;  %v344_v33 = vpop.permute.xlu0 %343 }
  0xc8   : > { %1214 = vst.msk [vmem:[%s1465_s15 + $0x208] sm:$0xff] %vm149_vm0, %v346_v32  ;;  %1213 = vst.msk [vmem:[%s1465_s15 + $0x200] sm:$0xff] %vm149_vm0, %v344_v33 }
  0xc9   : > { %526 = vrot.lane.b32.xlu1 %v1633_v26, %s1434_s18  ;;  %524 = vrot.lane.b32.xlu0 %v1642_v27, %s1434_s18 }
  0xcb   : > { %v350_v34 = vpop.permute.xlu1 %349  ;;  %v348_v35 = vpop.permute.xlu0 %347 }
  0xcc   : > { %1216 = vst.msk [vmem:[%s1465_s15 + $0x218] sm:$0xff] %vm149_vm0, %v350_v34  ;;  %1215 = vst.msk [vmem:[%s1465_s15 + $0x210] sm:$0xff] %vm149_vm0, %v348_v35 }
  0xcd   : > { %530 = vrot.lane.b32.xlu1 %v1645_v28, %s1434_s18  ;;  %528 = vrot.lane.b32.xlu0 %v1648_v29, %s1434_s18 }
  0xcf   : > { %v354_v36 = vpop.permute.xlu1 %353  ;;  %v352_v37 = vpop.permute.xlu0 %351 }
  0xd0   : > { %1218 = vst.msk [vmem:[%s1465_s15 + $0x228] sm:$0xff] %vm149_vm0, %v354_v36  ;;  %1217 = vst.msk [vmem:[%s1465_s15 + $0x220] sm:$0xff] %vm149_vm0, %v352_v37 }
  0xd1   : > { %534 = vrot.lane.b32.xlu1 %v1660_v30, %s1434_s18  ;;  %532 = vrot.lane.b32.xlu0 %v1663_v31, %s1434_s18 }
  0xd3   : > { %v358_v38 = vpop.permute.xlu1 %357  ;;  %v356_v39 = vpop.permute.xlu0 %355 }
  0xd4   : > { %1220 = vst.msk [vmem:[%s1465_s15 + $0x238] sm:$0xff] %vm149_vm0, %v358_v38  ;;  %1219 = vst.msk [vmem:[%s1465_s15 + $0x230] sm:$0xff] %vm149_vm0, %v356_v39 }
  0xd5   : > { %603 = vrot.lane.b32.xlu1 %v1490_v3, %s1435_s19  ;;  %601 = vrot.lane.b32.xlu0 %v1471_v1, %s1435_s19 }
  0xd7   : > { %v362_v40 = vpop.permute.xlu1 %361  ;;  %v360_v41 = vpop.permute.xlu0 %359 }
  0xd8   : > { %1222 = vst.msk [vmem:[%s1465_s15 + $0x248] sm:$0xff] %vm149_vm0, %v362_v40  ;;  %1221 = vst.msk [vmem:[%s1465_s15 + $0x240] sm:$0xff] %vm149_vm0, %v360_v41 }
  0xd9   : > { %607 = vrot.lane.b32.xlu1 %v1474_v2, %s1435_s19  ;;  %605 = vrot.lane.b32.xlu0 %v1468_v0, %s1435_s19 }
  0xdb   : > { %v366_v42 = vpop.permute.xlu1 %365  ;;  %v364_v43 = vpop.permute.xlu0 %363 }
  0xdc   : > { %1224 = vst.msk [vmem:[%s1465_s15 + $0x258] sm:$0xff] %vm149_vm0, %v366_v42  ;;  %1223 = vst.msk [vmem:[%s1465_s15 + $0x250] sm:$0xff] %vm149_vm0, %v364_v43 }
  0xdd   : > { %611 = vrot.lane.b32.xlu1 %v1493_v4, %s1435_s19  ;;  %609 = vrot.lane.b32.xlu0 %v1502_v5, %s1435_s19 }
  0xdf   : > { %v370_v44 = vpop.permute.xlu1 %369  ;;  %v368_v45 = vpop.permute.xlu0 %367 }
  0xe0   : > { %1226 = vst.msk [vmem:[%s1465_s15 + $0x268] sm:$0xff] %vm149_vm0, %v370_v44  ;;  %1225 = vst.msk [vmem:[%s1465_s15 + $0x260] sm:$0xff] %vm149_vm0, %v368_v45 }
  0xe1   : > { %615 = vrot.lane.b32.xlu1 %v1505_v6, %s1435_s19  ;;  %613 = vrot.lane.b32.xlu0 %v1508_v7, %s1435_s19 }
  0xe3   : > { %v374_v46 = vpop.permute.xlu1 %373  ;;  %v372_v47 = vpop.permute.xlu0 %371 }
  0xe4   : > { %1228 = vst.msk [vmem:[%s1465_s15 + $0x278] sm:$0xff] %vm149_vm0, %v374_v46  ;;  %1227 = vst.msk [vmem:[%s1465_s15 + $0x270] sm:$0xff] %vm149_vm0, %v372_v47 }
  0xe5   : > { %619 = vrot.lane.b32.xlu1 %v1520_v8, %s1435_s19  ;;  %617 = vrot.lane.b32.xlu0 %v1523_v9, %s1435_s19 }
  0xe7   : > { %v378_v48 = vpop.permute.xlu1 %377  ;;  %v376_v49 = vpop.permute.xlu0 %375 }
  0xe8   : > { %1230 = vst.msk [vmem:[%s1465_s15 + $0x288] sm:$0xff] %vm149_vm0, %v378_v48  ;;  %1229 = vst.msk [vmem:[%s1465_s15 + $0x280] sm:$0xff] %vm149_vm0, %v376_v49 }
  0xe9   : > { %623 = vrot.lane.b32.xlu1 %v1526_v10, %s1435_s19  ;;  %621 = vrot.lane.b32.xlu0 %v1538_v11, %s1435_s19 }
  0xeb   : > { %v382_v50 = vpop.permute.xlu1 %381  ;;  %v380_v51 = vpop.permute.xlu0 %379 }
  0xec   : > { %1232 = vst.msk [vmem:[%s1465_s15 + $0x298] sm:$0xff] %vm149_vm0, %v382_v50  ;;  %1231 = vst.msk [vmem:[%s1465_s15 + $0x290] sm:$0xff] %vm149_vm0, %v380_v51 }
  0xed   : > { %627 = vrot.lane.b32.xlu1 %v1541_v12, %s1435_s19  ;;  %625 = vrot.lane.b32.xlu0 %v1544_v13, %s1435_s19 }
  0xef   : > { %v386_v52 = vpop.permute.xlu1 %385  ;;  %v384_v53 = vpop.permute.xlu0 %383 }
  0xf0   : > { %1234 = vst.msk [vmem:[%s1465_s15 + $0x2a8] sm:$0xff] %vm149_vm0, %v386_v52  ;;  %1233 = vst.msk [vmem:[%s1465_s15 + $0x2a0] sm:$0xff] %vm149_vm0, %v384_v53 }
  0xf1   : > { %631 = vrot.lane.b32.xlu1 %v1560_v14, %s1435_s19  ;;  %629 = vrot.lane.b32.xlu0 %v1563_v15, %s1435_s19 }
  0xf3   : > { %v390_v54 = vpop.permute.xlu1 %389  ;;  %v388_v55 = vpop.permute.xlu0 %387 }
  0xf4   : > { %1236 = vst.msk [vmem:[%s1465_s15 + $0x2b8] sm:$0xff] %vm149_vm0, %v390_v54  ;;  %1235 = vst.msk [vmem:[%s1465_s15 + $0x2b0] sm:$0xff] %vm149_vm0, %v388_v55 }
  0xf5   : > { %635 = vrot.lane.b32.xlu1 %v1572_v16, %s1435_s19  ;;  %633 = vrot.lane.b32.xlu0 %v1575_v17, %s1435_s19 }
  0xf7   : > { %v394_v56 = vpop.permute.xlu1 %393  ;;  %v392_v57 = vpop.permute.xlu0 %391 }
  0xf8   : > { %1238 = vst.msk [vmem:[%s1465_s15 + $0x2c8] sm:$0xff] %vm149_vm0, %v394_v56  ;;  %1237 = vst.msk [vmem:[%s1465_s15 + $0x2c0] sm:$0xff] %vm149_vm0, %v392_v57 }
  0xf9   : > { %639 = vrot.lane.b32.xlu1 %v1578_v18, %s1435_s19  ;;  %637 = vrot.lane.b32.xlu0 %v1590_v19, %s1435_s19 }
  0xfb   : > { %v398_v58 = vpop.permute.xlu1 %397  ;;  %v396_v59 = vpop.permute.xlu0 %395 }
  0xfc   : > { %1240 = vst.msk [vmem:[%s1465_s15 + $0x2d8] sm:$0xff] %vm149_vm0, %v398_v58  ;;  %1239 = vst.msk [vmem:[%s1465_s15 + $0x2d0] sm:$0xff] %vm149_vm0, %v396_v59 }
  0xfd   : > { %643 = vrot.lane.b32.xlu1 %v1593_v20, %s1435_s19  ;;  %641 = vrot.lane.b32.xlu0 %v1596_v21, %s1435_s19 }
  0xff   : > { %v402_v60 = vpop.permute.xlu1 %401  ;;  %v400_v61 = vpop.permute.xlu0 %399 }
 0x100   : > { %1242 = vst.msk [vmem:[%s1465_s15 + $0x2e8] sm:$0xff] %vm149_vm0, %v402_v60  ;;  %1241 = vst.msk [vmem:[%s1465_s15 + $0x2e0] sm:$0xff] %vm149_vm0, %v400_v61 }
 0x101   : > { %647 = vrot.lane.b32.xlu1 %v1608_v22, %s1435_s19  ;;  %645 = vrot.lane.b32.xlu0 %v1611_v23, %s1435_s19 }
 0x103   : > { %v406_v62 = vpop.permute.xlu1 %405  ;;  %v404_v63 = vpop.permute.xlu0 %403 }
 0x104   : > { %1244 = vst.msk [vmem:[%s1465_s15 + $0x2f8] sm:$0xff] %vm149_vm0, %v406_v62  ;;  %1243 = vst.msk [vmem:[%s1465_s15 + $0x2f0] sm:$0xff] %vm149_vm0, %v404_v63 }
 0x105   : > { %651 = vrot.lane.b32.xlu1 %v1614_v24, %s1435_s19  ;;  %649 = vrot.lane.b32.xlu0 %v1630_v25, %s1435_s19 }
 0x107   : > { %v475_v32 = vpop.permute.xlu1 %474  ;;  %v473_v33 = vpop.permute.xlu0 %472 }
 0x108   : > { %1246 = vst.msk [vmem:[%s1465_s15 + $0x308] sm:$0xff] %vm149_vm0, %v475_v32  ;;  %1245 = vst.msk [vmem:[%s1465_s15 + $0x300] sm:$0xff] %vm149_vm0, %v473_v33 }
 0x109   : > { %655 = vrot.lane.b32.xlu1 %v1633_v26, %s1435_s19  ;;  %653 = vrot.lane.b32.xlu0 %v1642_v27, %s1435_s19 }
 0x10b   : > { %v479_v34 = vpop.permute.xlu1 %478  ;;  %v477_v35 = vpop.permute.xlu0 %476 }
 0x10c   : > { %1248 = vst.msk [vmem:[%s1465_s15 + $0x318] sm:$0xff] %vm149_vm0, %v479_v34  ;;  %1247 = vst.msk [vmem:[%s1465_s15 + $0x310] sm:$0xff] %vm149_vm0, %v477_v35 }
 0x10d   : > { %659 = vrot.lane.b32.xlu1 %v1645_v28, %s1435_s19  ;;  %657 = vrot.lane.b32.xlu0 %v1648_v29, %s1435_s19 }
 0x10f   : > { %v483_v36 = vpop.permute.xlu1 %482  ;;  %v481_v37 = vpop.permute.xlu0 %480 }
 0x110   : > { %1250 = vst.msk [vmem:[%s1465_s15 + $0x328] sm:$0xff] %vm149_vm0, %v483_v36  ;;  %1249 = vst.msk [vmem:[%s1465_s15 + $0x320] sm:$0xff] %vm149_vm0, %v481_v37 }
 0x111   : > { %663 = vrot.lane.b32.xlu1 %v1660_v30, %s1435_s19  ;;  %661 = vrot.lane.b32.xlu0 %v1663_v31, %s1435_s19 }
 0x113   : > { %v487_v38 = vpop.permute.xlu1 %486  ;;  %v485_v39 = vpop.permute.xlu0 %484 }
 0x114   : > { %1252 = vst.msk [vmem:[%s1465_s15 + $0x338] sm:$0xff] %vm149_vm0, %v487_v38  ;;  %1251 = vst.msk [vmem:[%s1465_s15 + $0x330] sm:$0xff] %vm149_vm0, %v485_v39 }
 0x115   : > { %732 = vrot.lane.b32.xlu1 %v1490_v3, %s1436_s20  ;;  %730 = vrot.lane.b32.xlu0 %v1471_v1, %s1436_s20 }
 0x117   : > { %v491_v40 = vpop.permute.xlu1 %490  ;;  %v489_v41 = vpop.permute.xlu0 %488 }
 0x118   : > { %1254 = vst.msk [vmem:[%s1465_s15 + $0x348] sm:$0xff] %vm149_vm0, %v491_v40  ;;  %1253 = vst.msk [vmem:[%s1465_s15 + $0x340] sm:$0xff] %vm149_vm0, %v489_v41 }
 0x119   : > { %736 = vrot.lane.b32.xlu1 %v1474_v2, %s1436_s20  ;;  %734 = vrot.lane.b32.xlu0 %v1468_v0, %s1436_s20 }
 0x11b   : > { %v495_v42 = vpop.permute.xlu1 %494  ;;  %v493_v43 = vpop.permute.xlu0 %492 }
 0x11c   : > { %1256 = vst.msk [vmem:[%s1465_s15 + $0x358] sm:$0xff] %vm149_vm0, %v495_v42  ;;  %1255 = vst.msk [vmem:[%s1465_s15 + $0x350] sm:$0xff] %vm149_vm0, %v493_v43 }
 0x11d   : > { %740 = vrot.lane.b32.xlu1 %v1493_v4, %s1436_s20  ;;  %738 = vrot.lane.b32.xlu0 %v1502_v5, %s1436_s20 }
 0x11f   : > { %v499_v44 = vpop.permute.xlu1 %498  ;;  %v497_v45 = vpop.permute.xlu0 %496 }
 0x120   : > { %1258 = vst.msk [vmem:[%s1465_s15 + $0x368] sm:$0xff] %vm149_vm0, %v499_v44  ;;  %1257 = vst.msk [vmem:[%s1465_s15 + $0x360] sm:$0xff] %vm149_vm0, %v497_v45 }
 0x121   : > { %744 = vrot.lane.b32.xlu1 %v1505_v6, %s1436_s20  ;;  %742 = vrot.lane.b32.xlu0 %v1508_v7, %s1436_s20 }
 0x123   : > { %v503_v46 = vpop.permute.xlu1 %502  ;;  %v501_v47 = vpop.permute.xlu0 %500 }
 0x124   : > { %1260 = vst.msk [vmem:[%s1465_s15 + $0x378] sm:$0xff] %vm149_vm0, %v503_v46  ;;  %1259 = vst.msk [vmem:[%s1465_s15 + $0x370] sm:$0xff] %vm149_vm0, %v501_v47 }
 0x125   : > { %748 = vrot.lane.b32.xlu1 %v1520_v8, %s1436_s20  ;;  %746 = vrot.lane.b32.xlu0 %v1523_v9, %s1436_s20 }
 0x127   : > { %v507_v48 = vpop.permute.xlu1 %506  ;;  %v505_v49 = vpop.permute.xlu0 %504 }
 0x128   : > { %1262 = vst.msk [vmem:[%s1465_s15 + $0x388] sm:$0xff] %vm149_vm0, %v507_v48  ;;  %1261 = vst.msk [vmem:[%s1465_s15 + $0x380] sm:$0xff] %vm149_vm0, %v505_v49 }
 0x129   : > { %752 = vrot.lane.b32.xlu1 %v1526_v10, %s1436_s20  ;;  %750 = vrot.lane.b32.xlu0 %v1538_v11, %s1436_s20 }
 0x12b   : > { %v511_v50 = vpop.permute.xlu1 %510  ;;  %v509_v51 = vpop.permute.xlu0 %508 }
 0x12c   : > { %1264 = vst.msk [vmem:[%s1465_s15 + $0x398] sm:$0xff] %vm149_vm0, %v511_v50  ;;  %1263 = vst.msk [vmem:[%s1465_s15 + $0x390] sm:$0xff] %vm149_vm0, %v509_v51 }
 0x12d   : > { %756 = vrot.lane.b32.xlu1 %v1541_v12, %s1436_s20  ;;  %754 = vrot.lane.b32.xlu0 %v1544_v13, %s1436_s20 }
 0x12f   : > { %v515_v52 = vpop.permute.xlu1 %514  ;;  %v513_v53 = vpop.permute.xlu0 %512 }
 0x130   : > { %1266 = vst.msk [vmem:[%s1465_s15 + $0x3a8] sm:$0xff] %vm149_vm0, %v515_v52  ;;  %1265 = vst.msk [vmem:[%s1465_s15 + $0x3a0] sm:$0xff] %vm149_vm0, %v513_v53 }
 0x131   : > { %760 = vrot.lane.b32.xlu1 %v1560_v14, %s1436_s20  ;;  %758 = vrot.lane.b32.xlu0 %v1563_v15, %s1436_s20 }
 0x133   : > { %v519_v54 = vpop.permute.xlu1 %518  ;;  %v517_v55 = vpop.permute.xlu0 %516 }
 0x134   : > { %1268 = vst.msk [vmem:[%s1465_s15 + $0x3b8] sm:$0xff] %vm149_vm0, %v519_v54  ;;  %1267 = vst.msk [vmem:[%s1465_s15 + $0x3b0] sm:$0xff] %vm149_vm0, %v517_v55 }
 0x135   : > { %764 = vrot.lane.b32.xlu1 %v1572_v16, %s1436_s20  ;;  %762 = vrot.lane.b32.xlu0 %v1575_v17, %s1436_s20 }
 0x137   : > { %v523_v56 = vpop.permute.xlu1 %522  ;;  %v521_v57 = vpop.permute.xlu0 %520 }
 0x138   : > { %1270 = vst.msk [vmem:[%s1465_s15 + $0x3c8] sm:$0xff] %vm149_vm0, %v523_v56  ;;  %1269 = vst.msk [vmem:[%s1465_s15 + $0x3c0] sm:$0xff] %vm149_vm0, %v521_v57 }
 0x139   : > { %768 = vrot.lane.b32.xlu1 %v1578_v18, %s1436_s20  ;;  %766 = vrot.lane.b32.xlu0 %v1590_v19, %s1436_s20 }
 0x13b   : > { %v527_v58 = vpop.permute.xlu1 %526  ;;  %v525_v59 = vpop.permute.xlu0 %524 }
 0x13c   : > { %1272 = vst.msk [vmem:[%s1465_s15 + $0x3d8] sm:$0xff] %vm149_vm0, %v527_v58  ;;  %1271 = vst.msk [vmem:[%s1465_s15 + $0x3d0] sm:$0xff] %vm149_vm0, %v525_v59 }
 0x13d   : > { %772 = vrot.lane.b32.xlu1 %v1593_v20, %s1436_s20  ;;  %770 = vrot.lane.b32.xlu0 %v1596_v21, %s1436_s20 }
 0x13f   : > { %v531_v60 = vpop.permute.xlu1 %530  ;;  %v529_v61 = vpop.permute.xlu0 %528 }
 0x140   : > { %1274 = vst.msk [vmem:[%s1465_s15 + $0x3e8] sm:$0xff] %vm149_vm0, %v531_v60  ;;  %1273 = vst.msk [vmem:[%s1465_s15 + $0x3e0] sm:$0xff] %vm149_vm0, %v529_v61 }
 0x141   : > { %776 = vrot.lane.b32.xlu1 %v1608_v22, %s1436_s20  ;;  %774 = vrot.lane.b32.xlu0 %v1611_v23, %s1436_s20 }
 0x143   : > { %v535_v62 = vpop.permute.xlu1 %534  ;;  %v533_v63 = vpop.permute.xlu0 %532 }
 0x144   : > { %1276 = vst.msk [vmem:[%s1465_s15 + $0x3f8] sm:$0xff] %vm149_vm0, %v535_v62  ;;  %1275 = vst.msk [vmem:[%s1465_s15 + $0x3f0] sm:$0xff] %vm149_vm0, %v533_v63 }
 0x145   : > { %780 = vrot.lane.b32.xlu1 %v1614_v24, %s1436_s20  ;;  %778 = vrot.lane.b32.xlu0 %v1630_v25, %s1436_s20 }
 0x147   : > { %v604_v32 = vpop.permute.xlu1 %603  ;;  %v602_v33 = vpop.permute.xlu0 %601 }
 0x148   : > { %1278 = vst.msk [vmem:[%s1465_s15 + $0x408] sm:$0xff] %vm149_vm0, %v604_v32  ;;  %1277 = vst.msk [vmem:[%s1465_s15 + $0x400] sm:$0xff] %vm149_vm0, %v602_v33 }
 0x149   : > { %784 = vrot.lane.b32.xlu1 %v1633_v26, %s1436_s20  ;;  %782 = vrot.lane.b32.xlu0 %v1642_v27, %s1436_s20 }
 0x14b   : > { %v608_v34 = vpop.permute.xlu1 %607  ;;  %v606_v35 = vpop.permute.xlu0 %605 }
 0x14c   : > { %1280 = vst.msk [vmem:[%s1465_s15 + $0x418] sm:$0xff] %vm149_vm0, %v608_v34  ;;  %1279 = vst.msk [vmem:[%s1465_s15 + $0x410] sm:$0xff] %vm149_vm0, %v606_v35 }
 0x14d   : > { %788 = vrot.lane.b32.xlu1 %v1645_v28, %s1436_s20  ;;  %786 = vrot.lane.b32.xlu0 %v1648_v29, %s1436_s20 }
 0x14f   : > { %v612_v36 = vpop.permute.xlu1 %611  ;;  %v610_v37 = vpop.permute.xlu0 %609 }
 0x150   : > { %1282 = vst.msk [vmem:[%s1465_s15 + $0x428] sm:$0xff] %vm149_vm0, %v612_v36  ;;  %1281 = vst.msk [vmem:[%s1465_s15 + $0x420] sm:$0xff] %vm149_vm0, %v610_v37 }
 0x151   : > { %792 = vrot.lane.b32.xlu1 %v1660_v30, %s1436_s20  ;;  %790 = vrot.lane.b32.xlu0 %v1663_v31, %s1436_s20 }
 0x153   : > { %v616_v38 = vpop.permute.xlu1 %615  ;;  %v614_v39 = vpop.permute.xlu0 %613 }
 0x154   : > { %1284 = vst.msk [vmem:[%s1465_s15 + $0x438] sm:$0xff] %vm149_vm0, %v616_v38  ;;  %1283 = vst.msk [vmem:[%s1465_s15 + $0x430] sm:$0xff] %vm149_vm0, %v614_v39 }
 0x155   : > { %861 = vrot.lane.b32.xlu1 %v1490_v3, %s1437_s21  ;;  %859 = vrot.lane.b32.xlu0 %v1471_v1, %s1437_s21 }
 0x157   : > { %v620_v40 = vpop.permute.xlu1 %619  ;;  %v618_v41 = vpop.permute.xlu0 %617 }
 0x158   : > { %1286 = vst.msk [vmem:[%s1465_s15 + $0x448] sm:$0xff] %vm149_vm0, %v620_v40  ;;  %1285 = vst.msk [vmem:[%s1465_s15 + $0x440] sm:$0xff] %vm149_vm0, %v618_v41 }
 0x159   : > { %865 = vrot.lane.b32.xlu1 %v1474_v2, %s1437_s21  ;;  %863 = vrot.lane.b32.xlu0 %v1468_v0, %s1437_s21 }
 0x15b   : > { %v624_v42 = vpop.permute.xlu1 %623  ;;  %v622_v43 = vpop.permute.xlu0 %621 }
 0x15c   : > { %1288 = vst.msk [vmem:[%s1465_s15 + $0x458] sm:$0xff] %vm149_vm0, %v624_v42  ;;  %1287 = vst.msk [vmem:[%s1465_s15 + $0x450] sm:$0xff] %vm149_vm0, %v622_v43 }
 0x15d   : > { %869 = vrot.lane.b32.xlu1 %v1493_v4, %s1437_s21  ;;  %867 = vrot.lane.b32.xlu0 %v1502_v5, %s1437_s21 }
 0x15f   : > { %v628_v44 = vpop.permute.xlu1 %627  ;;  %v626_v45 = vpop.permute.xlu0 %625 }
 0x160   : > { %1290 = vst.msk [vmem:[%s1465_s15 + $0x468] sm:$0xff] %vm149_vm0, %v628_v44  ;;  %1289 = vst.msk [vmem:[%s1465_s15 + $0x460] sm:$0xff] %vm149_vm0, %v626_v45 }
 0x161   : > { %873 = vrot.lane.b32.xlu1 %v1505_v6, %s1437_s21  ;;  %871 = vrot.lane.b32.xlu0 %v1508_v7, %s1437_s21 }
 0x163   : > { %v632_v46 = vpop.permute.xlu1 %631  ;;  %v630_v47 = vpop.permute.xlu0 %629 }
 0x164   : > { %1292 = vst.msk [vmem:[%s1465_s15 + $0x478] sm:$0xff] %vm149_vm0, %v632_v46  ;;  %1291 = vst.msk [vmem:[%s1465_s15 + $0x470] sm:$0xff] %vm149_vm0, %v630_v47 }
 0x165   : > { %877 = vrot.lane.b32.xlu1 %v1520_v8, %s1437_s21  ;;  %875 = vrot.lane.b32.xlu0 %v1523_v9, %s1437_s21 }
 0x167   : > { %v636_v48 = vpop.permute.xlu1 %635  ;;  %v634_v49 = vpop.permute.xlu0 %633 }
 0x168   : > { %1294 = vst.msk [vmem:[%s1465_s15 + $0x488] sm:$0xff] %vm149_vm0, %v636_v48  ;;  %1293 = vst.msk [vmem:[%s1465_s15 + $0x480] sm:$0xff] %vm149_vm0, %v634_v49 }
 0x169   : > { %881 = vrot.lane.b32.xlu1 %v1526_v10, %s1437_s21  ;;  %879 = vrot.lane.b32.xlu0 %v1538_v11, %s1437_s21 }
 0x16b   : > { %v640_v50 = vpop.permute.xlu1 %639  ;;  %v638_v51 = vpop.permute.xlu0 %637 }
 0x16c   : > { %1296 = vst.msk [vmem:[%s1465_s15 + $0x498] sm:$0xff] %vm149_vm0, %v640_v50  ;;  %1295 = vst.msk [vmem:[%s1465_s15 + $0x490] sm:$0xff] %vm149_vm0, %v638_v51 }
 0x16d   : > { %885 = vrot.lane.b32.xlu1 %v1541_v12, %s1437_s21  ;;  %883 = vrot.lane.b32.xlu0 %v1544_v13, %s1437_s21 }
 0x16f   : > { %v644_v52 = vpop.permute.xlu1 %643  ;;  %v642_v53 = vpop.permute.xlu0 %641 }
 0x170   : > { %1298 = vst.msk [vmem:[%s1465_s15 + $0x4a8] sm:$0xff] %vm149_vm0, %v644_v52  ;;  %1297 = vst.msk [vmem:[%s1465_s15 + $0x4a0] sm:$0xff] %vm149_vm0, %v642_v53 }
 0x171   : > { %889 = vrot.lane.b32.xlu1 %v1560_v14, %s1437_s21  ;;  %887 = vrot.lane.b32.xlu0 %v1563_v15, %s1437_s21 }
 0x173   : > { %v648_v54 = vpop.permute.xlu1 %647  ;;  %v646_v55 = vpop.permute.xlu0 %645 }
 0x174   : > { %1300 = vst.msk [vmem:[%s1465_s15 + $0x4b8] sm:$0xff] %vm149_vm0, %v648_v54  ;;  %1299 = vst.msk [vmem:[%s1465_s15 + $0x4b0] sm:$0xff] %vm149_vm0, %v646_v55 }
 0x175   : > { %893 = vrot.lane.b32.xlu1 %v1572_v16, %s1437_s21  ;;  %891 = vrot.lane.b32.xlu0 %v1575_v17, %s1437_s21 }
 0x177   : > { %v652_v56 = vpop.permute.xlu1 %651  ;;  %v650_v57 = vpop.permute.xlu0 %649 }
 0x178   : > { %1302 = vst.msk [vmem:[%s1465_s15 + $0x4c8] sm:$0xff] %vm149_vm0, %v652_v56  ;;  %1301 = vst.msk [vmem:[%s1465_s15 + $0x4c0] sm:$0xff] %vm149_vm0, %v650_v57 }
 0x179   : > { %897 = vrot.lane.b32.xlu1 %v1578_v18, %s1437_s21  ;;  %895 = vrot.lane.b32.xlu0 %v1590_v19, %s1437_s21 }
 0x17b   : > { %v656_v58 = vpop.permute.xlu1 %655  ;;  %v654_v59 = vpop.permute.xlu0 %653 }
 0x17c   : > { %1304 = vst.msk [vmem:[%s1465_s15 + $0x4d8] sm:$0xff] %vm149_vm0, %v656_v58  ;;  %1303 = vst.msk [vmem:[%s1465_s15 + $0x4d0] sm:$0xff] %vm149_vm0, %v654_v59 }
 0x17d   : > { %901 = vrot.lane.b32.xlu1 %v1593_v20, %s1437_s21  ;;  %899 = vrot.lane.b32.xlu0 %v1596_v21, %s1437_s21 }
 0x17f   : > { %v660_v60 = vpop.permute.xlu1 %659  ;;  %v658_v61 = vpop.permute.xlu0 %657 }
 0x180   : > { %1306 = vst.msk [vmem:[%s1465_s15 + $0x4e8] sm:$0xff] %vm149_vm0, %v660_v60  ;;  %1305 = vst.msk [vmem:[%s1465_s15 + $0x4e0] sm:$0xff] %vm149_vm0, %v658_v61 }
 0x181   : > { %905 = vrot.lane.b32.xlu1 %v1608_v22, %s1437_s21  ;;  %903 = vrot.lane.b32.xlu0 %v1611_v23, %s1437_s21 }
 0x183   : > { %v664_v62 = vpop.permute.xlu1 %663  ;;  %v662_v63 = vpop.permute.xlu0 %661 }
 0x184   : > { %1308 = vst.msk [vmem:[%s1465_s15 + $0x4f8] sm:$0xff] %vm149_vm0, %v664_v62  ;;  %1307 = vst.msk [vmem:[%s1465_s15 + $0x4f0] sm:$0xff] %vm149_vm0, %v662_v63 }
 0x185   : > { %909 = vrot.lane.b32.xlu1 %v1614_v24, %s1437_s21  ;;  %907 = vrot.lane.b32.xlu0 %v1630_v25, %s1437_s21 }
 0x187   : > { %v733_v32 = vpop.permute.xlu1 %732  ;;  %v731_v33 = vpop.permute.xlu0 %730 }
 0x188   : > { %1310 = vst.msk [vmem:[%s1465_s15 + $0x508] sm:$0xff] %vm149_vm0, %v733_v32  ;;  %1309 = vst.msk [vmem:[%s1465_s15 + $0x500] sm:$0xff] %vm149_vm0, %v731_v33 }
 0x189   : > { %913 = vrot.lane.b32.xlu1 %v1633_v26, %s1437_s21  ;;  %911 = vrot.lane.b32.xlu0 %v1642_v27, %s1437_s21 }
 0x18b   : > { %v737_v34 = vpop.permute.xlu1 %736  ;;  %v735_v35 = vpop.permute.xlu0 %734 }
 0x18c   : > { %1312 = vst.msk [vmem:[%s1465_s15 + $0x518] sm:$0xff] %vm149_vm0, %v737_v34  ;;  %1311 = vst.msk [vmem:[%s1465_s15 + $0x510] sm:$0xff] %vm149_vm0, %v735_v35 }
 0x18d   : > { %917 = vrot.lane.b32.xlu1 %v1645_v28, %s1437_s21  ;;  %915 = vrot.lane.b32.xlu0 %v1648_v29, %s1437_s21 }
 0x18f   : > { %v741_v36 = vpop.permute.xlu1 %740  ;;  %v739_v37 = vpop.permute.xlu0 %738 }
 0x190   : > { %1314 = vst.msk [vmem:[%s1465_s15 + $0x528] sm:$0xff] %vm149_vm0, %v741_v36  ;;  %1313 = vst.msk [vmem:[%s1465_s15 + $0x520] sm:$0xff] %vm149_vm0, %v739_v37 }
 0x191   : > { %921 = vrot.lane.b32.xlu1 %v1660_v30, %s1437_s21  ;;  %919 = vrot.lane.b32.xlu0 %v1663_v31, %s1437_s21 }
 0x193   : > { %v745_v38 = vpop.permute.xlu1 %744  ;;  %v743_v39 = vpop.permute.xlu0 %742 }
 0x194   : > { %1316 = vst.msk [vmem:[%s1465_s15 + $0x538] sm:$0xff] %vm149_vm0, %v745_v38  ;;  %1315 = vst.msk [vmem:[%s1465_s15 + $0x530] sm:$0xff] %vm149_vm0, %v743_v39 }
 0x195   : > { %990 = vrot.lane.b32.xlu1 %v1490_v3, %s1438_s22  ;;  %988 = vrot.lane.b32.xlu0 %v1471_v1, %s1438_s22 }
 0x197   : > { %v749_v40 = vpop.permute.xlu1 %748  ;;  %v747_v41 = vpop.permute.xlu0 %746 }
 0x198   : > { %1318 = vst.msk [vmem:[%s1465_s15 + $0x548] sm:$0xff] %vm149_vm0, %v749_v40  ;;  %1317 = vst.msk [vmem:[%s1465_s15 + $0x540] sm:$0xff] %vm149_vm0, %v747_v41 }
 0x199   : > { %994 = vrot.lane.b32.xlu1 %v1474_v2, %s1438_s22  ;;  %992 = vrot.lane.b32.xlu0 %v1468_v0, %s1438_s22 }
 0x19b   : > { %v753_v3 = vpop.permute.xlu1 %752  ;;  %v751_v42 = vpop.permute.xlu0 %750 }
 0x19c   : > { %1320 = vst.msk [vmem:[%s1465_s15 + $0x558] sm:$0xff] %vm149_vm0, %v753_v3  ;;  %1319 = vst.msk [vmem:[%s1465_s15 + $0x550] sm:$0xff] %vm149_vm0, %v751_v42 }
 0x19d   : > { %998 = vrot.lane.b32.xlu1 %v1493_v4, %s1438_s22  ;;  %996 = vrot.lane.b32.xlu0 %v1502_v5, %s1438_s22 }
 0x19f   : > { %v757_v1 = vpop.permute.xlu1 %756  ;;  %v755_v2 = vpop.permute.xlu0 %754 }
 0x1a0   : > { %1322 = vst.msk [vmem:[%s1465_s15 + $0x568] sm:$0xff] %vm149_vm0, %v757_v1  ;;  %1321 = vst.msk [vmem:[%s1465_s15 + $0x560] sm:$0xff] %vm149_vm0, %v755_v2 }
 0x1a1   : > { %1002 = vrot.lane.b32.xlu1 %v1505_v6, %s1438_s22  ;;  %1000 = vrot.lane.b32.xlu0 %v1508_v7, %s1438_s22 }
 0x1a3   : > { %v761_v0 = vpop.permute.xlu1 %760  ;;  %v759_v4 = vpop.permute.xlu0 %758 }
 0x1a4   : > { %1324 = vst.msk [vmem:[%s1465_s15 + $0x578] sm:$0xff] %vm149_vm0, %v761_v0  ;;  %1323 = vst.msk [vmem:[%s1465_s15 + $0x570] sm:$0xff] %vm149_vm0, %v759_v4 }
 0x1a5   : > { %1006 = vrot.lane.b32.xlu1 %v1520_v8, %s1438_s22  ;;  %1004 = vrot.lane.b32.xlu0 %v1523_v9, %s1438_s22 }
 0x1a7   : > { %v765_v5 = vpop.permute.xlu1 %764  ;;  %v763_v6 = vpop.permute.xlu0 %762 }
 0x1a8   : > { %1326 = vst.msk [vmem:[%s1465_s15 + $0x588] sm:$0xff] %vm149_vm0, %v765_v5  ;;  %1325 = vst.msk [vmem:[%s1465_s15 + $0x580] sm:$0xff] %vm149_vm0, %v763_v6 }
 0x1a9   : > { %1010 = vrot.lane.b32.xlu1 %v1526_v10, %s1438_s22  ;;  %1008 = vrot.lane.b32.xlu0 %v1538_v11, %s1438_s22 }
 0x1ab   : > { %v769_v7 = vpop.permute.xlu1 %768  ;;  %v767_v8 = vpop.permute.xlu0 %766 }
 0x1ac   : > { %1328 = vst.msk [vmem:[%s1465_s15 + $0x598] sm:$0xff] %vm149_vm0, %v769_v7  ;;  %1327 = vst.msk [vmem:[%s1465_s15 + $0x590] sm:$0xff] %vm149_vm0, %v767_v8 }
 0x1ad   : > { %1014 = vrot.lane.b32.xlu1 %v1541_v12, %s1438_s22  ;;  %1012 = vrot.lane.b32.xlu0 %v1544_v13, %s1438_s22 }
 0x1af   : > { %v773_v9 = vpop.permute.xlu1 %772  ;;  %v771_v10 = vpop.permute.xlu0 %770 }
 0x1b0   : > { %1330 = vst.msk [vmem:[%s1465_s15 + $0x5a8] sm:$0xff] %vm149_vm0, %v773_v9  ;;  %1329 = vst.msk [vmem:[%s1465_s15 + $0x5a0] sm:$0xff] %vm149_vm0, %v771_v10 }
 0x1b1   : > { %1018 = vrot.lane.b32.xlu1 %v1560_v14, %s1438_s22  ;;  %1016 = vrot.lane.b32.xlu0 %v1563_v15, %s1438_s22 }
 0x1b3   : > { %v777_v11 = vpop.permute.xlu1 %776  ;;  %v775_v12 = vpop.permute.xlu0 %774 }
 0x1b4   : > { %1332 = vst.msk [vmem:[%s1465_s15 + $0x5b8] sm:$0xff] %vm149_vm0, %v777_v11  ;;  %1331 = vst.msk [vmem:[%s1465_s15 + $0x5b0] sm:$0xff] %vm149_vm0, %v775_v12 }
 0x1b5   : > { %1022 = vrot.lane.b32.xlu1 %v1572_v16, %s1438_s22  ;;  %1020 = vrot.lane.b32.xlu0 %v1575_v17, %s1438_s22 }
 0x1b7   : > { %v781_v13 = vpop.permute.xlu1 %780  ;;  %v779_v14 = vpop.permute.xlu0 %778 }
 0x1b8   : > { %1334 = vst.msk [vmem:[%s1465_s15 + $0x5c8] sm:$0xff] %vm149_vm0, %v781_v13  ;;  %1333 = vst.msk [vmem:[%s1465_s15 + $0x5c0] sm:$0xff] %vm149_vm0, %v779_v14 }
 0x1b9   : > { %1026 = vrot.lane.b32.xlu1 %v1578_v18, %s1438_s22  ;;  %1024 = vrot.lane.b32.xlu0 %v1590_v19, %s1438_s22 }
 0x1bb   : > { %v785_v15 = vpop.permute.xlu1 %784  ;;  %v783_v16 = vpop.permute.xlu0 %782 }
 0x1bc   : > { %1336 = vst.msk [vmem:[%s1465_s15 + $0x5d8] sm:$0xff] %vm149_vm0, %v785_v15  ;;  %1335 = vst.msk [vmem:[%s1465_s15 + $0x5d0] sm:$0xff] %vm149_vm0, %v783_v16 }
 0x1bd   : > { %1030 = vrot.lane.b32.xlu1 %v1593_v20, %s1438_s22  ;;  %1028 = vrot.lane.b32.xlu0 %v1596_v21, %s1438_s22 }
 0x1bf   : > { %v789_v17 = vpop.permute.xlu1 %788  ;;  %v787_v18 = vpop.permute.xlu0 %786 }
 0x1c0   : > { %1338 = vst.msk [vmem:[%s1465_s15 + $0x5e8] sm:$0xff] %vm149_vm0, %v789_v17  ;;  %1337 = vst.msk [vmem:[%s1465_s15 + $0x5e0] sm:$0xff] %vm149_vm0, %v787_v18 }
 0x1c1   : > { %1034 = vrot.lane.b32.xlu1 %v1608_v22, %s1438_s22  ;;  %1032 = vrot.lane.b32.xlu0 %v1611_v23, %s1438_s22 }
 0x1c3   : > { %v793_v19 = vpop.permute.xlu1 %792  ;;  %v791_v20 = vpop.permute.xlu0 %790 }
 0x1c4   : > { %1340 = vst.msk [vmem:[%s1465_s15 + $0x5f8] sm:$0xff] %vm149_vm0, %v793_v19  ;;  %1339 = vst.msk [vmem:[%s1465_s15 + $0x5f0] sm:$0xff] %vm149_vm0, %v791_v20 }
 0x1c5   : > { %1038 = vrot.lane.b32.xlu1 %v1614_v24, %s1438_s22  ;;  %1036 = vrot.lane.b32.xlu0 %v1630_v25, %s1438_s22 }
 0x1c7   : > { %v862_v21 = vpop.permute.xlu1 %861  ;;  %v860_v22 = vpop.permute.xlu0 %859 }
 0x1c8   : > { %1342 = vst.msk [vmem:[%s1465_s15 + $0x608] sm:$0xff] %vm149_vm0, %v862_v21  ;;  %1341 = vst.msk [vmem:[%s1465_s15 + $0x600] sm:$0xff] %vm149_vm0, %v860_v22 }
 0x1c9   : > { %1042 = vrot.lane.b32.xlu1 %v1633_v26, %s1438_s22  ;;  %1040 = vrot.lane.b32.xlu0 %v1642_v27, %s1438_s22 }
 0x1cb   : > { %v866_v23 = vpop.permute.xlu1 %865  ;;  %v864_v24 = vpop.permute.xlu0 %863 }
 0x1cc   : > { %1344 = vst.msk [vmem:[%s1465_s15 + $0x618] sm:$0xff] %vm149_vm0, %v866_v23  ;;  %1343 = vst.msk [vmem:[%s1465_s15 + $0x610] sm:$0xff] %vm149_vm0, %v864_v24 }
 0x1cd   : > { %1046 = vrot.lane.b32.xlu1 %v1645_v28, %s1438_s22  ;;  %1044 = vrot.lane.b32.xlu0 %v1648_v29, %s1438_s22 }
 0x1cf   : > { %v870_v25 = vpop.permute.xlu1 %869  ;;  %v868_v26 = vpop.permute.xlu0 %867 }
 0x1d0   : > { %1346 = vst.msk [vmem:[%s1465_s15 + $0x628] sm:$0xff] %vm149_vm0, %v870_v25  ;;  %1345 = vst.msk [vmem:[%s1465_s15 + $0x620] sm:$0xff] %vm149_vm0, %v868_v26 }
 0x1d1   : > { %1050 = vrot.lane.b32.xlu1 %v1660_v30, %s1438_s22  ;;  %1048 = vrot.lane.b32.xlu0 %v1663_v31, %s1438_s22 }
 0x1d3   : > { %v874_v27 = vpop.permute.xlu1 %873  ;;  %v872_v28 = vpop.permute.xlu0 %871 }
 0x1d4   : > { %1348 = vst.msk [vmem:[%s1465_s15 + $0x638] sm:$0xff] %vm149_vm0, %v874_v27  ;;  %1347 = vst.msk [vmem:[%s1465_s15 + $0x630] sm:$0xff] %vm149_vm0, %v872_v28 }
 0x1d7   : > { %v878_v29 = vpop.permute.xlu1 %877  ;;  %v876_v43 = vpop.permute.xlu0 %875 }
 0x1d8   : > { %1350 = vst.msk [vmem:[%s1465_s15 + $0x648] sm:$0xff] %vm149_vm0, %v878_v29  ;;  %1349 = vst.msk [vmem:[%s1465_s15 + $0x640] sm:$0xff] %vm149_vm0, %v876_v43 }
 0x1db   : > { %v882_v30 = vpop.permute.xlu1 %881  ;;  %v880_v44 = vpop.permute.xlu0 %879 }
 0x1dc   : > { %1352 = vst.msk [vmem:[%s1465_s15 + $0x658] sm:$0xff] %vm149_vm0, %v882_v30  ;;  %1351 = vst.msk [vmem:[%s1465_s15 + $0x650] sm:$0xff] %vm149_vm0, %v880_v44 }
 0x1df   : > { %v886_v31 = vpop.permute.xlu1 %885  ;;  %v884_v45 = vpop.permute.xlu0 %883 }
 0x1e0   : > { %1354 = vst.msk [vmem:[%s1465_s15 + $0x668] sm:$0xff] %vm149_vm0, %v886_v31  ;;  %1353 = vst.msk [vmem:[%s1465_s15 + $0x660] sm:$0xff] %vm149_vm0, %v884_v45 }
 0x1e3   : > { %v890_v46 = vpop.permute.xlu1 %889  ;;  %v888_v47 = vpop.permute.xlu0 %887 }
 0x1e4   : > { %1356 = vst.msk [vmem:[%s1465_s15 + $0x678] sm:$0xff] %vm149_vm0, %v890_v46  ;;  %1355 = vst.msk [vmem:[%s1465_s15 + $0x670] sm:$0xff] %vm149_vm0, %v888_v47 }
 0x1e7   : > { %v894_v48 = vpop.permute.xlu1 %893  ;;  %v892_v49 = vpop.permute.xlu0 %891 }
 0x1e8   : > { %1358 = vst.msk [vmem:[%s1465_s15 + $0x688] sm:$0xff] %vm149_vm0, %v894_v48  ;;  %1357 = vst.msk [vmem:[%s1465_s15 + $0x680] sm:$0xff] %vm149_vm0, %v892_v49 }
 0x1eb   : > { %v898_v50 = vpop.permute.xlu1 %897  ;;  %v896_v51 = vpop.permute.xlu0 %895 }
 0x1ec   : > { %1360 = vst.msk [vmem:[%s1465_s15 + $0x698] sm:$0xff] %vm149_vm0, %v898_v50  ;;  %1359 = vst.msk [vmem:[%s1465_s15 + $0x690] sm:$0xff] %vm149_vm0, %v896_v51 }
 0x1ef   : > { %v902_v52 = vpop.permute.xlu1 %901  ;;  %v900_v53 = vpop.permute.xlu0 %899 }
 0x1f0   : > { %1362 = vst.msk [vmem:[%s1465_s15 + $0x6a8] sm:$0xff] %vm149_vm0, %v902_v52  ;;  %1361 = vst.msk [vmem:[%s1465_s15 + $0x6a0] sm:$0xff] %vm149_vm0, %v900_v53 }
 0x1f3   : > { %v906_v54 = vpop.permute.xlu1 %905  ;;  %v904_v55 = vpop.permute.xlu0 %903 }
 0x1f4   : > { %1364 = vst.msk [vmem:[%s1465_s15 + $0x6b8] sm:$0xff] %vm149_vm0, %v906_v54  ;;  %1363 = vst.msk [vmem:[%s1465_s15 + $0x6b0] sm:$0xff] %vm149_vm0, %v904_v55 }
 0x1f7   : > { %v910_v56 = vpop.permute.xlu1 %909  ;;  %v908_v57 = vpop.permute.xlu0 %907 }
 0x1f8   : > { %1366 = vst.msk [vmem:[%s1465_s15 + $0x6c8] sm:$0xff] %vm149_vm0, %v910_v56  ;;  %1365 = vst.msk [vmem:[%s1465_s15 + $0x6c0] sm:$0xff] %vm149_vm0, %v908_v57 }
 0x1fb   : > { %v914_v58 = vpop.permute.xlu1 %913  ;;  %v912_v59 = vpop.permute.xlu0 %911 }
 0x1fc   : > { %1368 = vst.msk [vmem:[%s1465_s15 + $0x6d8] sm:$0xff] %vm149_vm0, %v914_v58  ;;  %1367 = vst.msk [vmem:[%s1465_s15 + $0x6d0] sm:$0xff] %vm149_vm0, %v912_v59 }
 0x1ff   : > { %v918_v60 = vpop.permute.xlu1 %917  ;;  %v916_v61 = vpop.permute.xlu0 %915 }
 0x200   : > { %1370 = vst.msk [vmem:[%s1465_s15 + $0x6e8] sm:$0xff] %vm149_vm0, %v918_v60  ;;  %1369 = vst.msk [vmem:[%s1465_s15 + $0x6e0] sm:$0xff] %vm149_vm0, %v916_v61 }
 0x203   : > { %v922_v62 = vpop.permute.xlu1 %921  ;;  %v920_v63 = vpop.permute.xlu0 %919 }
 0x204   : > { %1372 = vst.msk [vmem:[%s1465_s15 + $0x6f8] sm:$0xff] %vm149_vm0, %v922_v62  ;;  %1371 = vst.msk [vmem:[%s1465_s15 + $0x6f0] sm:$0xff] %vm149_vm0, %v920_v63 }
 0x207   : > { %v991_v32 = vpop.permute.xlu1 %990  ;;  %v989_v33 = vpop.permute.xlu0 %988 }
 0x208   : > { %1374 = vst.msk [vmem:[%s1465_s15 + $0x708] sm:$0xff] %vm149_vm0, %v991_v32  ;;  %1373 = vst.msk [vmem:[%s1465_s15 + $0x700] sm:$0xff] %vm149_vm0, %v989_v33 }
 0x20b   : > { %v995_v34 = vpop.permute.xlu1 %994  ;;  %v993_v35 = vpop.permute.xlu0 %992 }
 0x20c   : > { %1376 = vst.msk [vmem:[%s1465_s15 + $0x718] sm:$0xff] %vm149_vm0, %v995_v34  ;;  %1375 = vst.msk [vmem:[%s1465_s15 + $0x710] sm:$0xff] %vm149_vm0, %v993_v35 }
 0x20f   : > { %v999_v36 = vpop.permute.xlu1 %998  ;;  %v997_v37 = vpop.permute.xlu0 %996 }
 0x210   : > { %1378 = vst.msk [vmem:[%s1465_s15 + $0x728] sm:$0xff] %vm149_vm0, %v999_v36  ;;  %1377 = vst.msk [vmem:[%s1465_s15 + $0x720] sm:$0xff] %vm149_vm0, %v997_v37 }
 0x213   : > { %v1003_v38 = vpop.permute.xlu1 %1002  ;;  %v1001_v39 = vpop.permute.xlu0 %1000 }
 0x214   : > { %1380 = vst.msk [vmem:[%s1465_s15 + $0x738] sm:$0xff] %vm149_vm0, %v1003_v38  ;;  %1379 = vst.msk [vmem:[%s1465_s15 + $0x730] sm:$0xff] %vm149_vm0, %v1001_v39 }
 0x217   : > { %v1007_v40 = vpop.permute.xlu1 %1006  ;;  %v1005_v41 = vpop.permute.xlu0 %1004 }
 0x218   : > { %1382 = vst.msk [vmem:[%s1465_s15 + $0x748] sm:$0xff] %vm149_vm0, %v1007_v40  ;;  %1381 = vst.msk [vmem:[%s1465_s15 + $0x740] sm:$0xff] %vm149_vm0, %v1005_v41 }
 0x21b   : > { %v1011_v3 = vpop.permute.xlu1 %1010  ;;  %v1009_v42 = vpop.permute.xlu0 %1008 }
 0x21c   : > { %1384 = vst.msk [vmem:[%s1465_s15 + $0x758] sm:$0xff] %vm149_vm0, %v1011_v3  ;;  %1383 = vst.msk [vmem:[%s1465_s15 + $0x750] sm:$0xff] %vm149_vm0, %v1009_v42 }
 0x21f   : > { %v1015_v1 = vpop.permute.xlu1 %1014  ;;  %v1013_v2 = vpop.permute.xlu0 %1012 }
 0x220   : > { %1386 = vst.msk [vmem:[%s1465_s15 + $0x768] sm:$0xff] %vm149_vm0, %v1015_v1  ;;  %1385 = vst.msk [vmem:[%s1465_s15 + $0x760] sm:$0xff] %vm149_vm0, %v1013_v2 }
 0x223   : > { %v1019_v0 = vpop.permute.xlu1 %1018  ;;  %v1017_v4 = vpop.permute.xlu0 %1016 }
 0x224   : > { %1388 = vst.msk [vmem:[%s1465_s15 + $0x778] sm:$0xff] %vm149_vm0, %v1019_v0  ;;  %1387 = vst.msk [vmem:[%s1465_s15 + $0x770] sm:$0xff] %vm149_vm0, %v1017_v4 }
 0x227   : > { %v1023_v5 = vpop.permute.xlu1 %1022  ;;  %v1021_v6 = vpop.permute.xlu0 %1020 }
 0x228   : > { %1390 = vst.msk [vmem:[%s1465_s15 + $0x788] sm:$0xff] %vm149_vm0, %v1023_v5  ;;  %1389 = vst.msk [vmem:[%s1465_s15 + $0x780] sm:$0xff] %vm149_vm0, %v1021_v6 }
 0x22b   : > { %v1027_v7 = vpop.permute.xlu1 %1026  ;;  %v1025_v8 = vpop.permute.xlu0 %1024 }
 0x22c   : > { %1392 = vst.msk [vmem:[%s1465_s15 + $0x798] sm:$0xff] %vm149_vm0, %v1027_v7  ;;  %1391 = vst.msk [vmem:[%s1465_s15 + $0x790] sm:$0xff] %vm149_vm0, %v1025_v8 }
 0x22f   : > { %v1031_v9 = vpop.permute.xlu1 %1030  ;;  %v1029_v10 = vpop.permute.xlu0 %1028 }
 0x230   : > { %1394 = vst.msk [vmem:[%s1465_s15 + $0x7a8] sm:$0xff] %vm149_vm0, %v1031_v9  ;;  %1393 = vst.msk [vmem:[%s1465_s15 + $0x7a0] sm:$0xff] %vm149_vm0, %v1029_v10 }
 0x233   : > { %v1035_v11 = vpop.permute.xlu1 %1034  ;;  %v1033_v12 = vpop.permute.xlu0 %1032 }
 0x234   : > { %1396 = vst.msk [vmem:[%s1465_s15 + $0x7b8] sm:$0xff] %vm149_vm0, %v1035_v11  ;;  %1395 = vst.msk [vmem:[%s1465_s15 + $0x7b0] sm:$0xff] %vm149_vm0, %v1033_v12 }
 0x237   : > { %v1039_v13 = vpop.permute.xlu1 %1038  ;;  %v1037_v14 = vpop.permute.xlu0 %1036 }
 0x238   : > { %1398 = vst.msk [vmem:[%s1465_s15 + $0x7c8] sm:$0xff] %vm149_vm0, %v1039_v13  ;;  %1397 = vst.msk [vmem:[%s1465_s15 + $0x7c0] sm:$0xff] %vm149_vm0, %v1037_v14 }
 0x23b   : > { %v1043_v15 = vpop.permute.xlu1 %1042  ;;  %v1041_v16 = vpop.permute.xlu0 %1040 }
 0x23c   : > { %1400 = vst.msk [vmem:[%s1465_s15 + $0x7d8] sm:$0xff] %vm149_vm0, %v1043_v15  ;;  %1399 = vst.msk [vmem:[%s1465_s15 + $0x7d0] sm:$0xff] %vm149_vm0, %v1041_v16 }
 0x23f   : > { %v1047_v17 = vpop.permute.xlu1 %1046  ;;  %v1045_v18 = vpop.permute.xlu0 %1044 }
 0x240   : > { %1402 = vst.msk [vmem:[%s1465_s15 + $0x7e8] sm:$0xff] %vm149_vm0, %v1047_v17  ;;  %1401 = vst.msk [vmem:[%s1465_s15 + $0x7e0] sm:$0xff] %vm149_vm0, %v1045_v18 }
 0x243   : > { %v1051_v19 = vpop.permute.xlu1 %1050  ;;  %v1049_v20 = vpop.permute.xlu0 %1048 }
 0x244   : > { %1404 = vst.msk [vmem:[%s1465_s15 + $0x7f8] sm:$0xff] %vm149_vm0, %v1051_v19  ;;  %1403 = vst.msk [vmem:[%s1465_s15 + $0x7f0] sm:$0xff] %vm149_vm0, %v1049_v20 }
 0x245 PF: > { %s11_s6 = sadd.s32 1, %s1430_s6  }
 0x246   : > { %p8_p4 = scmp.ge.s32.totalorder %s11_s6, 4  }
 0x248   :  { %10 = sbr.rel (!%p8_p4) target bundleno = 1 (0x1), region = 61 }

</bundles_post_ra>
